<compile_context>
chip_gen: v6e
topology: v6e:2x2x1
jax: 0.10.0
libtpu: 0.0.40
codegen_flags: <defaults>
</compile_context>

<pallas_src>
import functools
import math

import jax
import jax.numpy as jnp
from jax.experimental import pallas as pl
from jax.experimental.pallas import tpu as pltpu


def _mhsa_kernel(x_ref, wq_ref, bq_ref, wkv_ref, bkv_ref, wo_ref, bo_ref,
                 o_ref, k_ref, v_ref, qh_ref, ctx_ref,
                 *, num_heads, head_dim, seq_len, q_tile):
    # NOTE: the head-major K/V scratch is carried across the query-tile axis,
    # so that axis must stay the innermost, sequentially iterated ("arbitrary")
    # grid dimension and restart at qi == 0 for every batch element.
    qi = pl.program_id(1)
    H, hd = num_heads, head_dim
    E = H * hd
    s_pad = x_ref.shape[0]

    # ---- fused K/V projection: once per batch element ----------------------
    @pl.when(qi == 0)
    def _():
        x_full = x_ref[...].astype(jnp.bfloat16)                     # (S_pad, E)
        kv = jnp.dot(x_full, wkv_ref[...],
                     preferred_element_type=jnp.float32) + bkv_ref[...]
        kv = kv.astype(jnp.bfloat16)                                  # (S_pad, 2E)
        # Stage head-major so per-head access below is a leading-axis index
        # (the lane-slice shuffles happen once per batch, not per query tile).
        for h in range(H):
            lo = h * hd
            k_ref[h] = kv[:, lo:lo + hd]
            v_ref[h] = kv[:, E + lo:E + lo + hd]

    # ---- query tile: sliced from the already-resident full block -----------
    row0 = pl.multiple_of(qi * q_tile, q_tile)
    x_q = x_ref[pl.ds(row0, q_tile), :]                               # (TQ, E) f32

    # Q projection (1/sqrt(head_dim) already folded into wq / bq on the host).
    q = jnp.dot(x_q.astype(jnp.bfloat16), wq_ref[...],
                preferred_element_type=jnp.float32) + bq_ref[...]
    q = q.astype(jnp.bfloat16)                                        # (TQ, E)
    for h in range(H):                                                # head-major staging
        qh_ref[h] = q[:, h * hd:(h + 1) * hd]

    q_h = qh_ref[...]                                                 # (H, TQ,    hd) bf16
    k = k_ref[...]                                                    # (H, S_pad, hd) bf16
    v = v_ref[...]                                                    # (H, S_pad, hd) bf16

    # ---- attention, batched over heads --------------------------------------
    scores = jnp.einsum("hqd,hkd->hqk", q_h, k,
                        preferred_element_type=jnp.float32)           # (H, TQ, S_pad)
    if seq_len < s_pad:   # static: mask padded key columns
        key_mask = jax.lax.broadcasted_iota(jnp.int32, (1, 1, s_pad), 2) < seq_len
        scores = jnp.where(key_mask, scores, jnp.float32(-1e30))

    m = jnp.max(scores, axis=-1, keepdims=True)
    p = jnp.exp(scores - m)
    denom = jnp.sum(p, axis=-1, keepdims=True)
    attn = (p * pl.reciprocal(denom, approx=True)).astype(jnp.bfloat16)

    ctx = jnp.einsum("hqk,hkd->hqd", attn, v,
                     preferred_element_type=jnp.float32)              # (H, TQ, hd)

    # ---- output projection: ONE full-depth (K = E) MXU matmul ---------------
    for h in range(H):
        ctx_ref[:, h * hd:(h + 1) * hd] = ctx[h].astype(jnp.bfloat16)
    out = jnp.dot(ctx_ref[...], wo_ref[...],
                  preferred_element_type=jnp.float32)                 # (TQ, E)

    o_ref[...] = (out + bo_ref[...] + x_q).astype(o_ref.dtype)


def _vmem_limit_bytes(footprint_bytes):
    """Per-generation VMEM budget: footprint + headroom, capped below physical."""
    try:
        cap = pltpu.get_tpu_info().vmem_capacity_bytes
    except Exception:
        cap = 64 * 1024 * 1024          # conservative (v7x per-core) fallback
    want = max(2 * footprint_bytes + (8 << 20), 32 << 20)
    return int(min(want, cap - (4 << 20)))


def multi_head_self_attention(x, params, *, num_heads, q_tile=128):
    """x: (B, S, E) float32.  params: dict of f32 weights/biases (see init_params).

    q_tile: query rows per grid step.  128 matches v5e's 4x128^2 MXU; on v6e/v7x
    with long sequences, 256 matches the native 2x256^2 MXU tile and halves the
    per-step grid overhead.
    """
    B, S, E = x.shape
    assert E % num_heads == 0
    head_dim = E // num_heads
    H = num_heads

    n_q = (S + q_tile - 1) // q_tile
    s_pad = n_q * q_tile
    x_in = jnp.pad(x, ((0, 0), (0, s_pad - S), (0, 0))) if s_pad != S else x

    # bf16 MXU operands; biases stay f32; fold the softmax scale into Wq / bq.
    scale = 1.0 / math.sqrt(head_dim)
    wq = (params["wq"] * scale).astype(jnp.bfloat16)
    bq = params["bq"] * scale
    wkv = jnp.concatenate([params["wk"], params["wv"]], axis=1).astype(jnp.bfloat16)
    bkv = jnp.concatenate([params["bk"], params["bv"]], axis=1)
    wo = params["wo"].astype(jnp.bfloat16)
    bo = params["bo"]

    kernel = functools.partial(_mhsa_kernel, num_heads=H, head_dim=head_dim,
                               seq_len=S, q_tile=q_tile)

    flops = (2 * B * s_pad * E * 2 * E               # fused K/V projection
             + 2 * B * s_pad * E * E                 # Q projection
             + 4 * B * H * s_pad * s_pad * head_dim  # scores + attn @ V
             + 2 * B * s_pad * E * E)                # output projection
    transcendentals = B * H * s_pad * s_pad
    bytes_accessed = (B * s_pad * E * 4              # x (read once per batch)
                      + B * s_pad * E * 4            # output
                      + 8 * E * E                    # bf16 weights (wq + wkv + wo)
                      + 16 * E)                      # f32 biases
    cost = pl.CostEstimate(flops=flops, transcendentals=transcendentals,
                           bytes_accessed=bytes_accessed)

    # VMEM footprint: x + out blocks (double-buffered), weights/biases, and the
    # head-major scratches (minor dim padded to a full 128-lane tile if hd<128).
    hd_pad = ((head_dim + 127) // 128) * 128
    def footprint(constant_buffers):
        return (2 * s_pad * E * 4 + 2 * q_tile * E * 4
                + constant_buffers * (4 * E * E * 2 + 8 * 4 * E * 4)
                + 2 * H * s_pad * hd_pad * 2          # K, V scratch
                + H * q_tile * hd_pad * 2             # Q staging
                + q_tile * E * 2)                     # stitched context

    weight_map = lambda b, qi: (0, 0)

    def build(single_buffer_constants):
        # Weights / biases have constant index maps -> never re-fetched, so a
        # single buffer suffices (halves their VMEM; key on v7x's 64 MiB).
        if single_buffer_constants:
            const_spec = lambda shape: pl.BlockSpec(
                shape, weight_map, pipeline_mode=pl.Buffered(1))
        else:
            const_spec = lambda shape: pl.BlockSpec(shape, weight_map)
        nbuf = 1 if single_buffer_constants else 2
        grid_spec = pltpu.PrefetchScalarGridSpec(
            num_scalar_prefetch=0,
            grid=(B, n_q),
            in_specs=[
                # x: one full-sequence block per batch element; the query tile
                # is sliced from it in-kernel (no duplicate x input / DMA).
                pl.BlockSpec((None, s_pad, E), lambda b, qi: (b, 0, 0)),
                const_spec((E, E)),          # wq  (scaled, bf16)
                const_spec((1, E)),          # bq  (scaled, f32)
                const_spec((E, 2 * E)),      # wkv (bf16)
                const_spec((1, 2 * E)),      # bkv (f32)
                const_spec((E, E)),          # wo  (bf16)
                const_spec((1, E)),          # bo  (f32)
            ],
            out_specs=pl.BlockSpec((None, q_tile, E), lambda b, qi: (b, qi, 0)),
            scratch_shapes=[
                pltpu.VMEM((H, s_pad, head_dim), jnp.bfloat16),   # K, head-major
                pltpu.VMEM((H, s_pad, head_dim), jnp.bfloat16),   # V, head-major
                pltpu.VMEM((H, q_tile, head_dim), jnp.bfloat16),  # Q, head-major
                pltpu.VMEM((q_tile, E), jnp.bfloat16),            # stitched context
            ],
        )
        return pl.pallas_call(
            kernel,
            out_shape=jax.ShapeDtypeStruct((B, s_pad, E), x.dtype),
            grid_spec=grid_spec,
            compiler_params=pltpu.CompilerParams(
                # batch axis "parallel" (megacore); the query-tile axis must be
                # "arbitrary" so the per-batch K/V scratch stays valid across it.
                dimension_semantics=("parallel", "arbitrary"),
                vmem_limit_bytes=_vmem_limit_bytes(footprint(nbuf)),
            ),
            cost_estimate=cost,
        )

    try:
        out = build(True)(x_in, wq, bq, wkv, bkv, wo, bo)
    except Exception:
        # pipeline_mode=pl.Buffered(1) not supported by this jax version in
        # pallas_call BlockSpecs -> fall back to default double-buffering.
        out = build(False)(x_in, wq, bq, wkv, bkv, wo, bo)

    return out[:, :S, :] if s_pad != S else out


def init_params(key, embed_dim):
    """Deterministic synthetic parameters (shapes match nn.Linear(E, E), transposed)."""
    keys = jax.random.split(key, 8)
    scale = 1.0 / math.sqrt(embed_dim)

    def lin(kw, kb):
        w = jax.random.uniform(kw, (embed_dim, embed_dim), jnp.float32, -scale, scale)
        b = jax.random.uniform(kb, (1, embed_dim), jnp.float32, -scale, scale)
        return w, b

    wq, bq = lin(keys[0], keys[1])
    wk, bk = lin(keys[2], keys[3])
    wv, bv = lin(keys[4], keys[5])
    wo, bo = lin(keys[6], keys[7])
    return dict(wq=wq, bq=bq, wk=wk, bk=bk, wv=wv, bv=bv, wo=wo, bo=bo)


def reference(x, params, *, num_heads):
    """Pure-JAX f32 reference mirroring the PyTorch forward pass."""
    B, S, E = x.shape
    hd = E // num_heads

    def proj(w, b):
        y = x @ w + b[0]
        return y.reshape(B, S, num_heads, hd).transpose(0, 2, 1, 3)  # (B,H,S,hd)

    q = proj(params["wq"], params["bq"])
    k = proj(params["wk"], params["bk"])
    v = proj(params["wv"], params["bv"])

    scores = jnp.einsum("bhqd,bhkd->bhqk", q, k) / jnp.sqrt(jnp.float32(hd))
    attn = jax.nn.softmax(scores, axis=-1)
    att = jnp.einsum("bhqk,bhkd->bhqd", attn, v)
    att = att.transpose(0, 2, 1, 3).reshape(B, S, E)
    return att @ params["wo"] + params["bo"][0] + x


if __name__ == "__main__":
    B, S, E = 2, 30, 128
    num_heads = 4

    key = jax.random.PRNGKey(0)
    kx, kp = jax.random.split(key)
    x = jax.random.normal(kx, (B, S, E), dtype=jnp.float32)
    params = init_params(kp, E)

    out = multi_head_self_attention(x, params, num_heads=num_heads)
    out = jax.block_until_ready(out)

    ref = reference(x, params, num_heads=num_heads)
    assert out.shape == (B, S, E)
    max_err = float(jnp.max(jnp.abs(out - ref)))
    # bf16 MXU operands (f32 accumulation) -> relaxed tolerance vs. pure-f32 ref.
    assert jnp.allclose(out, ref, atol=5e-2, rtol=5e-2), max_err

    print("KERNEL_OK")
</pallas_src>

<mosaic_0001>
module attributes {stable_mosaic.version = 11 : i64} {
  func.func @_mhsa_kernel(%arg0: i32, %arg1: i32, %arg2: memref<1x128x128xf32, #tpu.memory_space<vmem>>, %arg3: memref<128x128xbf16, #tpu.memory_space<vmem>>, %arg4: memref<1x128xf32, #tpu.memory_space<vmem>>, %arg5: memref<128x256xbf16, #tpu.memory_space<vmem>>, %arg6: memref<1x256xf32, #tpu.memory_space<vmem>>, %arg7: memref<128x128xbf16, #tpu.memory_space<vmem>>, %arg8: memref<1x128xf32, #tpu.memory_space<vmem>>, %arg9: memref<1x128x128xf32, #tpu.memory_space<vmem>>, %arg10: memref<4x128x32xbf16, #tpu.memory_space<vmem>>, %arg11: memref<4x128x32xbf16, #tpu.memory_space<vmem>>, %arg12: memref<4x128x32xbf16, #tpu.memory_space<vmem>>, %arg13: memref<128x128xbf16, #tpu.memory_space<vmem>>) attributes {dimension_semantics = [#tpu.dimension_semantics<parallel>, #tpu.dimension_semantics<arbitrary>], iteration_bounds = array<i64: 2, 1>, scalar_prefetch = 0 : i64, scratch_operands = 4 : i64, tpu.core_type = #tpu.core_type<tc>, window_params = [{transform_indices = @transform_0, window_bounds = array<i64: 1, 128, 128>}, {pipeline_mode = #tpu.pipeline_mode<synchronous>, transform_indices = @transform_1, window_bounds = array<i64: 128, 128>}, {pipeline_mode = #tpu.pipeline_mode<synchronous>, transform_indices = @transform_2, window_bounds = array<i64: 1, 128>}, {pipeline_mode = #tpu.pipeline_mode<synchronous>, transform_indices = @transform_3, window_bounds = array<i64: 128, 256>}, {pipeline_mode = #tpu.pipeline_mode<synchronous>, transform_indices = @transform_4, window_bounds = array<i64: 1, 256>}, {pipeline_mode = #tpu.pipeline_mode<synchronous>, transform_indices = @transform_5, window_bounds = array<i64: 128, 128>}, {pipeline_mode = #tpu.pipeline_mode<synchronous>, transform_indices = @transform_6, window_bounds = array<i64: 1, 128>}, {transform_indices = @transform_7, window_bounds = array<i64: 1, 128, 128>}]} {
    %c0_i32 = arith.constant 0 : i32
    %0 = arith.cmpi eq, %arg1, %c0_i32 : i32
    %1 = arith.extui %0 : i1 to i32
    %c0_i32_0 = arith.constant 0 : i32
    %2 = arith.cmpi ne, %1, %c0_i32_0 : i32
    scf.if %2 {
      %c0_44 = arith.constant 0 : index
      %c0_45 = arith.constant 0 : index
      %c0_46 = arith.constant 0 : index
      %80 = vector.load %arg2[%c0_44, %c0_45, %c0_46] : memref<1x128x128xf32, #tpu.memory_space<vmem>>, vector<1x128x128xf32>
      %81 = vector.shape_cast %80 : vector<1x128x128xf32> to vector<128x128xf32>
      %82 = arith.truncf %81 : vector<128x128xf32> to vector<128x128xbf16>
      %c0_47 = arith.constant 0 : index
      %c0_48 = arith.constant 0 : index
      %83 = vector.load %arg5[%c0_47, %c0_48] : memref<128x256xbf16, #tpu.memory_space<vmem>>, vector<128x256xbf16>
      %cst_49 = arith.constant dense<0.000000e+00> : vector<128x256xf32>
      %84 = tpu.matmul %82, %83, %cst_49 {dimension_numbers = #tpu.dot_dimension_numbers<[1], [0], [0], [1], [0, 0, 1, 1], [], []>} : vector<128x128xbf16>, vector<128x256xbf16>, vector<128x256xf32> -> vector<128x256xf32>
      %c0_50 = arith.constant 0 : index
      %c0_51 = arith.constant 0 : index
      %85 = vector.load %arg6[%c0_50, %c0_51] : memref<1x256xf32, #tpu.memory_space<vmem>>, vector<1x256xf32>
      %86 = vector.broadcast %85 : vector<1x256xf32> to vector<128x256xf32>
      %87 = arith.addf %84, %86 : vector<128x256xf32>
      %88 = arith.truncf %87 : vector<128x256xf32> to vector<128x256xbf16>
      %89 = vector.extract_strided_slice %88 {offsets = [0, 0], sizes = [128, 32], strides = [1, 1]} : vector<128x256xbf16> to vector<128x32xbf16>
      %c0_52 = arith.constant 0 : index
      %c0_53 = arith.constant 0 : index
      %c0_54 = arith.constant 0 : index
      %90 = vector.load %arg10[%c0_52, %c0_53, %c0_54] : memref<4x128x32xbf16, #tpu.memory_space<vmem>>, vector<1x128x32xbf16>
      %91 = vector.shape_cast %90 : vector<1x128x32xbf16> to vector<128x32xbf16>
      %92 = vector.shape_cast %89 : vector<128x32xbf16> to vector<1x128x32xbf16>
      tpu.vector_store %arg10[%c0_52, %c0_53, %c0_54], %92 {strides = array<i32>} : memref<4x128x32xbf16, #tpu.memory_space<vmem>>, vector<1x128x32xbf16>,
      %93 = vector.extract_strided_slice %88 {offsets = [0, 128], sizes = [128, 32], strides = [1, 1]} : vector<128x256xbf16> to vector<128x32xbf16>
      %c0_55 = arith.constant 0 : index
      %c0_56 = arith.constant 0 : index
      %c0_57 = arith.constant 0 : index
      %94 = vector.load %arg11[%c0_55, %c0_56, %c0_57] : memref<4x128x32xbf16, #tpu.memory_space<vmem>>, vector<1x128x32xbf16>
      %95 = vector.shape_cast %94 : vector<1x128x32xbf16> to vector<128x32xbf16>
      %96 = vector.shape_cast %93 : vector<128x32xbf16> to vector<1x128x32xbf16>
      tpu.vector_store %arg11[%c0_55, %c0_56, %c0_57], %96 {strides = array<i32>} : memref<4x128x32xbf16, #tpu.memory_space<vmem>>, vector<1x128x32xbf16>,
      %97 = vector.extract_strided_slice %88 {offsets = [0, 32], sizes = [128, 32], strides = [1, 1]} : vector<128x256xbf16> to vector<128x32xbf16>
      %c1_58 = arith.constant 1 : index
      %c0_59 = arith.constant 0 : index
      %c0_60 = arith.constant 0 : index
      %98 = vector.load %arg10[%c1_58, %c0_59, %c0_60] : memref<4x128x32xbf16, #tpu.memory_space<vmem>>, vector<1x128x32xbf16>
      %99 = vector.shape_cast %98 : vector<1x128x32xbf16> to vector<128x32xbf16>
      %100 = vector.shape_cast %97 : vector<128x32xbf16> to vector<1x128x32xbf16>
      tpu.vector_store %arg10[%c1_58, %c0_59, %c0_60], %100 {strides = array<i32>} : memref<4x128x32xbf16, #tpu.memory_space<vmem>>, vector<1x128x32xbf16>,
      %101 = vector.extract_strided_slice %88 {offsets = [0, 160], sizes = [128, 32], strides = [1, 1]} : vector<128x256xbf16> to vector<128x32xbf16>
      %c1_61 = arith.constant 1 : index
      %c0_62 = arith.constant 0 : index
      %c0_63 = arith.constant 0 : index
      %102 = vector.load %arg11[%c1_61, %c0_62, %c0_63] : memref<4x128x32xbf16, #tpu.memory_space<vmem>>, vector<1x128x32xbf16>
      %103 = vector.shape_cast %102 : vector<1x128x32xbf16> to vector<128x32xbf16>
      %104 = vector.shape_cast %101 : vector<128x32xbf16> to vector<1x128x32xbf16>
      tpu.vector_store %arg11[%c1_61, %c0_62, %c0_63], %104 {strides = array<i32>} : memref<4x128x32xbf16, #tpu.memory_space<vmem>>, vector<1x128x32xbf16>,
      %105 = vector.extract_strided_slice %88 {offsets = [0, 64], sizes = [128, 32], strides = [1, 1]} : vector<128x256xbf16> to vector<128x32xbf16>
      %c2_64 = arith.constant 2 : index
      %c0_65 = arith.constant 0 : index
      %c0_66 = arith.constant 0 : index
      %106 = vector.load %arg10[%c2_64, %c0_65, %c0_66] : memref<4x128x32xbf16, #tpu.memory_space<vmem>>, vector<1x128x32xbf16>
      %107 = vector.shape_cast %106 : vector<1x128x32xbf16> to vector<128x32xbf16>
      %108 = vector.shape_cast %105 : vector<128x32xbf16> to vector<1x128x32xbf16>
      tpu.vector_store %arg10[%c2_64, %c0_65, %c0_66], %108 {strides = array<i32>} : memref<4x128x32xbf16, #tpu.memory_space<vmem>>, vector<1x128x32xbf16>,
      %109 = vector.extract_strided_slice %88 {offsets = [0, 192], sizes = [128, 32], strides = [1, 1]} : vector<128x256xbf16> to vector<128x32xbf16>
      %c2_67 = arith.constant 2 : index
      %c0_68 = arith.constant 0 : index
      %c0_69 = arith.constant 0 : index
      %110 = vector.load %arg11[%c2_67, %c0_68, %c0_69] : memref<4x128x32xbf16, #tpu.memory_space<vmem>>, vector<1x128x32xbf16>
      %111 = vector.shape_cast %110 : vector<1x128x32xbf16> to vector<128x32xbf16>
      %112 = vector.shape_cast %109 : vector<128x32xbf16> to vector<1x128x32xbf16>
      tpu.vector_store %arg11[%c2_67, %c0_68, %c0_69], %112 {strides = array<i32>} : memref<4x128x32xbf16, #tpu.memory_space<vmem>>, vector<1x128x32xbf16>,
      %113 = vector.extract_strided_slice %88 {offsets = [0, 96], sizes = [128, 32], strides = [1, 1]} : vector<128x256xbf16> to vector<128x32xbf16>
      %c3_70 = arith.constant 3 : index
      %c0_71 = arith.constant 0 : index
      %c0_72 = arith.constant 0 : index
      %114 = vector.load %arg10[%c3_70, %c0_71, %c0_72] : memref<4x128x32xbf16, #tpu.memory_space<vmem>>, vector<1x128x32xbf16>
      %115 = vector.shape_cast %114 : vector<1x128x32xbf16> to vector<128x32xbf16>
      %116 = vector.shape_cast %113 : vector<128x32xbf16> to vector<1x128x32xbf16>
      tpu.vector_store %arg10[%c3_70, %c0_71, %c0_72], %116 {strides = array<i32>} : memref<4x128x32xbf16, #tpu.memory_space<vmem>>, vector<1x128x32xbf16>,
      %117 = vector.extract_strided_slice %88 {offsets = [0, 224], sizes = [128, 32], strides = [1, 1]} : vector<128x256xbf16> to vector<128x32xbf16>
      %c3_73 = arith.constant 3 : index
      %c0_74 = arith.constant 0 : index
      %c0_75 = arith.constant 0 : index
      %118 = vector.load %arg11[%c3_73, %c0_74, %c0_75] : memref<4x128x32xbf16, #tpu.memory_space<vmem>>, vector<1x128x32xbf16>
      %119 = vector.shape_cast %118 : vector<1x128x32xbf16> to vector<128x32xbf16>
      %120 = vector.shape_cast %117 : vector<128x32xbf16> to vector<1x128x32xbf16>
      tpu.vector_store %arg11[%c3_73, %c0_74, %c0_75], %120 {strides = array<i32>} : memref<4x128x32xbf16, #tpu.memory_space<vmem>>, vector<1x128x32xbf16>,
    } else {
    }
    %c128_i32 = arith.constant 128 : i32
    %3 = arith.muli %arg1, %c128_i32 : i32
    %4 = tpu.assume_multiple %3, 128 : i32
    %c0 = arith.constant 0 : index
    %5 = arith.index_cast %4 : i32 to index
    %c0_1 = arith.constant 0 : index
    %6 = vector.load %arg2[%c0, %5, %c0_1] : memref<1x128x128xf32, #tpu.memory_space<vmem>>, vector<1x128x128xf32>
    %7 = vector.shape_cast %6 : vector<1x128x128xf32> to vector<128x128xf32>
    %8 = arith.truncf %7 : vector<128x128xf32> to vector<128x128xbf16>
    %c0_2 = arith.constant 0 : index
    %c0_3 = arith.constant 0 : index
    %9 = vector.load %arg3[%c0_2, %c0_3] : memref<128x128xbf16, #tpu.memory_space<vmem>>, vector<128x128xbf16>
    %cst = arith.constant dense<0.000000e+00> : vector<128x128xf32>
    %10 = tpu.matmul %8, %9, %cst {dimension_numbers = #tpu.dot_dimension_numbers<[1], [0], [0], [1], [0, 0, 1, 1], [], []>} : vector<128x128xbf16>, vector<128x128xbf16>, vector<128x128xf32> -> vector<128x128xf32>
    %c0_4 = arith.constant 0 : index
    %c0_5 = arith.constant 0 : index
    %11 = vector.load %arg4[%c0_4, %c0_5] : memref<1x128xf32, #tpu.memory_space<vmem>>, vector<1x128xf32>
    %12 = vector.broadcast %11 : vector<1x128xf32> to vector<128x128xf32>
    %13 = arith.addf %10, %12 : vector<128x128xf32>
    %14 = arith.truncf %13 : vector<128x128xf32> to vector<128x128xbf16>
    %15 = vector.extract_strided_slice %14 {offsets = [0, 0], sizes = [128, 32], strides = [1, 1]} : vector<128x128xbf16> to vector<128x32xbf16>
    %c0_6 = arith.constant 0 : index
    %c0_7 = arith.constant 0 : index
    %c0_8 = arith.constant 0 : index
    %16 = vector.load %arg12[%c0_6, %c0_7, %c0_8] : memref<4x128x32xbf16, #tpu.memory_space<vmem>>, vector<1x128x32xbf16>
    %17 = vector.shape_cast %16 : vector<1x128x32xbf16> to vector<128x32xbf16>
    %18 = vector.shape_cast %15 : vector<128x32xbf16> to vector<1x128x32xbf16>
    tpu.vector_store %arg12[%c0_6, %c0_7, %c0_8], %18 {strides = array<i32>} : memref<4x128x32xbf16, #tpu.memory_space<vmem>>, vector<1x128x32xbf16>,
    %19 = vector.extract_strided_slice %14 {offsets = [0, 32], sizes = [128, 32], strides = [1, 1]} : vector<128x128xbf16> to vector<128x32xbf16>
    %c1 = arith.constant 1 : index
    %c0_9 = arith.constant 0 : index
    %c0_10 = arith.constant 0 : index
    %20 = vector.load %arg12[%c1, %c0_9, %c0_10] : memref<4x128x32xbf16, #tpu.memory_space<vmem>>, vector<1x128x32xbf16>
    %21 = vector.shape_cast %20 : vector<1x128x32xbf16> to vector<128x32xbf16>
    %22 = vector.shape_cast %19 : vector<128x32xbf16> to vector<1x128x32xbf16>
    tpu.vector_store %arg12[%c1, %c0_9, %c0_10], %22 {strides = array<i32>} : memref<4x128x32xbf16, #tpu.memory_space<vmem>>, vector<1x128x32xbf16>,
    %23 = vector.extract_strided_slice %14 {offsets = [0, 64], sizes = [128, 32], strides = [1, 1]} : vector<128x128xbf16> to vector<128x32xbf16>
    %c2 = arith.constant 2 : index
    %c0_11 = arith.constant 0 : index
    %c0_12 = arith.constant 0 : index
    %24 = vector.load %arg12[%c2, %c0_11, %c0_12] : memref<4x128x32xbf16, #tpu.memory_space<vmem>>, vector<1x128x32xbf16>
    %25 = vector.shape_cast %24 : vector<1x128x32xbf16> to vector<128x32xbf16>
    %26 = vector.shape_cast %23 : vector<128x32xbf16> to vector<1x128x32xbf16>
    tpu.vector_store %arg12[%c2, %c0_11, %c0_12], %26 {strides = array<i32>} : memref<4x128x32xbf16, #tpu.memory_space<vmem>>, vector<1x128x32xbf16>,
    %27 = vector.extract_strided_slice %14 {offsets = [0, 96], sizes = [128, 32], strides = [1, 1]} : vector<128x128xbf16> to vector<128x32xbf16>
    %c3 = arith.constant 3 : index
    %c0_13 = arith.constant 0 : index
    %c0_14 = arith.constant 0 : index
    %28 = vector.load %arg12[%c3, %c0_13, %c0_14] : memref<4x128x32xbf16, #tpu.memory_space<vmem>>, vector<1x128x32xbf16>
    %29 = vector.shape_cast %28 : vector<1x128x32xbf16> to vector<128x32xbf16>
    %30 = vector.shape_cast %27 : vector<128x32xbf16> to vector<1x128x32xbf16>
    tpu.vector_store %arg12[%c3, %c0_13, %c0_14], %30 {strides = array<i32>} : memref<4x128x32xbf16, #tpu.memory_space<vmem>>, vector<1x128x32xbf16>,
    %c0_15 = arith.constant 0 : index
    %c0_16 = arith.constant 0 : index
    %c0_17 = arith.constant 0 : index
    %31 = vector.load %arg12[%c0_15, %c0_16, %c0_17] : memref<4x128x32xbf16, #tpu.memory_space<vmem>>, vector<4x128x32xbf16>
    %c0_18 = arith.constant 0 : index
    %c0_19 = arith.constant 0 : index
    %c0_20 = arith.constant 0 : index
    %32 = vector.load %arg10[%c0_18, %c0_19, %c0_20] : memref<4x128x32xbf16, #tpu.memory_space<vmem>>, vector<4x128x32xbf16>
    %c0_21 = arith.constant 0 : index
    %c0_22 = arith.constant 0 : index
    %c0_23 = arith.constant 0 : index
    %33 = vector.load %arg11[%c0_21, %c0_22, %c0_23] : memref<4x128x32xbf16, #tpu.memory_space<vmem>>, vector<4x128x32xbf16>
    "tpu.trace_start"() <{level = 10 : i32, message = "hqd,hkd->hqk"}> : () -> ()
    %cst_24 = arith.constant dense<0.000000e+00> : vector<4x128x128xf32>
    %34 = tpu.matmul %31, %32, %cst_24 {dimension_numbers = #tpu.dot_dimension_numbers<[2], [2], [1], [1], [0, 0, 0, 1, 1, 1], [0], [0]>} : vector<4x128x32xbf16>, vector<4x128x32xbf16>, vector<4x128x128xf32> -> vector<4x128x128xf32>
    "tpu.trace_stop"() : () -> ()
    %35 = tpu.iota {dimensions = array<i32: 2>} : vector<1x1x128xi32>
    %c30_i32 = arith.constant 30 : i32
    %36 = vector.broadcast %c30_i32 : i32 to vector<1x1x128xi32>
    %37 = arith.cmpi slt, %35, %36 : vector<1x1x128xi32>
    %cst_25 = arith.constant -1.000000e+30 : f32
    %38 = vector.shape_cast %37 : vector<1x1x128xi1> to vector<1x1x128xi1>
    %39 = vector.broadcast %38 : vector<1x1x128xi1> to vector<4x128x128xi1>
    %40 = vector.broadcast %cst_25 : f32 to vector<4x128x128xf32>
    %41 = arith.select %39, %34, %40 : vector<4x128x128xi1>, vector<4x128x128xf32>
    %cst_26 = arith.constant dense<0xFF800000> : vector<4x128xf32>
    %42 = vector.multi_reduction <maximumf>, %41, %cst_26 [2] : vector<4x128x128xf32> to vector<4x128xf32>
    %43 = vector.shape_cast %42 : vector<4x128xf32> to vector<4x128x1xf32>
    %44 = vector.broadcast %43 : vector<4x128x1xf32> to vector<4x128x128xf32>
    %45 = arith.subf %41, %44 : vector<4x128x128xf32>
    %46 = math.exp %45 : vector<4x128x128xf32>
    %cst_27 = arith.constant dense<0.000000e+00> : vector<4x128xf32>
    %47 = vector.multi_reduction <add>, %46, %cst_27 [2] : vector<4x128x128xf32> to vector<4x128xf32>
    %48 = vector.shape_cast %47 : vector<4x128xf32> to vector<4x128x1xf32>
    %49 = tpu.reciprocal %48 {approx = true} : vector<4x128x1xf32> -> vector<4x128x1xf32>
    %50 = vector.broadcast %49 : vector<4x128x1xf32> to vector<4x128x128xf32>
    %51 = arith.mulf %46, %50 : vector<4x128x128xf32>
    %52 = arith.truncf %51 : vector<4x128x128xf32> to vector<4x128x128xbf16>
    "tpu.trace_start"() <{level = 10 : i32, message = "hqk,hkd->hqd"}> : () -> ()
    %cst_28 = arith.constant dense<0.000000e+00> : vector<4x128x32xf32>
    %53 = tpu.matmul %52, %33, %cst_28 {dimension_numbers = #tpu.dot_dimension_numbers<[2], [1], [1], [2], [0, 0, 0, 1, 1, 2], [0], [0]>} : vector<4x128x128xbf16>, vector<4x128x32xbf16>, vector<4x128x32xf32> -> vector<4x128x32xf32>
    "tpu.trace_stop"() : () -> ()
    %54 = vector.extract_strided_slice %53 {offsets = [0, 0, 0], sizes = [1, 128, 32], strides = [1, 1, 1]} : vector<4x128x32xf32> to vector<1x128x32xf32>
    %55 = vector.shape_cast %54 : vector<1x128x32xf32> to vector<128x32xf32>
    %56 = arith.truncf %55 : vector<128x32xf32> to vector<128x32xbf16>
    %c0_29 = arith.constant 0 : index
    %c0_30 = arith.constant 0 : index
    %57 = vector.load %arg13[%c0_29, %c0_30] : memref<128x128xbf16, #tpu.memory_space<vmem>>, vector<128x32xbf16>
    tpu.vector_store %arg13[%c0_29, %c0_30], %56 {strides = array<i32>} : memref<128x128xbf16, #tpu.memory_space<vmem>>, vector<128x32xbf16>,
    %58 = vector.extract_strided_slice %53 {offsets = [1, 0, 0], sizes = [1, 128, 32], strides = [1, 1, 1]} : vector<4x128x32xf32> to vector<1x128x32xf32>
    %59 = vector.shape_cast %58 : vector<1x128x32xf32> to vector<128x32xf32>
    %60 = arith.truncf %59 : vector<128x32xf32> to vector<128x32xbf16>
    %c0_31 = arith.constant 0 : index
    %c32 = arith.constant 32 : index
    %61 = vector.load %arg13[%c0_31, %c32] : memref<128x128xbf16, #tpu.memory_space<vmem>>, vector<128x32xbf16>
    tpu.vector_store %arg13[%c0_31, %c32], %60 {strides = array<i32>} : memref<128x128xbf16, #tpu.memory_space<vmem>>, vector<128x32xbf16>,
    %62 = vector.extract_strided_slice %53 {offsets = [2, 0, 0], sizes = [1, 128, 32], strides = [1, 1, 1]} : vector<4x128x32xf32> to vector<1x128x32xf32>
    %63 = vector.shape_cast %62 : vector<1x128x32xf32> to vector<128x32xf32>
    %64 = arith.truncf %63 : vector<128x32xf32> to vector<128x32xbf16>
    %c0_32 = arith.constant 0 : index
    %c64 = arith.constant 64 : index
    %65 = vector.load %arg13[%c0_32, %c64] : memref<128x128xbf16, #tpu.memory_space<vmem>>, vector<128x32xbf16>
    tpu.vector_store %arg13[%c0_32, %c64], %64 {strides = array<i32>} : memref<128x128xbf16, #tpu.memory_space<vmem>>, vector<128x32xbf16>,
    %66 = vector.extract_strided_slice %53 {offsets = [3, 0, 0], sizes = [1, 128, 32], strides = [1, 1, 1]} : vector<4x128x32xf32> to vector<1x128x32xf32>
    %67 = vector.shape_cast %66 : vector<1x128x32xf32> to vector<128x32xf32>
    %68 = arith.truncf %67 : vector<128x32xf32> to vector<128x32xbf16>
    %c0_33 = arith.constant 0 : index
    %c96 = arith.constant 96 : index
    %69 = vector.load %arg13[%c0_33, %c96] : memref<128x128xbf16, #tpu.memory_space<vmem>>, vector<128x32xbf16>
    tpu.vector_store %arg13[%c0_33, %c96], %68 {strides = array<i32>} : memref<128x128xbf16, #tpu.memory_space<vmem>>, vector<128x32xbf16>,
    %c0_34 = arith.constant 0 : index
    %c0_35 = arith.constant 0 : index
    %70 = vector.load %arg13[%c0_34, %c0_35] : memref<128x128xbf16, #tpu.memory_space<vmem>>, vector<128x128xbf16>
    %c0_36 = arith.constant 0 : index
    %c0_37 = arith.constant 0 : index
    %71 = vector.load %arg7[%c0_36, %c0_37] : memref<128x128xbf16, #tpu.memory_space<vmem>>, vector<128x128xbf16>
    %cst_38 = arith.constant dense<0.000000e+00> : vector<128x128xf32>
    %72 = tpu.matmul %70, %71, %cst_38 {dimension_numbers = #tpu.dot_dimension_numbers<[1], [0], [0], [1], [0, 0, 1, 1], [], []>} : vector<128x128xbf16>, vector<128x128xbf16>, vector<128x128xf32> -> vector<128x128xf32>
    %c0_39 = arith.constant 0 : index
    %c0_40 = arith.constant 0 : index
    %73 = vector.load %arg8[%c0_39, %c0_40] : memref<1x128xf32, #tpu.memory_space<vmem>>, vector<1x128xf32>
    %74 = vector.broadcast %73 : vector<1x128xf32> to vector<128x128xf32>
    %75 = arith.addf %72, %74 : vector<128x128xf32>
    %76 = arith.addf %75, %7 : vector<128x128xf32>
    %c0_41 = arith.constant 0 : index
    %c0_42 = arith.constant 0 : index
    %c0_43 = arith.constant 0 : index
    %77 = vector.load %arg9[%c0_41, %c0_42, %c0_43] : memref<1x128x128xf32, #tpu.memory_space<vmem>>, vector<1x128x128xf32>
    %78 = vector.shape_cast %77 : vector<1x128x128xf32> to vector<128x128xf32>
    %79 = vector.shape_cast %76 : vector<128x128xf32> to vector<1x128x128xf32>
    tpu.vector_store %arg9[%c0_41, %c0_42, %c0_43], %79 {strides = array<i32>} : memref<1x128x128xf32, #tpu.memory_space<vmem>>, vector<1x128x128xf32>,
    return
  }
  func.func @transform_0(%arg0: i32, %arg1: i32) -> (i32, i32, i32) {
    %c0_i32 = arith.constant 0 : i32
    %c0_i32_0 = arith.constant 0 : i32
    %c0_i32_1 = arith.constant 0 : i32
    return %arg0, %c0_i32, %c0_i32_0 : i32, i32, i32
  }
  func.func @transform_1(%arg0: i32, %arg1: i32) -> (i32, i32) {
    %c0_i32 = arith.constant 0 : i32
    %c0_i32_0 = arith.constant 0 : i32
    %c0_i32_1 = arith.constant 0 : i32
    return %c0_i32, %c0_i32_0 : i32, i32
  }
  func.func @transform_2(%arg0: i32, %arg1: i32) -> (i32, i32) {
    %c0_i32 = arith.constant 0 : i32
    %c0_i32_0 = arith.constant 0 : i32
    %c0_i32_1 = arith.constant 0 : i32
    return %c0_i32, %c0_i32_0 : i32, i32
  }
  func.func @transform_3(%arg0: i32, %arg1: i32) -> (i32, i32) {
    %c0_i32 = arith.constant 0 : i32
    %c0_i32_0 = arith.constant 0 : i32
    %c0_i32_1 = arith.constant 0 : i32
    return %c0_i32, %c0_i32_0 : i32, i32
  }
  func.func @transform_4(%arg0: i32, %arg1: i32) -> (i32, i32) {
    %c0_i32 = arith.constant 0 : i32
    %c0_i32_0 = arith.constant 0 : i32
    %c0_i32_1 = arith.constant 0 : i32
    return %c0_i32, %c0_i32_0 : i32, i32
  }
  func.func @transform_5(%arg0: i32, %arg1: i32) -> (i32, i32) {
    %c0_i32 = arith.constant 0 : i32
    %c0_i32_0 = arith.constant 0 : i32
    %c0_i32_1 = arith.constant 0 : i32
    return %c0_i32, %c0_i32_0 : i32, i32
  }
  func.func @transform_6(%arg0: i32, %arg1: i32) -> (i32, i32) {
    %c0_i32 = arith.constant 0 : i32
    %c0_i32_0 = arith.constant 0 : i32
    %c0_i32_1 = arith.constant 0 : i32
    return %c0_i32, %c0_i32_0 : i32, i32
  }
  func.func @transform_7(%arg0: i32, %arg1: i32) -> (i32, i32, i32) {
    %c0_i32 = arith.constant 0 : i32
    %c0_i32_0 = arith.constant 0 : i32
    return %arg0, %arg1, %c0_i32 : i32, i32, i32
  }
}

module attributes {stable_mosaic.version = 11 : i64} {
  func.func @_mhsa_kernel(%arg0: i32, %arg1: i32, %arg2: memref<1x128x128xf32, #tpu.memory_space<vmem>>, %arg3: memref<128x128xbf16, #tpu.memory_space<vmem>>, %arg4: memref<1x128xf32, #tpu.memory_space<vmem>>, %arg5: memref<128x256xbf16, #tpu.memory_space<vmem>>, %arg6: memref<1x256xf32, #tpu.memory_space<vmem>>, %arg7: memref<128x128xbf16, #tpu.memory_space<vmem>>, %arg8: memref<1x128xf32, #tpu.memory_space<vmem>>, %arg9: memref<1x128x128xf32, #tpu.memory_space<vmem>>, %arg10: memref<4x128x32xbf16, #tpu.memory_space<vmem>>, %arg11: memref<4x128x32xbf16, #tpu.memory_space<vmem>>, %arg12: memref<4x128x32xbf16, #tpu.memory_space<vmem>>, %arg13: memref<128x128xbf16, #tpu.memory_space<vmem>>) attributes {dimension_semantics = [#tpu.dimension_semantics<parallel>, #tpu.dimension_semantics<arbitrary>], iteration_bounds = array<i64: 2, 1>, scalar_prefetch = 0 : i64, scratch_operands = 4 : i64, tpu.core_type = #tpu.core_type<tc>, window_params = [{transform_indices = @transform_0, window_bounds = array<i64: 1, 128, 128>}, {pipeline_mode = #tpu.pipeline_mode<synchronous>, transform_indices = @transform_1, window_bounds = array<i64: 128, 128>}, {pipeline_mode = #tpu.pipeline_mode<synchronous>, transform_indices = @transform_2, window_bounds = array<i64: 1, 128>}, {pipeline_mode = #tpu.pipeline_mode<synchronous>, transform_indices = @transform_3, window_bounds = array<i64: 128, 256>}, {pipeline_mode = #tpu.pipeline_mode<synchronous>, transform_indices = @transform_4, window_bounds = array<i64: 1, 256>}, {pipeline_mode = #tpu.pipeline_mode<synchronous>, transform_indices = @transform_5, window_bounds = array<i64: 128, 128>}, {pipeline_mode = #tpu.pipeline_mode<synchronous>, transform_indices = @transform_6, window_bounds = array<i64: 1, 128>}, {transform_indices = @transform_7, window_bounds = array<i64: 1, 128, 128>}]} {
    %c0_i32 = arith.constant 0 : i32
    %0 = arith.cmpi eq, %arg1, %c0_i32 : i32
    %1 = arith.extui %0 : i1 to i32
    %c0_i32_0 = arith.constant 0 : i32
    %2 = arith.cmpi ne, %1, %c0_i32_0 : i32
    scf.if %2 {
      %c0_44 = arith.constant 0 : index
      %c0_45 = arith.constant 0 : index
      %c0_46 = arith.constant 0 : index
      %80 = vector.load %arg2[%c0_44, %c0_45, %c0_46] : memref<1x128x128xf32, #tpu.memory_space<vmem>>, vector<1x128x128xf32>
      %81 = vector.shape_cast %80 : vector<1x128x128xf32> to vector<128x128xf32>
      %82 = arith.truncf %81 : vector<128x128xf32> to vector<128x128xbf16>
      %c0_47 = arith.constant 0 : index
      %c0_48 = arith.constant 0 : index
      %83 = vector.load %arg5[%c0_47, %c0_48] : memref<128x256xbf16, #tpu.memory_space<vmem>>, vector<128x256xbf16>
      %cst_49 = arith.constant dense<0.000000e+00> : vector<128x256xf32>
      %84 = tpu.matmul %82, %83, %cst_49 {dimension_numbers = #tpu.dot_dimension_numbers<[1], [0], [0], [1], [0, 0, 1, 1], [], []>} : vector<128x128xbf16>, vector<128x256xbf16>, vector<128x256xf32> -> vector<128x256xf32>
      %c0_50 = arith.constant 0 : index
      %c0_51 = arith.constant 0 : index
      %85 = vector.load %arg6[%c0_50, %c0_51] : memref<1x256xf32, #tpu.memory_space<vmem>>, vector<1x256xf32>
      %86 = vector.broadcast %85 : vector<1x256xf32> to vector<128x256xf32>
      %87 = arith.addf %84, %86 : vector<128x256xf32>
      %88 = arith.truncf %87 : vector<128x256xf32> to vector<128x256xbf16>
      %89 = vector.extract_strided_slice %88 {offsets = [0, 0], sizes = [128, 32], strides = [1, 1]} : vector<128x256xbf16> to vector<128x32xbf16>
      %c0_52 = arith.constant 0 : index
      %c0_53 = arith.constant 0 : index
      %c0_54 = arith.constant 0 : index
      %90 = vector.load %arg10[%c0_52, %c0_53, %c0_54] : memref<4x128x32xbf16, #tpu.memory_space<vmem>>, vector<1x128x32xbf16>
      %91 = vector.shape_cast %90 : vector<1x128x32xbf16> to vector<128x32xbf16>
      %92 = vector.shape_cast %89 : vector<128x32xbf16> to vector<1x128x32xbf16>
      tpu.vector_store %arg10[%c0_52, %c0_53, %c0_54], %92 {strides = array<i32>} : memref<4x128x32xbf16, #tpu.memory_space<vmem>>, vector<1x128x32xbf16>,
      %93 = vector.extract_strided_slice %88 {offsets = [0, 128], sizes = [128, 32], strides = [1, 1]} : vector<128x256xbf16> to vector<128x32xbf16>
      %c0_55 = arith.constant 0 : index
      %c0_56 = arith.constant 0 : index
      %c0_57 = arith.constant 0 : index
      %94 = vector.load %arg11[%c0_55, %c0_56, %c0_57] : memref<4x128x32xbf16, #tpu.memory_space<vmem>>, vector<1x128x32xbf16>
      %95 = vector.shape_cast %94 : vector<1x128x32xbf16> to vector<128x32xbf16>
      %96 = vector.shape_cast %93 : vector<128x32xbf16> to vector<1x128x32xbf16>
      tpu.vector_store %arg11[%c0_55, %c0_56, %c0_57], %96 {strides = array<i32>} : memref<4x128x32xbf16, #tpu.memory_space<vmem>>, vector<1x128x32xbf16>,
      %97 = vector.extract_strided_slice %88 {offsets = [0, 32], sizes = [128, 32], strides = [1, 1]} : vector<128x256xbf16> to vector<128x32xbf16>
      %c1_58 = arith.constant 1 : index
      %c0_59 = arith.constant 0 : index
      %c0_60 = arith.constant 0 : index
      %98 = vector.load %arg10[%c1_58, %c0_59, %c0_60] : memref<4x128x32xbf16, #tpu.memory_space<vmem>>, vector<1x128x32xbf16>
      %99 = vector.shape_cast %98 : vector<1x128x32xbf16> to vector<128x32xbf16>
      %100 = vector.shape_cast %97 : vector<128x32xbf16> to vector<1x128x32xbf16>
      tpu.vector_store %arg10[%c1_58, %c0_59, %c0_60], %100 {strides = array<i32>} : memref<4x128x32xbf16, #tpu.memory_space<vmem>>, vector<1x128x32xbf16>,
      %101 = vector.extract_strided_slice %88 {offsets = [0, 160], sizes = [128, 32], strides = [1, 1]} : vector<128x256xbf16> to vector<128x32xbf16>
      %c1_61 = arith.constant 1 : index
      %c0_62 = arith.constant 0 : index
      %c0_63 = arith.constant 0 : index
      %102 = vector.load %arg11[%c1_61, %c0_62, %c0_63] : memref<4x128x32xbf16, #tpu.memory_space<vmem>>, vector<1x128x32xbf16>
      %103 = vector.shape_cast %102 : vector<1x128x32xbf16> to vector<128x32xbf16>
      %104 = vector.shape_cast %101 : vector<128x32xbf16> to vector<1x128x32xbf16>
      tpu.vector_store %arg11[%c1_61, %c0_62, %c0_63], %104 {strides = array<i32>} : memref<4x128x32xbf16, #tpu.memory_space<vmem>>, vector<1x128x32xbf16>,
      %105 = vector.extract_strided_slice %88 {offsets = [0, 64], sizes = [128, 32], strides = [1, 1]} : vector<128x256xbf16> to vector<128x32xbf16>
      %c2_64 = arith.constant 2 : index
      %c0_65 = arith.constant 0 : index
      %c0_66 = arith.constant 0 : index
      %106 = vector.load %arg10[%c2_64, %c0_65, %c0_66] : memref<4x128x32xbf16, #tpu.memory_space<vmem>>, vector<1x128x32xbf16>
      %107 = vector.shape_cast %106 : vector<1x128x32xbf16> to vector<128x32xbf16>
      %108 = vector.shape_cast %105 : vector<128x32xbf16> to vector<1x128x32xbf16>
      tpu.vector_store %arg10[%c2_64, %c0_65, %c0_66], %108 {strides = array<i32>} : memref<4x128x32xbf16, #tpu.memory_space<vmem>>, vector<1x128x32xbf16>,
      %109 = vector.extract_strided_slice %88 {offsets = [0, 192], sizes = [128, 32], strides = [1, 1]} : vector<128x256xbf16> to vector<128x32xbf16>
      %c2_67 = arith.constant 2 : index
      %c0_68 = arith.constant 0 : index
      %c0_69 = arith.constant 0 : index
      %110 = vector.load %arg11[%c2_67, %c0_68, %c0_69] : memref<4x128x32xbf16, #tpu.memory_space<vmem>>, vector<1x128x32xbf16>
      %111 = vector.shape_cast %110 : vector<1x128x32xbf16> to vector<128x32xbf16>
      %112 = vector.shape_cast %109 : vector<128x32xbf16> to vector<1x128x32xbf16>
      tpu.vector_store %arg11[%c2_67, %c0_68, %c0_69], %112 {strides = array<i32>} : memref<4x128x32xbf16, #tpu.memory_space<vmem>>, vector<1x128x32xbf16>,
      %113 = vector.extract_strided_slice %88 {offsets = [0, 96], sizes = [128, 32], strides = [1, 1]} : vector<128x256xbf16> to vector<128x32xbf16>
      %c3_70 = arith.constant 3 : index
      %c0_71 = arith.constant 0 : index
      %c0_72 = arith.constant 0 : index
      %114 = vector.load %arg10[%c3_70, %c0_71, %c0_72] : memref<4x128x32xbf16, #tpu.memory_space<vmem>>, vector<1x128x32xbf16>
      %115 = vector.shape_cast %114 : vector<1x128x32xbf16> to vector<128x32xbf16>
      %116 = vector.shape_cast %113 : vector<128x32xbf16> to vector<1x128x32xbf16>
      tpu.vector_store %arg10[%c3_70, %c0_71, %c0_72], %116 {strides = array<i32>} : memref<4x128x32xbf16, #tpu.memory_space<vmem>>, vector<1x128x32xbf16>,
      %117 = vector.extract_strided_slice %88 {offsets = [0, 224], sizes = [128, 32], strides = [1, 1]} : vector<128x256xbf16> to vector<128x32xbf16>
      %c3_73 = arith.constant 3 : index
      %c0_74 = arith.constant 0 : index
      %c0_75 = arith.constant 0 : index
      %118 = vector.load %arg11[%c3_73, %c0_74, %c0_75] : memref<4x128x32xbf16, #tpu.memory_space<vmem>>, vector<1x128x32xbf16>
      %119 = vector.shape_cast %118 : vector<1x128x32xbf16> to vector<128x32xbf16>
      %120 = vector.shape_cast %117 : vector<128x32xbf16> to vector<1x128x32xbf16>
      tpu.vector_store %arg11[%c3_73, %c0_74, %c0_75], %120 {strides = array<i32>} : memref<4x128x32xbf16, #tpu.memory_space<vmem>>, vector<1x128x32xbf16>,
    } else {
    }
    %c128_i32 = arith.constant 128 : i32
    %3 = arith.muli %arg1, %c128_i32 : i32
    %4 = tpu.assume_multiple %3, 128 : i32
    %c0 = arith.constant 0 : index
    %5 = arith.index_cast %4 : i32 to index
    %c0_1 = arith.constant 0 : index
    %6 = vector.load %arg2[%c0, %5, %c0_1] : memref<1x128x128xf32, #tpu.memory_space<vmem>>, vector<1x128x128xf32>
    %7 = vector.shape_cast %6 : vector<1x128x128xf32> to vector<128x128xf32>
    %8 = arith.truncf %7 : vector<128x128xf32> to vector<128x128xbf16>
    %c0_2 = arith.constant 0 : index
    %c0_3 = arith.constant 0 : index
    %9 = vector.load %arg3[%c0_2, %c0_3] : memref<128x128xbf16, #tpu.memory_space<vmem>>, vector<128x128xbf16>
    %cst = arith.constant dense<0.000000e+00> : vector<128x128xf32>
    %10 = tpu.matmul %8, %9, %cst {dimension_numbers = #tpu.dot_dimension_numbers<[1], [0], [0], [1], [0, 0, 1, 1], [], []>} : vector<128x128xbf16>, vector<128x128xbf16>, vector<128x128xf32> -> vector<128x128xf32>
    %c0_4 = arith.constant 0 : index
    %c0_5 = arith.constant 0 : index
    %11 = vector.load %arg4[%c0_4, %c0_5] : memref<1x128xf32, #tpu.memory_space<vmem>>, vector<1x128xf32>
    %12 = vector.broadcast %11 : vector<1x128xf32> to vector<128x128xf32>
    %13 = arith.addf %10, %12 : vector<128x128xf32>
    %14 = arith.truncf %13 : vector<128x128xf32> to vector<128x128xbf16>
    %15 = vector.extract_strided_slice %14 {offsets = [0, 0], sizes = [128, 32], strides = [1, 1]} : vector<128x128xbf16> to vector<128x32xbf16>
    %c0_6 = arith.constant 0 : index
    %c0_7 = arith.constant 0 : index
    %c0_8 = arith.constant 0 : index
    %16 = vector.load %arg12[%c0_6, %c0_7, %c0_8] : memref<4x128x32xbf16, #tpu.memory_space<vmem>>, vector<1x128x32xbf16>
    %17 = vector.shape_cast %16 : vector<1x128x32xbf16> to vector<128x32xbf16>
    %18 = vector.shape_cast %15 : vector<128x32xbf16> to vector<1x128x32xbf16>
    tpu.vector_store %arg12[%c0_6, %c0_7, %c0_8], %18 {strides = array<i32>} : memref<4x128x32xbf16, #tpu.memory_space<vmem>>, vector<1x128x32xbf16>,
    %19 = vector.extract_strided_slice %14 {offsets = [0, 32], sizes = [128, 32], strides = [1, 1]} : vector<128x128xbf16> to vector<128x32xbf16>
    %c1 = arith.constant 1 : index
    %c0_9 = arith.constant 0 : index
    %c0_10 = arith.constant 0 : index
    %20 = vector.load %arg12[%c1, %c0_9, %c0_10] : memref<4x128x32xbf16, #tpu.memory_space<vmem>>, vector<1x128x32xbf16>
    %21 = vector.shape_cast %20 : vector<1x128x32xbf16> to vector<128x32xbf16>
    %22 = vector.shape_cast %19 : vector<128x32xbf16> to vector<1x128x32xbf16>
    tpu.vector_store %arg12[%c1, %c0_9, %c0_10], %22 {strides = array<i32>} : memref<4x128x32xbf16, #tpu.memory_space<vmem>>, vector<1x128x32xbf16>,
    %23 = vector.extract_strided_slice %14 {offsets = [0, 64], sizes = [128, 32], strides = [1, 1]} : vector<128x128xbf16> to vector<128x32xbf16>
    %c2 = arith.constant 2 : index
    %c0_11 = arith.constant 0 : index
    %c0_12 = arith.constant 0 : index
    %24 = vector.load %arg12[%c2, %c0_11, %c0_12] : memref<4x128x32xbf16, #tpu.memory_space<vmem>>, vector<1x128x32xbf16>
    %25 = vector.shape_cast %24 : vector<1x128x32xbf16> to vector<128x32xbf16>
    %26 = vector.shape_cast %23 : vector<128x32xbf16> to vector<1x128x32xbf16>
    tpu.vector_store %arg12[%c2, %c0_11, %c0_12], %26 {strides = array<i32>} : memref<4x128x32xbf16, #tpu.memory_space<vmem>>, vector<1x128x32xbf16>,
    %27 = vector.extract_strided_slice %14 {offsets = [0, 96], sizes = [128, 32], strides = [1, 1]} : vector<128x128xbf16> to vector<128x32xbf16>
    %c3 = arith.constant 3 : index
    %c0_13 = arith.constant 0 : index
    %c0_14 = arith.constant 0 : index
    %28 = vector.load %arg12[%c3, %c0_13, %c0_14] : memref<4x128x32xbf16, #tpu.memory_space<vmem>>, vector<1x128x32xbf16>
    %29 = vector.shape_cast %28 : vector<1x128x32xbf16> to vector<128x32xbf16>
    %30 = vector.shape_cast %27 : vector<128x32xbf16> to vector<1x128x32xbf16>
    tpu.vector_store %arg12[%c3, %c0_13, %c0_14], %30 {strides = array<i32>} : memref<4x128x32xbf16, #tpu.memory_space<vmem>>, vector<1x128x32xbf16>,
    %c0_15 = arith.constant 0 : index
    %c0_16 = arith.constant 0 : index
    %c0_17 = arith.constant 0 : index
    %31 = vector.load %arg12[%c0_15, %c0_16, %c0_17] : memref<4x128x32xbf16, #tpu.memory_space<vmem>>, vector<4x128x32xbf16>
    %c0_18 = arith.constant 0 : index
    %c0_19 = arith.constant 0 : index
    %c0_20 = arith.constant 0 : index
    %32 = vector.load %arg10[%c0_18, %c0_19, %c0_20] : memref<4x128x32xbf16, #tpu.memory_space<vmem>>, vector<4x128x32xbf16>
    %c0_21 = arith.constant 0 : index
    %c0_22 = arith.constant 0 : index
    %c0_23 = arith.constant 0 : index
    %33 = vector.load %arg11[%c0_21, %c0_22, %c0_23] : memref<4x128x32xbf16, #tpu.memory_space<vmem>>, vector<4x128x32xbf16>
    "tpu.trace_start"() <{level = 10 : i32, message = "hqd,hkd->hqk"}> : () -> ()
    %cst_24 = arith.constant dense<0.000000e+00> : vector<4x128x128xf32>
    %34 = tpu.matmul %31, %32, %cst_24 {dimension_numbers = #tpu.dot_dimension_numbers<[2], [2], [1], [1], [0, 0, 0, 1, 1, 1], [0], [0]>} : vector<4x128x32xbf16>, vector<4x128x32xbf16>, vector<4x128x128xf32> -> vector<4x128x128xf32>
    "tpu.trace_stop"() : () -> ()
    %35 = tpu.iota {dimensions = array<i32: 2>} : vector<1x1x128xi32>
    %c30_i32 = arith.constant 30 : i32
    %36 = vector.broadcast %c30_i32 : i32 to vector<1x1x128xi32>
    %37 = arith.cmpi slt, %35, %36 : vector<1x1x128xi32>
    %cst_25 = arith.constant -1.000000e+30 : f32
    %38 = vector.shape_cast %37 : vector<1x1x128xi1> to vector<1x1x128xi1>
    %39 = vector.broadcast %38 : vector<1x1x128xi1> to vector<4x128x128xi1>
    %40 = vector.broadcast %cst_25 : f32 to vector<4x128x128xf32>
    %41 = arith.select %39, %34, %40 : vector<4x128x128xi1>, vector<4x128x128xf32>
    %cst_26 = arith.constant dense<0xFF800000> : vector<4x128xf32>
    %42 = vector.multi_reduction <maximumf>, %41, %cst_26 [2] : vector<4x128x128xf32> to vector<4x128xf32>
    %43 = vector.shape_cast %42 : vector<4x128xf32> to vector<4x128x1xf32>
    %44 = vector.broadcast %43 : vector<4x128x1xf32> to vector<4x128x128xf32>
    %45 = arith.subf %41, %44 : vector<4x128x128xf32>
    %46 = math.exp %45 : vector<4x128x128xf32>
    %cst_27 = arith.constant dense<0.000000e+00> : vector<4x128xf32>
    %47 = vector.multi_reduction <add>, %46, %cst_27 [2] : vector<4x128x128xf32> to vector<4x128xf32>
    %48 = vector.shape_cast %47 : vector<4x128xf32> to vector<4x128x1xf32>
    %49 = tpu.reciprocal %48 {approx = true} : vector<4x128x1xf32> -> vector<4x128x1xf32>
    %50 = vector.broadcast %49 : vector<4x128x1xf32> to vector<4x128x128xf32>
    %51 = arith.mulf %46, %50 : vector<4x128x128xf32>
    %52 = arith.truncf %51 : vector<4x128x128xf32> to vector<4x128x128xbf16>
    "tpu.trace_start"() <{level = 10 : i32, message = "hqk,hkd->hqd"}> : () -> ()
    %cst_28 = arith.constant dense<0.000000e+00> : vector<4x128x32xf32>
    %53 = tpu.matmul %52, %33, %cst_28 {dimension_numbers = #tpu.dot_dimension_numbers<[2], [1], [1], [2], [0, 0, 0, 1, 1, 2], [0], [0]>} : vector<4x128x128xbf16>, vector<4x128x32xbf16>, vector<4x128x32xf32> -> vector<4x128x32xf32>
    "tpu.trace_stop"() : () -> ()
    %54 = vector.extract_strided_slice %53 {offsets = [0, 0, 0], sizes = [1, 128, 32], strides = [1, 1, 1]} : vector<4x128x32xf32> to vector<1x128x32xf32>
    %55 = vector.shape_cast %54 : vector<1x128x32xf32> to vector<128x32xf32>
    %56 = arith.truncf %55 : vector<128x32xf32> to vector<128x32xbf16>
    %c0_29 = arith.constant 0 : index
    %c0_30 = arith.constant 0 : index
    %57 = vector.load %arg13[%c0_29, %c0_30] : memref<128x128xbf16, #tpu.memory_space<vmem>>, vector<128x32xbf16>
    tpu.vector_store %arg13[%c0_29, %c0_30], %56 {strides = array<i32>} : memref<128x128xbf16, #tpu.memory_space<vmem>>, vector<128x32xbf16>,
    %58 = vector.extract_strided_slice %53 {offsets = [1, 0, 0], sizes = [1, 128, 32], strides = [1, 1, 1]} : vector<4x128x32xf32> to vector<1x128x32xf32>
    %59 = vector.shape_cast %58 : vector<1x128x32xf32> to vector<128x32xf32>
    %60 = arith.truncf %59 : vector<128x32xf32> to vector<128x32xbf16>
    %c0_31 = arith.constant 0 : index
    %c32 = arith.constant 32 : index
    %61 = vector.load %arg13[%c0_31, %c32] : memref<128x128xbf16, #tpu.memory_space<vmem>>, vector<128x32xbf16>
    tpu.vector_store %arg13[%c0_31, %c32], %60 {strides = array<i32>} : memref<128x128xbf16, #tpu.memory_space<vmem>>, vector<128x32xbf16>,
    %62 = vector.extract_strided_slice %53 {offsets = [2, 0, 0], sizes = [1, 128, 32], strides = [1, 1, 1]} : vector<4x128x32xf32> to vector<1x128x32xf32>
    %63 = vector.shape_cast %62 : vector<1x128x32xf32> to vector<128x32xf32>
    %64 = arith.truncf %63 : vector<128x32xf32> to vector<128x32xbf16>
    %c0_32 = arith.constant 0 : index
    %c64 = arith.constant 64 : index
    %65 = vector.load %arg13[%c0_32, %c64] : memref<128x128xbf16, #tpu.memory_space<vmem>>, vector<128x32xbf16>
    tpu.vector_store %arg13[%c0_32, %c64], %64 {strides = array<i32>} : memref<128x128xbf16, #tpu.memory_space<vmem>>, vector<128x32xbf16>,
    %66 = vector.extract_strided_slice %53 {offsets = [3, 0, 0], sizes = [1, 128, 32], strides = [1, 1, 1]} : vector<4x128x32xf32> to vector<1x128x32xf32>
    %67 = vector.shape_cast %66 : vector<1x128x32xf32> to vector<128x32xf32>
    %68 = arith.truncf %67 : vector<128x32xf32> to vector<128x32xbf16>
    %c0_33 = arith.constant 0 : index
    %c96 = arith.constant 96 : index
    %69 = vector.load %arg13[%c0_33, %c96] : memref<128x128xbf16, #tpu.memory_space<vmem>>, vector<128x32xbf16>
    tpu.vector_store %arg13[%c0_33, %c96], %68 {strides = array<i32>} : memref<128x128xbf16, #tpu.memory_space<vmem>>, vector<128x32xbf16>,
    %c0_34 = arith.constant 0 : index
    %c0_35 = arith.constant 0 : index
    %70 = vector.load %arg13[%c0_34, %c0_35] : memref<128x128xbf16, #tpu.memory_space<vmem>>, vector<128x128xbf16>
    %c0_36 = arith.constant 0 : index
    %c0_37 = arith.constant 0 : index
    %71 = vector.load %arg7[%c0_36, %c0_37] : memref<128x128xbf16, #tpu.memory_space<vmem>>, vector<128x128xbf16>
    %cst_38 = arith.constant dense<0.000000e+00> : vector<128x128xf32>
    %72 = tpu.matmul %70, %71, %cst_38 {dimension_numbers = #tpu.dot_dimension_numbers<[1], [0], [0], [1], [0, 0, 1, 1], [], []>} : vector<128x128xbf16>, vector<128x128xbf16>, vector<128x128xf32> -> vector<128x128xf32>
    %c0_39 = arith.constant 0 : index
    %c0_40 = arith.constant 0 : index
    %73 = vector.load %arg8[%c0_39, %c0_40] : memref<1x128xf32, #tpu.memory_space<vmem>>, vector<1x128xf32>
    %74 = vector.broadcast %73 : vector<1x128xf32> to vector<128x128xf32>
    %75 = arith.addf %72, %74 : vector<128x128xf32>
    %76 = arith.addf %75, %7 : vector<128x128xf32>
    %c0_41 = arith.constant 0 : index
    %c0_42 = arith.constant 0 : index
    %c0_43 = arith.constant 0 : index
    %77 = vector.load %arg9[%c0_41, %c0_42, %c0_43] : memref<1x128x128xf32, #tpu.memory_space<vmem>>, vector<1x128x128xf32>
    %78 = vector.shape_cast %77 : vector<1x128x128xf32> to vector<128x128xf32>
    %79 = vector.shape_cast %76 : vector<128x128xf32> to vector<1x128x128xf32>
    tpu.vector_store %arg9[%c0_41, %c0_42, %c0_43], %79 {strides = array<i32>} : memref<1x128x128xf32, #tpu.memory_space<vmem>>, vector<1x128x128xf32>,
    return
  }
  func.func @transform_0(%arg0: i32, %arg1: i32) -> (i32, i32, i32) {
    %c0_i32 = arith.constant 0 : i32
    %c0_i32_0 = arith.constant 0 : i32
    %c0_i32_1 = arith.constant 0 : i32
    return %arg0, %c0_i32, %c0_i32_0 : i32, i32, i32
  }
  func.func @transform_1(%arg0: i32, %arg1: i32) -> (i32, i32) {
    %c0_i32 = arith.constant 0 : i32
    %c0_i32_0 = arith.constant 0 : i32
    %c0_i32_1 = arith.constant 0 : i32
    return %c0_i32, %c0_i32_0 : i32, i32
  }
  func.func @transform_2(%arg0: i32, %arg1: i32) -> (i32, i32) {
    %c0_i32 = arith.constant 0 : i32
    %c0_i32_0 = arith.constant 0 : i32
    %c0_i32_1 = arith.constant 0 : i32
    return %c0_i32, %c0_i32_0 : i32, i32
  }
  func.func @transform_3(%arg0: i32, %arg1: i32) -> (i32, i32) {
    %c0_i32 = arith.constant 0 : i32
    %c0_i32_0 = arith.constant 0 : i32
    %c0_i32_1 = arith.constant 0 : i32
    return %c0_i32, %c0_i32_0 : i32, i32
  }
  func.func @transform_4(%arg0: i32, %arg1: i32) -> (i32, i32) {
    %c0_i32 = arith.constant 0 : i32
    %c0_i32_0 = arith.constant 0 : i32
    %c0_i32_1 = arith.constant 0 : i32
    return %c0_i32, %c0_i32_0 : i32, i32
  }
  func.func @transform_5(%arg0: i32, %arg1: i32) -> (i32, i32) {
    %c0_i32 = arith.constant 0 : i32
    %c0_i32_0 = arith.constant 0 : i32
    %c0_i32_1 = arith.constant 0 : i32
    return %c0_i32, %c0_i32_0 : i32, i32
  }
  func.func @transform_6(%arg0: i32, %arg1: i32) -> (i32, i32) {
    %c0_i32 = arith.constant 0 : i32
    %c0_i32_0 = arith.constant 0 : i32
    %c0_i32_1 = arith.constant 0 : i32
    return %c0_i32, %c0_i32_0 : i32, i32
  }
  func.func @transform_7(%arg0: i32, %arg1: i32) -> (i32, i32, i32) {
    %c0_i32 = arith.constant 0 : i32
    %c0_i32_0 = arith.constant 0 : i32
    return %arg0, %arg1, %c0_i32 : i32, i32, i32
  }
}

</mosaic_0001>

<bundles_post_ra>
// kernel: tpu_custom_call.1
= control target key start
LH: loop header
LB: loop body
LE: loop exit
PB: predicated region body
PF: predicated region fallthrough
CT: control target
= control target key end

     0   :  { %s8573_s0 = inlined_call_operand.hbm [shape: f32[2,128,128], index: 0, kind: input, shape index: {}]   ;;  %s8574_s1 = inlined_call_operand.hbm [shape: bf16[128,128], index: 1, kind: input, shape index: {}]   ;;  %s8575_s2 = inlined_call_operand.vmem [shape: f32[1,128], index: 2, kind: input, shape index: {}]   ;;  %s8576_s3 = inlined_call_operand.hbm [shape: bf16[128,256], index: 3, kind: input, shape index: {}]   ;;  %s8577_s4 = inlined_call_operand.vmem [shape: f32[1,256], index: 4, kind: input, shape index: {}]   ;;  %s8578_s5 = inlined_call_operand.hbm [shape: bf16[128,128], index: 5, kind: input, shape index: {}]   ;;  %s8579_s6 = inlined_call_operand.vmem [shape: f32[1,128], index: 6, kind: input, shape index: {}]   ;;  %s8580_s7 = inlined_call_operand.hbm [shape: f32[2,128,128], index: 7, kind: output, shape index: {}]  }
   0x1   :  { %8626 = sst [smem:[#allocation65_spill]] %s8574_s1 }
   0x2   :  { %8627 = sst [smem:[#allocation66_spill]] %s8576_s3 }
   0x3   :  { %8628 = sst [smem:[#allocation67_spill]] %s8578_s5 }
   0x4   :  { %12 = vsyncpa [#allocation7], 0 }
   0x5   :  { %14 = vsyncpa [#allocation7 + $0x1], 0 }
   0x6   :  { %15 = vsyncpa [#allocation10], 0 }
   0x7   :  { %16 = vsyncpa [#allocation13], 0 }
   0x8   :  { %17 = vsyncpa [#allocation8], 0 }
   0x9   :  { %19 = vsyncpa [#allocation8 + $0x1], 0  ;;  %s6507_s24 = smov 0   ;;  %s6509_s25 = smov 0  }
   0xa   :  { %s6511_s26 = smov 0   ;;  %s6513_s27 = smov 0  }
   0xb   :  { %s6515_s28 = smov 0   ;;  %s6517_s29 = smov 0  }
   0xc LB: > { %s4791_s30 = sadd.s32 4294967295, %s6450_s29   ;;  %s4792_s8 = sadd.s32 4294967294, %s6450_s29   ;;  %s6450_s29 = sphi %s6517_s29, %s25_s29   ;;  %s6446_s28 = sphi %s6515_s28, %s8742_s28   ;;  %s6442_s27 = sphi %s6513_s27, %s8741_s27   ;;  %s6438_s26 = sphi %s6511_s26, %s8740_s26   ;;  %s6434_s25 = sphi %s6509_s25, %s8739_s25   ;;  %s6430_s24 = sphi %s6507_s24, %s8738_s24  }
   0xd   : > { %p57_p0 = scmp.ne.s32.totalorder %s6434_s25, %s6430_s24  ;;  %p6541_p1 = scmp.eq.s32.totalorder %s4791_s30, 0 }
   0xe   : > { %p6545_p2 = scmp.eq.s32.totalorder %s4791_s30, 1  ;;  %p215_p3 = scmp.eq.s32.totalorder %s4792_s8, 1 }
   0xf   : > { %p6551_p4 = por %p6541_p1, %p57_p0  ;;  %p4793_p5 = scmp.ge.s32.totalorder %s6450_s29, 1 }
  0x10   : > { %p6556_p6 = por %p215_p3, %p57_p0  ;;  %p222_p7 = scmp.lt.s32.totalorder %s6450_s29, 3 }
  0x11   : > { %s6452_s14 = smov [#allocation9]   ;;  %s6453_s17 = smov [#allocation11]  }
  0x12   : > { %s8632_s12 = scalar_select %p6556_p6, 1, 0 }
  0x13   : > { %p6561_p8 = pnand %p4793_p5, %p222_p7  ;;  %s234_s15 = sshll.u32 %s6452_s14, 4  ;;  %s235_s15 = int_to_ptr.vmem [resolvable:$true] %s234_s15 }
  0x14   : > { %s250_s18 = sshll.u32 %s6453_s17, 4  ;;  %s6267_s19 = scalar_lea.vmem %s235_s15, 1024  ;;  %s251_s18 = int_to_ptr.vmem [resolvable:$true] %s250_s18 }
  0x15   : > { %p5752_p9 = pneg %p6561_p8  ;;  %p6268_p13 = scmp.ne.s32.totalorder %s235_s15, %s6267_s19 }
  0x16   : > { %p6275_p5 = scmp.lt.s32.totalorder %s235_s15, %s235_s15  ;;  %p6276_p7 = scmp.lt.s32.totalorder %s6267_s19, %s6267_s19 }
  0x17   : > { %p6570_p11 = pnand %p5752_p9, %p6541_p1 }
  0x18   : > { %p6277_p10 = por %p6276_p7, %p6275_p5 }
  0x19   : > { %p6258_p12 = pneg %p6570_p11 }
  0x1b   : > { %p6270_p0 = pnand %p6268_p13, %p6258_p12 }
  0x1d   : > { %p6271_p3 = pneg %p6270_p0 }
  0x1f   : > { %p6278_p9 = pnand %p6277_p10, %p6271_p3 }
  0x21   : > { %6281 = shalt.err (!%p6278_p9)
}
  0x22   : > { %s6454_s20 = smov 64   ;;  %s6455_s21 = smov 4  }
  0x23   : > { %s8635_s1 = sld [smem:[#allocation65_spill]]  ;;  %s6293_s30 = scalar_lea.vmem %s251_s18, 2048 }
  0x24   : > { %p6294_p13 = scmp.ne.s32.totalorder %s251_s18, %s6293_s30  ;;  %p6301_p10 = scmp.lt.s32.totalorder %s251_s18, %s251_s18 }
  0x25   : > { %p6302_p3 = scmp.lt.s32.totalorder %s6293_s30, %s6293_s30 }
  0x26   : > { %p6296_p0 = pnand %p6294_p13, %p6258_p12 }
  0x27   : > { %p6303_p7 = por %p6302_p3, %p6301_p10 }
  0x28   : > { %p6297_p5 = pneg %p6296_p0 }
  0x29   : > { %5755 = dma.hbm_to_vmem [thread:$0]  (!%p6570_p11), %s8635_s1, 1024, %s235_s15, [#allocation10], %s6454_s20, %s6454_s20, %s6455_s21  }
  0x2a   : > { %p6304_p9 = pnand %p6303_p7, %p6297_p5 }
  0x2c   : > { %6307 = shalt.err (!%p6304_p9)
}
  0x2d   : > { %s8581_s8 = smov 128   ;;  %s8582_s14 = smov 8  }
  0x2e   : > { %s8636_s3 = sld [smem:[#allocation66_spill]]  ;;  %s6458_s19 = smov [#allocation12]  }
  0x2f   : > { %s266_s22 = sshll.u32 %s6458_s19, 4  ;;  %s267_s22 = int_to_ptr.vmem [resolvable:$true] %s266_s22 }
  0x30   : > { %s6319_s23 = scalar_lea.vmem %s267_s22, 1024  ;;  %p6327_p10 = scmp.lt.s32.totalorder %s267_s22, %s267_s22 }
  0x31   : > { %p6320_p13 = scmp.ne.s32.totalorder %s267_s22, %s6319_s23  ;;  %p6328_p3 = scmp.lt.s32.totalorder %s6319_s23, %s6319_s23 }
  0x33   : > { %p6322_p0 = pnand %p6320_p13, %p6258_p12  ;;  %p6329_p7 = por %p6328_p3, %p6327_p10 }
  0x34   : > { %5758 = dma.hbm_to_vmem [thread:$0]  (!%p6570_p11), %s8636_s3, 2048, %s251_s18, [#allocation10], %s8581_s8, %s8581_s8, %s8582_s14  }
  0x35   : > { %p6323_p5 = pneg %p6322_p0 }
  0x37   : > { %p6330_p9 = pnand %p6329_p7, %p6323_p5 }
  0x39   : > { %6333 = shalt.err (!%p6330_p9)
}
  0x3a   : > { %s8637_s5 = sld [smem:[#allocation67_spill]]  ;;  %s37_s15 = sadd.s32 1, %s6446_s28 }
  0x3b   : > { %p39_p12 = scmp.ge.s32.totalorder %s37_s15, 2  ;;  %s44_s16 = sadd.s32 1, %s6438_s26 }
  0x3c   : > { %p51_p13 = scmp.ne.s32.totalorder %s6438_s26, %s6434_s25  ;;  %p52_p0 = scmp.eq.s32.totalorder %s6450_s29, 0 }
  0x3d   : > { %s8744_s15 = smov (%p39_p12, %s37_s15), 0  ;;  %s5094_s18 = sshll.u32 %s6446_s28, 11 }
  0x3e   : > { %8638 = sst [smem:[#allocation19_spill]] %s8744_s15  ;;  %p6616_p5 = por %p52_p0, %p51_p13 }
  0x3f   : > { %p6622_p10 = por %p6545_p2, %p51_p13  ;;  %s41_s23 = ssub.s32 %s6446_s28, %s8744_s15 }
  0x40   : > { %5761 = dma.hbm_to_vmem [thread:$0]  (!%p6570_p11), %s8637_s5, 1024, %s267_s22, [#allocation13], %s6454_s20, %s6454_s20, %s6455_s21  }
  0x41   : > { %s8640_s19 = scalar_select %p6622_p10, 1, 0 }
  0x42   : > { %p5773_p11 = scmp.lt.s32.totalorder %s6450_s29, 2  ;;  %p42_p3 = scmp.eq.s32.totalorder %s41_s23, 0 }
  0x43   : > { %s283_s20 = sand.u32 1, %s6438_s26   ;;  %s293_s14 = scalar_lea.hbm %s8573_s0, %s5094_s18 }
  0x44   : > { %s4798_s21 = sshll.u32 %s283_s20, 7  ;;  %p6639_p2 = pnand %p5773_p11, %p6616_p5 }
  0x45   : > { %s6631_s22 = scalar_select %p42_p3, %s6438_s26, %s44_s16  }
  0x46   : > { %s287_s1 = scalar_lea.vmem [#allocation6], %s4798_s21  ;;  %s284_s5 = scalar_lea.sflag [#allocation7], %s283_s20 }
  0x47   : > { %s294_s3 = sshll.u32 %s287_s1, 4  ;;  %p6336_p7 = pneg %p6639_p2  ;;  %s295_s3 = int_to_ptr.vmem [resolvable:$true] %s294_s3 }
  0x48   : > { %s6347_s23 = scalar_lea.vmem %s295_s3, 2048  ;;  %s6459_s16 = smov [#allocation6]  }
  0x49   : > { %p6348_p9 = scmp.ne.s32.totalorder %s295_s3, %s6347_s23  ;;  %s6352_s15 = sshll.u32 %s6459_s16, 4  ;;  %s6353_s15 = int_to_ptr.vmem [resolvable:$false] %s6352_s15 }
  0x4a   : > { %s6354_s8 = scalar_lea.vmem %s6353_s15, 4096  ;;  %p6355_p0 = scmp.lt.s32.totalorder %s295_s3, %s6353_s15 }
  0x4b   : > { %p6350_p12 = pnand %p6348_p9, %p6336_p7  ;;  %p6356_p3 = scmp.lt.s32.totalorder %s6354_s8, %s6347_s23 }
  0x4d   : > { %p6351_p13 = pneg %p6350_p12  ;;  %p6357_p6 = por %p6356_p3, %p6355_p0 }
  0x4f   : > { %p6358_p10 = pnand %p6357_p6, %p6351_p13 }
  0x51   : > { %6361 = shalt.err (!%p6358_p10)
}
  0x52   : > { %s8642_s1 = smov 8   ;;  %s8643_s17 = smov 128  }
  0x53   : > { %5765 = dma.hbm_to_vmem [thread:$0]  (!%p6639_p2), %s293_s14, 2048, %s295_s3, %s284_s5, %s8643_s17, %s8643_s17, %s8642_s1  }
  0x54   : > { %306 = sbr.rel (%p6561_p8) target bundleno = 2399 (0x95f), region = 48 }
  0x59   : > { %s6653_s20 = sand.u32 1, %s6434_s25  }
  0x5a   : > { %s4802_s15 = sshll.u32 %s6653_s20, 7  ;;  %s309_s21 = scalar_lea.sflag [#allocation7], %s6653_s20 }
  0x5b   : > { %s6659_s18 = scalar_lea.vmem [#allocation6], %s4802_s15 }
  0x5c   : > { %6413 = dma.done.wait (%p6551_p4), %s309_s21, 2048  }
  0x5d   : > { %6415 = vsyncadd (%p6551_p4), %s309_s21, 4294965248 }
  0x5e   : > { %6417 = dma.done.wait (%p6541_p1), [#allocation10], 3072  }
  0x5f   : > { %6419 = vsyncadd (%p6541_p1), [#allocation10], 4294964224 }
  0x60   : > { %6421 = dma.done.wait (%p6541_p1), [#allocation13], 1024  }
  0x61   : > { %6423 = vsyncadd (%p6541_p1), [#allocation13], 4294966272  ;;  %v6460_v0 = vmov 0   ;;  %v5839_v1 = vld [vmem:[#allocation11 + $0x74] ss:$8 sps:$4 sm:$0xff]   ;;  %v5849_v8 = vld [vmem:[#allocation9 + $0x28] sm:$0xff]   ;;  %v403_v49 = vlaneseq }
  0x62   : > { %525 = vmatprep.mubr.bf16.mxu0 %v6460_v0  ;;  %v5841_v2 = vld [vmem:[#allocation9 + $0x38] sm:$0xff]   ;;  %493 = vmatprep.subr.bf16.mxu0 %v5839_v1  ;;  %v5843_v4 = vld [vmem:[#allocation11 + $0x64] ss:$8 sps:$4 sm:$0xff]   ;;  %v5845_v5 = vld [vmem:[#allocation9 + $0x30] sm:$0xff]   ;;  %vm678_vm0 = vcmask 257024   ;;  %s6461_s13 = smov 96  }
  0x63   : > { %v5842_v3 = vld [vmem:[#allocation11 + $0x70] ss:$8 sps:$4 sm:$0xff]   ;;  %5368 = vmatprep.subr.bf16.mxu1 %v5841_v2  ;;  %v5846_v6 = vld [vmem:[#allocation11 + $0x60] ss:$8 sps:$4 sm:$0xff]   ;;  %v5847_v7 = vld [vmem:[#allocation11 + $0x54] ss:$8 sps:$4 sm:$0xff]  }
  0x64   : > { %494 = vmatpush1.bf16.msra.mxu0 %v5842_v3  ;;  %5369 = vmatpush3.bf16.msra.mxu1 %v5841_v2  ;;  %v5850_v9 = vld [vmem:[#allocation11 + $0x50] ss:$8 sps:$4 sm:$0xff]   ;;  %v5851_v10 = vld [vmem:[#allocation11 + $0x44] ss:$8 sps:$4 sm:$0xff]   ;;  %v5854_v12 = vld [vmem:[#allocation11 + $0x40] ss:$8 sps:$4 sm:$0xff]  }
  0x65   : > { %495 = vmatprep.subr.bf16.mxu0 %v5843_v4  ;;  %5370 = vmatprep.subr.bf16.mxu1 %v5845_v5  ;;  %v5853_v11 = vld [vmem:[#allocation9 + $0x20] sm:$0xff]   ;;  %v5855_v13 = vld [vmem:[#allocation11 + $0x34] ss:$8 sps:$4 sm:$0xff]   ;;  %v5858_v15 = vld [vmem:[#allocation11 + $0x30] ss:$8 sps:$4 sm:$0xff]   ;;  %v404_v50 = vshrl.u32 %v403_v49, 7 }
  0x66   : > { %v5857_v14 = vld [vmem:[#allocation9 + $0x18] sm:$0xff]   ;;  %v5859_v16 = vld [vmem:[#allocation11 + $0x24] ss:$8 sps:$4 sm:$0xff]   ;;  %v5861_v17 = vld [vmem:[#allocation9 + $0x10] sm:$0xff]   ;;  %s6462_s14 = smov 64   ;;  %s6463_s30 = smov 32  }
  0x67   : > { %v1159_v18 = vld [vmem:[%s6659_s18] sm:$0xff]  ;;  %v1160_v19 = vld [vmem:[%s6659_s18 + $0x8] sm:$0xff]  ;;  %v5863_v22 = vld [vmem:[#allocation11 + $0x14] ss:$8 sps:$4 sm:$0xff]   ;;  %v405_v51 = vsub.s32 0, %v404_v50  ;;  %v409_v53 = vsub.s32 1, %v404_v50 }
  0x68   : > { %496 = vmatpush1.bf16.msra.mxu0 %v5846_v6  ;;  %5371 = vmatpush3.bf16.msra.mxu1 %v5845_v5  ;;  %v5862_v20 = vld [vmem:[#allocation11 + $0x20] ss:$8 sps:$4 sm:$0xff]   ;;  %v1175_v21 = vpack.c.bf16 %v1160_v19, %v1159_v18  ;;  %v5866_v24 = vld [vmem:[#allocation11 + $0x10] ss:$8 sps:$4 sm:$0xff]   ;;  %v5867_v25 = vld [vmem:[#allocation11 + $0x4] ss:$8 sps:$4 sm:$0xff]  }
  0x69   : > { %497 = vmatprep.subr.bf16.mxu0 %v5847_v7  ;;  %5372 = vmatprep.subr.bf16.mxu1 %v5849_v8  ;;  %v5865_v23 = vld [vmem:[#allocation9 + $0x8] sm:$0xff]   ;;  %v5869_v26 = vld [vmem:[#allocation9] sm:$0xff]   ;;  %v1161_v28 = vld [vmem:[%s6659_s18 + $0x10] sm:$0xff]  ;;  %vm1899_vm1 = vcmask 261120   ;;  %vm4153_vm3 = vcmask 519424   ;;  %vm4266_vm4 = vcmask 781824  }
  0x6a   : > { %5384 = vmatprep.mubr.bf16.mxu1 %v1175_v21  ;;  %v5870_v27 = vld [vmem:[#allocation11] ss:$8 sps:$4 sm:$0xff]   ;;  %v1162_v29 = vld [vmem:[%s6659_s18 + $0x18] sm:$0xff]  ;;  %v367_v34 = vld [vmem:[%s6659_s18 + $0x30] sm:$0xff]  ;;  %vm4379_vm5 = vcmask 1044224   ;;  %s8471_s16 = scalar_lea.vmem [#allocation14], %s4802_s15 }
  0x6b   : > { %v1176_v30 = vpack.c.bf16 %v1162_v29, %v1161_v28  ;;  %v365_v31 = vld [vmem:[%s6659_s18 + $0x20] sm:$0xff]  ;;  %v366_v32 = vld [vmem:[%s6659_s18 + $0x28] sm:$0xff]  ;;  %v368_v35 = vld [vmem:[%s6659_s18 + $0x38] sm:$0xff]  ;;  %s5207_s8 = sshll.u32 %s6442_s27, 11  ;;  %s4676_s1 = sshll.u32 %s8471_s16, 4  ;;  %s8522_s1 = int_to_ptr.vmem [resolvable:$true] %s4676_s1 }
  0x6c   : > { %498 = vmatpush1.bf16.msra.mxu0 %v5850_v9  ;;  %5373 = vmatpush3.bf16.msra.mxu1 %v5849_v8  ;;  %v379_v33 = vpack.c.bf16 %v366_v32, %v365_v31  ;;  %v369_v36 = vld [vmem:[%s6659_s18 + $0x40] sm:$0xff]  ;;  %v370_v37 = vld [vmem:[%s6659_s18 + $0x48] sm:$0xff]  ;;  %v380_v38 = vpack.c.bf16 %v368_v35, %v367_v34  ;;  %v371_v40 = vld [vmem:[%s6659_s18 + $0x50] sm:$0xff]  ;;  %s8520_s21 = scalar_lea.hbm %s8580_s7, %s5207_s8  ;;  %s4661_s27 = scalar_lea.sflag [#allocation8], %s6653_s20 }
  0x6d   : > { %499 = vmatprep.subr.bf16.mxu0 %v5851_v10  ;;  %5374 = vmatprep.subr.bf16.mxu1 %v5853_v11  ;;  %v381_v39 = vpack.c.bf16 %v370_v37, %v369_v36  ;;  %v372_v41 = vld [vmem:[%s6659_s18 + $0x58] sm:$0xff]  ;;  %v373_v42 = vld [vmem:[%s6659_s18 + $0x60] sm:$0xff]  ;;  %v374_v43 = vld [vmem:[%s6659_s18 + $0x68] sm:$0xff]  ;;  %s6362_s3 = scalar_lea.vmem %s8522_s1, 2048  ;;  %p8734_p4 = scmp.ne.s32.totalorder %s8640_s19, 0 }
  0x6e   : > { %v382_v44 = vpack.c.bf16 %v372_v41, %v371_v40  ;;  %v383_v45 = vpack.c.bf16 %v374_v43, %v373_v42  ;;  %v375_v46 = vld [vmem:[%s6659_s18 + $0x70] sm:$0xff]  ;;  %v376_v47 = vld [vmem:[%s6659_s18 + $0x78] sm:$0xff]  ;;  %v401_v52 = vld [vmem:[%s8577_s4] sm:$0x3]  ;;  %p6363_p1 = scmp.ne.s32.totalorder %s8522_s1, %s6362_s3  ;;  %s6464_s5 = smov [#allocation14]  }
  0x6f   : > { %v384_v48 = vpack.c.bf16 %v376_v47, %v375_v46  ;;  %v6701_v54 = vrot.slane %v401_v52, %v405_v51  ;;  %v6706_v55 = vld [vmem:[%s8575_s2] ss:$0 sm:$0xff]  ;;  %v6708_v56 = vrot.slane %v401_v52, %v409_v53  ;;  %s6366_s9 = sshll.u32 %s6464_s5, 4  ;;  %s6367_s9 = int_to_ptr.vmem [resolvable:$false] %s6366_s9 }
  0x70   : > { %500 = vmatpush1.bf16.msra.mxu0 %v5854_v12  ;;  %5375 = vmatpush3.bf16.msra.mxu1 %v5853_v11  ;;  %p6364_p6 = pnand %p6363_p1, %p8734_p4  ;;  %s6368_s11 = scalar_lea.vmem %s6367_s9, 4096 }
  0x71   : > { %501 = vmatprep.subr.bf16.mxu0 %v5855_v13  ;;  %5376 = vmatprep.subr.bf16.mxu1 %v5857_v14  ;;  %p6369_p5 = scmp.lt.s32.totalorder %s8522_s1, %s6367_s9  ;;  %p6370_p10 = scmp.lt.s32.totalorder %s6368_s11, %s6362_s3 }
  0x72   : > { %p6365_p8 = pneg %p6364_p6 }
  0x73   : > { %p6371_p11 = por %p6370_p10, %p6369_p5 }
  0x74   : > { %502 = vmatpush1.bf16.msra.mxu0 %v5858_v15  ;;  %5377 = vmatpush3.bf16.msra.mxu1 %v5857_v14 }
  0x75   : > { %503 = vmatprep.subr.bf16.mxu0 %v5859_v16  ;;  %5378 = vmatprep.subr.bf16.mxu1 %v5861_v17  ;;  %p6372_p2 = pnand %p6371_p11, %p6365_p8 }
  0x78   : > { %504 = vmatpush1.bf16.msra.mxu0 %v5862_v20  ;;  %5379 = vmatpush3.bf16.msra.mxu1 %v5861_v17 }
  0x79   : > { %505 = vmatprep.subr.bf16.mxu0 %v5863_v22  ;;  %5380 = vmatprep.subr.bf16.mxu1 %v5865_v23 }
  0x7c   : > { %506 = vmatpush1.bf16.msra.mxu0 %v5866_v24  ;;  %5381 = vmatpush3.bf16.msra.mxu1 %v5865_v23 }
  0x7d   : > { %507 = vmatprep.subr.bf16.mxu0 %v5867_v25  ;;  %5382 = vmatprep.subr.bf16.mxu1 %v5869_v26 }
  0x80   : > { %508 = vmatpush1.bf16.msra.mxu0 %v5870_v27  ;;  %5383 = vmatpush3.bf16.msra.mxu1 %v5869_v26 }
  0x83   : > { %526 = vmatmul.mubr.bf16.vlgmr.msra.gmra.mxu0 %v1175_v21  ;;  %5385 = vmatmul.mubr.bf16.vlgmr.msra.gmra.mxu1 %v1176_v30 }
  0x84   : > { %535 = vmatprep.mubr.bf16.mxu0 %v6460_v0  ;;  %5388 = vmatprep.mubr.bf16.mxu1 %v379_v33 }
  0x8b   : > { %536 = vmatmul.mubr.bf16.gmra.mxu0 %v1176_v30  ;;  %5389 = vmatmul.mubr.bf16.gmra.mxu1 %v380_v38 }
  0x8c   : > { %545 = vmatprep.mubr.bf16.mxu0 %v6460_v0  ;;  %5392 = vmatprep.mubr.bf16.mxu1 %v381_v39 }
  0x93   : > { %546 = vmatmul.mubr.bf16.gmra.mxu0 %v379_v33  ;;  %5393 = vmatmul.mubr.bf16.gmra.mxu1 %v382_v44 }
  0x94   : > { %555 = vmatprep.mubr.bf16.mxu0 %v6460_v0  ;;  %5396 = vmatprep.mubr.bf16.mxu1 %v383_v45 }
  0x9b   : > { %556 = vmatmul.mubr.bf16.gmra.mxu0 %v380_v38  ;;  %5397 = vmatmul.mubr.bf16.gmra.mxu1 %v384_v48 }
  0x9c   : > { %565 = vmatprep.mubr.bf16.mxu0 %v6460_v0 }
  0xa3   : > { %566 = vmatmul.mubr.bf16.gmra.mxu0 %v381_v39 }
  0xa4   : > { %575 = vmatprep.mubr.bf16.mxu0 %v6460_v0 }
  0xab   : > { %576 = vmatmul.mubr.bf16.gmra.mxu0 %v382_v44 }
  0xac   : > { %585 = vmatprep.mubr.bf16.mxu0 %v6460_v0 }
  0xb3   : > { %586 = vmatmul.mubr.bf16.gmra.mxu0 %v383_v45 }
  0xb4   : > { %595 = vmatprep.mubr.bf16.mxu0 %v6460_v0 }
  0xbb   : > { %596 = vmatmul.mubr.bf16.gmra.mxu0 %v384_v48 }
 0x143   : > { %v527_v57 = vpop.f32.mrf.mxu0  ;;  %v5386_v58 = vpop.f32.mrf.mxu1 }
 0x144   : > { %v528_v59 = vadd.f32 %v527_v57, %v6701_v54  ;;  %v1297_v60 = vadd.f32 %v5386_v58, %v6706_v55 }
 0x145   : > { %v529_v61 = vpop.f32.mrf.mxu0  ;;  %v1288_v62 = vpop.f32.mrf.mxu1 }
 0x146   : > { %v6712_v63 = vpack.c.bf16 %v528_v59, %v528_v59  ;;  %v6714_v0 = vpack.c.bf16 %v1297_v60, %v1297_v60  ;;  %v530_v1 = vadd.f32 %v529_v61, %v6708_v56  ;;  %v1289_v2 = vadd.f32 %v6706_v55, %v1288_v62 }
 0x147   : > { %v531_v3 = vpop.f32.mrf.mxu0  ;;  %v5387_v4 = vpop.f32.mrf.mxu1 }
 0x148   : > { %679 = vst.msk [vmem:[#allocation2] sm:$0xf] %vm678_vm0, %v6712_v63  ;;  %1418 = vst.msk [vmem:[#allocation4 + $0x8] sm:$0xf] %vm678_vm0, %v6714_v0  ;;  %v6722_v5 = vpack.c.bf16 %v530_v1, %v530_v1  ;;  %v6724_v6 = vpack.c.bf16 %v1289_v2, %v1289_v2  ;;  %v532_v7 = vadd.f32 %v531_v3, %v6701_v54  ;;  %767 = vrot.lane.b32.xlu0 %v6712_v63, %s6461_s13 }
 0x149   : > { %v1300_v8 = vadd.f32 %v5387_v4, %v6706_v55  ;;  %v533_v9 = vpop.f32.mrf.mxu0  ;;  %v1291_v10 = vpop.f32.mrf.mxu1 }
 0x14a   : > { %8644 = vst [vmem:[#allocation20_spill] sm:$0xff] %v6722_v5  ;;  %751 = vst.msk [vmem:[#allocation3] sm:$0xf] %vm678_vm0, %v6722_v5  ;;  %v6734_v11 = vpack.c.bf16 %v532_v7, %v532_v7  ;;  %v534_v13 = vadd.f32 %v533_v9, %v6708_v56  ;;  %v1292_v14 = vadd.f32 %v6706_v55, %v1291_v10 }
 0x14b   : > { %1416 = vst.msk [vmem:[#allocation4] sm:$0xf] %vm678_vm0, %v6724_v6  ;;  %v6736_v12 = vpack.c.bf16 %v1300_v8, %v1300_v8  ;;  %v537_v15 = vpop.f32.mrf.mxu0  ;;  %v5390_v16 = vpop.f32.mrf.mxu1 }
 0x14c   : > { %680 = vst.msk [vmem:[#allocation2 + $0x4] sm:$0xf] %vm678_vm0, %v6734_v11  ;;  %v6744_v17 = vpack.c.bf16 %v534_v13, %v534_v13  ;;  %v6746_v18 = vpack.c.bf16 %v1292_v14, %v1292_v14  ;;  %v538_v19 = vadd.f32 %v537_v15, %v6701_v54  ;;  %769 = vrot.lane.b32.xlu1 %v6734_v11, %s6461_s13 }
 0x14d   : > { %1419 = vst.msk [vmem:[#allocation4 + $0xc] sm:$0xf] %vm678_vm0, %v6736_v12  ;;  %1436 = vrot.lane.b32.xlu0 %v6714_v0, %s6461_s13  ;;  %v539_v20 = vpop.f32.mrf.mxu0  ;;  %v1313_v21 = vadd.f32 %v5390_v16, %v6706_v55  ;;  %v1304_v22 = vpop.f32.mrf.mxu1 }
 0x14e   : > { %8645 = vst [vmem:[#allocation21_spill] sm:$0xff] %v6744_v17  ;;  %752 = vst.msk [vmem:[#allocation3 + $0x4] sm:$0xf] %vm678_vm0, %v6744_v17  ;;  %v6758_v23 = vpack.c.bf16 %v538_v19, %v538_v19  ;;  %v540_v24 = vadd.f32 %v539_v20, %v6708_v56  ;;  %v1305_v25 = vadd.f32 %v6706_v55, %v1304_v22 }
 0x14f   : > { %1417 = vst.msk [vmem:[#allocation4 + $0x4] sm:$0xf] %vm678_vm0, %v6746_v18  ;;  %v541_v26 = vpop.f32.mrf.mxu0  ;;  %v6762_v27 = vpack.c.bf16 %v1313_v21, %v1313_v21  ;;  %v5391_v28 = vpop.f32.mrf.mxu1 }
 0x150   : > { %681 = vst.msk [vmem:[#allocation2 + $0x8] sm:$0xf] %vm678_vm0, %v6758_v23  ;;  %v6766_v29 = vpack.c.bf16 %v540_v24, %v540_v24  ;;  %v542_v30 = vadd.f32 %v541_v26, %v6701_v54  ;;  %1438 = vrot.lane.b32.xlu1 %v6736_v12, %s6461_s13  ;;  %v6773_v31 = vpack.c.bf16 %v1305_v25, %v1305_v25 }
 0x151   : > { %897 = vrot.lane.b32.xlu0 %v6712_v63, %s6462_s14  ;;  %v543_v32 = vpop.f32.mrf.mxu0  ;;  %1422 = vst.msk [vmem:[#allocation4 + $0x18] sm:$0xf] %vm678_vm0, %v6762_v27  ;;  %v1316_v33 = vadd.f32 %v5391_v28, %v6706_v55  ;;  %v1307_v34 = vpop.f32.mrf.mxu1 }
 0x152   : > { %8646 = vst [vmem:[#allocation22_spill] sm:$0xff] %v6766_v29  ;;  %753 = vst.msk [vmem:[#allocation3 + $0x8] sm:$0xf] %vm678_vm0, %v6766_v29  ;;  %v6780_v35 = vpack.c.bf16 %v542_v30, %v542_v30  ;;  %v544_v36 = vadd.f32 %v543_v32, %v6708_v56  ;;  %v1308_v37 = vadd.f32 %v6706_v55, %v1307_v34 }
 0x153   : > { %1420 = vst.msk [vmem:[#allocation4 + $0x10] sm:$0xf] %vm678_vm0, %v6773_v31  ;;  %v547_v38 = vpop.f32.mrf.mxu0  ;;  %v6786_v39 = vpack.c.bf16 %v1316_v33, %v1316_v33  ;;  %v5394_v40 = vpop.f32.mrf.mxu1 }
 0x154   : > { %682 = vst.msk [vmem:[#allocation2 + $0xc] sm:$0xf] %vm678_vm0, %v6780_v35  ;;  %v6790_v41 = vpack.c.bf16 %v544_v36, %v544_v36  ;;  %v548_v42 = vadd.f32 %v547_v38, %v6701_v54  ;;  %899 = vrot.lane.b32.xlu1 %v6734_v11, %s6462_s14  ;;  %v6797_v43 = vpack.c.bf16 %v1308_v37, %v1308_v37 }
 0x155   : > { %1027 = vrot.lane.b32.xlu0 %v6712_v63, %s6463_s30  ;;  %v549_v44 = vpop.f32.mrf.mxu0  ;;  %1423 = vst.msk [vmem:[#allocation4 + $0x1c] sm:$0xf] %vm678_vm0, %v6786_v39  ;;  %v1329_v46 = vadd.f32 %v5394_v40, %v6706_v55  ;;  %v1320_v47 = vpop.f32.mrf.mxu1 }
 0x156   : > { %8647 = vst [vmem:[#allocation23_spill] sm:$0xff] %v6790_v41  ;;  %v5871_v45 = vld [vmem:[#allocation4] sm:$0xff]   ;;  %754 = vst.msk [vmem:[#allocation3 + $0xc] sm:$0xf] %vm678_vm0, %v6790_v41  ;;  %v6804_v48 = vpack.c.bf16 %v548_v42, %v548_v42  ;;  %v550_v50 = vadd.f32 %v549_v44, %v6708_v56  ;;  %v1321_v51 = vadd.f32 %v6706_v55, %v1320_v47 }
 0x157   : > { %1421 = vst.msk [vmem:[#allocation4 + $0x14] sm:$0xf] %vm678_vm0, %v6797_v43  ;;  %v551_v52 = vpop.f32.mrf.mxu0  ;;  %5416 = vmatprep.mubr.msk.bf16.mxu0 %vm1899_vm1, %v5871_v45  ;;  %v6811_v53 = vpack.c.bf16 %v1329_v46, %v1329_v46  ;;  %v5395_v57 = vpop.f32.mrf.mxu1 }
 0x158   : > { %683 = vst.msk [vmem:[#allocation2 + $0x10] sm:$0xf] %vm678_vm0, %v6804_v48  ;;  %v6815_v58 = vpack.c.bf16 %v550_v50, %v550_v50  ;;  %v552_v59 = vadd.f32 %v551_v52, %v6701_v54  ;;  %1029 = vrot.lane.b32.xlu1 %v6734_v11, %s6463_s30  ;;  %v6822_v60 = vpack.c.bf16 %v1321_v51, %v1321_v51 }
 0x159   : > { %1501 = vrot.lane.b32.xlu0 %v6714_v0, %s6462_s14  ;;  %v553_v61 = vpop.f32.mrf.mxu0  ;;  %1426 = vst.msk [vmem:[#allocation4 + $0x28] sm:$0xf] %vm678_vm0, %v6811_v53  ;;  %v1332_v62 = vadd.f32 %v5395_v57, %v6706_v55  ;;  %v1323_v63 = vpop.f32.mrf.mxu1 }
 0x15a   : > { %8648 = vst [vmem:[#allocation24_spill] sm:$0xff] %v6815_v58  ;;  %755 = vst.msk [vmem:[#allocation3 + $0x10] sm:$0xf] %vm678_vm0, %v6815_v58  ;;  %v6829_v1 = vpack.c.bf16 %v552_v59, %v552_v59  ;;  %v554_v2 = vadd.f32 %v553_v61, %v6708_v56  ;;  %v1324_v3 = vadd.f32 %v6706_v55, %v1323_v63 }
 0x15b   : > { %1424 = vst.msk [vmem:[#allocation4 + $0x20] sm:$0xf] %vm678_vm0, %v6822_v60  ;;  %v557_v4 = vpop.f32.mrf.mxu0  ;;  %v6835_v7 = vpack.c.bf16 %v1332_v62, %v1332_v62  ;;  %v5398_v8 = vpop.f32.mrf.mxu1 }
 0x15c   : > { %684 = vst.msk [vmem:[#allocation2 + $0x14] sm:$0xf] %vm678_vm0, %v6829_v1  ;;  %v6839_v9 = vpack.c.bf16 %v554_v2, %v554_v2  ;;  %v558_v10 = vadd.f32 %v557_v4, %v6701_v54  ;;  %1503 = vrot.lane.b32.xlu1 %v6736_v12, %s6462_s14  ;;  %v6846_v11 = vpack.c.bf16 %v1324_v3, %v1324_v3 }
 0x15d   : > { %1566 = vrot.lane.b32.xlu0 %v6714_v0, %s6463_s30  ;;  %v559_v13 = vpop.f32.mrf.mxu0  ;;  %1427 = vst.msk [vmem:[#allocation4 + $0x2c] sm:$0xf] %vm678_vm0, %v6835_v7  ;;  %v1345_v14 = vadd.f32 %v5398_v8, %v6706_v55  ;;  %v1336_v15 = vpop.f32.mrf.mxu1 }
 0x15e   : > { %8649 = vst [vmem:[#allocation25_spill] sm:$0xff] %v6839_v9  ;;  %756 = vst.msk [vmem:[#allocation3 + $0x14] sm:$0xf] %vm678_vm0, %v6839_v9  ;;  %v6853_v16 = vpack.c.bf16 %v558_v10, %v558_v10  ;;  %v560_v19 = vadd.f32 %v559_v13, %v6708_v56  ;;  %v1337_v0 = vadd.f32 %v6706_v55, %v1336_v15 }
 0x15f   : > { %1425 = vst.msk [vmem:[#allocation4 + $0x24] sm:$0xf] %vm678_vm0, %v6846_v11  ;;  %v561_v20 = vpop.f32.mrf.mxu0  ;;  %v6859_v21 = vpack.c.bf16 %v1345_v14, %v1345_v14  ;;  %v5399_v22 = vpop.f32.mrf.mxu1 }
 0x160   : > { %685 = vst.msk [vmem:[#allocation2 + $0x18] sm:$0xf] %vm678_vm0, %v6853_v16  ;;  %v6863_v24 = vpack.c.bf16 %v560_v19, %v560_v19  ;;  %v562_v25 = vadd.f32 %v561_v20, %v6701_v54  ;;  %1568 = vrot.lane.b32.xlu1 %v6736_v12, %s6463_s30  ;;  %v6870_v26 = vpack.c.bf16 %v1337_v0, %v1337_v0 }
 0x161   : > { %1432 = vrot.lane.b32.xlu0 %v6724_v6, %s6461_s13  ;;  %v563_v28 = vpop.f32.mrf.mxu0  ;;  %1430 = vst.msk [vmem:[#allocation4 + $0x38] sm:$0xf] %vm678_vm0, %v6859_v21  ;;  %v1348_v30 = vadd.f32 %v5399_v22, %v6706_v55  ;;  %v1339_v32 = vpop.f32.mrf.mxu1 }
 0x162   : > { %8650 = vst [vmem:[#allocation26_spill] sm:$0xff] %v6863_v24  ;;  %757 = vst.msk [vmem:[#allocation3 + $0x18] sm:$0xf] %vm678_vm0, %v6863_v24  ;;  %v6877_v33 = vpack.c.bf16 %v562_v25, %v562_v25  ;;  %v564_v34 = vadd.f32 %v563_v28, %v6708_v56  ;;  %v1340_v12 = vadd.f32 %v6706_v55, %v1339_v32 }
 0x163   : > { %1428 = vst.msk [vmem:[#allocation4 + $0x30] sm:$0xf] %vm678_vm0, %v6870_v26  ;;  %v567_v36 = vpop.f32.mrf.mxu0  ;;  %v6883_v37 = vpack.c.bf16 %v1348_v30, %v1348_v30 }
 0x164   : > { %686 = vst.msk [vmem:[#allocation2 + $0x1c] sm:$0xf] %vm678_vm0, %v6877_v33  ;;  %v6887_v38 = vpack.c.bf16 %v564_v34, %v564_v34  ;;  %v568_v40 = vadd.f32 %v567_v36, %v6701_v54  ;;  %1434 = vrot.lane.b32.xlu1 %v6746_v18, %s6461_s13  ;;  %v6894_v42 = vpack.c.bf16 %v1340_v12, %v1340_v12 }
 0x165   : > { %1497 = vrot.lane.b32.xlu0 %v6724_v6, %s6462_s14  ;;  %v569_v44 = vpop.f32.mrf.mxu0  ;;  %1431 = vst.msk [vmem:[#allocation4 + $0x3c] sm:$0xf] %vm678_vm0, %v6883_v37 }
 0x166   : > { %8651 = vst [vmem:[#allocation27_spill] sm:$0xff] %v6887_v38  ;;  %758 = vst.msk [vmem:[#allocation3 + $0x1c] sm:$0xf] %vm678_vm0, %v6887_v38  ;;  %v6900_v55 = vpack.c.bf16 %v568_v40, %v568_v40  ;;  %v570_v45 = vadd.f32 %v569_v44, %v6708_v56 }
 0x167   : > { %1429 = vst.msk [vmem:[#allocation4 + $0x34] sm:$0xf] %vm678_vm0, %v6894_v42  ;;  %v571_v46 = vpop.f32.mrf.mxu0 }
 0x168   : > { %687 = vst.msk [vmem:[#allocation2 + $0x20] sm:$0xf] %vm678_vm0, %v6900_v55  ;;  %v6907_v47 = vpack.c.bf16 %v570_v45, %v570_v45  ;;  %v572_v50 = vadd.f32 %v571_v46, %v6701_v54  ;;  %1499 = vrot.lane.b32.xlu1 %v6746_v18, %s6462_s14 }
 0x169   : > { %1562 = vrot.lane.b32.xlu0 %v6724_v6, %s6463_s30  ;;  %v573_v51 = vpop.f32.mrf.mxu0 }
 0x16a   : > { %759 = vst.msk [vmem:[#allocation3 + $0x20] sm:$0xf] %vm678_vm0, %v6907_v47  ;;  %v6916_v52 = vpack.c.bf16 %v572_v50, %v572_v50  ;;  %v574_v57 = vadd.f32 %v573_v51, %v6708_v56 }
 0x16b   : > { %v577_v59 = vpop.f32.mrf.mxu0 }
 0x16c   : > { %688 = vst.msk [vmem:[#allocation2 + $0x24] sm:$0xf] %vm678_vm0, %v6916_v52  ;;  %v6921_v61 = vpack.c.bf16 %v574_v57, %v574_v57  ;;  %v578_v62 = vadd.f32 %v577_v59, %v6701_v54  ;;  %1564 = vrot.lane.b32.xlu1 %v6746_v18, %s6463_s30 }
 0x16d   : > { %771 = vrot.lane.b32.xlu0 %v6758_v23, %s6461_s13  ;;  %v579_v6 = vpop.f32.mrf.mxu0 }
 0x16e   : > { %760 = vst.msk [vmem:[#allocation3 + $0x24] sm:$0xf] %vm678_vm0, %v6921_v61  ;;  %v6930_v63 = vpack.c.bf16 %v578_v62, %v578_v62  ;;  %v580_v2 = vadd.f32 %v579_v6, %v6708_v56 }
 0x16f   : > { %v581_v3 = vpop.f32.mrf.mxu0 }
 0x170   : > { %689 = vst.msk [vmem:[#allocation2 + $0x28] sm:$0xf] %vm678_vm0, %v6930_v63  ;;  %v6935_v4 = vpack.c.bf16 %v580_v2, %v580_v2  ;;  %v582_v8 = vadd.f32 %v581_v3, %v6701_v54  ;;  %836 = vrot.lane.b32.xlu1 %v6766_v29, %s6461_s13 }
 0x171   : > { %1444 = vrot.lane.b32.xlu0 %v6762_v27, %s6461_s13  ;;  %v583_v18 = vpop.f32.mrf.mxu0 }
 0x172   : > { %761 = vst.msk [vmem:[#allocation3 + $0x28] sm:$0xf] %vm678_vm0, %v6935_v4  ;;  %v6944_v10 = vpack.c.bf16 %v582_v8, %v582_v8  ;;  %v584_v13 = vadd.f32 %v583_v18, %v6708_v56  ;;  %v5878_v18 = vld [vmem:[#allocation2 + $0x8] sm:$0xff]  }
 0x173   : > { %v587_v14 = vpop.f32.mrf.mxu0  ;;  %v5875_v3 = vld [vmem:[#allocation2 + $0x20] sm:$0xff]  }
 0x174   : > { %690 = vst.msk [vmem:[#allocation2 + $0x2c] sm:$0xf] %vm678_vm0, %v6944_v10  ;;  %v6949_v15 = vpack.c.bf16 %v584_v13, %v584_v13  ;;  %v588_v19 = vadd.f32 %v587_v14, %v6701_v54  ;;  %773 = vrot.lane.b32.xlu1 %v6780_v35, %s6461_s13  ;;  %v5879_v13 = vld [vmem:[#allocation2] sm:$0xff]  }
 0x175   : > { %901 = vrot.lane.b32.xlu0 %v6758_v23, %s6462_s14  ;;  %v589_v0 = vpop.f32.mrf.mxu0 }
 0x176   : > { %762 = vst.msk [vmem:[#allocation3 + $0x2c] sm:$0xf] %vm678_vm0, %v6949_v15  ;;  %v6958_v20 = vpack.c.bf16 %v588_v19, %v588_v19  ;;  %v590_v22 = vadd.f32 %v589_v0, %v6708_v56 }
 0x177   : > { %v591_v25 = vpop.f32.mrf.mxu0 }
 0x178   : > { %691 = vst.msk [vmem:[#allocation2 + $0x30] sm:$0xf] %vm678_vm0, %v6958_v20  ;;  %v6963_v28 = vpack.c.bf16 %v590_v22, %v590_v22  ;;  %v592_v30 = vadd.f32 %v591_v25, %v6701_v54  ;;  %1446 = vrot.lane.b32.xlu1 %v6786_v39, %s6461_s13  ;;  %v1925_v22 = vsel %vm1899_vm1, %v5879_v13, 0 }
 0x179   : > { %1031 = vrot.lane.b32.xlu0 %v6758_v23, %s6463_s30  ;;  %v593_v32 = vpop.f32.mrf.mxu0 }
 0x17a   : > { %763 = vst.msk [vmem:[#allocation3 + $0x30] sm:$0xf] %vm678_vm0, %v6963_v28  ;;  %v6972_v34 = vpack.c.bf16 %v592_v30, %v592_v30  ;;  %v594_v12 = vadd.f32 %v593_v32, %v6708_v56 }
 0x17b   : > { %v597_v36 = vpop.f32.mrf.mxu0  ;;  %v5874_v2 = vld [vmem:[#allocation2 + $0x28] sm:$0xff]  }
 0x17c   : > { %692 = vst.msk [vmem:[#allocation2 + $0x34] sm:$0xf] %vm678_vm0, %v6972_v34  ;;  %v6977_v40 = vpack.c.bf16 %v594_v12, %v594_v12  ;;  %v598_v44 = vadd.f32 %v597_v36, %v6701_v54  ;;  %903 = vrot.lane.b32.xlu1 %v6780_v35, %s6462_s14  ;;  %v5880_v12 = vld [vmem:[#allocation4 + $0x8] sm:$0xff]   ;;  %v5881_v36 = vld [vmem:[#allocation4 + $0x10] sm:$0xff]  }
 0x17d   : > { %1509 = vrot.lane.b32.xlu0 %v6762_v27, %s6462_s14  ;;  %v599_v23 = vpop.f32.mrf.mxu0 }
 0x17e   : > { %764 = vst.msk [vmem:[#allocation3 + $0x34] sm:$0xf] %vm678_vm0, %v6977_v40  ;;  %v6986_v45 = vpack.c.bf16 %v598_v44, %v598_v44  ;;  %v600_v46 = vadd.f32 %v599_v23, %v6708_v56 }
 0x17f   : > { %v601_v50 = vpop.f32.mrf.mxu0 }
 0x180   : > { %693 = vst.msk [vmem:[#allocation2 + $0x38] sm:$0xf] %vm678_vm0, %v6986_v45  ;;  %v6991_v51 = vpack.c.bf16 %v600_v46, %v600_v46  ;;  %v602_v57 = vadd.f32 %v601_v50, %v6701_v54  ;;  %1033 = vrot.lane.b32.xlu1 %v6780_v35, %s6463_s30  ;;  %v5883_v50 = vld [vmem:[#allocation4 + $0x20] sm:$0xff]  }
 0x181   : > { %1574 = vrot.lane.b32.xlu0 %v6762_v27, %s6463_s30  ;;  %v603_v62 = vpop.f32.mrf.mxu0 }
 0x182   : > { %765 = vst.msk [vmem:[#allocation3 + $0x38] sm:$0xf] %vm678_vm0, %v6991_v51  ;;  %v7000_v59 = vpack.c.bf16 %v602_v57, %v602_v57 }
 0x183   : > { %v5873_v27 = vld [vmem:[#allocation2 + $0x30] sm:$0xff]  }
 0x184   : > { %694 = vst.msk [vmem:[#allocation2 + $0x3c] sm:$0xf] %vm678_vm0, %v7000_v59  ;;  %1511 = vrot.lane.b32.xlu1 %v6786_v39, %s6462_s14 }
 0x185   : > { %1440 = vrot.lane.b32.xlu0 %v6773_v31, %s6461_s13 }
 0x188   : > { %1576 = vrot.lane.b32.xlu1 %v6786_v39, %s6463_s30  ;;  %v604_v39 = vadd.f32 %v603_v62, %v6708_v56  ;;  %v1940_v56 = vsel %vm1899_vm1, %v5874_v2, 0  ;;  %v5884_v62 = vld [vmem:[#allocation4 + $0x28] sm:$0xff]  }
 0x189   : > { %1505 = vrot.lane.b32.xlu0 %v6773_v31, %s6462_s14 }
 0x18a   : > { %v7024_v6 = vpack.c.bf16 %v604_v39, %v604_v39  ;;  %v5885_v39 = vld [vmem:[#allocation4 + $0x30] sm:$0xff]  }
 0x18b   : > { %v5872_v54 = vld [vmem:[#allocation2 + $0x38] sm:$0xff]  }
 0x18c   : > { %1442 = vrot.lane.b32.xlu1 %v6797_v43, %s6461_s13  ;;  %5704 = vmatprep.subr.msk.bf16.mxu0 %vm1899_vm1, %v5872_v54  ;;  %v1946_v35 = vsel %vm1899_vm1, %v5872_v54, 0  ;;  %766 = vst.msk [vmem:[#allocation3 + $0x3c] sm:$0xf] %vm678_vm0, %v7024_v6 }
 0x18d   : > { %1570 = vrot.lane.b32.xlu0 %v6773_v31, %s6463_s30  ;;  %5401 = vmatpush3.bf16.xpose.msra.mxu0 %v1946_v35  ;;  %v1943_v31 = vsel %vm1899_vm1, %v5873_v27, 0 }
 0x18e   : > { %5705 = vmatprep.subr.msk.bf16.mxu0 %vm1899_vm1, %v5873_v27 }
 0x190   : > { %1507 = vrot.lane.b32.xlu1 %v6797_v43, %s6462_s14 }
 0x191   : > { %775 = vrot.lane.b32.xlu0 %v6804_v48, %s6461_s13 }
 0x194   : > { %1572 = vrot.lane.b32.xlu1 %v6797_v43, %s6463_s30  ;;  %v1937_v43 = vsel %vm1899_vm1, %v5875_v3, 0 }
 0x195   : > { %905 = vrot.lane.b32.xlu0 %v6804_v48, %s6462_s14  ;;  %5403 = vmatpush3.bf16.xpose.msra.mxu0 %v1943_v31 }
 0x196   : > { %5706 = vmatprep.subr.msk.bf16.mxu0 %vm1899_vm1, %v5874_v2 }
 0x198   : > { %840 = vrot.lane.b32.xlu1 %v6815_v58, %s6461_s13 }
 0x199   : > { %1035 = vrot.lane.b32.xlu0 %v6804_v48, %s6463_s30  ;;  %v5876_v48 = vld [vmem:[#allocation2 + $0x18] sm:$0xff]  }
 0x19a   : > { %v1934_v8 = vsel %vm1899_vm1, %v5876_v48, 0 }
 0x19c   : > { %777 = vrot.lane.b32.xlu1 %v6829_v1, %s6461_s13 }
 0x19d   : > { %1452 = vrot.lane.b32.xlu0 %v6811_v53, %s6461_s13  ;;  %5405 = vmatpush3.bf16.xpose.msra.mxu0 %v1940_v56 }
 0x19e   : > { %5707 = vmatprep.subr.msk.bf16.mxu0 %vm1899_vm1, %v5875_v3  ;;  %v5887_v3 = vld [vmem:[#allocation4 + $0x38] sm:$0xff]  }
 0x1a0   : > { %907 = vrot.lane.b32.xlu1 %v6829_v1, %s6462_s14 }
 0x1a1   : > { %1517 = vrot.lane.b32.xlu0 %v6811_v53, %s6462_s14 }
 0x1a4   : > { %1037 = vrot.lane.b32.xlu1 %v6829_v1, %s6463_s30  ;;  %v5877_v1 = vld [vmem:[#allocation2 + $0x10] sm:$0xff]  }
 0x1a5   : > { %1582 = vrot.lane.b32.xlu0 %v6811_v53, %s6463_s30  ;;  %5407 = vmatpush3.bf16.xpose.msra.mxu0 %v1937_v43  ;;  %v1931_v53 = vsel %vm1899_vm1, %v5877_v1, 0 }
 0x1a6   : > { %5708 = vmatprep.subr.msk.bf16.mxu0 %vm1899_vm1, %v5876_v48 }
 0x1a8   : > { %1454 = vrot.lane.b32.xlu1 %v6835_v7, %s6461_s13 }
 0x1a9   : > { %1448 = vrot.lane.b32.xlu0 %v6822_v60, %s6461_s13 }
 0x1ac   : > { %1519 = vrot.lane.b32.xlu1 %v6835_v7, %s6462_s14 }
 0x1ad   : > { %1513 = vrot.lane.b32.xlu0 %v6822_v60, %s6462_s14  ;;  %5409 = vmatpush3.bf16.xpose.msra.mxu0 %v1934_v8 }
 0x1ae   : > { %5709 = vmatprep.subr.msk.bf16.mxu0 %vm1899_vm1, %v5877_v1 }
 0x1b0   : > { %1584 = vrot.lane.b32.xlu1 %v6835_v7, %s6463_s30 }
 0x1b1   : > { %1578 = vrot.lane.b32.xlu0 %v6822_v60, %s6463_s30  ;;  %v1928_v60 = vsel %vm1899_vm1, %v5878_v18, 0 }
 0x1b4   : > { %1450 = vrot.lane.b32.xlu1 %v6846_v11, %s6461_s13 }
 0x1b5   : > { %842 = vrot.lane.b32.xlu0 %v6839_v9, %s6461_s13  ;;  %5411 = vmatpush3.bf16.xpose.msra.mxu0 %v1931_v53 }
 0x1b6   : > { %5710 = vmatprep.subr.msk.bf16.mxu0 %vm1899_vm1, %v5878_v18 }
 0x1b8   : > { %1515 = vrot.lane.b32.xlu1 %v6846_v11, %s6462_s14 }
 0x1b9   : > { %779 = vrot.lane.b32.xlu0 %v6853_v16, %s6461_s13 }
 0x1ba   : > { %v768_v7 = vpop.permute.xlu0 %767 }
 0x1bb   : > { %816 = vst.msk [vmem:[#allocation2 + $0x40] sm:$0xf] %vm678_vm0, %v768_v7 }
 0x1bc   : > { %1580 = vrot.lane.b32.xlu1 %v6846_v11, %s6463_s30 }
 0x1bd   : > { %909 = vrot.lane.b32.xlu0 %v6853_v16, %s6462_s14  ;;  %5413 = vmatpush3.bf16.xpose.msra.mxu0 %v1928_v60 }
 0x1be   : > { %v770_v14 = vpop.permute.xlu1 %769  ;;  %5711 = vmatprep.subr.msk.bf16.mxu0 %vm1899_vm1, %v5879_v13 }
 0x1bf   : > { %v1437_v19 = vpop.permute.xlu0 %1436  ;;  %817 = vst.msk [vmem:[#allocation2 + $0x44] sm:$0xf] %vm678_vm0, %v770_v14 }
 0x1c0   : > { %1483 = vst.msk [vmem:[#allocation4 + $0x48] sm:$0xf] %vm678_vm0, %v1437_v19  ;;  %844 = vrot.lane.b32.xlu1 %v6863_v24, %s6461_s13 }
 0x1c1   : > { %1039 = vrot.lane.b32.xlu0 %v6853_v16, %s6463_s30 }
 0x1c2   : > { %v1439_v11 = vpop.permute.xlu1 %1438 }
 0x1c3   : > { %v898_v0 = vpop.permute.xlu0 %897  ;;  %1484 = vst.msk [vmem:[#allocation4 + $0x4c] sm:$0xf] %vm678_vm0, %v1439_v11 }
 0x1c4   : > { %946 = vst.msk [vmem:[#allocation2 + $0x80] sm:$0xf] %vm678_vm0, %v898_v0  ;;  %781 = vrot.lane.b32.xlu1 %v6877_v33, %s6461_s13 }
 0x1c5   : > { %1460 = vrot.lane.b32.xlu0 %v6859_v21, %s6461_s13  ;;  %5415 = vmatpush3.bf16.xpose.msra.mxu0 %v1925_v22 }
 0x1c6   : > { %v900_v25 = vpop.permute.xlu1 %899 }
 0x1c7   : > { %v1028_v30 = vpop.permute.xlu0 %1027  ;;  %947 = vst.msk [vmem:[#allocation2 + $0x84] sm:$0xf] %vm678_vm0, %v900_v25 }
 0x1c8   : > { %1076 = vst.msk [vmem:[#allocation2 + $0xc0] sm:$0xf] %vm678_vm0, %v1028_v30  ;;  %911 = vrot.lane.b32.xlu1 %v6877_v33, %s6462_s14 }
 0x1c9   : > { %1525 = vrot.lane.b32.xlu0 %v6859_v21, %s6462_s14 }
 0x1ca   : > { %v1030_v16 = vpop.permute.xlu1 %1029 }
 0x1cb   : > { %v1502_v32 = vpop.permute.xlu0 %1501  ;;  %1077 = vst.msk [vmem:[#allocation2 + $0xc4] sm:$0xf] %vm678_vm0, %v1030_v16 }
 0x1cc   : > { %1548 = vst.msk [vmem:[#allocation4 + $0x88] sm:$0xf] %vm678_vm0, %v1502_v32  ;;  %1041 = vrot.lane.b32.xlu1 %v6877_v33, %s6463_s30  ;;  %5417 = vmatmul.mubr.msk.bf16.vlgmr.msra.gmra.mxu0 %vm1899_vm1, %v5880_v12 }
 0x1cd   : > { %1590 = vrot.lane.b32.xlu0 %v6859_v21, %s6463_s30  ;;  %5420 = vmatprep.mubr.msk.bf16.mxu0 %vm1899_vm1, %v5881_v36  ;;  %v5882_v21 = vld [vmem:[#allocation4 + $0x18] sm:$0xff]  }
 0x1ce   : > { %v1504_v44 = vpop.permute.xlu1 %1503 }
 0x1cf   : > { %v1567_v23 = vpop.permute.xlu0 %1566  ;;  %1549 = vst.msk [vmem:[#allocation4 + $0x8c] sm:$0xf] %vm678_vm0, %v1504_v44 }
 0x1d0   : > { %1613 = vst.msk [vmem:[#allocation4 + $0xc8] sm:$0xf] %vm678_vm0, %v1567_v23  ;;  %1462 = vrot.lane.b32.xlu1 %v6883_v37, %s6461_s13 }
 0x1d1   : > { %1456 = vrot.lane.b32.xlu0 %v6870_v26, %s6461_s13 }
 0x1d2   : > { %v1569_v33 = vpop.permute.xlu1 %1568 }
 0x1d3   : > { %v1433_v46 = vpop.permute.xlu0 %1432  ;;  %1614 = vst.msk [vmem:[#allocation4 + $0xcc] sm:$0xf] %vm678_vm0, %v1569_v33 }
 0x1d4   : > { %1481 = vst.msk [vmem:[#allocation4 + $0x40] sm:$0xf] %vm678_vm0, %v1433_v46  ;;  %1527 = vrot.lane.b32.xlu1 %v6883_v37, %s6462_s14  ;;  %5421 = vmatmul.mubr.msk.bf16.gmra.mxu0 %vm1899_vm1, %v5882_v21 }
 0x1d5   : > { %1521 = vrot.lane.b32.xlu0 %v6870_v26, %s6462_s14  ;;  %5424 = vmatprep.mubr.msk.bf16.mxu0 %vm1899_vm1, %v5883_v50 }
 0x1d6   : > { %v1435_v57 = vpop.permute.xlu1 %1434 }
 0x1d7   : > { %v1498_v54 = vpop.permute.xlu0 %1497  ;;  %1482 = vst.msk [vmem:[#allocation4 + $0x44] sm:$0xf] %vm678_vm0, %v1435_v57 }
 0x1d8   : > { %1546 = vst.msk [vmem:[#allocation4 + $0x80] sm:$0xf] %vm678_vm0, %v1498_v54  ;;  %1592 = vrot.lane.b32.xlu1 %v6883_v37, %s6463_s30 }
 0x1d9   : > { %1586 = vrot.lane.b32.xlu0 %v6870_v26, %s6463_s30 }
 0x1da   : > { %v1500_v27 = vpop.permute.xlu1 %1499 }
 0x1db   : > { %v1563_v35 = vpop.permute.xlu0 %1562  ;;  %1547 = vst.msk [vmem:[#allocation4 + $0x84] sm:$0xf] %vm678_vm0, %v1500_v27 }
 0x1dc   : > { %1611 = vst.msk [vmem:[#allocation4 + $0xc0] sm:$0xf] %vm678_vm0, %v1563_v35  ;;  %1458 = vrot.lane.b32.xlu1 %v6894_v42, %s6461_s13  ;;  %5425 = vmatmul.mubr.msk.bf16.gmra.mxu0 %vm1899_vm1, %v5884_v62 }
 0x1dd   : > { %846 = vrot.lane.b32.xlu0 %v6887_v38, %s6461_s13  ;;  %5428 = vmatprep.mubr.msk.bf16.mxu0 %vm1899_vm1, %v5885_v39 }
 0x1de   : > { %v1565_v37 = vpop.permute.xlu1 %1564  ;;  %v5886_v26 = vld [vmem:[#allocation4 + $0x40] sm:$0xff]  }
 0x1df   : > { %v772_v31 = vpop.permute.xlu0 %771  ;;  %1612 = vst.msk [vmem:[#allocation4 + $0xc4] sm:$0xf] %vm678_vm0, %v1565_v37  ;;  %5448 = vmatprep.mubr.msk.bf16.mxu1 %vm1899_vm1, %v5886_v26 }
 0x1e0   : > { %818 = vst.msk [vmem:[#allocation2 + $0x48] sm:$0xf] %vm678_vm0, %v772_v31  ;;  %1523 = vrot.lane.b32.xlu1 %v6894_v42, %s6462_s14 }
 0x1e1   : > { %783 = vrot.lane.b32.xlu0 %v6900_v55, %s6461_s13 }
 0x1e2   : > { %v837_v2 = vpop.permute.xlu1 %836  ;;  %v5888_v43 = vld [vmem:[#allocation4 + $0x80] sm:$0xff]  }
 0x1e3   : > { %v1445_v56 = vpop.permute.xlu0 %1444  ;;  %883 = vst.msk [vmem:[#allocation3 + $0x48] sm:$0xf] %vm678_vm0, %v837_v2 }
 0x1e4   : > { %1487 = vst.msk [vmem:[#allocation4 + $0x58] sm:$0xf] %vm678_vm0, %v1445_v56  ;;  %1588 = vrot.lane.b32.xlu1 %v6894_v42, %s6463_s30  ;;  %5429 = vmatmul.mubr.msk.bf16.gmra.mxu0 %vm1899_vm1, %v5887_v3 }
 0x1e5   : > { %913 = vrot.lane.b32.xlu0 %v6900_v55, %s6462_s14  ;;  %5480 = vmatprep.mubr.msk.bf16.mxu0 %vm1899_vm1, %v5888_v43 }
 0x1e6   : > { %v774_v48 = vpop.permute.xlu1 %773 }
 0x1e7   : > { %v902_v8 = vpop.permute.xlu0 %901  ;;  %819 = vst.msk [vmem:[#allocation2 + $0x4c] sm:$0xf] %vm678_vm0, %v774_v48 }
 0x1e8   : > { %948 = vst.msk [vmem:[#allocation2 + $0x88] sm:$0xf] %vm678_vm0, %v902_v8  ;;  %848 = vrot.lane.b32.xlu1 %v6907_v47, %s6461_s13 }
 0x1e9   : > { %1043 = vrot.lane.b32.xlu0 %v6900_v55, %s6463_s30 }
 0x1ea   : > { %v1447_v42 = vpop.permute.xlu1 %1446 }
 0x1eb   : > { %v1032_v1 = vpop.permute.xlu0 %1031  ;;  %1488 = vst.msk [vmem:[#allocation4 + $0x5c] sm:$0xf] %vm678_vm0, %v1447_v42 }
 0x1ec   : > { %1078 = vst.msk [vmem:[#allocation2 + $0xc8] sm:$0xf] %vm678_vm0, %v1032_v1  ;;  %785 = vrot.lane.b32.xlu1 %v6916_v52, %s6461_s13 }
 0x1ed   : > { %850 = vrot.lane.b32.xlu0 %v6921_v61, %s6461_s13 }
 0x1ee   : > { %v904_v53 = vpop.permute.xlu1 %903 }
 0x1ef   : > { %v1510_v18 = vpop.permute.xlu0 %1509  ;;  %949 = vst.msk [vmem:[#allocation2 + $0x8c] sm:$0xf] %vm678_vm0, %v904_v53 }
 0x1f0   : > { %1552 = vst.msk [vmem:[#allocation4 + $0x98] sm:$0xf] %vm678_vm0, %v1510_v18  ;;  %915 = vrot.lane.b32.xlu1 %v6916_v52, %s6462_s14 }
 0x1f1   : > { %787 = vrot.lane.b32.xlu0 %v6930_v63, %s6461_s13 }
 0x1f2   : > { %v1034_v55 = vpop.permute.xlu1 %1033 }
 0x1f3   : > { %v1575_v7 = vpop.permute.xlu0 %1574  ;;  %1079 = vst.msk [vmem:[#allocation2 + $0xcc] sm:$0xf] %vm678_vm0, %v1034_v55 }
 0x1f4   : > { %1617 = vst.msk [vmem:[#allocation4 + $0xd8] sm:$0xf] %vm678_vm0, %v1575_v7  ;;  %1045 = vrot.lane.b32.xlu1 %v6916_v52, %s6463_s30 }
 0x1f5   : > { %917 = vrot.lane.b32.xlu0 %v6930_v63, %s6462_s14 }
 0x1f6   : > { %v1512_v60 = vpop.permute.xlu1 %1511 }
 0x1f7   : > { %v1441_v13 = vpop.permute.xlu0 %1440  ;;  %1553 = vst.msk [vmem:[#allocation4 + $0x9c] sm:$0xf] %vm678_vm0, %v1512_v60 }
 0x1f8   : > { %1485 = vst.msk [vmem:[#allocation4 + $0x50] sm:$0xf] %vm678_vm0, %v1441_v13  ;;  %789 = vrot.lane.b32.xlu1 %v6944_v10, %s6461_s13 }
 0x1f9   : > { %1047 = vrot.lane.b32.xlu0 %v6930_v63, %s6463_s30 }
 0x1fa   : > { %v1577_v14 = vpop.permute.xlu1 %1576 }
 0x1fb   : > { %v1506_v19 = vpop.permute.xlu0 %1505  ;;  %1618 = vst.msk [vmem:[#allocation4 + $0xdc] sm:$0xf] %vm678_vm0, %v1577_v14 }
 0x1fc   : > { %1550 = vst.msk [vmem:[#allocation4 + $0x90] sm:$0xf] %vm678_vm0, %v1506_v19  ;;  %919 = vrot.lane.b32.xlu1 %v6944_v10, %s6462_s14 }
 0x1fd   : > { %852 = vrot.lane.b32.xlu0 %v6935_v4, %s6461_s13 }
 0x1fe   : > { %v1443_v52 = vpop.permute.xlu1 %1442 }
 0x1ff   : > { %v1571_v11 = vpop.permute.xlu0 %1570  ;;  %1486 = vst.msk [vmem:[#allocation4 + $0x54] sm:$0xf] %vm678_vm0, %v1443_v52 }
 0x200   : > { %1615 = vst.msk [vmem:[#allocation4 + $0xd0] sm:$0xf] %vm678_vm0, %v1571_v11  ;;  %1049 = vrot.lane.b32.xlu1 %v6944_v10, %s6463_s30 }
 0x201   : > { %921 = vrot.lane.b32.xlu0 %v6958_v20, %s6462_s14 }
 0x202   : > { %v1508_v63 = vpop.permute.xlu1 %1507 }
 0x203   : > { %v776_v0 = vpop.permute.xlu0 %775  ;;  %1551 = vst.msk [vmem:[#allocation4 + $0x94] sm:$0xf] %vm678_vm0, %v1508_v63 }
 0x204   : > { %820 = vst.msk [vmem:[#allocation2 + $0x50] sm:$0xf] %vm678_vm0, %v776_v0  ;;  %854 = vrot.lane.b32.xlu1 %v6949_v15, %s6461_s13 }
 0x205   : > { %1051 = vrot.lane.b32.xlu0 %v6958_v20, %s6463_s30 }
 0x206   : > { %v1573_v22 = vpop.permute.xlu1 %1572 }
 0x207   : > { %v906_v25 = vpop.permute.xlu0 %905  ;;  %1616 = vst.msk [vmem:[#allocation4 + $0xd4] sm:$0xf] %vm678_vm0, %v1573_v22 }
 0x208   : > { %950 = vst.msk [vmem:[#allocation2 + $0x90] sm:$0xf] %vm678_vm0, %v906_v25  ;;  %791 = vrot.lane.b32.xlu1 %v6958_v20, %s6461_s13 }
 0x209   : > { %795 = vrot.lane.b32.xlu0 %v6986_v45, %s6461_s13 }
 0x20a   : > { %v841_v10 = vpop.permute.xlu1 %840 }
 0x20b   : > { %v1036_v30 = vpop.permute.xlu0 %1035  ;;  %885 = vst.msk [vmem:[#allocation3 + $0x50] sm:$0xf] %vm678_vm0, %v841_v10 }
 0x20c   : > { %1080 = vst.msk [vmem:[#allocation2 + $0xd0] sm:$0xf] %vm678_vm0, %v1036_v30  ;;  %856 = vrot.lane.b32.xlu1 %v6963_v28, %s6461_s13 }
 0x20d   : > { %925 = vrot.lane.b32.xlu0 %v6986_v45, %s6462_s14 }
 0x20e   : > { %v778_v16 = vpop.permute.xlu1 %777 }
 0x20f   : > { %v1453_v32 = vpop.permute.xlu0 %1452  ;;  %821 = vst.msk [vmem:[#allocation2 + $0x54] sm:$0xf] %vm678_vm0, %v778_v16 }
 0x210   : > { %1491 = vst.msk [vmem:[#allocation4 + $0x68] sm:$0xf] %vm678_vm0, %v1453_v32  ;;  %793 = vrot.lane.b32.xlu1 %v6972_v34, %s6461_s13 }
 0x211   : > { %1055 = vrot.lane.b32.xlu0 %v6986_v45, %s6463_s30 }
 0x212   : > { %v908_v20 = vpop.permute.xlu1 %907 }
 0x213   : > { %v1518_v12 = vpop.permute.xlu0 %1517  ;;  %951 = vst.msk [vmem:[#allocation2 + $0x94] sm:$0xf] %vm678_vm0, %v908_v20 }
 0x214   : > { %1556 = vst.msk [vmem:[#allocation4 + $0xa8] sm:$0xf] %vm678_vm0, %v1518_v12  ;;  %923 = vrot.lane.b32.xlu1 %v6972_v34, %s6462_s14 }
 0x215   : > { %797 = vrot.lane.b32.xlu0 %v7000_v59, %s6461_s13 }
 0x216   : > { %v1038_v36 = vpop.permute.xlu1 %1037 }
 0x217   : > { %v1583_v44 = vpop.permute.xlu0 %1582  ;;  %1081 = vst.msk [vmem:[#allocation2 + $0xd4] sm:$0xf] %vm678_vm0, %v1038_v36 }
 0x218   : > { %1621 = vst.msk [vmem:[#allocation4 + $0xe8] sm:$0xf] %vm678_vm0, %v1583_v44  ;;  %1053 = vrot.lane.b32.xlu1 %v6972_v34, %s6463_s30 }
 0x219   : > { %862 = vrot.lane.b32.xlu0 %v7024_v6, %s6461_s13 }
 0x21a   : > { %v1455_v45 = vpop.permute.xlu1 %1454 }
 0x21b   : > { %v1449_v23 = vpop.permute.xlu0 %1448  ;;  %1492 = vst.msk [vmem:[#allocation4 + $0x6c] sm:$0xf] %vm678_vm0, %v1455_v45 }
 0x21c   : > { %1489 = vst.msk [vmem:[#allocation4 + $0x60] sm:$0xf] %vm678_vm0, %v1449_v23  ;;  %858 = vrot.lane.b32.xlu1 %v6977_v40, %s6461_s13 }
 0x21d   : > { %838 = vrot.lane.b32.xlu0 %v6790_v41, %s6461_s13 }
 0x21e   : > { %v1520_v33 = vpop.permute.xlu1 %1519 }
 0x21f   : > { %v1514_v46 = vpop.permute.xlu0 %1513  ;;  %1557 = vst.msk [vmem:[#allocation4 + $0xac] sm:$0xf] %vm678_vm0, %v1520_v33 }
 0x220   : > { %1554 = vst.msk [vmem:[#allocation4 + $0xa0] sm:$0xf] %vm678_vm0, %v1514_v46  ;;  %860 = vrot.lane.b32.xlu1 %v6991_v51, %s6461_s13 }
 0x221   : > { %834 = vrot.lane.b32.xlu0 %v6744_v17, %s6461_s13 }
 0x222   : > { %v1585_v34 = vpop.permute.xlu1 %1584 }
 0x223   : > { %v1579_v21 = vpop.permute.xlu0 %1578  ;;  %1622 = vst.msk [vmem:[#allocation4 + $0xec] sm:$0xf] %vm678_vm0, %v1585_v34 }
 0x224   : > { %1619 = vst.msk [vmem:[#allocation4 + $0xe0] sm:$0xf] %vm678_vm0, %v1579_v21  ;;  %927 = vrot.lane.b32.xlu1 %v7000_v59, %s6462_s14  ;;  %v7318_v21 = vand.u32 127, %v403_v49 }
 0x225   : > { %992 = vrot.lane.b32.xlu0 %v7024_v6, %s6462_s14 }
 0x226   : > { %v1451_v50 = vpop.permute.xlu1 %1450  ;;  %vm2722_vm2 = vcmp.lt.s32.totalorder %v7318_v21, 30 }
 0x227   : > { %v843_v57 = vpop.permute.xlu0 %842  ;;  %1490 = vst.msk [vmem:[#allocation4 + $0x64] sm:$0xf] %vm678_vm0, %v1451_v50 }
 0x228   : > { %886 = vst.msk [vmem:[#allocation3 + $0x54] sm:$0xf] %vm678_vm0, %v843_v57  ;;  %1057 = vrot.lane.b32.xlu1 %v7000_v59, %s6463_s30 }
 0x229   : > { %986 = vrot.lane.b32.xlu0 %v6963_v28, %s6462_s14 }
 0x22a   : > { %v1516_v54 = vpop.permute.xlu1 %1515 }
 0x22b   : > { %v780_v27 = vpop.permute.xlu0 %779  ;;  %1555 = vst.msk [vmem:[#allocation4 + $0xa4] sm:$0xf] %vm678_vm0, %v1516_v54 }
 0x22c   : > { %822 = vst.msk [vmem:[#allocation2 + $0x58] sm:$0xf] %vm678_vm0, %v780_v27  ;;  %832 = vrot.lane.b32.xlu1 %v6722_v5, %s6461_s13 }
 0x22d   : > { %1118 = vrot.lane.b32.xlu0 %v6977_v40, %s6463_s30 }
 0x22e   : > { %v1581_v35 = vpop.permute.xlu1 %1580 }
 0x22f   : > { %v910_v62 = vpop.permute.xlu0 %909  ;;  %1620 = vst.msk [vmem:[#allocation4 + $0xe4] sm:$0xf] %vm678_vm0, %v1581_v35 }
 0x230   : > { %952 = vst.msk [vmem:[#allocation2 + $0x98] sm:$0xf] %vm678_vm0, %v910_v62  ;;  %990 = vrot.lane.b32.xlu1 %v6991_v51, %s6462_s14 }
 0x232   : > { %v845_v59 = vpop.permute.xlu1 %844 }
 0x233   : > { %v1040_v39 = vpop.permute.xlu0 %1039  ;;  %887 = vst.msk [vmem:[#allocation3 + $0x58] sm:$0xf] %vm678_vm0, %v845_v59 }
 0x234   : > { %1082 = vst.msk [vmem:[#allocation2 + $0xd8] sm:$0xf] %vm678_vm0, %v1040_v39  ;;  %1120 = vrot.lane.b32.xlu1 %v6991_v51, %s6463_s30 }
 0x236   : > { %v782_v37 = vpop.permute.xlu1 %781 }
 0x237   : > { %v1461_v31 = vpop.permute.xlu0 %1460  ;;  %823 = vst.msk [vmem:[#allocation2 + $0x5c] sm:$0xf] %vm678_vm0, %v782_v37 }
 0x238   : > { %1495 = vst.msk [vmem:[#allocation4 + $0x78] sm:$0xf] %vm678_vm0, %v1461_v31  ;;  %1122 = vrot.lane.b32.xlu1 %v7024_v6, %s6463_s30 }
 0x23a   : > { %v912_v26 = vpop.permute.xlu1 %911 }
 0x23b   : > { %v1526_v2 = vpop.permute.xlu0 %1525  ;;  %953 = vst.msk [vmem:[#allocation2 + $0x9c] sm:$0xf] %vm678_vm0, %v912_v26 }
 0x23c   : > { %1560 = vst.msk [vmem:[#allocation4 + $0xb8] sm:$0xf] %vm678_vm0, %v1526_v2  ;;  %988 = vrot.lane.b32.xlu1 %v6977_v40, %s6462_s14 }
 0x23e   : > { %v1042_v56 = vpop.permute.xlu1 %1041 }
 0x23f   : > { %v1591_v51 = vpop.permute.xlu0 %1590  ;;  %1083 = vst.msk [vmem:[#allocation2 + $0xdc] sm:$0xf] %vm678_vm0, %v1042_v56 }
 0x240   : > { %1625 = vst.msk [vmem:[#allocation4 + $0xf8] sm:$0xf] %vm678_vm0, %v1591_v51  ;;  %1116 = vrot.lane.b32.xlu1 %v6963_v28, %s6463_s30 }
 0x242   : > { %v1463_v3 = vpop.permute.xlu1 %1462 }
 0x243   : > { %v1457_v6 = vpop.permute.xlu0 %1456  ;;  %1496 = vst.msk [vmem:[#allocation4 + $0x7c] sm:$0xf] %vm678_vm0, %v1463_v3 }
 0x244   : > { %1493 = vst.msk [vmem:[#allocation4 + $0x70] sm:$0xf] %vm678_vm0, %v1457_v6 }
 0x246   : > { %v1528_v43 = vpop.permute.xlu1 %1527 }
 0x247   : > { %v1522_v48 = vpop.permute.xlu0 %1521  ;;  %1561 = vst.msk [vmem:[#allocation4 + $0xbc] sm:$0xf] %vm678_vm0, %v1528_v43 }
 0x248   : > { %1558 = vst.msk [vmem:[#allocation4 + $0xb0] sm:$0xf] %vm678_vm0, %v1522_v48 }
 0x24a   : > { %v1593_v40 = vpop.permute.xlu1 %1592 }
 0x24b   : > { %v1587_v8 = vpop.permute.xlu0 %1586  ;;  %1626 = vst.msk [vmem:[#allocation4 + $0xfc] sm:$0xf] %vm678_vm0, %v1593_v40 }
 0x24c   : > { %1623 = vst.msk [vmem:[#allocation4 + $0xf0] sm:$0xf] %vm678_vm0, %v1587_v8 }
 0x24e   : > { %v1459_v42 = vpop.permute.xlu1 %1458 }
 0x24f   : > { %v847_v28 = vpop.permute.xlu0 %846  ;;  %1494 = vst.msk [vmem:[#allocation4 + $0x74] sm:$0xf] %vm678_vm0, %v1459_v42 }
 0x250   : > { %888 = vst.msk [vmem:[#allocation3 + $0x5c] sm:$0xf] %vm678_vm0, %v847_v28 }
 0x252   : > { %v1524_v1 = vpop.permute.xlu1 %1523 }
 0x253   : > { %v784_v53 = vpop.permute.xlu0 %783  ;;  %1559 = vst.msk [vmem:[#allocation4 + $0xb4] sm:$0xf] %vm678_vm0, %v1524_v1 }
 0x254   : > { %824 = vst.msk [vmem:[#allocation2 + $0x60] sm:$0xf] %vm678_vm0, %v784_v53 }
 0x256   : > { %v1589_v18 = vpop.permute.xlu1 %1588 }
 0x257   : > { %v914_v55 = vpop.permute.xlu0 %913  ;;  %1624 = vst.msk [vmem:[#allocation4 + $0xf4] sm:$0xf] %vm678_vm0, %v1589_v18 }
 0x258   : > { %954 = vst.msk [vmem:[#allocation2 + $0xa0] sm:$0xf] %vm678_vm0, %v914_v55 }
 0x25a   : > { %v849_v7 = vpop.permute.xlu1 %848 }
 0x25b   : > { %v1044_v60 = vpop.permute.xlu0 %1043  ;;  %889 = vst.msk [vmem:[#allocation3 + $0x60] sm:$0xf] %vm678_vm0, %v849_v7 }
 0x25c   : > { %1084 = vst.msk [vmem:[#allocation2 + $0xe0] sm:$0xf] %vm678_vm0, %v1044_v60 }
 0x25e   : > { %v786_v13 = vpop.permute.xlu1 %785 }
 0x25f   : > { %v851_v14 = vpop.permute.xlu0 %850  ;;  %825 = vst.msk [vmem:[#allocation2 + $0x64] sm:$0xf] %vm678_vm0, %v786_v13 }
 0x260   : > { %890 = vst.msk [vmem:[#allocation3 + $0x64] sm:$0xf] %vm678_vm0, %v851_v14 }
 0x262   : > { %v916_v19 = vpop.permute.xlu1 %915 }
 0x263   : > { %v788_v52 = vpop.permute.xlu0 %787  ;;  %955 = vst.msk [vmem:[#allocation2 + $0xa4] sm:$0xf] %vm678_vm0, %v916_v19 }
 0x264   : > { %826 = vst.msk [vmem:[#allocation2 + $0x68] sm:$0xf] %vm678_vm0, %v788_v52 }
 0x266   : > { %v1046_v11 = vpop.permute.xlu1 %1045 }
 0x267   : > { %v918_v63 = vpop.permute.xlu0 %917  ;;  %1085 = vst.msk [vmem:[#allocation2 + $0xe4] sm:$0xf] %vm678_vm0, %v1046_v11 }
 0x268   : > { %956 = vst.msk [vmem:[#allocation2 + $0xa8] sm:$0xf] %vm678_vm0, %v918_v63 }
 0x26a   : > { %v790_v0 = vpop.permute.xlu1 %789 }
 0x26b   : > { %v1048_v22 = vpop.permute.xlu0 %1047  ;;  %827 = vst.msk [vmem:[#allocation2 + $0x6c] sm:$0xf] %vm678_vm0, %v790_v0 }
 0x26c   : > { %1086 = vst.msk [vmem:[#allocation2 + $0xe8] sm:$0xf] %vm678_vm0, %v1048_v22 }
 0x26e   : > { %v920_v25 = vpop.permute.xlu1 %919 }
 0x26f   : > { %v853_v10 = vpop.permute.xlu0 %852  ;;  %957 = vst.msk [vmem:[#allocation2 + $0xac] sm:$0xf] %vm678_vm0, %v920_v25 }
 0x270   : > { %891 = vst.msk [vmem:[#allocation3 + $0x68] sm:$0xf] %vm678_vm0, %v853_v10  ;;  %v5893_v10 = vld [vmem:[#allocation2 + $0x60] sm:$0xff]  }
 0x272   : > { %v1050_v30 = vpop.permute.xlu1 %1049  ;;  %v5891_v1 = vld [vmem:[#allocation2 + $0x68] sm:$0xff]  }
 0x273   : > { %v922_v16 = vpop.permute.xlu0 %921  ;;  %1087 = vst.msk [vmem:[#allocation2 + $0xec] sm:$0xf] %vm678_vm0, %v1050_v30  ;;  %v2165_v22 = vsel %vm1899_vm1, %v5891_v1, 0 }
 0x274   : > { %958 = vst.msk [vmem:[#allocation2 + $0xb0] sm:$0xf] %vm678_vm0, %v922_v16 }
 0x276   : > { %v855_v32 = vpop.permute.xlu1 %854 }
 0x277   : > { %v1052_v20 = vpop.permute.xlu0 %1051  ;;  %892 = vst.msk [vmem:[#allocation3 + $0x6c] sm:$0xf] %vm678_vm0, %v855_v32 }
 0x278   : > { %1088 = vst.msk [vmem:[#allocation2 + $0xf0] sm:$0xf] %vm678_vm0, %v1052_v20 }
 0x27a   : > { %v792_v12 = vpop.permute.xlu1 %791 }
 0x27b   : > { %v796_v36 = vpop.permute.xlu0 %795  ;;  %828 = vst.msk [vmem:[#allocation2 + $0x70] sm:$0xf] %vm678_vm0, %v792_v12 }
 0x27c   : > { %830 = vst.msk [vmem:[#allocation2 + $0x78] sm:$0xf] %vm678_vm0, %v796_v36 }
 0x27e   : > { %v857_v44 = vpop.permute.xlu1 %856 }
 0x27f   : > { %v926_v45 = vpop.permute.xlu0 %925  ;;  %893 = vst.msk [vmem:[#allocation3 + $0x70] sm:$0xf] %vm678_vm0, %v857_v44 }
 0x280   : > { %960 = vst.msk [vmem:[#allocation2 + $0xb8] sm:$0xf] %vm678_vm0, %v926_v45 }
 0x282   : > { %v794_v23 = vpop.permute.xlu1 %793 }
 0x283   : > { %v1056_v33 = vpop.permute.xlu0 %1055  ;;  %829 = vst.msk [vmem:[#allocation2 + $0x74] sm:$0xf] %vm678_vm0, %v794_v23 }
 0x284   : > { %1090 = vst.msk [vmem:[#allocation2 + $0xf8] sm:$0xf] %vm678_vm0, %v1056_v33 }
 0x286   : > { %v924_v46 = vpop.permute.xlu1 %923 }
 0x287   : > { %v798_v34 = vpop.permute.xlu0 %797  ;;  %959 = vst.msk [vmem:[#allocation2 + $0xb4] sm:$0xf] %vm678_vm0, %v924_v46 }
 0x288   : > { %831 = vst.msk [vmem:[#allocation2 + $0x7c] sm:$0xf] %vm678_vm0, %v798_v34  ;;  %v2162_v34 = vsel %vm1899_vm1, %v5893_v10, 0 }
 0x28a   : > { %v1054_v50 = vpop.permute.xlu1 %1053  ;;  %v5890_v37 = vld [vmem:[#allocation2 + $0x70] sm:$0xff]  }
 0x28b   : > { %v863_v57 = vpop.permute.xlu0 %862  ;;  %1089 = vst.msk [vmem:[#allocation2 + $0xf4] sm:$0xf] %vm678_vm0, %v1054_v50  ;;  %v2168_v28 = vsel %vm1899_vm1, %v5890_v37, 0 }
 0x28c   : > { %896 = vst.msk [vmem:[#allocation3 + $0x7c] sm:$0xf] %vm678_vm0, %v863_v57  ;;  %v5418_v54 = vpop.f32.mrf.mxu0  ;;  %v5895_v57 = vld [vmem:[#allocation2 + $0x58] sm:$0xff]  }
 0x28d   : > { %v7327_v62 = vsel %vm2722_vm2, %v5418_v54, -1e+30 }
 0x28e   : > { %v859_v27 = vpop.permute.xlu1 %858  ;;  %2793 = vmax.xlane.f32.xlu0 %v7327_v62  ;;  %v1982_v59 = vpop.f32.mrf.mxu0  ;;  %v5894_v32 = vld [vmem:[#allocation2 + $0xb0] sm:$0xff]  }
 0x28f   : > { %v839_v35 = vpop.permute.xlu0 %838  ;;  %v5889_v49 = vld [vmem:[#allocation2 + $0x78] sm:$0xff]   ;;  %894 = vst.msk [vmem:[#allocation3 + $0x74] sm:$0xf] %vm678_vm0, %v859_v27  ;;  %v7336_v26 = vsel %vm2722_vm2, %v1982_v59, -1e+30  ;;  %v2393_v50 = vsel %vm1899_vm1, %v5894_v32, 0 }
 0x290   : > { %884 = vst.msk [vmem:[#allocation3 + $0x4c] sm:$0xf] %vm678_vm0, %v839_v35  ;;  %5712 = vmatprep.subr.msk.bf16.mxu1 %vm1899_vm1, %v5889_v49  ;;  %v2171_v39 = vsel %vm1899_vm1, %v5889_v49, 0  ;;  %v5419_v31 = vpop.f32.mrf.mxu0  ;;  %v5896_v35 = vld [vmem:[#allocation2 + $0xa8] sm:$0xff]  }
 0x291   : > { %5433 = vmatpush3.bf16.xpose.msra.mxu1 %v2171_v39  ;;  %v7349_v43 = vsel %vm2722_vm2, %v5419_v31, -1e+30 }
 0x292   : > { %v861_v2 = vpop.permute.xlu1 %860  ;;  %5713 = vmatprep.subr.msk.bf16.mxu1 %vm1899_vm1, %v5890_v37  ;;  %2789 = vmax.xlane.f32.xlu0 %v7336_v26  ;;  %v1985_v51 = vpop.f32.mrf.mxu0 }
 0x293   : > { %v835_v56 = vpop.permute.xlu0 %834  ;;  %895 = vst.msk [vmem:[#allocation3 + $0x78] sm:$0xf] %vm678_vm0, %v861_v2  ;;  %v7344_v3 = vsel %vm2722_vm2, %v1985_v51, -1e+30  ;;  %v2390_v51 = vsel %vm1899_vm1, %v5896_v35, 0 }
 0x294   : > { %882 = vst.msk [vmem:[#allocation3 + $0x44] sm:$0xf] %vm678_vm0, %v835_v56  ;;  %2791 = vmax.xlane.f32.xlu1 %v7344_v3  ;;  %v5422_v6 = vpop.f32.mrf.mxu0  ;;  %v2159_v56 = vsel %vm1899_vm1, %v5895_v57, 0 }
 0x295   : > { %v7356_v42 = vsel %vm2722_vm2, %v5422_v6, -1e+30  ;;  %v5897_v6 = vld [vmem:[#allocation2 + $0x50] sm:$0xff]  }
 0x296   : > { %v928_v48 = vpop.permute.xlu1 %927  ;;  %2795 = vmax.xlane.f32.xlu0 %v7349_v43  ;;  %v1998_v8 = vpop.f32.mrf.mxu0 }
 0x297   : > { %v993_v40 = vpop.permute.xlu0 %992  ;;  %961 = vst.msk [vmem:[#allocation2 + $0xbc] sm:$0xf] %vm678_vm0, %v928_v48  ;;  %v7370_v13 = vsel %vm2722_vm2, %v1998_v8, -1e+30  ;;  %v5898_v48 = vld [vmem:[#allocation2 + $0xa0] sm:$0xff]   ;;  %v2156_v8 = vsel %vm1899_vm1, %v5897_v6, 0 }
 0x298   : > { %1026 = vst.msk [vmem:[#allocation3 + $0xbc] sm:$0xf] %vm678_vm0, %v993_v40  ;;  %2801 = vmax.xlane.f32.xlu1 %v7356_v42  ;;  %v5423_v53 = vpop.f32.mrf.mxu0 }
 0x299   : > { %5435 = vmatpush3.bf16.xpose.msra.mxu1 %v2168_v28  ;;  %v7362_v7 = vsel %vm2722_vm2, %v5423_v53, -1e+30  ;;  %v2387_v28 = vsel %vm1899_vm1, %v5898_v48, 0  ;;  %v5900_v53 = vld [vmem:[#allocation2 + $0x98] sm:$0xff]  }
 0x29a   : > { %v1058_v18 = vpop.permute.xlu1 %1057  ;;  %5714 = vmatprep.subr.msk.bf16.mxu1 %vm1899_vm1, %v5891_v1  ;;  %2803 = vmax.xlane.f32.xlu0 %v7362_v7  ;;  %v2001_v60 = vpop.f32.mrf.mxu0  ;;  %v5899_v1 = vld [vmem:[#allocation2 + $0x48] sm:$0xff]  }
 0x29b   : > { %v987_v55 = vpop.permute.xlu0 %986  ;;  %1091 = vst.msk [vmem:[#allocation2 + $0xfc] sm:$0xf] %vm678_vm0, %v1058_v18  ;;  %v7375_v19 = vsel %vm2722_vm2, %v2001_v60, -1e+30  ;;  %v2153_v18 = vsel %vm1899_vm1, %v5899_v1, 0  ;;  %v5901_v60 = vld [vmem:[#allocation2 + $0x40] sm:$0xff]  }
 0x29c   : > { %1023 = vst.msk [vmem:[#allocation3 + $0xb0] sm:$0xf] %vm678_vm0, %v987_v55  ;;  %2797 = vmax.xlane.f32.xlu1 %v7370_v13  ;;  %v5426_v14 = vpop.f32.mrf.mxu0  ;;  %v2384_v55 = vsel %vm1899_vm1, %v5900_v53, 0 }
 0x29d   : > { %v7385_v30 = vsel %vm2722_vm2, %v5426_v14, -1e+30  ;;  %v5902_v14 = vld [vmem:[#allocation2 + $0x90] sm:$0xff]  }
 0x29e   : > { %v833_v52 = vpop.permute.xlu1 %832  ;;  %v5892_v63 = vld [vmem:[#allocation2 + $0xb8] sm:$0xff]   ;;  %2799 = vmax.xlane.f32.xlu0 %v7375_v19  ;;  %v2014_v0 = vpop.f32.mrf.mxu0 }
 0x29f   : > { %v1119_v11 = vpop.permute.xlu0 %1118  ;;  %881 = vst.msk [vmem:[#allocation3 + $0x40] sm:$0xf] %vm678_vm0, %v833_v52  ;;  %5720 = vmatprep.subr.msk.bf16.mxu0 %vm1899_vm1, %v5892_v63  ;;  %v2396_v25 = vsel %vm1899_vm1, %v5892_v63, 0  ;;  %v7398_v44 = vsel %vm2722_vm2, %v2014_v0, -1e+30  ;;  %v2150_v52 = vsel %vm1899_vm1, %v5901_v60, 0 }
 0x2a0   : > { %1154 = vst.msk [vmem:[#allocation3 + $0xf4] sm:$0xf] %vm678_vm0, %v1119_v11  ;;  %5465 = vmatpush3.bf16.xpose.msra.mxu0 %v2396_v25  ;;  %v5427_v16 = vpop.f32.mrf.mxu0  ;;  %2809 = vmax.xlane.f32.xlu1 %v7385_v30  ;;  %v2381_v11 = vsel %vm1899_vm1, %v5902_v14, 0  ;;  %v5903_v63 = vld [vmem:[#allocation2 + $0x88] sm:$0xff]   ;;  %v5906_v25 = vld [vmem:[#allocation4 + $0x50] sm:$0xff]  }
 0x2a1   : > { %5437 = vmatpush3.bf16.xpose.msra.mxu1 %v2165_v22  ;;  %v7390_v12 = vsel %vm2722_vm2, %v5427_v16, -1e+30  ;;  %5721 = vmatprep.subr.msk.bf16.mxu0 %vm1899_vm1, %v5894_v32  ;;  %v5905_v22 = vld [vmem:[#allocation4 + $0x48] sm:$0xff]   ;;  %v5907_v16 = vld [vmem:[#allocation2 + $0x80] sm:$0xff]  }
 0x2a2   : > { %v991_v20 = vpop.permute.xlu1 %990  ;;  %5715 = vmatprep.subr.msk.bf16.mxu1 %vm1899_vm1, %v5893_v10  ;;  %2811 = vmax.xlane.f32.xlu0 %v7390_v12  ;;  %v2017_v36 = vpop.f32.mrf.mxu0  ;;  %v5904_v0 = vld [vmem:[#allocation2 + $0xf8] sm:$0xff]   ;;  %v2378_v10 = vsel %vm1899_vm1, %v5903_v63, 0 }
 0x2a3   : > { %1025 = vst.msk [vmem:[#allocation3 + $0xb8] sm:$0xf] %vm678_vm0, %v991_v20  ;;  %v7402_v23 = vsel %vm2722_vm2, %v2017_v36, -1e+30  ;;  %v2621_v32 = vsel %vm1899_vm1, %v5904_v0, 0  ;;  %v5908_v20 = vld [vmem:[#allocation2 + $0xf0] sm:$0xff]  }
 0x2a4   : > { %v5430_v45 = vpop.f32.mrf.mxu0  ;;  %2805 = vmax.xlane.f32.xlu1 %v7398_v44  ;;  %v5909_v36 = vld [vmem:[#allocation4 + $0x58] sm:$0xff]  }
 0x2a5   : > { %v7411_v54 = vsel %vm2722_vm2, %v5430_v45, -1e+30  ;;  %v5910_v45 = vld [vmem:[#allocation4 + $0x60] sm:$0xff]  }
 0x2a6   : > { %v1121_v33 = vpop.permute.xlu1 %1120  ;;  %2807 = vmax.xlane.f32.xlu0 %v7402_v23  ;;  %v2030_v46 = vpop.f32.mrf.mxu0 }
 0x2a7   : > { %1155 = vst.msk [vmem:[#allocation3 + $0xf8] sm:$0xf] %vm678_vm0, %v1121_v33  ;;  %v7424_v37 = vsel %vm2722_vm2, %v2030_v46, -1e+30  ;;  %v2375_v33 = vsel %vm1899_vm1, %v5907_v16, 0  ;;  %v5912_v46 = vld [vmem:[#allocation3 + $0x38] sm:$0xff]  }
 0x2a8   : > { %5467 = vmatpush3.bf16.xpose.msra.mxu0 %v2393_v50  ;;  %v5431_v27 = vpop.f32.mrf.mxu0  ;;  %2817 = vmax.xlane.f32.xlu1 %v7411_v54  ;;  %v5911_v50 = vld [vmem:[#allocation2 + $0xe8] sm:$0xff]  }
 0x2a9   : > { %5439 = vmatpush3.bf16.xpose.msra.mxu1 %v2162_v34  ;;  %v7416_v59 = vsel %vm2722_vm2, %v5431_v27, -1e+30  ;;  %5722 = vmatprep.subr.msk.bf16.mxu0 %vm1899_vm1, %v5896_v35  ;;  %v2618_v34 = vsel %vm1899_vm1, %v5908_v20, 0  ;;  %v5914_v27 = vld [vmem:[#allocation4 + $0x88] sm:$0xff]   ;;  %v5915_v35 = vld [vmem:[#allocation4 + $0x70] sm:$0xff]  }
 0x2aa   : > { %v1123_v49 = vpop.permute.xlu1 %1122  ;;  %5716 = vmatprep.subr.msk.bf16.mxu1 %vm1899_vm1, %v5895_v57  ;;  %2819 = vmax.xlane.f32.xlu0 %v7416_v59  ;;  %v2033_v39 = vpop.f32.mrf.mxu0  ;;  %v5913_v57 = vld [vmem:[#allocation4 + $0x68] sm:$0xff]  }
 0x2ab   : > { %1156 = vst.msk [vmem:[#allocation3 + $0xfc] sm:$0xf] %vm678_vm0, %v1123_v49  ;;  %v7428_v31 = vsel %vm2722_vm2, %v2033_v39, -1e+30  ;;  %v5916_v49 = vld [vmem:[#allocation4 + $0x90] sm:$0xff]   ;;  %v2615_v39 = vsel %vm1899_vm1, %v5911_v50, 0 }
 0x2ac   : > { %2813 = vmax.xlane.f32.xlu1 %v7424_v37 }
 0x2ae   : > { %v989_v2 = vpop.permute.xlu1 %988  ;;  %2815 = vmax.xlane.f32.xlu0 %v7428_v31 }
 0x2af   : > { %1024 = vst.msk [vmem:[#allocation3 + $0xb4] sm:$0xf] %vm678_vm0, %v989_v2  ;;  %v5917_v2 = vld [vmem:[#allocation2 + $0xe0] sm:$0xff]  }
 0x2b0   : > { %5469 = vmatpush3.bf16.xpose.msra.mxu0 %v2390_v51  ;;  %v5919_v51 = vld [vmem:[#allocation3 + $0x28] sm:$0xff]  }
 0x2b1   : > { %5441 = vmatpush3.bf16.xpose.msra.mxu1 %v2159_v56  ;;  %5723 = vmatprep.subr.msk.bf16.mxu0 %vm1899_vm1, %v5898_v48  ;;  %v5918_v56 = vld [vmem:[#allocation3 + $0x30] sm:$0xff]   ;;  %v5921_v48 = vld [vmem:[#allocation4 + $0x98] sm:$0xff]  }
 0x2b2   : > { %v1117_v40 = vpop.permute.xlu1 %1116  ;;  %5717 = vmatprep.subr.msk.bf16.mxu1 %vm1899_vm1, %v5897_v6  ;;  %v5920_v6 = vld [vmem:[#allocation4 + $0x78] sm:$0xff]  }
 0x2b3   : > { %1153 = vst.msk [vmem:[#allocation3 + $0xf0] sm:$0xf] %vm678_vm0, %v1117_v40  ;;  %v5922_v40 = vld [vmem:[#allocation4 + $0xa0] sm:$0xff]  }
 0x2b8   : > { %5471 = vmatpush3.bf16.xpose.msra.mxu0 %v2387_v28  ;;  %v2612_v28 = vsel %vm1899_vm1, %v5917_v2, 0 }
 0x2b9   : > { %5443 = vmatpush3.bf16.xpose.msra.mxu1 %v2156_v8  ;;  %5724 = vmatprep.subr.msk.bf16.mxu0 %vm1899_vm1, %v5900_v53  ;;  %v5923_v8 = vld [vmem:[#allocation4 + $0xc0] sm:$0xff]  }
 0x2ba   : > { %5718 = vmatprep.subr.msk.bf16.mxu1 %vm1899_vm1, %v5899_v1  ;;  %v5924_v1 = vld [vmem:[#allocation2 + $0xd8] sm:$0xff]   ;;  %v5925_v53 = vld [vmem:[#allocation3 + $0x20] sm:$0xff]  }
 0x2c0   : > { %5473 = vmatpush3.bf16.xpose.msra.mxu0 %v2384_v55  ;;  %v5927_v55 = vld [vmem:[#allocation4 + $0xa8] sm:$0xff]  }
 0x2c1   : > { %5445 = vmatpush3.bf16.xpose.msra.mxu1 %v2153_v18  ;;  %5725 = vmatprep.subr.msk.bf16.mxu0 %vm1899_vm1, %v5902_v14  ;;  %v5926_v18 = vld [vmem:[#allocation3 + $0x18] sm:$0xff]   ;;  %v2609_v14 = vsel %vm1899_vm1, %v5924_v1, 0 }
 0x2c2   : > { %5719 = vmatprep.subr.msk.bf16.mxu1 %vm1899_vm1, %v5901_v60  ;;  %v5928_v60 = vld [vmem:[#allocation4 + $0xb0] sm:$0xff]  }
 0x2c8   : > { %5475 = vmatpush3.bf16.xpose.msra.mxu0 %v2381_v11  ;;  %v5930_v11 = vld [vmem:[#allocation3 + $0x10] sm:$0xff]  }
 0x2c9   : > { %5447 = vmatpush3.bf16.xpose.msra.mxu1 %v2150_v52  ;;  %5726 = vmatprep.subr.msk.bf16.mxu0 %vm1899_vm1, %v5903_v63  ;;  %v5929_v52 = vld [vmem:[#allocation2 + $0xd0] sm:$0xff]   ;;  %v5931_v63 = vld [vmem:[#allocation3 + $0x8] sm:$0xff]  }
 0x2ca   : > { %5728 = vmatprep.subr.msk.bf16.mxu1 %vm1899_vm1, %v5904_v0  ;;  %v5932_v0 = vld [vmem:[#allocation4 + $0xb8] sm:$0xff]  }
 0x2d0   : > { %5449 = vmatmul.mubr.msk.bf16.vlgmr.msra.gmra.mxu1 %vm1899_vm1, %v5905_v22  ;;  %5477 = vmatpush3.bf16.xpose.msra.mxu0 %v2378_v10  ;;  %v2606_v22 = vsel %vm1899_vm1, %v5929_v52, 0  ;;  %v5934_v10 = vld [vmem:[#allocation3] sm:$0xff]  }
 0x2d1   : > { %5452 = vmatprep.mubr.msk.bf16.mxu1 %vm1899_vm1, %v5906_v25  ;;  %5497 = vmatpush3.bf16.xpose.msra.mxu1 %v2621_v32  ;;  %v5933_v25 = vld [vmem:[#allocation2 + $0xc8] sm:$0xff]  }
 0x2d2   : > { %5727 = vmatprep.subr.msk.bf16.mxu0 %vm1899_vm1, %v5907_v16  ;;  %5729 = vmatprep.subr.msk.bf16.mxu1 %vm1899_vm1, %v5908_v20  ;;  %v7480_v16 = vld [vmem:[#allocation3 + $0xb8] sm:$0xff]   ;;  %v2603_v32 = vsel %vm1899_vm1, %v5933_v25, 0  ;;  %v5936_v20 = vld [vmem:[#allocation2 + $0xc0] sm:$0xff]  }
 0x2d8   : > { %5453 = vmatmul.mubr.msk.bf16.gmra.mxu1 %vm1899_vm1, %v5909_v36  ;;  %5479 = vmatpush3.bf16.xpose.msra.mxu0 %v2375_v33  ;;  %v2600_v36 = vsel %vm1899_vm1, %v5936_v20, 0  ;;  %v5938_v33 = vld [vmem:[#allocation4 + $0xc8] sm:$0xff]  }
 0x2d9   : > { %5456 = vmatprep.mubr.msk.bf16.mxu1 %vm1899_vm1, %v5910_v45  ;;  %5499 = vmatpush3.bf16.xpose.msra.mxu1 %v2618_v34  ;;  %v5937_v45 = vld [vmem:[#allocation3 + $0x78] sm:$0xff]   ;;  %v5940_v34 = vld [vmem:[#allocation3 + $0x70] sm:$0xff]  }
 0x2da   : > { %5528 = vmatprep.subr.bf16.mxu0 %v5912_v46  ;;  %5730 = vmatprep.subr.msk.bf16.mxu1 %vm1899_vm1, %v5911_v50  ;;  %v5941_v50 = vld [vmem:[#allocation3 + $0x68] sm:$0xff]  }
 0x2df   : > { %5481 = vmatmul.mubr.msk.bf16.vlgmr.msra.gmra.mxu0 %vm1899_vm1, %v5914_v27  ;;  %v5943_v27 = vld [vmem:[#allocation4 + $0xe0] sm:$0xff]  }
 0x2e0   : > { %5457 = vmatmul.mubr.msk.bf16.gmra.mxu1 %vm1899_vm1, %v5913_v57  ;;  %5484 = vmatprep.mubr.msk.bf16.mxu0 %vm1899_vm1, %v5916_v49  ;;  %v5942_v57 = vld [vmem:[#allocation4 + $0xd8] sm:$0xff]  }
 0x2e1   : > { %5460 = vmatprep.mubr.msk.bf16.mxu1 %vm1899_vm1, %v5915_v35  ;;  %5501 = vmatpush3.bf16.xpose.msra.mxu1 %v2615_v39  ;;  %v5944_v35 = vld [vmem:[#allocation3 + $0x60] sm:$0xff]   ;;  %v5945_v49 = vld [vmem:[#allocation3 + $0x58] sm:$0xff]   ;;  %v5946_v39 = vld [vmem:[#allocation4 + $0xe8] sm:$0xff]  }
 0x2e2   : > { %5529 = vmatpush3.bf16.msra.mxu0 %v5912_v46  ;;  %5731 = vmatprep.subr.msk.bf16.mxu1 %vm1899_vm1, %v5917_v2  ;;  %v5939_v46 = vld [vmem:[#allocation4 + $0xd0] sm:$0xff]  }
 0x2e3   : > { %5530 = vmatprep.subr.bf16.mxu0 %v5918_v56  ;;  %v5947_v2 = vld [vmem:[#allocation4 + $0xf0] sm:$0xff]  }
 0x2e6   : > { %5531 = vmatpush3.bf16.msra.mxu0 %v5918_v56  ;;  %v5948_v56 = vld [vmem:[#allocation3 + $0x50] sm:$0xff]  }
 0x2e7   : > { %5532 = vmatprep.subr.bf16.mxu0 %v5919_v51  ;;  %5485 = vmatmul.mubr.msk.bf16.gmra.mxu0 %vm1899_vm1, %v5921_v48  ;;  %v5951_v48 = vld [vmem:[#allocation3 + $0x40] sm:$0xff]  }
 0x2e8   : > { %5461 = vmatmul.mubr.msk.bf16.gmra.mxu1 %vm1899_vm1, %v5920_v6  ;;  %5488 = vmatprep.mubr.msk.bf16.mxu0 %vm1899_vm1, %v5922_v40  ;;  %v5950_v6 = vld [vmem:[#allocation4 + $0xf8] sm:$0xff]  }
 0x2e9   : > { %5512 = vmatprep.mubr.msk.bf16.mxu1 %vm1899_vm1, %v5923_v8  ;;  %5503 = vmatpush3.bf16.xpose.msra.mxu1 %v2612_v28  ;;  %v5952_v40 = vld [vmem:[#allocation3 + $0xf8] sm:$0xff]  }
 0x2ea   : > { %5533 = vmatpush3.bf16.msra.mxu0 %v5919_v51  ;;  %5732 = vmatprep.subr.msk.bf16.mxu1 %vm1899_vm1, %v5924_v1  ;;  %v5949_v51 = vld [vmem:[#allocation3 + $0x48] sm:$0xff]  }
 0x2eb   : > { %5534 = vmatprep.subr.bf16.mxu0 %v5925_v53 }
 0x2ee   : > { %5535 = vmatpush3.bf16.msra.mxu0 %v5925_v53 }
 0x2ef   : > { %5536 = vmatprep.subr.bf16.mxu0 %v5926_v18  ;;  %5489 = vmatmul.mubr.msk.bf16.gmra.mxu0 %vm1899_vm1, %v5927_v55 }
 0x2f0   : > { %5492 = vmatprep.mubr.msk.bf16.mxu0 %vm1899_vm1, %v5928_v60 }
 0x2f1   : > { %5505 = vmatpush3.bf16.xpose.msra.mxu1 %v2609_v14 }
 0x2f2   : > { %5537 = vmatpush3.bf16.msra.mxu0 %v5926_v18  ;;  %5733 = vmatprep.subr.msk.bf16.mxu1 %vm1899_vm1, %v5929_v52 }
 0x2f3   : > { %5538 = vmatprep.subr.bf16.mxu0 %v5930_v11 }
 0x2f6   : > { %5539 = vmatpush3.bf16.msra.mxu0 %v5930_v11 }
 0x2f7   : > { %5540 = vmatprep.subr.bf16.mxu0 %v5931_v63  ;;  %5493 = vmatmul.mubr.msk.bf16.gmra.mxu0 %vm1899_vm1, %v5932_v0 }
 0x2f9   : > { %5507 = vmatpush3.bf16.xpose.msra.mxu1 %v2606_v22 }
 0x2fa   : > { %5541 = vmatpush3.bf16.msra.mxu0 %v5931_v63  ;;  %5734 = vmatprep.subr.msk.bf16.mxu1 %vm1899_vm1, %v5933_v25 }
 0x2fb   : > { %5542 = vmatprep.subr.bf16.mxu0 %v5934_v10 }
 0x2fe   : > { %5543 = vmatpush3.bf16.msra.mxu0 %v5934_v10 }
 0x2ff   : > { %5592 = vmatprep.subr.bf16.mxu0 %v7480_v16 }
 0x301   : > { %5509 = vmatpush3.bf16.xpose.msra.mxu1 %v2603_v32 }
 0x302   : > { %5735 = vmatprep.subr.msk.bf16.mxu1 %vm1899_vm1, %v5936_v20 }
 0x309   : > { %5511 = vmatpush3.bf16.xpose.msra.mxu1 %v2600_v36 }
 0x30a   : > { %5560 = vmatprep.subr.bf16.mxu1 %v5937_v45 }
 0x310   : > { %5513 = vmatmul.mubr.msk.bf16.vlgmr.msra.gmra.mxu1 %vm1899_vm1, %v5938_v33 }
 0x311   : > { %5516 = vmatprep.mubr.msk.bf16.mxu1 %vm1899_vm1, %v5939_v46  ;;  %5561 = vmatpush3.bf16.msra.mxu1 %v5937_v45 }
 0x312   : > { %5562 = vmatprep.subr.bf16.mxu1 %v5940_v34 }
 0x315   : > { %5563 = vmatpush3.bf16.msra.mxu1 %v5940_v34 }
 0x316   : > { %5564 = vmatprep.subr.bf16.mxu1 %v5941_v50 }
 0x318   : > { %5517 = vmatmul.mubr.msk.bf16.gmra.mxu1 %vm1899_vm1, %v5942_v57 }
 0x319   : > { %5520 = vmatprep.mubr.msk.bf16.mxu1 %vm1899_vm1, %v5943_v27  ;;  %5565 = vmatpush3.bf16.msra.mxu1 %v5941_v50 }
 0x31a   : > { %5566 = vmatprep.subr.bf16.mxu1 %v5944_v35 }
 0x31d   : > { %5567 = vmatpush3.bf16.msra.mxu1 %v5944_v35 }
 0x31e   : > { %5568 = vmatprep.subr.bf16.mxu1 %v5945_v49 }
 0x320   : > { %5521 = vmatmul.mubr.msk.bf16.gmra.mxu1 %vm1899_vm1, %v5946_v39 }
 0x321   : > { %5524 = vmatprep.mubr.msk.bf16.mxu1 %vm1899_vm1, %v5947_v2  ;;  %5569 = vmatpush3.bf16.msra.mxu1 %v5945_v49  ;;  %v2794_v49 = vpop.xlane.xlu0 %2793 }
 0x322   : > { %5570 = vmatprep.subr.bf16.mxu1 %v5948_v56 }
 0x325   : > { %5571 = vmatpush3.bf16.msra.mxu1 %v5948_v56 }
 0x326   : > { %5572 = vmatprep.subr.bf16.mxu1 %v5949_v51 }
 0x328   : > { %5525 = vmatmul.mubr.msk.bf16.gmra.mxu1 %vm1899_vm1, %v5950_v6 }
 0x329   : > { %5573 = vmatpush3.bf16.msra.mxu1 %v5949_v51 }
 0x32a   : > { %5574 = vmatprep.subr.bf16.mxu1 %v5951_v48 }
 0x32d   : > { %5575 = vmatpush3.bf16.msra.mxu1 %v5951_v48 }
 0x32e   : > { %5624 = vmatprep.subr.bf16.mxu1 %v5952_v40 }
 0x390   : > { %v5450_v8 = vpop.f32.mrf.mxu1 }
 0x391   : > { %v7495_v28 = vsel %vm2722_vm2, %v5450_v8, -1e+30 }
 0x392   : > { %v2207_v1 = vpop.f32.mrf.mxu1  ;;  %2825 = vmax.xlane.f32.xlu1 %v7495_v28 }
 0x393   : > { %v7510_v63 = vsel %vm2722_vm2, %v2207_v1, -1e+30  ;;  %v2790_v1 = vpop.xlane.xlu0 %2789 }
 0x394   : > { %v5451_v53 = vpop.f32.mrf.mxu1 }
 0x395   : > { %v7500_v18 = vsel %vm2722_vm2, %v5451_v53, -1e+30  ;;  %v2792_v53 = vpop.xlane.xlu1 %2791 }
 0x396   : > { %2827 = vmax.xlane.f32.xlu0 %v7500_v18  ;;  %v2210_v14 = vpop.f32.mrf.mxu1 }
 0x397   : > { %v7520_v10 = vsel %vm2722_vm2, %v2210_v14, -1e+30 }
 0x398   : > { %v5454_v22 = vpop.f32.mrf.mxu1 }
 0x399   : > { %v7530_v45 = vsel %vm2722_vm2, %v5454_v22, -1e+30  ;;  %v2796_v22 = vpop.xlane.xlu0 %2795 }
 0x39a   : > { %v2223_v20 = vpop.f32.mrf.mxu1 }
 0x39b   : > { %v7550_v39 = vsel %vm2722_vm2, %v2223_v20, -1e+30 }
 0x39c   : > { %v5455_v46 = vpop.f32.mrf.mxu1 }
 0x39d   : > { %v7540_v50 = vsel %vm2722_vm2, %v5455_v46, -1e+30 }
 0x39e   : > { %v2226_v27 = vpop.f32.mrf.mxu1 }
 0x39f   : > { %v5482_v55 = vpop.f32.mrf.mxu0  ;;  %v7560_v6 = vsel %vm2722_vm2, %v2226_v27, -1e+30 }
 0x3a0   : > { %v7505_v60 = vsel %vm2722_vm2, %v5482_v55, -1e+30  ;;  %v5458_v56 = vpop.f32.mrf.mxu1 }
 0x3a1   : > { %2857 = vmax.xlane.f32.xlu1 %v7505_v60  ;;  %v2432_v52 = vpop.f32.mrf.mxu0  ;;  %v7570_v55 = vsel %vm2722_vm2, %v5458_v56, -1e+30 }
 0x3a2   : > { %v7524_v32 = vsel %vm2722_vm2, %v2432_v52, -1e+30  ;;  %v2239_v40 = vpop.f32.mrf.mxu1 }
 0x3a3   : > { %v5483_v11 = vpop.f32.mrf.mxu0  ;;  %v7590_v27 = vsel %vm2722_vm2, %v2239_v40, -1e+30 }
 0x3a4   : > { %v7514_v0 = vsel %vm2722_vm2, %v5483_v11, -1e+30  ;;  %v5459_v52 = vpop.f32.mrf.mxu1 }
 0x3a5   : > { %2821 = vmax.xlane.f32.xlu1 %v7510_v63  ;;  %2859 = vmax.xlane.f32.xlu0 %v7514_v0  ;;  %v2435_v25 = vpop.f32.mrf.mxu0 }
 0x3a6   : > { %v7534_v33 = vsel %vm2722_vm2, %v2435_v25, -1e+30  ;;  %v7580_v25 = vsel %vm2722_vm2, %v5459_v52, -1e+30  ;;  %v2918_v52 = vsub.f32 %v7344_v3, %v2792_v53 }
 0x3a7   : > { %v5486_v36 = vpop.f32.mrf.mxu0 }
 0x3a8   : > { %v7544_v57 = vsel %vm2722_vm2, %v5486_v36, -1e+30  ;;  %v2242_v36 = vpop.f32.mrf.mxu1  ;;  %v2983_v41 = vmul.f32 1.442695, %v2918_v52 }
 0x3a9   : > { %2853 = vmax.xlane.f32.xlu1 %v7524_v32  ;;  %2823 = vmax.xlane.f32.xlu0 %v7520_v10  ;;  %v2448_v34 = vpop.f32.mrf.mxu0  ;;  %8652 = vst [vmem:[#allocation28_spill] sm:$0xff] %v7544_v57 }
 0x3aa   : > { %v7564_v48 = vsel %vm2722_vm2, %v2448_v34, -1e+30  ;;  %v2802_v34 = vpop.xlane.xlu1 %2801  ;;  %v5462_v56 = vpop.f32.mrf.mxu1  ;;  %5983 = vpow2.f32 %v2983_v41  ;;  %v2920_v41 = vsub.f32 %v7349_v43, %v2796_v22 }
 0x3ab   : > { %v5487_v35 = vpop.f32.mrf.mxu0  ;;  %8654 = vst [vmem:[#allocation30_spill] sm:$0xff] %v7564_v48  ;;  %v2923_v3 = vsub.f32 %v7356_v42, %v2802_v34 }
 0x3ac   : > { %v7554_v2 = vsel %vm2722_vm2, %v5487_v35, -1e+30  ;;  %v2987_v43 = vmul.f32 1.442695, %v2920_v41 }
 0x3ad   : > { %2833 = vmax.xlane.f32.xlu1 %v7530_v45  ;;  %2855 = vmax.xlane.f32.xlu0 %v7534_v33  ;;  %8653 = vst [vmem:[#allocation29_spill] sm:$0xff] %v7554_v2  ;;  %v2451_v51 = vpop.f32.mrf.mxu0  ;;  %v2993_v42 = vmul.f32 1.442695, %v2923_v3 }
 0x3ae   : > { %v7574_v14 = vsel %vm2722_vm2, %v2451_v51, -1e+30  ;;  %v2798_v5 = vpop.xlane.xlu1 %2797 }
 0x3af   : > { %v5490_v8 = vpop.f32.mrf.mxu0  ;;  %8655 = vst [vmem:[#allocation31_spill] sm:$0xff] %v7574_v14  ;;  %v2921_v34 = vsub.f32 %v7370_v13, %v2798_v5 }
 0x3b0   : > { %v7584_v20 = vsel %vm2722_vm2, %v5490_v8, -1e+30  ;;  %v2804_v8 = vpop.xlane.xlu0 %2803 }
 0x3b1   : > { %2835 = vmax.xlane.f32.xlu0 %v7540_v50  ;;  %2865 = vmax.xlane.f32.xlu1 %v7544_v57  ;;  %v2464_v11 = vpop.f32.mrf.mxu0  ;;  %8656 = vst [vmem:[#allocation32_spill] sm:$0xff] %v7584_v20  ;;  %v2989_v5 = vmul.f32 1.442695, %v2921_v34  ;;  %v2924_v22 = vsub.f32 %v7362_v7, %v2804_v8 }
 0x3b2   : > { %v7605_v40 = vsel %vm2722_vm2, %v2464_v11, -1e+30 }
 0x3b3   : > { %v5491_v46 = vpop.f32.mrf.mxu0  ;;  %8658 = vst [vmem:[#allocation34_spill] sm:$0xff] %v7605_v40  ;;  %v2995_v7 = vmul.f32 1.442695, %v2924_v22 }
 0x3b4   : > { %v7594_v35 = vsel %vm2722_vm2, %v5491_v46, -1e+30  ;;  %v2255_v46 = vpop.f32.mrf.mxu1  ;;  %v2800_v53 = vpop.xlane.xlu0 %2799 }
 0x3b5   : > { %2829 = vmax.xlane.f32.xlu1 %v7550_v39  ;;  %2867 = vmax.xlane.f32.xlu0 %v7554_v2  ;;  %8657 = vst [vmem:[#allocation33_spill] sm:$0xff] %v7594_v35  ;;  %v2467_v51 = vpop.f32.mrf.mxu0  ;;  %v2922_v8 = vsub.f32 %v7375_v19, %v2800_v53 }
 0x3b6   : > { %v7617_v11 = vsel %vm2722_vm2, %v2467_v51, -1e+30  ;;  %v5463_v29 = vpop.f32.mrf.mxu1 }
 0x3b7   : > { %v5494_v17 = vpop.f32.mrf.mxu0  ;;  %8659 = vst [vmem:[#allocation35_spill] sm:$0xff] %v7617_v11  ;;  %v7658_v34 = vpop.eup %5983 }
 0x3b8   : > { %v7629_v51 = vsel %vm2722_vm2, %v5494_v17, -1e+30  ;;  %v2258_v3 = vpop.f32.mrf.mxu1 }
 0x3b9   : > { %2861 = vmax.xlane.f32.xlu1 %v7564_v48  ;;  %2831 = vmax.xlane.f32.xlu0 %v7560_v6  ;;  %v2480_v57 = vpop.f32.mrf.mxu0  ;;  %8660 = vst [vmem:[#allocation36_spill] sm:$0xff] %v7629_v51 }
 0x3bb   : > { %v5495_v52 = vpop.f32.mrf.mxu0 }
 0x3bc   : > { %v7641_v17 = vsel %vm2722_vm2, %v5495_v52, -1e+30 }
 0x3bd   : > { %2841 = vmax.xlane.f32.xlu1 %v7570_v55  ;;  %2863 = vmax.xlane.f32.xlu0 %v7574_v14  ;;  %8661 = vst [vmem:[#allocation37_spill] sm:$0xff] %v7641_v17 }
 0x3c1   : > { %2843 = vmax.xlane.f32.xlu0 %v7580_v25  ;;  %2873 = vmax.xlane.f32.xlu1 %v7584_v20  ;;  %v7601_v20 = vsel %vm2722_vm2, %v2242_v36, -1e+30  ;;  %v7613_v36 = vsel %vm2722_vm2, %v5462_v56, -1e+30  ;;  %v7625_v56 = vsel %vm2722_vm2, %v5463_v29, -1e+30 }
 0x3c5   : > { %2837 = vmax.xlane.f32.xlu1 %v7590_v27  ;;  %2875 = vmax.xlane.f32.xlu0 %v7594_v35  ;;  %v2919_v35 = vsub.f32 %v7327_v62, %v2794_v49  ;;  %v2917_v62 = vsub.f32 %v7336_v26, %v2790_v1  ;;  %v2810_v49 = vpop.xlane.xlu1 %2809  ;;  %v2812_v1 = vpop.xlane.xlu0 %2811 }
 0x3c6   : > { %v2927_v13 = vsub.f32 %v7385_v30, %v2810_v49  ;;  %v7653_v49 = vsel %vm2722_vm2, %v2480_v57, -1e+30  ;;  %v2928_v19 = vsub.f32 %v7390_v12, %v2812_v1 }
 0x3c7   : > { %v2981_v26 = vmul.f32 1.442695, %v2917_v62  ;;  %8662 = vst [vmem:[#allocation38_spill] sm:$0xff] %v7653_v49 }
 0x3c8   : > { %v3001_v30 = vmul.f32 1.442695, %v2927_v13  ;;  %v3003_v22 = vmul.f32 1.442695, %v2928_v19 }
 0x3c9   : > { %2869 = vmax.xlane.f32.xlu1 %v7605_v40  ;;  %2839 = vmax.xlane.f32.xlu0 %v7601_v20  ;;  %v2985_v40 = vmul.f32 1.442695, %v2919_v35  ;;  %v2806_v29 = vpop.xlane.xlu1 %2805  ;;  %v7637_v35 = vsel %vm2722_vm2, %v2255_v46, -1e+30  ;;  %v2808_v62 = vpop.xlane.xlu0 %2807  ;;  %v7649_v46 = vsel %vm2722_vm2, %v2258_v3, -1e+30 }
 0x3cb   : > { %5985 = vpow2.f32 %v2985_v40  ;;  %v2925_v40 = vsub.f32 %v7398_v44, %v2806_v29  ;;  %v2926_v29 = vsub.f32 %v7402_v23, %v2808_v62 }
 0x3cc   : > { %5987 = vpow2.f32 %v2993_v42  ;;  %v2483_v42 = vpop.f32.mrf.mxu0 }
 0x3cd   : > { %2849 = vmax.xlane.f32.xlu1 %v7613_v36  ;;  %2871 = vmax.xlane.f32.xlu0 %v7617_v11  ;;  %5989 = vpow2.f32 %v2981_v26  ;;  %v2997_v44 = vmul.f32 1.442695, %v2925_v40  ;;  %v7662_v52 = vsel %vm2722_vm2, %v2483_v42, -1e+30  ;;  %v2820_v57 = vpop.xlane.xlu0 %2819  ;;  %v2818_v3 = vpop.xlane.xlu1 %2817  ;;  %v2999_v42 = vmul.f32 1.442695, %v2926_v29 }
 0x3ce   : > { %5991 = vpow2.f32 %v2989_v5  ;;  %8663 = vst [vmem:[#allocation39_spill] sm:$0xff] %v7662_v52  ;;  %v2991_v5 = vmul.f32 1.442695, %v2922_v8 }
 0x3cf   : > { %5993 = vpow2.f32 %v2987_v43 }
 0x3d0   : > { %5995 = vpow2.f32 %v3001_v30  ;;  %v5514_v26 = vpop.f32.mrf.mxu1  ;;  %v2932_v30 = vsub.f32 %v7416_v59, %v2820_v57 }
 0x3d1   : > { %2851 = vmax.xlane.f32.xlu0 %v7625_v56  ;;  %2881 = vmax.xlane.f32.xlu1 %v7629_v51  ;;  %5997 = vpow2.f32 %v2995_v7  ;;  %v2816_v12 = vpop.xlane.xlu0 %2815  ;;  %v2931_v7 = vsub.f32 %v7411_v54, %v2818_v3  ;;  %v2814_v59 = vpop.xlane.xlu1 %2813 }
 0x3d2   : > { %5999 = vpow2.f32 %v2997_v44  ;;  %v2657_v13 = vpop.f32.mrf.mxu1  ;;  %v3011_v23 = vmul.f32 1.442695, %v2932_v30  ;;  %v2930_v62 = vsub.f32 %v7428_v31, %v2816_v12  ;;  %v2929_v54 = vsub.f32 %v7424_v37, %v2814_v59 }
 0x3d3   : > { %6001 = vpow2.f32 %v2991_v5  ;;  %v3009_v5 = vmul.f32 1.442695, %v2931_v7  ;;  %v7700_v12 = vsel %vm2722_vm2, %v5514_v26, -1e+30  ;;  %v7708_v7 = vsel %vm2722_vm2, %v2657_v13, -1e+30 }
 0x3d4   : > { %v5515_v1 = vpop.f32.mrf.mxu1  ;;  %6003 = vpow2.f32 %v3003_v22  ;;  %v3007_v29 = vmul.f32 1.442695, %v2930_v62  ;;  %v3005_v31 = vmul.f32 1.442695, %v2929_v54 }
 0x3d5   : > { %2845 = vmax.xlane.f32.xlu1 %v7637_v35  ;;  %2883 = vmax.xlane.f32.xlu0 %v7641_v17  ;;  %6005 = vpow2.f32 %v2999_v42 }
 0x3d6   : > { %v2660_v57 = vpop.f32.mrf.mxu1  ;;  %6007 = vpow2.f32 %v3011_v23 }
 0x3d7   : > { %6009 = vpow2.f32 %v3009_v5 }
 0x3d8   : > { %v7666_v41 = vpop.eup %5985  ;;  %v5518_v22 = vpop.f32.mrf.mxu1  ;;  %6011 = vpow2.f32 %v3007_v29 }
 0x3d9   : > { %2877 = vmax.xlane.f32.xlu1 %v7653_v49  ;;  %2847 = vmax.xlane.f32.xlu0 %v7649_v46  ;;  %v7669_v53 = vpop.eup %5987  ;;  %6013 = vpow2.f32 %v3005_v31  ;;  %v7728_v31 = vsel %vm2722_vm2, %v5518_v22, -1e+30  ;;  %v7744_v22 = vsel %vm2722_vm2, %v2660_v57, -1e+30 }
 0x3da   : > { %v7674_v43 = vpop.eup %5989  ;;  %v2673_v42 = vpop.f32.mrf.mxu1  ;;  %8664 = vst [vmem:[#allocation40_spill] sm:$0xff] %v7728_v31 }
 0x3db   : > { %v7677_v40 = vpop.eup %5991  ;;  %v7738_v51 = vsel %vm2722_vm2, %v2673_v42, -1e+30 }
 0x3dc   : > { %v7682_v8 = vpop.eup %5993  ;;  %v5519_v23 = vpop.f32.mrf.mxu1  ;;  %8665 = vst [vmem:[#allocation41_spill] sm:$0xff] %v7738_v51 }
 0x3dd   : > { %3111 = vadd.xlane.f32.xlu1 %v7658_v34  ;;  %2879 = vmax.xlane.f32.xlu0 %v7662_v52  ;;  %v7685_v44 = vpop.eup %5995  ;;  %v7734_v52 = vsel %vm2722_vm2, %v5515_v1, -1e+30  ;;  %v7754_v1 = vsel %vm2722_vm2, %v5519_v23, -1e+30 }
 0x3de   : > { %v7689_v19 = vpop.eup %5997  ;;  %v2676_v59 = vpop.f32.mrf.mxu1  ;;  %8667 = vst [vmem:[#allocation43_spill] sm:$0xff] %v7754_v1 }
 0x3df   : > { %v7692_v3 = vpop.eup %5999  ;;  %v7764_v57 = vsel %vm2722_vm2, %v2676_v59, -1e+30 }
 0x3e0   : > { %v7696_v30 = vpop.eup %6001  ;;  %v5522_v13 = vpop.f32.mrf.mxu1  ;;  %8669 = vst [vmem:[#allocation45_spill] sm:$0xff] %v7764_v57 }
 0x3e1   : > { %3121 = vadd.xlane.f32.xlu1 %v7669_v53  ;;  %3113 = vadd.xlane.f32.xlu0 %v7666_v41  ;;  %v7704_v37 = vpop.eup %6003  ;;  %v7748_v11 = vsel %vm2722_vm2, %v5522_v13, -1e+30 }
 0x3e2   : > { %v7712_v62 = vpop.eup %6005  ;;  %v2689_v17 = vpop.f32.mrf.mxu1  ;;  %8666 = vst [vmem:[#allocation42_spill] sm:$0xff] %v7748_v11 }
 0x3e3   : > { %v7714_v26 = vpop.eup %6007  ;;  %v7758_v42 = vsel %vm2722_vm2, %v2689_v17, -1e+30 }
 0x3e4   : > { %v7718_v5 = vpop.eup %6009  ;;  %v5523_v49 = vpop.f32.mrf.mxu1  ;;  %8668 = vst [vmem:[#allocation44_spill] sm:$0xff] %v7758_v42 }
 0x3e5   : > { %3117 = vadd.xlane.f32.xlu1 %v7677_v40  ;;  %3109 = vadd.xlane.f32.xlu0 %v7674_v43  ;;  %v7720_v54 = vpop.eup %6011  ;;  %v7774_v17 = vsel %vm2722_vm2, %v5523_v49, -1e+30 }
 0x3e6   : > { %v7724_v29 = vpop.eup %6013  ;;  %8671 = vst [vmem:[#allocation47_spill] sm:$0xff] %v7774_v17 }
 0x3e9   : > { %3129 = vadd.xlane.f32.xlu1 %v7685_v44  ;;  %3115 = vadd.xlane.f32.xlu0 %v7682_v8 }
 0x3ed   : > { %3125 = vadd.xlane.f32.xlu1 %v7692_v3  ;;  %3123 = vadd.xlane.f32.xlu0 %v7689_v19 }
 0x3f1   : > { %2889 = vmax.xlane.f32.xlu1 %v7700_v12  ;;  %3119 = vadd.xlane.f32.xlu0 %v7696_v30 }
 0x3f5   : > { %2885 = vmax.xlane.f32.xlu1 %v7708_v7  ;;  %3131 = vadd.xlane.f32.xlu0 %v7704_v37 }
 0x3f9   : > { %3139 = vadd.xlane.f32.xlu1 %v7714_v26  ;;  %3127 = vadd.xlane.f32.xlu0 %v7712_v62 }
 0x3fd   : > { %3135 = vadd.xlane.f32.xlu1 %v7720_v54  ;;  %3137 = vadd.xlane.f32.xlu0 %v7718_v5 }
 0x401   : > { %2897 = vmax.xlane.f32.xlu1 %v7728_v31  ;;  %3133 = vadd.xlane.f32.xlu0 %v7724_v29  ;;  %v2692_v31 = vpop.f32.mrf.mxu1 }
 0x405   : > { %2893 = vmax.xlane.f32.xlu1 %v7738_v51  ;;  %2891 = vmax.xlane.f32.xlu0 %v7734_v52  ;;  %v5526_v51 = vpop.f32.mrf.mxu1 }
 0x406   : > { %v7768_v13 = vsel %vm2722_vm2, %v5526_v51, -1e+30  ;;  %v7784_v51 = vsel %vm2722_vm2, %v2692_v31, -1e+30 }
 0x407   : > { %8670 = vst [vmem:[#allocation46_spill] sm:$0xff] %v7768_v13  ;;  %8673 = vst [vmem:[#allocation49_spill] sm:$0xff] %v7784_v51 }
 0x409   : > { %2905 = vmax.xlane.f32.xlu1 %v7748_v11  ;;  %2887 = vmax.xlane.f32.xlu0 %v7744_v22  ;;  %v2705_v11 = vpop.f32.mrf.mxu1 }
 0x40a   : > { %v7778_v23 = vsel %vm2722_vm2, %v2705_v11, -1e+30 }
 0x40b   : > { %8672 = vst [vmem:[#allocation48_spill] sm:$0xff] %v7778_v23  ;;  %v5527_v59 = vpop.f32.mrf.mxu1 }
 0x40c   : > { %v7790_v49 = vsel %vm2722_vm2, %v5527_v59, -1e+30 }
 0x40d   : > { %2901 = vmax.xlane.f32.xlu1 %v7758_v42  ;;  %2899 = vmax.xlane.f32.xlu0 %v7754_v1  ;;  %8674 = vst [vmem:[#allocation50_spill] sm:$0xff] %v7790_v49  ;;  %v2708_v11 = vpop.f32.mrf.mxu1 }
 0x40e   : > { %v7796_v31 = vsel %vm2722_vm2, %v2708_v11, -1e+30 }
 0x40f   : > { %8675 = vst [vmem:[#allocation51_spill] sm:$0xff] %v7796_v31 }
 0x411   : > { %2913 = vmax.xlane.f32.xlu1 %v7768_v13  ;;  %2895 = vmax.xlane.f32.xlu0 %v7764_v57 }
 0x415   : > { %2909 = vmax.xlane.f32.xlu1 %v7778_v23  ;;  %2907 = vmax.xlane.f32.xlu0 %v7774_v17 }
 0x419   : > { %2903 = vmax.xlane.f32.xlu0 %v7784_v51 }
 0x41b   : > { %v2826_v13 = vpop.xlane.xlu1 %2825 }
 0x41c   : > { %v2935_v42 = vsub.f32 %v7495_v28, %v2826_v13 }
 0x41d   : > { %2915 = vmax.xlane.f32.xlu0 %v7790_v49 }
 0x41e   : > { %v3017_v1 = vmul.f32 1.442695, %v2935_v42 }
 0x41f   : > { %v2828_v23 = vpop.xlane.xlu0 %2827 }
 0x420   : > { %6015 = vpow2.f32 %v3017_v1  ;;  %v2936_v17 = vsub.f32 %v7500_v18, %v2828_v23 }
 0x421   : > { %2911 = vmax.xlane.f32.xlu0 %v7796_v31 }
 0x422   : > { %v3019_v51 = vmul.f32 1.442695, %v2936_v17 }
 0x424   : > { %6017 = vpow2.f32 %v3019_v51 }
 0x42a   : > { %v7799_v28 = vpop.xlane.xlu1 %2857 }
 0x42d   : > { %v7801_v13 = vpop.eup %6015 }
 0x42e   : > { %3145 = vadd.xlane.f32.xlu1 %v7801_v13  ;;  %v2822_v42 = vpop.xlane.xlu1 %2821  ;;  %v7804_v59 = vpop.xlane.xlu0 %2859 }
 0x42f   : > { %v2933_v1 = vsub.f32 %v7510_v63, %v2822_v42 }
 0x431   : > { %v7807_v18 = vpop.eup %6017  ;;  %v3013_v21 = vmul.f32 1.442695, %v2933_v1 }
 0x432   : > { %3147 = vadd.xlane.f32.xlu0 %v7807_v18  ;;  %v7810_v17 = vpop.xlane.xlu1 %2853  ;;  %v2824_v23 = vpop.xlane.xlu0 %2823 }
 0x433   : > { %6019 = vpow2.f32 %v3013_v21  ;;  %v2934_v51 = vsub.f32 %v7520_v10, %v2824_v23 }
 0x435   : > { %v3015_v11 = vmul.f32 1.442695, %v2934_v51 }
 0x436   : > { %v2834_v49 = vpop.xlane.xlu1 %2833  ;;  %v7813_v31 = vpop.xlane.xlu0 %2855 }
 0x437   : > { %v2939_v57 = vsub.f32 %v7530_v45, %v2834_v49  ;;  %6021 = vpow2.f32 %v3015_v11 }
 0x439   : > { %v3025_v2 = vmul.f32 1.442695, %v2939_v57 }
 0x43a   : > { %v2836_v63 = vpop.xlane.xlu0 %2835  ;;  %v7816_v42 = vpop.xlane.xlu1 %2865 }
 0x43b   : > { %8676 = vst [vmem:[#allocation52_spill] sm:$0xff] %v7816_v42  ;;  %6023 = vpow2.f32 %v3025_v2  ;;  %v2940_v1 = vsub.f32 %v7540_v50, %v2836_v63 }
 0x43d   : > { %v3027_v58 = vmul.f32 1.442695, %v2940_v1 }
 0x43e   : > { %v2830_v9 = vpop.xlane.xlu1 %2829  ;;  %v7819_v48 = vpop.xlane.xlu0 %2867 }
 0x43f   : > { %8677 = vst [vmem:[#allocation53_spill] sm:$0xff] %v7819_v48  ;;  %6025 = vpow2.f32 %v3027_v58  ;;  %v2937_v10 = vsub.f32 %v7550_v39, %v2830_v9 }
 0x440   : > { %v7822_v21 = vpop.eup %6019 }
 0x441   : > { %v3021_v23 = vmul.f32 1.442695, %v2937_v10  ;;  %3141 = vadd.xlane.f32.xlu1 %v7822_v21 }
 0x442   : > { %v7825_v45 = vpop.xlane.xlu1 %2861  ;;  %v2832_v57 = vpop.xlane.xlu0 %2831 }
 0x443   : > { %8678 = vst [vmem:[#allocation54_spill] sm:$0xff] %v7825_v45  ;;  %6027 = vpow2.f32 %v3021_v23  ;;  %v2938_v2 = vsub.f32 %v7560_v6, %v2832_v57 }
 0x444   : > { %v7828_v49 = vpop.eup %6021 }
 0x445   : > { %v3023_v50 = vmul.f32 1.442695, %v2938_v2  ;;  %3143 = vadd.xlane.f32.xlu0 %v7828_v49 }
 0x446   : > { %v2842_v51 = vpop.xlane.xlu1 %2841  ;;  %v7831_v58 = vpop.xlane.xlu0 %2863 }
 0x447   : > { %8679 = vst [vmem:[#allocation55_spill] sm:$0xff] %v7831_v58  ;;  %v2943_v9 = vsub.f32 %v7570_v55, %v2842_v51  ;;  %6029 = vpow2.f32 %v3023_v50 }
 0x448   : > { %v7834_v39 = vpop.eup %6023 }
 0x449   : > { %v3033_v11 = vmul.f32 1.442695, %v2943_v9  ;;  %3153 = vadd.xlane.f32.xlu1 %v7834_v39 }
 0x44a   : > { %v2844_v63 = vpop.xlane.xlu0 %2843  ;;  %v7837_v1 = vpop.xlane.xlu1 %2873 }
 0x44b   : > { %8680 = vst [vmem:[#allocation56_spill] sm:$0xff] %v7837_v1  ;;  %6031 = vpow2.f32 %v3033_v11  ;;  %v2944_v6 = vsub.f32 %v7580_v25, %v2844_v63 }
 0x44c   : > { %v7840_v10 = vpop.eup %6025 }
 0x44d   : > { %v3035_v23 = vmul.f32 1.442695, %v2944_v6  ;;  %3155 = vadd.xlane.f32.xlu0 %v7840_v10 }
 0x44e   : > { %v2838_v57 = vpop.xlane.xlu1 %2837  ;;  %v7843_v2 = vpop.xlane.xlu0 %2875 }
 0x44f   : > { %8681 = vst [vmem:[#allocation57_spill] sm:$0xff] %v7843_v2  ;;  %6033 = vpow2.f32 %v3035_v23  ;;  %v2941_v55 = vsub.f32 %v7590_v27, %v2838_v57 }
 0x450   : > { %v7846_v50 = vpop.eup %6027 }
 0x451   : > { %v3029_v51 = vmul.f32 1.442695, %v2941_v55  ;;  %3149 = vadd.xlane.f32.xlu1 %v7846_v50 }
 0x452   : > { %v7849_v9 = vpop.xlane.xlu1 %2869  ;;  %v2840_v11 = vpop.xlane.xlu0 %2839 }
 0x453   : > { %8682 = vst [vmem:[#allocation58_spill] sm:$0xff] %v7849_v9  ;;  %6035 = vpow2.f32 %v3029_v51  ;;  %v2942_v25 = vsub.f32 %v7601_v20, %v2840_v11 }
 0x454   : > { %v7852_v63 = vpop.eup %6029 }
 0x455   : > { %v3031_v6 = vmul.f32 1.442695, %v2942_v25  ;;  %3151 = vadd.xlane.f32.xlu0 %v7852_v63 }
 0x456   : > { %v2850_v1 = vpop.xlane.xlu1 %2849  ;;  %v7855_v23 = vpop.xlane.xlu0 %2871 }
 0x457   : > { %8683 = vst [vmem:[#allocation59_spill] sm:$0xff] %v7855_v23  ;;  %v2947_v27 = vsub.f32 %v7613_v36, %v2850_v1  ;;  %6037 = vpow2.f32 %v3031_v6 }
 0x458   : > { %v7858_v57 = vpop.eup %6031 }
 0x459   : > { %v3041_v55 = vmul.f32 1.442695, %v2947_v27  ;;  %3161 = vadd.xlane.f32.xlu1 %v7858_v57 }
 0x45a   : > { %v2852_v2 = vpop.xlane.xlu0 %2851  ;;  %v7861_v51 = vpop.xlane.xlu1 %2881 }
 0x45b   : > { %8684 = vst [vmem:[#allocation60_spill] sm:$0xff] %v7861_v51  ;;  %6039 = vpow2.f32 %v3041_v55  ;;  %v2948_v9 = vsub.f32 %v7625_v56, %v2852_v2 }
 0x45c   : > { %v7863_v20 = vpop.eup %6033 }
 0x45d   : > { %3163 = vadd.xlane.f32.xlu0 %v7863_v20  ;;  %v3043_v55 = vmul.f32 1.442695, %v2948_v9 }
 0x45e   : > { %v2846_v11 = vpop.xlane.xlu1 %2845  ;;  %v7866_v25 = vpop.xlane.xlu0 %2883 }
 0x45f   : > { %8685 = vst [vmem:[#allocation61_spill] sm:$0xff] %v7866_v25  ;;  %v2945_v36 = vsub.f32 %v7637_v35, %v2846_v11 }
 0x460   : > { %v7870_v1 = vpop.eup %6035 }
 0x461   : > { %v3037_v6 = vmul.f32 1.442695, %v2945_v36  ;;  %3157 = vadd.xlane.f32.xlu1 %v7870_v1 }
 0x462   : > { %v7873_v27 = vpop.xlane.xlu1 %2877  ;;  %v2848_v51 = vpop.xlane.xlu0 %2847 }
 0x463   : > { %8686 = vst [vmem:[#allocation62_spill] sm:$0xff] %v7873_v27  ;;  %6041 = vpow2.f32 %v3037_v6  ;;  %v2946_v23 = vsub.f32 %v7649_v46, %v2848_v51 }
 0x464   : > { %v7876_v42 = vpop.eup %6037  ;;  %6043 = vpow2.f32 %v3043_v55 }
 0x465   : > { %3159 = vadd.xlane.f32.xlu0 %v7876_v42  ;;  %v3039_v35 = vmul.f32 1.442695, %v2946_v23 }
 0x466   : > { %v3112_v25 = vpop.xlane.xlu1 %3111  ;;  %v7879_v56 = vpop.xlane.xlu0 %2879 }
 0x467   : > { %8687 = vst [vmem:[#allocation63_spill] sm:$0xff] %v7879_v56  ;;  %6045 = vpow2.f32 %v3039_v35 }
 0x468   : > { %v7881_v2 = vpop.eup %6039  ;;  %6047 = vrcp.f32 %v3112_v25 }
 0x469   : > { %8688 = vst [vmem:[#allocation64_spill] sm:$0xff] %v7881_v2  ;;  %3169 = vadd.xlane.f32.xlu1 %v7881_v2 }
 0x46a   : > { %v3122_v11 = vpop.xlane.xlu1 %3121  ;;  %v3114_v36 = vpop.xlane.xlu0 %3113 }
 0x46e   : > { %v3118_v9 = vpop.xlane.xlu1 %3117  ;;  %v3110_v6 = vpop.xlane.xlu0 %3109 }
 0x46f   : > { %6049 = vrcp.f32 %v3110_v6 }
 0x470   : > { %v7884_v46 = vpop.eup %6041  ;;  %6051 = vrcp.f32 %v3114_v36 }
 0x471   : > { %3165 = vadd.xlane.f32.xlu0 %v7884_v46  ;;  %v7887_v55 = vpop.eup %6043 }
 0x472   : > { %v3130_v51 = vpop.xlane.xlu1 %3129  ;;  %v3116_v56 = vpop.xlane.xlu0 %3115 }
 0x473   : > { %6053 = vrcp.f32 %v3116_v56 }
 0x474   : > { %v7890_v48 = vpop.eup %6045 }
 0x475   : > { %3171 = vadd.xlane.f32.xlu0 %v7887_v55  ;;  %v6048_v36 = vpop.eup %6047 }
 0x476   : > { %v3126_v23 = vpop.xlane.xlu1 %3125  ;;  %v3124_v27 = vpop.xlane.xlu0 %3123 }
 0x477   : > { %6055 = vrcp.f32 %v3124_v27 }
 0x478   : > { %6057 = vrcp.f32 %v3118_v9  ;;  %v3302_v9 = vmul.f32 %v6048_v36, %v7658_v34 }
 0x479   : > { %3167 = vadd.xlane.f32.xlu0 %v7890_v48  ;;  %6059 = vrcp.f32 %v3122_v11 }
 0x47a   : > { %982 = vrot.lane.b32.xlu1 %v6935_v4, %s6462_s14  ;;  %v7895_v25 = vpop.xlane.xlu1 %2889  ;;  %v3120_v35 = vpop.xlane.xlu0 %3119 }
 0x47b   : > { %6061 = vrcp.f32 %v3120_v35 }
 0x47c   : > { %v6050_v56 = vpop.eup %6049 }
 0x47d   : > { %v3301_v27 = vmul.f32 %v6050_v56, %v7674_v43  ;;  %v6052_v11 = vpop.eup %6051  ;;  %v5953_v56 = vld [vmem:[#allocation3 + $0xb0] sm:$0xff]  }
 0x47e   : > { %1112 = vrot.lane.b32.xlu1 %v6935_v4, %s6463_s30  ;;  %v7899_v6 = vpop.xlane.xlu1 %2885  ;;  %v3132_v45 = vpop.xlane.xlu0 %3131  ;;  %v3303_v24 = vmul.f32 %v6052_v11, %v7666_v41 }
 0x47f   : > { %v3365_v14 = vpack.c.bf16 %v3302_v9, %v3301_v27  ;;  %6063 = vrcp.f32 %v3132_v45 }
 0x480   : > { %v6054_v58 = vpop.eup %6053  ;;  %6065 = vrcp.f32 %v3126_v23 }
 0x481   : > { %5544 = vmatprep.mubr.bf16.mxu0 %v3365_v14  ;;  %v3304_v4 = vmul.f32 %v6054_v58, %v7682_v8  ;;  %6067 = vrcp.f32 %v3130_v51 }
 0x482   : > { %1114 = vrot.lane.b32.xlu1 %v6949_v15, %s6463_s30  ;;  %v3140_v35 = vpop.xlane.xlu1 %3139  ;;  %v3128_v38 = vpop.xlane.xlu0 %3127 }
 0x483   : > { %v3366_v2 = vpack.c.bf16 %v3304_v4, %v3303_v24  ;;  %6069 = vrcp.f32 %v3128_v38 }
 0x484   : > { %v6056_v43 = vpop.eup %6055 }
 0x485   : > { %v6058_v34 = vpop.eup %6057  ;;  %5545 = vmatmul.mubr.bf16.vlgmr.msra.gmra.mxu0 %v3366_v2  ;;  %v3308_v9 = vmul.f32 %v6056_v43, %v7689_v19 }
 0x486   : > { %v3136_v36 = vpop.xlane.xlu1 %3135  ;;  %v3138_v45 = vpop.xlane.xlu0 %3137  ;;  %5593 = vmatpush3.bf16.msra.mxu0 %v7480_v16  ;;  %v3305_v41 = vmul.f32 %v6058_v34, %v7677_v40  ;;  %v2950_v40 = vsub.f32 %v7534_v33, %v7813_v31  ;;  %v2949_v33 = vsub.f32 %v7524_v32, %v7810_v17 }
 0x487   : > { %v6060_v14 = vpop.eup %6059  ;;  %5594 = vmatprep.subr.bf16.mxu0 %v5953_v56  ;;  %6071 = vrcp.f32 %v3136_v36 }
 0x488   : > { %v6062_v27 = vpop.eup %6061  ;;  %6073 = vrcp.f32 %v3138_v45  ;;  %v3307_v38 = vmul.f32 %v6060_v14, %v7669_v53 }
 0x489   : > { %v3306_v8 = vmul.f32 %v6062_v27, %v7696_v30 }
 0x48a   : > { %v3134_v24 = vpop.xlane.xlu0 %3133  ;;  %5595 = vmatpush3.bf16.msra.mxu0 %v5953_v56  ;;  %v3368_v2 = vpack.c.bf16 %v3308_v9, %v3307_v38 }
 0x48b   : > { %6075 = vrcp.f32 %v3134_v24  ;;  %v3367_v58 = vpack.c.bf16 %v3306_v8, %v3305_v41  ;;  %v7930_v41 = vpop.xlane.xlu1 %2897 }
 0x48c   : > { %6077 = vrcp.f32 %v3140_v35  ;;  %v6064_v16 = vpop.eup %6063  ;;  %v3047_v35 = vmul.f32 1.442695, %v2950_v40  ;;  %v2952_v40 = vsub.f32 %v7514_v0, %v7804_v59  ;;  %v2965_v0 = vsub.f32 %v7708_v7, %v7899_v6 }
 0x48d   : > { %5548 = vmatprep.mubr.bf16.mxu0 %v3367_v58  ;;  %v6066_v19 = vpop.eup %6065  ;;  %v3312_v23 = vmul.f32 %v6064_v16, %v7704_v37 }
 0x48e   : > { %5549 = vmatmul.mubr.bf16.gmra.mxu0 %v3368_v2  ;;  %v6068_v30 = vpop.eup %6067  ;;  %v3309_v53 = vmul.f32 %v6066_v19, %v7692_v3  ;;  %6079 = vpow2.f32 %v3047_v35  ;;  %v7925_v14 = vpop.xlane.xlu0 %2891  ;;  %v2951_v35 = vsub.f32 %v7505_v60, %v7799_v28 }
 0x48f   : > { %984 = vrot.lane.b32.xlu0 %v6949_v15, %s6462_s14  ;;  %v3311_v4 = vmul.f32 %v6068_v30, %v7685_v44  ;;  %v3045_v44 = vmul.f32 1.442695, %v2949_v33 }
 0x490   : > { %v6070_v51 = vpop.eup %6069 }
 0x491   : > { %v3310_v11 = vmul.f32 %v6070_v51, %v7712_v62  ;;  %v3370_v36 = vpack.c.bf16 %v3312_v23, %v3311_v4  ;;  %6081 = vpow2.f32 %v3045_v44  ;;  %v3051_v23 = vmul.f32 1.442695, %v2952_v40 }
 0x492   : > { %v2888_v32 = vpop.xlane.xlu0 %2887 }
 0x493   : > { %v3369_v43 = vpack.c.bf16 %v3310_v11, %v3309_v53  ;;  %6083 = vpow2.f32 %v3051_v23  ;;  %v2966_v59 = vsub.f32 %v7744_v22, %v2888_v32  ;;  %v5954_v32 = vld [vmem:[#allocation3 + $0xf0] sm:$0xff]  }
 0x494   : > { %v6072_v34 = vpop.eup %6071 }
 0x495   : > { %v6074_v56 = vpop.eup %6073  ;;  %5552 = vmatprep.mubr.bf16.mxu0 %v3369_v43  ;;  %v3314_v3 = vmul.f32 %v6072_v34, %v7720_v54  ;;  %v3049_v43 = vmul.f32 1.442695, %v2951_v35  ;;  %v3077_v34 = vmul.f32 1.442695, %v2965_v0 }
 0x496   : > { %5553 = vmatmul.mubr.bf16.gmra.mxu0 %v3370_v36  ;;  %v3315_v62 = vmul.f32 %v6074_v56, %v7718_v5  ;;  %v7933_v54 = vpop.xlane.xlu0 %2899  ;;  %v7935_v5 = vpop.xlane.xlu1 %2893  ;;  %v3079_v56 = vmul.f32 1.442695, %v2966_v59 }
 0x498   : > { %v6076_v15 = vpop.eup %6075 }
 0x499   : > { %v6078_v31 = vpop.eup %6077  ;;  %v3313_v37 = vmul.f32 %v6076_v15, %v7724_v29 }
 0x49a   : > { %v3316_v27 = vmul.f32 %v6078_v31, %v7714_v26  ;;  %v7939_v8 = vpop.xlane.xlu0 %2895  ;;  %v7942_v26 = vpop.xlane.xlu1 %2905 }
 0x49b   : > { %v3371_v45 = vpack.c.bf16 %v3314_v3, %v3313_v37  ;;  %v7928_v17 = vpop.eup %6079 }
 0x49c   : > { %v3372_v9 = vpack.c.bf16 %v3316_v27, %v3315_v62 }
 0x49d   : > { %5556 = vmatprep.mubr.bf16.mxu0 %v3371_v45 }
 0x49e   : > { %5557 = vmatmul.mubr.bf16.gmra.mxu0 %v3372_v9  ;;  %v7937_v29 = vpop.eup %6081  ;;  %v7944_v24 = vpop.xlane.xlu0 %2907 }
 0x49f   : > { %v7946_v38 = vpop.xlane.xlu1 %2901 }
 0x4a0   : > { %v7969_v15 = vpop.eup %6083 }
 0x4a2   : > { %v7950_v58 = vpop.xlane.xlu0 %2903 }
 0x4a3   : > { %v7952_v2 = vpop.xlane.xlu1 %2913 }
 0x4a6   : > { %3175 = vadd.xlane.f32.xlu1 %v7928_v17  ;;  %v7954_v16 = vpop.xlane.xlu0 %2915 }
 0x4a7   : > { %v7956_v19 = vpop.xlane.xlu1 %2909 }
 0x4aa   : > { %v7962_v30 = vpop.xlane.xlu0 %2911 }
 0x4ae   : > { %3173 = vadd.xlane.f32.xlu0 %v7937_v29 }
 0x4b7   : > { %980 = vrot.lane.b32.xlu1 %v6921_v61, %s6462_s14  ;;  %v3146_v51 = vpop.xlane.xlu1 %3145 }
 0x4bb   : > { %v3148_v53 = vpop.xlane.xlu0 %3147 }
 0x4bc   : > { %6085 = vrcp.f32 %v3148_v53 }
 0x4c4   : > { %978 = vrot.lane.b32.xlu0 %v6907_v47, %s6462_s14 }
 0x4c9   : > { %v6086_v33 = vpop.eup %6085 }
 0x4ca   : > { %v3142_v11 = vpop.xlane.xlu1 %3141  ;;  %v3320_v7 = vmul.f32 %v6086_v33, %v7807_v18  ;;  %v6239_v18 = vld [vmem:[#allocation3 + $0xf8] sm:$0xff]  }
 0x4cb   : > { %6087 = vrcp.f32 %v3142_v11 }
 0x4cc   : > { %6089 = vrcp.f32 %v3146_v51 }
 0x4ce   : > { %v3144_v4 = vpop.xlane.xlu0 %3143 }
 0x4cf   : > { %6091 = vrcp.f32 %v3144_v4 }
 0x4d0   : > { %6093 = vpow2.f32 %v3049_v43 }
 0x4d1   : > { %6095 = vpow2.f32 %v3077_v34 }
 0x4d2   : > { %v3154_v36 = vpop.xlane.xlu1 %3153  ;;  %6097 = vpow2.f32 %v3079_v56 }
 0x4d6   : > { %v3156_v60 = vpop.xlane.xlu0 %3155 }
 0x4d7   : > { %6099 = vrcp.f32 %v3156_v60  ;;  %v2967_v60 = vsub.f32 %v7700_v12, %v7895_v25 }
 0x4d8   : > { %v6088_v28 = vpop.eup %6087 }
 0x4d9   : > { %v6090_v37 = vpop.eup %6089  ;;  %v3317_v22 = vmul.f32 %v6088_v28, %v7822_v21 }
 0x4da   : > { %v3150_v31 = vpop.xlane.xlu1 %3149  ;;  %v3319_v45 = vmul.f32 %v6090_v37, %v7801_v13 }
 0x4db   : > { %3179 = vadd.xlane.f32.xlu1 %v7969_v15  ;;  %6101 = vrcp.f32 %v3150_v31  ;;  %v3081_v31 = vmul.f32 1.442695, %v2967_v60  ;;  %v8695_v60 = vld [vmem:[#allocation30_spill] sm:$0xff] }
 0x4dc   : > { %v6092_v3 = vpop.eup %6091  ;;  %6103 = vrcp.f32 %v3154_v36  ;;  %v3374_v27 = vpack.c.bf16 %v3320_v7, %v3319_v45 }
 0x4dd   : > { %v3318_v6 = vmul.f32 %v6092_v3, %v7828_v49  ;;  %v7976_v9 = vpop.eup %6093 }
 0x4de   : > { %v3152_v62 = vpop.xlane.xlu0 %3151  ;;  %v7979_v21 = vpop.eup %6095 }
 0x4df   : > { %6105 = vrcp.f32 %v3152_v62  ;;  %v3373_v44 = vpack.c.bf16 %v3318_v6, %v3317_v22  ;;  %v7982_v13 = vpop.eup %6097 }
 0x4e1   : > { %5576 = vmatprep.mubr.bf16.mxu1 %v3373_v44 }
 0x4e2   : > { %5577 = vmatmul.mubr.bf16.vlgmr.msra.gmra.mxu1 %v3374_v27  ;;  %v3162_v49 = vpop.xlane.xlu1 %3161 }
 0x4e3   : > { %3177 = vadd.xlane.f32.xlu0 %v7976_v9  ;;  %5625 = vmatpush3.bf16.msra.mxu1 %v6239_v18 }
 0x4e4   : > { %5626 = vmatprep.subr.bf16.mxu1 %v5954_v32  ;;  %v6100_v40 = vpop.eup %6099 }
 0x4e5   : > { %v3324_v4 = vmul.f32 %v6100_v40, %v7840_v10 }
 0x4e6   : > { %v3164_v51 = vpop.xlane.xlu0 %3163 }
 0x4e7   : > { %3205 = vadd.xlane.f32.xlu0 %v7979_v21  ;;  %5627 = vmatpush3.bf16.msra.mxu1 %v5954_v32  ;;  %6107 = vrcp.f32 %v3164_v51 }
 0x4e8   : > { %v6102_v23 = vpop.eup %6101 }
 0x4e9   : > { %v6104_v11 = vpop.eup %6103  ;;  %v3321_v43 = vmul.f32 %v6102_v23, %v7846_v50 }
 0x4ea   : > { %v3158_v53 = vpop.xlane.xlu1 %3157  ;;  %v3323_v34 = vmul.f32 %v6104_v11, %v7834_v39 }
 0x4eb   : > { %3207 = vadd.xlane.f32.xlu0 %v7982_v13  ;;  %6109 = vrcp.f32 %v3158_v53 }
 0x4ec   : > { %1108 = vrot.lane.b32.xlu1 %v6907_v47, %s6463_s30  ;;  %v6106_v35 = vpop.eup %6105  ;;  %6111 = vrcp.f32 %v3162_v49  ;;  %v3376_v56 = vpack.c.bf16 %v3324_v4, %v3323_v34 }
 0x4ed   : > { %v3322_v0 = vmul.f32 %v6106_v35, %v7852_v63 }
 0x4ee   : > { %v3160_v59 = vpop.xlane.xlu0 %3159 }
 0x4ef   : > { %6113 = vrcp.f32 %v3160_v59  ;;  %v3375_v36 = vpack.c.bf16 %v3322_v0, %v3321_v43  ;;  %v8690_v43 = vld [vmem:[#allocation26_spill] sm:$0xff]  ;;  %v8692_v0 = vld [vmem:[#allocation55_spill] sm:$0xff] }
 0x4f0   : > { %6115 = vpow2.f32 %v3081_v31  ;;  %v8693_v59 = vld [vmem:[#allocation31_spill] sm:$0xff] }
 0x4f1   : > { %5580 = vmatprep.mubr.bf16.mxu1 %v3375_v36  ;;  %v2954_v34 = vsub.f32 %v8693_v59, %v8692_v0 }
 0x4f2   : > { %v3170_v33 = vpop.xlane.xlu1 %3169  ;;  %5581 = vmatmul.mubr.bf16.gmra.mxu1 %v3376_v56 }
 0x4f3   : > { %v3055_v56 = vmul.f32 1.442695, %v2954_v34 }
 0x4f4   : > { %v6108_v10 = vpop.eup %6107 }
 0x4f5   : > { %v3328_v3 = vmul.f32 %v6108_v10, %v7863_v20 }
 0x4f6   : > { %v983_v47 = vpop.permute.xlu1 %982 }
 0x4f7   : > { %1021 = vst.msk [vmem:[#allocation3 + $0xa8] sm:$0xf] %vm678_vm0, %v983_v47  ;;  %v8694_v47 = vld [vmem:[#allocation54_spill] sm:$0xff] }
 0x4f8   : > { %v6110_v63 = vpop.eup %6109  ;;  %v2953_v10 = vsub.f32 %v8695_v60, %v8694_v47  ;;  %v8697_v60 = vld [vmem:[#allocation24_spill] sm:$0xff] }
 0x4f9   : > { %v6112_v39 = vpop.eup %6111  ;;  %v3325_v6 = vmul.f32 %v6110_v63, %v7870_v1 }
 0x4fa   : > { %v1113_v50 = vpop.permute.xlu1 %1112  ;;  %v3166_v28 = vpop.xlane.xlu0 %3165  ;;  %v3327_v12 = vmul.f32 %v6112_v39, %v7858_v57 }
 0x4fb   : > { %1151 = vst.msk [vmem:[#allocation3 + $0xe8] sm:$0xf] %vm678_vm0, %v1113_v50 }
 0x4fc   : > { %v6114_v37 = vpop.eup %6113  ;;  %v3378_v45 = vpack.c.bf16 %v3328_v3, %v3327_v12 }
 0x4fd   : > { %v3326_v62 = vmul.f32 %v6114_v37, %v7876_v42  ;;  %v2968_v42 = vsub.f32 %v7734_v52, %v7925_v14  ;;  %v8005_v57 = vpop.eup %6115  ;;  %v8689_v52 = vld [vmem:[#allocation64_spill] sm:$0xff] }
 0x4fe   : > { %v1115_v7 = vpop.permute.xlu1 %1114  ;;  %v3172_v22 = vpop.xlane.xlu0 %3171 }
 0x4ff   : > { %1152 = vst.msk [vmem:[#allocation3 + $0xec] sm:$0xf] %vm678_vm0, %v1115_v7  ;;  %6117 = vrcp.f32 %v3172_v22  ;;  %v3377_v25 = vpack.c.bf16 %v3326_v62, %v3325_v6 }
 0x500   : > { %6119 = vrcp.f32 %v3166_v28  ;;  %v3053_v28 = vmul.f32 1.442695, %v2953_v10  ;;  %v8698_v10 = vld [vmem:[#allocation53_spill] sm:$0xff] }
 0x501   : > { %1110 = vrot.lane.b32.xlu0 %v6921_v61, %s6463_s30  ;;  %6121 = vrcp.f32 %v3170_v33  ;;  %5584 = vmatprep.mubr.bf16.mxu1 %v3377_v25  ;;  %v3083_v61 = vmul.f32 1.442695, %v2968_v42 }
 0x502   : > { %v3168_v20 = vpop.xlane.xlu0 %3167  ;;  %5585 = vmatmul.mubr.bf16.gmra.mxu1 %v3378_v45 }
 0x503   : > { %6123 = vrcp.f32 %v3168_v20 }
 0x504   : > { %6125 = vpow2.f32 %v3083_v61 }
 0x506   : > { %v985_v1 = vpop.permute.xlu0 %984  ;;  %v5955_v44 = vld [vmem:[#allocation3 + $0xe8] sm:$0xff]  }
 0x507   : > { %1022 = vst.msk [vmem:[#allocation3 + $0xac] sm:$0xf] %vm678_vm0, %v985_v1  ;;  %5628 = vmatprep.subr.bf16.mxu1 %v5955_v44 }
 0x508   : > { %5629 = vmatpush3.bf16.msra.mxu1 %v5955_v44 }
 0x50c   : > { %v6118_v27 = vpop.eup %6117 }
 0x50d   : > { %v6120_v32 = vpop.eup %6119  ;;  %v3332_v51 = vmul.f32 %v6118_v27, %v7887_v55 }
 0x50e   : > { %v5956_v18 = vld [vmem:[#allocation3 + $0xa8] sm:$0xff]   ;;  %v6122_v49 = vpop.eup %6121  ;;  %v3329_v23 = vmul.f32 %v6120_v32, %v7884_v46  ;;  %v8691_v46 = vld [vmem:[#allocation27_spill] sm:$0xff] }
 0x50f   : > { %5596 = vmatprep.subr.bf16.mxu0 %v5956_v18  ;;  %v3331_v14 = vmul.f32 %v6122_v49, %v8689_v52 }
 0x510   : > { %v6124_v40 = vpop.eup %6123  ;;  %3209 = vadd.xlane.f32.xlu1 %v8005_v57  ;;  %5597 = vmatpush3.bf16.msra.mxu0 %v5956_v18 }
 0x511   : > { %v3330_v53 = vmul.f32 %v6124_v40, %v7890_v48  ;;  %v3380_v35 = vpack.c.bf16 %v3332_v51, %v3331_v14  ;;  %v8012_v4 = vpop.eup %6125 }
 0x513   : > { %v3379_v11 = vpack.c.bf16 %v3330_v53, %v3329_v23 }
 0x515   : > { %5588 = vmatprep.mubr.bf16.mxu1 %v3379_v11 }
 0x516   : > { %5589 = vmatmul.mubr.bf16.gmra.mxu1 %v3380_v35  ;;  %v8696_v35 = vld [vmem:[#allocation25_spill] sm:$0xff] }
 0x520   : > { %3211 = vadd.xlane.f32.xlu0 %v8012_v4 }
 0x521   : > { %974 = vrot.lane.b32.xlu1 %v8690_v43, %s6462_s14 }
 0x525   : > { %1104 = vrot.lane.b32.xlu1 %v8690_v43, %s6463_s30 }
 0x529   : > { %1106 = vrot.lane.b32.xlu1 %v8691_v46, %s6463_s30 }
 0x52f   : > { %v3176_v48 = vpop.xlane.xlu1 %3175 }
 0x530   : > { %6127 = vrcp.f32 %v3176_v48 }
 0x533   : > { %v981_v55 = vpop.permute.xlu1 %980 }
 0x534   : > { %1020 = vst.msk [vmem:[#allocation3 + $0xa4] sm:$0xf] %vm678_vm0, %v981_v55 }
 0x536   : > { %976 = vrot.lane.b32.xlu0 %v8691_v46, %s6462_s14 }
 0x537   : > { %v3174_v36 = vpop.xlane.xlu0 %3173 }
 0x538   : > { %6129 = vrcp.f32 %v3174_v36 }
 0x539   : > { %6131 = vpow2.f32 %v3055_v56 }
 0x53a   : > { %6133 = vpow2.f32 %v3053_v28 }
 0x53b   : > { %v979_v33 = vpop.permute.xlu0 %978 }
 0x53c   : > { %1019 = vst.msk [vmem:[#allocation3 + $0xa0] sm:$0xf] %vm678_vm0, %v979_v33 }
 0x53d   : > { %v6128_v50 = vpop.eup %6127 }
 0x53e   : > { %v3334_v3 = vmul.f32 %v6128_v50, %v7928_v17  ;;  %v8699_v50 = vld [vmem:[#allocation29_spill] sm:$0xff] }
 0x53f   : > { %v2956_v28 = vsub.f32 %v8699_v50, %v8698_v10 }
 0x543   : > { %v5957_v63 = vld [vmem:[#allocation3 + $0xa0] sm:$0xff]  }
 0x544   : > { %5598 = vmatprep.subr.bf16.mxu0 %v5957_v63 }
 0x545   : > { %v6130_v31 = vpop.eup %6129  ;;  %v5546_v39 = vpop.f32.mrf.mxu0  ;;  %5599 = vmatpush3.bf16.msra.mxu0 %v5957_v63 }
 0x546   : > { %v3333_v37 = vmul.f32 %v6130_v31, %v7937_v29  ;;  %v5145_v7 = vpack.c.bf16 %v5546_v39, %v5546_v39  ;;  %v8033_v45 = vpop.eup %6131  ;;  %v3059_v31 = vmul.f32 1.442695, %v2956_v28  ;;  %v8706_v28 = vld [vmem:[#allocation22_spill] sm:$0xff] }
 0x547   : > { %v3479_v22 = vpop.f32.mrf.mxu0  ;;  %v8040_v61 = vpop.eup %6133 }
 0x548   : > { %v3381_v6 = vpack.c.bf16 %v3334_v3, %v3333_v37  ;;  %4043 = vst.msk [vmem:[#allocation5 + $0x8] sm:$0xf] %vm678_vm0, %v5145_v7  ;;  %v5143_v62 = vpack.c.bf16 %v3479_v22, %v3479_v22  ;;  %v8700_v37 = vld [vmem:[#allocation52_spill] sm:$0xff] }
 0x549   : > { %v5547_v12 = vpop.f32.mrf.mxu0  ;;  %v8701_v3 = vld [vmem:[#allocation28_spill] sm:$0xff] }
 0x54a   : > { %5608 = vmatprep.mubr.bf16.mxu0 %v3381_v6  ;;  %4041 = vst.msk [vmem:[#allocation5] sm:$0xf] %vm678_vm0, %v5143_v62  ;;  %v5146_v25 = vpack.c.bf16 %v5547_v12, %v5547_v12  ;;  %v2955_v7 = vsub.f32 %v8701_v3, %v8700_v37  ;;  %v8702_v12 = vld [vmem:[#allocation41_spill] sm:$0xff] }
 0x54b   : > { %v3482_v20 = vpop.f32.mrf.mxu0 }
 0x54c   : > { %4044 = vst.msk [vmem:[#allocation5 + $0xc] sm:$0xf] %vm678_vm0, %v5146_v25  ;;  %v5144_v29 = vpack.c.bf16 %v3482_v20, %v3482_v20  ;;  %v3057_v62 = vmul.f32 1.442695, %v2955_v7  ;;  %v2969_v25 = vsub.f32 %v8702_v12, %v7935_v5 }
 0x54d   : > { %3183 = vadd.xlane.f32.xlu1 %v8033_v45 }
 0x54e   : > { %v5550_v17 = vpop.f32.mrf.mxu0  ;;  %4042 = vst.msk [vmem:[#allocation5 + $0x4] sm:$0xf] %vm678_vm0, %v5144_v29 }
 0x54f   : > { %v5149_v1 = vpack.c.bf16 %v5550_v17, %v5550_v17 }
 0x550   : > { %v3495_v44 = vpop.f32.mrf.mxu0 }
 0x551   : > { %4047 = vst.msk [vmem:[#allocation5 + $0x18] sm:$0xf] %vm678_vm0, %v5149_v1  ;;  %v5147_v42 = vpack.c.bf16 %v3495_v44, %v3495_v44  ;;  %v3085_v44 = vmul.f32 1.442695, %v2969_v25 }
 0x552   : > { %v5551_v27 = vpop.f32.mrf.mxu0 }
 0x553   : > { %4045 = vst.msk [vmem:[#allocation5 + $0x10] sm:$0xf] %vm678_vm0, %v5147_v42  ;;  %v5150_v32 = vpack.c.bf16 %v5551_v27, %v5551_v27  ;;  %v8703_v42 = vld [vmem:[#allocation45_spill] sm:$0xff] }
 0x554   : > { %v3498_v18 = vpop.f32.mrf.mxu0  ;;  %v2970_v27 = vsub.f32 %v8703_v42, %v7939_v8 }
 0x555   : > { %4048 = vst.msk [vmem:[#allocation5 + $0x1c] sm:$0xf] %vm678_vm0, %v5150_v32  ;;  %v5148_v49 = vpack.c.bf16 %v3498_v18, %v3498_v18  ;;  %3181 = vadd.xlane.f32.xlu0 %v8040_v61 }
 0x556   : > { %v5554_v40 = vpop.f32.mrf.mxu0  ;;  %v3087_v5 = vmul.f32 1.442695, %v2970_v27 }
 0x557   : > { %4046 = vst.msk [vmem:[#allocation5 + $0x14] sm:$0xf] %vm678_vm0, %v5148_v49  ;;  %v5153_v51 = vpack.c.bf16 %v5554_v40, %v5554_v40 }
 0x558   : > { %v3511_v23 = vpop.f32.mrf.mxu0 }
 0x559   : > { %4051 = vst.msk [vmem:[#allocation5 + $0x28] sm:$0xf] %vm678_vm0, %v5153_v51  ;;  %v5151_v53 = vpack.c.bf16 %v3511_v23, %v3511_v23 }
 0x55a   : > { %v5555_v52 = vpop.f32.mrf.mxu0 }
 0x55b   : > { %4049 = vst.msk [vmem:[#allocation5 + $0x20] sm:$0xf] %vm678_vm0, %v5151_v53  ;;  %v5154_v14 = vpack.c.bf16 %v5555_v52, %v5555_v52 }
 0x55c   : > { %v3514_v11 = vpop.f32.mrf.mxu0 }
 0x55d   : > { %4052 = vst.msk [vmem:[#allocation5 + $0x2c] sm:$0xf] %vm678_vm0, %v5154_v14  ;;  %v5152_v43 = vpack.c.bf16 %v3514_v11, %v3514_v11  ;;  %v8704_v14 = vld [vmem:[#allocation40_spill] sm:$0xff] }
 0x55e   : > { %972 = vrot.lane.b32.xlu1 %v8696_v35, %s6462_s14  ;;  %v5558_v46 = vpop.f32.mrf.mxu0  ;;  %v2971_v11 = vsub.f32 %v8704_v14, %v7930_v41  ;;  %v8705_v41 = vld [vmem:[#allocation43_spill] sm:$0xff] }
 0x55f   : > { %4050 = vst.msk [vmem:[#allocation5 + $0x24] sm:$0xf] %vm678_vm0, %v5152_v43  ;;  %v5157_v48 = vpack.c.bf16 %v5558_v46, %v5558_v46 }
 0x560   : > { %v3527_v55 = vpop.f32.mrf.mxu0  ;;  %v3089_v46 = vmul.f32 1.442695, %v2971_v11 }
 0x561   : > { %4055 = vst.msk [vmem:[#allocation5 + $0x38] sm:$0xf] %vm678_vm0, %v5157_v48  ;;  %v5155_v0 = vpack.c.bf16 %v3527_v55, %v3527_v55 }
 0x562   : > { %v5559_v59 = vpop.f32.mrf.mxu0 }
 0x563   : > { %4053 = vst.msk [vmem:[#allocation5 + $0x30] sm:$0xf] %vm678_vm0, %v5155_v0  ;;  %v5158_v36 = vpack.c.bf16 %v5559_v59, %v5559_v59 }
 0x564   : > { %v3180_v34 = vpop.xlane.xlu1 %3179  ;;  %v3530_v56 = vpop.f32.mrf.mxu0 }
 0x565   : > { %4056 = vst.msk [vmem:[#allocation5 + $0x3c] sm:$0xf] %vm678_vm0, %v5158_v36  ;;  %v5156_v33 = vpack.c.bf16 %v3530_v56, %v3530_v56  ;;  %6135 = vrcp.f32 %v3180_v34  ;;  %v2972_v34 = vsub.f32 %v8705_v41, %v7933_v54  ;;  %v8718_v41 = vld [vmem:[#allocation44_spill] sm:$0xff] }
 0x567   : > { %4054 = vst.msk [vmem:[#allocation5 + $0x34] sm:$0xf] %vm678_vm0, %v5156_v33  ;;  %v3091_v56 = vmul.f32 1.442695, %v2972_v34  ;;  %v2973_v34 = vsub.f32 %v8718_v41, %v7946_v38 }
 0x568   : > { %v1109_v47 = vpop.permute.xlu1 %1108 }
 0x569   : > { %1149 = vst.msk [vmem:[#allocation3 + $0xe0] sm:$0xf] %vm678_vm0, %v1109_v47 }
 0x56b   : > { %970 = vrot.lane.b32.xlu0 %v8697_v60, %s6462_s14 }
 0x56c   : > { %v3178_v63 = vpop.xlane.xlu0 %3177 }
 0x56d   : > { %6137 = vrcp.f32 %v3178_v63 }
 0x570   : > { %v3206_v39 = vpop.xlane.xlu0 %3205 }
 0x571   : > { %6139 = vrcp.f32 %v3206_v39  ;;  %v8709_v39 = vld [vmem:[#allocation35_spill] sm:$0xff] }
 0x572   : > { %6141 = vpow2.f32 %v3059_v31  ;;  %v6136_v6 = vpop.eup %6135  ;;  %v8708_v31 = vld [vmem:[#allocation59_spill] sm:$0xff] }
 0x573   : > { %v8069_v1 = vmul.f32 %v6136_v6, %v7969_v15  ;;  %v2958_v37 = vsub.f32 %v8709_v39, %v8708_v31  ;;  %v8710_v6 = vld [vmem:[#allocation58_spill] sm:$0xff] }
 0x574   : > { %v3208_v22 = vpop.xlane.xlu0 %3207 }
 0x575   : > { %6143 = vrcp.f32 %v3208_v22  ;;  %v3063_v7 = vmul.f32 1.442695, %v2958_v37 }
 0x576   : > { %6145 = vpow2.f32 %v3057_v62  ;;  %v8711_v62 = vld [vmem:[#allocation34_spill] sm:$0xff] }
 0x577   : > { %6147 = vpow2.f32 %v3085_v44  ;;  %v2957_v12 = vsub.f32 %v8711_v62, %v8710_v6  ;;  %v8720_v62 = vld [vmem:[#allocation42_spill] sm:$0xff] }
 0x578   : > { %v1111_v20 = vpop.permute.xlu0 %1110  ;;  %6149 = vpow2.f32 %v3087_v5 }
 0x579   : > { %1150 = vst.msk [vmem:[#allocation3 + $0xe4] sm:$0xf] %vm678_vm0, %v1111_v20  ;;  %v3061_v20 = vmul.f32 1.442695, %v2957_v12  ;;  %v2975_v12 = vsub.f32 %v8720_v62, %v7942_v26 }
 0x57a   : > { %v6138_v29 = vpop.eup %6137 }
 0x57b   : > { %v8066_v17 = vmul.f32 %v6138_v29, %v7976_v9 }
 0x57d   : > { %v3382_v32 = vpack.c.bf16 %v8069_v1, %v8066_v17 }
 0x57e   : > { %v6140_v18 = vpop.eup %6139 }
 0x57f   : > { %v8075_v40 = vpop.eup %6141  ;;  %v3349_v15 = vmul.f32 %v6140_v18, %v7979_v21 }
 0x580   : > { %v5958_v49 = vld [vmem:[#allocation3 + $0xe0] sm:$0xff]  }
 0x581   : > { %5630 = vmatprep.subr.bf16.mxu1 %v5958_v49 }
 0x582   : > { %v6144_v51 = vpop.eup %6143  ;;  %3187 = vadd.xlane.f32.xlu1 %v8075_v40  ;;  %5631 = vmatpush3.bf16.msra.mxu1 %v5958_v49 }
 0x583   : > { %v3350_v9 = vmul.f32 %v6144_v51, %v7982_v13  ;;  %v8080_v23 = vpop.eup %6145  ;;  %v8712_v51 = vld [vmem:[#allocation21_spill] sm:$0xff] }
 0x584   : > { %v8083_v53 = vpop.eup %6147 }
 0x585   : > { %v3389_v8 = vpack.c.bf16 %v3350_v9, %v3349_v15  ;;  %v8086_v52 = vpop.eup %6149  ;;  %v8714_v9 = vld [vmem:[#allocation57_spill] sm:$0xff] }
 0x587   : > { %5640 = vmatprep.mubr.bf16.mxu1 %v3389_v8  ;;  %v8715_v8 = vld [vmem:[#allocation33_spill] sm:$0xff] }
 0x58a   : > { %3185 = vadd.xlane.f32.xlu0 %v8080_v23 }
 0x58e   : > { %3213 = vadd.xlane.f32.xlu0 %v8083_v53 }
 0x592   : > { %3215 = vadd.xlane.f32.xlu0 %v8086_v52 }
 0x593   : > { %1100 = vrot.lane.b32.xlu1 %v8697_v60, %s6463_s30 }
 0x599   : > { %v3210_v21 = vpop.xlane.xlu1 %3209 }
 0x59a   : > { %6151 = vrcp.f32 %v3210_v21  ;;  %v2960_v21 = vsub.f32 %v8715_v8, %v8714_v9  ;;  %v8724_v9 = vld [vmem:[#allocation36_spill] sm:$0xff] }
 0x59b   : > { %6153 = vpow2.f32 %v3089_v46  ;;  %v8717_v46 = vld [vmem:[#allocation32_spill] sm:$0xff] }
 0x59c   : > { %v3067_v14 = vmul.f32 1.442695, %v2960_v21 }
 0x59d   : > { %v975_v13 = vpop.permute.xlu1 %974 }
 0x59e   : > { %1017 = vst.msk [vmem:[#allocation3 + $0x98] sm:$0xf] %vm678_vm0, %v975_v13 }
 0x5a1   : > { %v1105_v43 = vpop.permute.xlu1 %1104 }
 0x5a2   : > { %1147 = vst.msk [vmem:[#allocation3 + $0xd8] sm:$0xf] %vm678_vm0, %v1105_v43  ;;  %v8716_v43 = vld [vmem:[#allocation56_spill] sm:$0xff]  ;;  %v8205_v41 = vpop.f32.mrf.mxu1 }
 0x5a5   : > { %v1107_v48 = vpop.permute.xlu1 %1106 }
 0x5a6   : > { %1148 = vst.msk [vmem:[#allocation3 + $0xdc] sm:$0xf] %vm678_vm0, %v1107_v48  ;;  %v2959_v48 = vsub.f32 %v8717_v46, %v8716_v43 }
 0x5a7   : > { %v6152_v36 = vpop.eup %6151 }
 0x5a8   : > { %1102 = vrot.lane.b32.xlu0 %v8696_v35, %s6463_s30  ;;  %v8101_v47 = vpop.eup %6153  ;;  %v8105_v35 = vmul.f32 %v6152_v36, %v8005_v57  ;;  %v8707_v57 = vld [vmem:[#allocation23_spill] sm:$0xff] }
 0x5a9   : > { %v3212_v55 = vpop.xlane.xlu0 %3211 }
 0x5aa   : > { %6155 = vrcp.f32 %v3212_v55 }
 0x5ab   : > { %6157 = vpow2.f32 %v3091_v56 }
 0x5ad   : > { %v977_v0 = vpop.permute.xlu0 %976  ;;  %v5959_v59 = vld [vmem:[#allocation3 + $0xd8] sm:$0xff]  }
 0x5ae   : > { %1018 = vst.msk [vmem:[#allocation3 + $0x9c] sm:$0xf] %vm678_vm0, %v977_v0  ;;  %5632 = vmatprep.subr.bf16.mxu1 %v5959_v59 }
 0x5af   : > { %5633 = vmatpush3.bf16.msra.mxu1 %v5959_v59  ;;  %v3065_v59 = vmul.f32 1.442695, %v2959_v48  ;;  %v8726_v48 = vld [vmem:[#allocation46_spill] sm:$0xff] }
 0x5b5   : > { %v5960_v33 = vld [vmem:[#allocation3 + $0x98] sm:$0xff]  }
 0x5b6   : > { %5600 = vmatprep.subr.bf16.mxu0 %v5960_v33 }
 0x5b7   : > { %v6156_v60 = vpop.eup %6155  ;;  %3217 = vadd.xlane.f32.xlu1 %v8101_v47  ;;  %5601 = vmatpush3.bf16.msra.mxu0 %v5960_v33 }
 0x5b8   : > { %v8108_v10 = vmul.f32 %v6156_v60, %v8012_v4  ;;  %v8112_v50 = vpop.eup %6157 }
 0x5ba   : > { %v3390_v54 = vpack.c.bf16 %v8108_v10, %v8105_v35 }
 0x5c7   : > { %3219 = vadd.xlane.f32.xlu0 %v8112_v50 }
 0x5c8   : > { %966 = vrot.lane.b32.xlu1 %v8706_v28, %s6462_s14 }
 0x5cc   : > { %1096 = vrot.lane.b32.xlu1 %v8706_v28, %s6463_s30  ;;  %v3093_v28 = vmul.f32 1.442695, %v2973_v34 }
 0x5d0   : > { %1098 = vrot.lane.b32.xlu1 %v8707_v57, %s6463_s30 }
 0x5d6   : > { %v3184_v63 = vpop.xlane.xlu1 %3183 }
 0x5d7   : > { %6159 = vrcp.f32 %v3184_v63 }
 0x5da   : > { %v973_v4 = vpop.permute.xlu1 %972 }
 0x5db   : > { %1016 = vst.msk [vmem:[#allocation3 + $0x94] sm:$0xf] %vm678_vm0, %v973_v4 }
 0x5dd   : > { %968 = vrot.lane.b32.xlu0 %v8707_v57, %s6462_s14  ;;  %v8719_v57 = vld [vmem:[#allocation49_spill] sm:$0xff] }
 0x5de   : > { %v3182_v3 = vpop.xlane.xlu0 %3181  ;;  %v2974_v63 = vsub.f32 %v8719_v57, %v7950_v58 }
 0x5df   : > { %6161 = vrcp.f32 %v3182_v3 }
 0x5e0   : > { %6163 = vpow2.f32 %v3063_v7  ;;  %v3095_v38 = vmul.f32 1.442695, %v2974_v63 }
 0x5e1   : > { %6165 = vpow2.f32 %v3061_v20  ;;  %v8721_v20 = vld [vmem:[#allocation62_spill] sm:$0xff] }
 0x5e2   : > { %v971_v22 = vpop.permute.xlu0 %970 }
 0x5e3   : > { %1015 = vst.msk [vmem:[#allocation3 + $0x90] sm:$0xf] %vm678_vm0, %v971_v22 }
 0x5e4   : > { %v6160_v25 = vpop.eup %6159 }
 0x5e5   : > { %v8133_v27 = vmul.f32 %v6160_v25, %v8033_v45  ;;  %v8713_v45 = vld [vmem:[#allocation20_spill] sm:$0xff] }
 0x5ea   : > { %v5961_v29 = vld [vmem:[#allocation3 + $0x90] sm:$0xff]  }
 0x5eb   : > { %5602 = vmatprep.subr.bf16.mxu0 %v5961_v29 }
 0x5ec   : > { %v6162_v44 = vpop.eup %6161  ;;  %5603 = vmatpush3.bf16.msra.mxu0 %v5961_v29  ;;  %v8722_v29 = vld [vmem:[#allocation38_spill] sm:$0xff] }
 0x5ed   : > { %v8130_v42 = vmul.f32 %v6162_v44, %v8040_v61  ;;  %v8137_v5 = vpop.eup %6163  ;;  %v2961_v44 = vsub.f32 %v8722_v29, %v8721_v20 }
 0x5ee   : > { %v8140_v49 = vpop.eup %6165 }
 0x5ef   : > { %v3383_v18 = vpack.c.bf16 %v8133_v27, %v8130_v42  ;;  %v3069_v21 = vmul.f32 1.442695, %v2961_v44 }
 0x5f4   : > { %3191 = vadd.xlane.f32.xlu1 %v8137_v5 }
 0x5fc   : > { %3189 = vadd.xlane.f32.xlu0 %v8140_v49 }
 0x605   : > { %964 = vrot.lane.b32.xlu1 %v8712_v51, %s6462_s14 }
 0x60b   : > { %v3188_v61 = vpop.xlane.xlu1 %3187 }
 0x60c   : > { %6167 = vrcp.f32 %v3188_v61  ;;  %v3097_v61 = vmul.f32 1.442695, %v2975_v12 }
 0x60f   : > { %v1101_v15 = vpop.permute.xlu1 %1100 }
 0x610   : > { %1145 = vst.msk [vmem:[#allocation3 + $0xd0] sm:$0xf] %vm678_vm0, %v1101_v15 }
 0x612   : > { %962 = vrot.lane.b32.xlu0 %v8713_v45, %s6462_s14 }
 0x613   : > { %v3186_v13 = vpop.xlane.xlu0 %3185 }
 0x614   : > { %6169 = vrcp.f32 %v3186_v13 }
 0x617   : > { %v3214_v11 = vpop.xlane.xlu0 %3213 }
 0x618   : > { %6171 = vrcp.f32 %v3214_v11 }
 0x619   : > { %6173 = vpow2.f32 %v3067_v14  ;;  %v6168_v0 = vpop.eup %6167  ;;  %v8725_v14 = vld [vmem:[#allocation48_spill] sm:$0xff] }
 0x61a   : > { %v8159_v60 = vmul.f32 %v6168_v0, %v8075_v40  ;;  %v2977_v11 = vsub.f32 %v8725_v14, %v7956_v19  ;;  %v8727_v0 = vld [vmem:[#allocation47_spill] sm:$0xff] }
 0x61b   : > { %v3216_v55 = vpop.xlane.xlu0 %3215  ;;  %v8729_v19 = vld [vmem:[#allocation39_spill] sm:$0xff] }
 0x61c   : > { %6175 = vrcp.f32 %v3216_v55  ;;  %v3101_v55 = vmul.f32 1.442695, %v2977_v11 }
 0x61d   : > { %6177 = vpow2.f32 %v3065_v59  ;;  %v2976_v59 = vsub.f32 %v8727_v0, %v7944_v24 }
 0x61e   : > { %6179 = vpow2.f32 %v3093_v28 }
 0x61f   : > { %v1103_v36 = vpop.permute.xlu0 %1102  ;;  %6181 = vpow2.f32 %v3095_v38  ;;  %v3099_v57 = vmul.f32 1.442695, %v2976_v59 }
 0x620   : > { %1146 = vst.msk [vmem:[#allocation3 + $0xd4] sm:$0xf] %vm678_vm0, %v1103_v36 }
 0x621   : > { %v6170_v56 = vpop.eup %6169 }
 0x622   : > { %v8156_v33 = vmul.f32 %v6170_v56, %v8080_v23  ;;  %v8728_v56 = vld [vmem:[#allocation63_spill] sm:$0xff] }
 0x623   : > { %v2962_v28 = vsub.f32 %v8729_v19, %v8728_v56 }
 0x624   : > { %v3384_v4 = vpack.c.bf16 %v8159_v60, %v8156_v33 }
 0x625   : > { %v6172_v31 = vpop.eup %6171  ;;  %v3071_v62 = vmul.f32 1.442695, %v2962_v28 }
 0x626   : > { %v8165_v37 = vpop.eup %6173  ;;  %v8169_v40 = vmul.f32 %v6172_v31, %v8083_v53 }
 0x627   : > { %v5962_v39 = vld [vmem:[#allocation3 + $0xd0] sm:$0xff]  }
 0x628   : > { %5634 = vmatprep.subr.bf16.mxu1 %v5962_v39 }
 0x629   : > { %v6176_v3 = vpop.eup %6175  ;;  %3195 = vadd.xlane.f32.xlu1 %v8165_v37  ;;  %5635 = vmatpush3.bf16.msra.mxu1 %v5962_v39 }
 0x62a   : > { %v8172_v23 = vmul.f32 %v6176_v3, %v8086_v52  ;;  %v8176_v7 = vpop.eup %6177  ;;  %v8730_v3 = vld [vmem:[#allocation61_spill] sm:$0xff] }
 0x62b   : > { %v8179_v22 = vpop.eup %6179 }
 0x62c   : > { %v3391_v58 = vpack.c.bf16 %v8172_v23, %v8169_v40  ;;  %v8182_v6 = vpop.eup %6181 }
 0x631   : > { %3193 = vadd.xlane.f32.xlu0 %v8176_v7 }
 0x635   : > { %3221 = vadd.xlane.f32.xlu0 %v8179_v22 }
 0x639   : > { %3223 = vadd.xlane.f32.xlu0 %v8182_v6 }
 0x63a   : > { %1092 = vrot.lane.b32.xlu1 %v8713_v45, %s6463_s30  ;;  %v8723_v45 = vld [vmem:[#allocation60_spill] sm:$0xff] }
 0x63b   : > { %v2963_v8 = vsub.f32 %v8724_v9, %v8723_v45 }
 0x63d   : > { %v3073_v13 = vmul.f32 1.442695, %v2963_v8 }
 0x640   : > { %v3218_v53 = vpop.xlane.xlu1 %3217 }
 0x641   : > { %6183 = vrcp.f32 %v3218_v53  ;;  %v8731_v53 = vld [vmem:[#allocation37_spill] sm:$0xff] }
 0x642   : > { %6185 = vpow2.f32 %v3097_v61 }
 0x644   : > { %v967_v52 = vpop.permute.xlu1 %966 }
 0x645   : > { %1013 = vst.msk [vmem:[#allocation3 + $0x88] sm:$0xf] %vm678_vm0, %v967_v52  ;;  %v2964_v52 = vsub.f32 %v8731_v53, %v8730_v3 }
 0x647   : > { %v3075_v29 = vmul.f32 1.442695, %v2964_v52 }
 0x648   : > { %v1097_v25 = vpop.permute.xlu1 %1096 }
 0x649   : > { %1143 = vst.msk [vmem:[#allocation3 + $0xc8] sm:$0xf] %vm678_vm0, %v1097_v25 }
 0x64c   : > { %v1099_v15 = vpop.permute.xlu1 %1098 }
 0x64d   : > { %1144 = vst.msk [vmem:[#allocation3 + $0xcc] sm:$0xf] %vm678_vm0, %v1099_v15  ;;  %v8733_v15 = vld [vmem:[#allocation50_spill] sm:$0xff] }
 0x64e   : > { %v6184_v36 = vpop.eup %6183  ;;  %v2980_v45 = vsub.f32 %v8733_v15, %v7954_v16 }
 0x64f   : > { %1094 = vrot.lane.b32.xlu0 %v8712_v51, %s6463_s30  ;;  %v2979_v51 = vsub.f32 %v8726_v48, %v7952_v2  ;;  %v8209_v31 = vpop.eup %6185  ;;  %v3624_v2 = vpop.f32.mrf.mxu1  ;;  %v8213_v24 = vmul.f32 %v6184_v36, %v8101_v47  ;;  %v8732_v47 = vld [vmem:[#allocation51_spill] sm:$0xff] }
 0x650   : > { %v3220_v26 = vpop.xlane.xlu0 %3219  ;;  %v2978_v44 = vsub.f32 %v8732_v47, %v7962_v30  ;;  %v5159_v59 = vpack.c.bf16 %v3624_v2, %v3624_v2 }
 0x651   : > { %6187 = vrcp.f32 %v3220_v26  ;;  %v3105_v34 = vmul.f32 1.442695, %v2979_v51  ;;  %v5579_v20 = vpop.f32.mrf.mxu1 }
 0x652   : > { %6189 = vpow2.f32 %v3069_v21  ;;  %v3103_v9 = vmul.f32 1.442695, %v2978_v44 }
 0x653   : > { %6191 = vpow2.f32 %v3073_v13  ;;  %v3627_v61 = vpop.f32.mrf.mxu1  ;;  %v3107_v13 = vmul.f32 1.442695, %v2980_v45 }
 0x654   : > { %v969_v43 = vpop.permute.xlu0 %968  ;;  %v5963_v46 = vld [vmem:[#allocation3 + $0xc8] sm:$0xff]   ;;  %6193 = vpow2.f32 %v3101_v55  ;;  %v5160_v52 = vpack.c.bf16 %v3627_v61, %v3627_v61 }
 0x655   : > { %1014 = vst.msk [vmem:[#allocation3 + $0x8c] sm:$0xf] %vm678_vm0, %v969_v43  ;;  %5636 = vmatprep.subr.bf16.mxu1 %v5963_v46  ;;  %6195 = vpow2.f32 %v3105_v34  ;;  %v8232_v8 = vpop.f32.mrf.mxu1 }
 0x656   : > { %5637 = vmatpush3.bf16.msra.mxu1 %v5963_v46  ;;  %6197 = vpow2.f32 %v3099_v57 }
 0x657   : > { %6199 = vpow2.f32 %v3071_v62  ;;  %v8239_v30 = vpop.f32.mrf.mxu1  ;;  %v5161_v62 = vpack.c.bf16 %v8205_v41, %v8205_v41 }
 0x658   : > { %6201 = vpow2.f32 %v3075_v29 }
 0x659   : > { %6203 = vpow2.f32 %v3103_v9  ;;  %v8245_v16 = vpop.f32.mrf.mxu1 }
 0x65a   : > { %6205 = vpow2.f32 %v3107_v13 }
 0x65b   : > { %v8250_v43 = vpop.f32.mrf.mxu1 }
 0x65c   : > { %v5964_v63 = vld [vmem:[#allocation3 + $0x88] sm:$0xff]  }
 0x65d   : > { %5604 = vmatprep.subr.bf16.mxu0 %v5964_v63  ;;  %v5586_v48 = vpop.f32.mrf.mxu1 }
 0x65e   : > { %v6188_v38 = vpop.eup %6187  ;;  %3225 = vadd.xlane.f32.xlu1 %v8209_v31  ;;  %5605 = vmatpush3.bf16.msra.mxu0 %v5964_v63  ;;  %v5169_v47 = vpack.c.bf16 %v5586_v48, %v5586_v48 }
 0x65f   : > { %v8216_v39 = vmul.f32 %v6188_v38, %v8112_v50  ;;  %v8220_v12 = vpop.eup %6189  ;;  %v3656_v55 = vpop.f32.mrf.mxu1  ;;  %v5162_v38 = vpack.c.bf16 %v5579_v20, %v5579_v20 }
 0x660   : > { %v8227_v50 = vpop.eup %6191  ;;  %v5167_v56 = vpack.c.bf16 %v3656_v55, %v3656_v55 }
 0x661   : > { %v3392_v25 = vpack.c.bf16 %v8216_v39, %v8213_v24  ;;  %v8234_v21 = vpop.eup %6193  ;;  %v5587_v36 = vpop.f32.mrf.mxu1 }
 0x662   : > { %3197 = vadd.xlane.f32.xlu1 %v8220_v12  ;;  %v8237_v26 = vpop.eup %6195  ;;  %v5170_v2 = vpack.c.bf16 %v5587_v36, %v5587_v36 }
 0x663   : > { %v8241_v14 = vpop.eup %6197  ;;  %v3659_v28 = vpop.f32.mrf.mxu1 }
 0x664   : > { %v8247_v11 = vpop.eup %6199  ;;  %v5168_v57 = vpack.c.bf16 %v3659_v28, %v3659_v28 }
 0x665   : > { %v8252_v46 = vpop.eup %6201 }
 0x666   : > { %3201 = vadd.xlane.f32.xlu1 %v8227_v50  ;;  %v8255_v51 = vpop.eup %6203 }
 0x667   : > { %v8258_v0 = vpop.eup %6205 }
 0x66a   : > { %3229 = vadd.xlane.f32.xlu1 %v8234_v21 }
 0x66e   : > { %3233 = vadd.xlane.f32.xlu1 %v8237_v26  ;;  %3227 = vadd.xlane.f32.xlu0 %v8241_v14 }
 0x672   : > { %3199 = vadd.xlane.f32.xlu0 %v8247_v11 }
 0x676   : > { %3203 = vadd.xlane.f32.xlu0 %v8252_v46 }
 0x67a   : > { %3231 = vadd.xlane.f32.xlu0 %v8255_v51 }
 0x67d   : > { %v3192_v34 = vpop.xlane.xlu1 %3191 }
 0x67e   : > { %3235 = vadd.xlane.f32.xlu0 %v8258_v0 }
 0x67f   : > { %4105 = vrot.lane.b32.xlu1 %v5159_v59, %s6463_s30 }
 0x681   : > { %v965_v19 = vpop.permute.xlu1 %964 }
 0x682   : > { %1012 = vst.msk [vmem:[#allocation3 + $0x84] sm:$0xf] %vm678_vm0, %v965_v19 }
 0x683   : > { %4121 = vrot.lane.b32.xlu1 %v5167_v56, %s6463_s30 }
 0x685   : > { %v3190_v63 = vpop.xlane.xlu0 %3189 }
 0x686   : > { %6207 = vrcp.f32 %v3190_v63 }
 0x687   : > { %4123 = vrot.lane.b32.xlu1 %v5168_v57, %s6463_s30  ;;  %6209 = vrcp.f32 %v3192_v34 }
 0x689   : > { %v963_v3 = vpop.permute.xlu0 %962 }
 0x68a   : > { %1011 = vst.msk [vmem:[#allocation3 + $0x80] sm:$0xf] %vm678_vm0, %v963_v3 }
 0x68b   : > { %4111 = vrot.lane.b32.xlu1 %v5162_v38, %s6463_s30 }
 0x68f   : > { %4127 = vrot.lane.b32.xlu1 %v5170_v2, %s6463_s30 }
 0x691   : > { %v5965_v53 = vld [vmem:[#allocation3 + $0x80] sm:$0xff]  }
 0x692   : > { %5606 = vmatprep.subr.bf16.mxu0 %v5965_v53 }
 0x693   : > { %5607 = vmatpush3.bf16.msra.mxu0 %v5965_v53  ;;  %v6208_v20 = vpop.eup %6207 }
 0x694   : > { %4107 = vrot.lane.b32.xlu0 %v5160_v52, %s6463_s30  ;;  %v6210_v29 = vpop.eup %6209  ;;  %v3341_v44 = vmul.f32 %v6208_v20, %v8140_v49 }
 0x695   : > { %v3342_v61 = vmul.f32 %v6210_v29, %v8137_v5 }
 0x696   : > { %5609 = vmatmul.mubr.bf16.vlgmr.msra.gmra.mxu0 %v3382_v32 }
 0x697   : > { %5612 = vmatprep.mubr.bf16.mxu0 %v3383_v18  ;;  %v3385_v41 = vpack.c.bf16 %v3342_v61, %v3341_v44 }
 0x698   : > { %4109 = vrot.lane.b32.xlu0 %v5161_v62, %s6463_s30 }
 0x69c   : > { %4125 = vrot.lane.b32.xlu0 %v5169_v47, %s6463_s30 }
 0x69e   : > { %5613 = vmatmul.mubr.bf16.gmra.mxu0 %v3384_v4 }
 0x69f   : > { %5616 = vmatprep.mubr.bf16.mxu0 %v3385_v41 }
 0x6b2   : > { %v3196_v17 = vpop.xlane.xlu1 %3195 }
 0x6b3   : > { %6211 = vrcp.f32 %v3196_v17 }
 0x6b6   : > { %v1093_v1 = vpop.permute.xlu1 %1092 }
 0x6b7   : > { %1141 = vst.msk [vmem:[#allocation3 + $0xc0] sm:$0xf] %vm678_vm0, %v1093_v1 }
 0x6ba   : > { %v3194_v32 = vpop.xlane.xlu0 %3193 }
 0x6bb   : > { %6213 = vrcp.f32 %v3194_v32 }
 0x6be   : > { %v3222_v42 = vpop.xlane.xlu0 %3221 }
 0x6c0   : > { %v6212_v18 = vpop.eup %6211 }
 0x6c1   : > { %v3344_v60 = vmul.f32 %v6212_v18, %v8165_v37 }
 0x6c2   : > { %v3224_v27 = vpop.xlane.xlu0 %3223 }
 0x6c3   : > { %6215 = vrcp.f32 %v3224_v27 }
 0x6c4   : > { %6217 = vrcp.f32 %v3222_v42 }
 0x6c6   : > { %v1095_v49 = vpop.permute.xlu0 %1094 }
 0x6c7   : > { %1142 = vst.msk [vmem:[#allocation3 + $0xc4] sm:$0xf] %vm678_vm0, %v1095_v49 }
 0x6c8   : > { %v6214_v5 = vpop.eup %6213 }
 0x6c9   : > { %v3343_v33 = vmul.f32 %v6214_v5, %v8176_v7 }
 0x6cb   : > { %v3386_v4 = vpack.c.bf16 %v3344_v60, %v3343_v33 }
 0x6cd   : > { %5617 = vmatmul.mubr.bf16.gmra.mxu0 %v3386_v4  ;;  %v8323_v4 = vpop.f32.mrf.mxu1 }
 0x6ce   : > { %v5966_v15 = vld [vmem:[#allocation3 + $0xc0] sm:$0xff]  }
 0x6cf   : > { %5638 = vmatprep.subr.bf16.mxu1 %v5966_v15 }
 0x6d0   : > { %5639 = vmatpush3.bf16.msra.mxu1 %v5966_v15  ;;  %v6216_v45 = vpop.eup %6215 }
 0x6d1   : > { %v6218_v9 = vpop.eup %6217  ;;  %v3358_v13 = vmul.f32 %v6216_v45, %v8182_v6 }
 0x6d2   : > { %v3357_v7 = vmul.f32 %v6218_v9, %v8179_v22 }
 0x6d3   : > { %5641 = vmatmul.mubr.bf16.vlgmr.msra.gmra.mxu1 %v3390_v54 }
 0x6d4   : > { %5644 = vmatprep.mubr.bf16.mxu1 %v3391_v58  ;;  %v3393_v37 = vpack.c.bf16 %v3358_v13, %v3357_v7 }
 0x6db   : > { %5645 = vmatmul.mubr.bf16.gmra.mxu1 %v3392_v25 }
 0x6dc   : > { %5648 = vmatprep.mubr.bf16.mxu1 %v3393_v37 }
 0x6e7   : > { %v3226_v48 = vpop.xlane.xlu1 %3225 }
 0x6e8   : > { %6219 = vrcp.f32 %v3226_v48 }
 0x6eb   : > { %v3198_v55 = vpop.xlane.xlu1 %3197 }
 0x6ef   : > { %v3202_v59 = vpop.xlane.xlu1 %3201 }
 0x6f3   : > { %v3230_v35 = vpop.xlane.xlu1 %3229 }
 0x6f5   : > { %v6220_v39 = vpop.eup %6219 }
 0x6f6   : > { %v3359_v19 = vmul.f32 %v6220_v39, %v8209_v31  ;;  %v5968_v39 = vld [vmem:[#allocation12 + $0x38] sm:$0xff]  }
 0x6f7   : > { %v3234_v10 = vpop.xlane.xlu1 %3233  ;;  %v3228_v54 = vpop.xlane.xlu0 %3227  ;;  %5656 = vmatprep.subr.bf16.mxu0 %v5968_v39  ;;  %5688 = vmatprep.subr.bf16.mxu1 %v5968_v39 }
 0x6f8   : > { %6221 = vrcp.f32 %v3228_v54  ;;  %5657 = vmatpush3.bf16.msra.mxu0 %v5968_v39  ;;  %5696 = vmatpush3.bf16.msra.mxu1 %v5968_v39 }
 0x6f9   : > { %6223 = vrcp.f32 %v3198_v55 }
 0x6fb   : > { %v4106_v40 = vpop.permute.xlu1 %4105  ;;  %v3200_v23 = vpop.xlane.xlu0 %3199 }
 0x6fc   : > { %4154 = vst.msk [vmem:[#allocation5] sm:$0xf] %vm4153_vm3, %v4106_v40  ;;  %6225 = vrcp.f32 %v3200_v23 }
 0x6fd   : > { %6227 = vrcp.f32 %v3202_v59 }
 0x6ff   : > { %v4122_v58 = vpop.permute.xlu1 %4121  ;;  %v3204_v22 = vpop.xlane.xlu0 %3203 }
 0x700   : > { %4162 = vst.msk [vmem:[#allocation5 + $0x20] sm:$0xf] %vm4153_vm3, %v4122_v58  ;;  %6229 = vrcp.f32 %v3204_v22 }
 0x701   : > { %6231 = vrcp.f32 %v3230_v35 }
 0x703   : > { %v4124_v6 = vpop.permute.xlu1 %4123  ;;  %v3232_v24 = vpop.xlane.xlu0 %3231 }
 0x704   : > { %4163 = vst.msk [vmem:[#allocation5 + $0x24] sm:$0xf] %vm4153_vm3, %v4124_v6  ;;  %6233 = vrcp.f32 %v3232_v24 }
 0x705   : > { %v6222_v25 = vpop.eup %6221  ;;  %6235 = vrcp.f32 %v3234_v10 }
 0x706   : > { %v6224_v34 = vpop.eup %6223  ;;  %v3360_v28 = vmul.f32 %v6222_v25, %v8241_v14  ;;  %v5969_v25 = vld [vmem:[#allocation12 + $0x30] sm:$0xff]  }
 0x707   : > { %v4112_v36 = vpop.permute.xlu1 %4111  ;;  %v3236_v56 = vpop.xlane.xlu0 %3235  ;;  %v3345_v38 = vmul.f32 %v6224_v34, %v8220_v12  ;;  %5658 = vmatprep.subr.bf16.mxu0 %v5969_v25  ;;  %5689 = vmatprep.subr.bf16.mxu1 %v5969_v25 }
 0x708   : > { %4157 = vst.msk [vmem:[#allocation5 + $0xc] sm:$0xf] %vm4153_vm3, %v4112_v36  ;;  %6237 = vrcp.f32 %v3236_v56  ;;  %v3394_v63 = vpack.c.bf16 %v3360_v28, %v3359_v19  ;;  %v5970_v36 = vld [vmem:[#allocation12 + $0x28] sm:$0xff]   ;;  %5659 = vmatpush3.bf16.msra.mxu0 %v5969_v25  ;;  %5697 = vmatpush3.bf16.msra.mxu1 %v5969_v25  ;;  %v5971_v56 = vld [vmem:[#allocation12 + $0x20] sm:$0xff]  }
 0x709   : > { %v6226_v57 = vpop.eup %6225  ;;  %5660 = vmatprep.subr.bf16.mxu0 %v5970_v36  ;;  %5690 = vmatprep.subr.bf16.mxu1 %v5970_v36 }
 0x70a   : > { %v3346_v3 = vmul.f32 %v6226_v57, %v8247_v11  ;;  %v6228_v2 = vpop.eup %6227  ;;  %5649 = vmatmul.mubr.bf16.gmra.mxu1 %v3394_v63  ;;  %v5972_v57 = vld [vmem:[#allocation12 + $0x18] sm:$0xff]  }
 0x70b   : > { %v4128_v53 = vpop.permute.xlu1 %4127  ;;  %v4108_v52 = vpop.permute.xlu0 %4107  ;;  %v3347_v14 = vmul.f32 %v6228_v2, %v8227_v50 }
 0x70c   : > { %4165 = vst.msk [vmem:[#allocation5 + $0x2c] sm:$0xf] %vm4153_vm3, %v4128_v53  ;;  %4155 = vst.msk [vmem:[#allocation5 + $0x4] sm:$0xf] %vm4153_vm3, %v4108_v52  ;;  %v3387_v31 = vpack.c.bf16 %v3346_v3, %v3345_v38  ;;  %5661 = vmatpush3.bf16.msra.mxu0 %v5970_v36  ;;  %5698 = vmatpush3.bf16.msra.mxu1 %v5970_v36  ;;  %v5973_v38 = vld [vmem:[#allocation12 + $0x10] sm:$0xff]   ;;  %v5974_v53 = vld [vmem:[#allocation12 + $0x8] sm:$0xff]  }
 0x70d   : > { %v6230_v62 = vpop.eup %6229  ;;  %5662 = vmatprep.subr.bf16.mxu0 %v5971_v56  ;;  %5691 = vmatprep.subr.bf16.mxu1 %v5971_v56 }
 0x70e   : > { %5620 = vmatprep.mubr.bf16.mxu0 %v3387_v31  ;;  %v3348_v20 = vmul.f32 %v6230_v62, %v8252_v46  ;;  %v6232_v29 = vpop.eup %6231 }
 0x70f   : > { %v4110_v47 = vpop.permute.xlu0 %4109  ;;  %v3361_v44 = vmul.f32 %v6232_v29, %v8234_v21 }
 0x710   : > { %4156 = vst.msk [vmem:[#allocation5 + $0x8] sm:$0xf] %vm4153_vm3, %v4110_v47  ;;  %v3388_v12 = vpack.c.bf16 %v3348_v20, %v3347_v14  ;;  %5663 = vmatpush3.bf16.msra.mxu0 %v5971_v56  ;;  %5699 = vmatpush3.bf16.msra.mxu1 %v5971_v56  ;;  %v5975_v20 = vld [vmem:[#allocation12] sm:$0xff]  }
 0x711   : > { %v6234_v11 = vpop.eup %6233  ;;  %5664 = vmatprep.subr.bf16.mxu0 %v5972_v57  ;;  %5692 = vmatprep.subr.bf16.mxu1 %v5972_v57 }
 0x712   : > { %5621 = vmatmul.mubr.bf16.gmra.mxu0 %v3388_v12  ;;  %v3362_v61 = vmul.f32 %v6234_v11, %v8255_v51  ;;  %v6236_v41 = vpop.eup %6235 }
 0x713   : > { %v4126_v17 = vpop.permute.xlu0 %4125  ;;  %v3363_v50 = vmul.f32 %v6236_v41, %v8237_v26  ;;  %v5163_v41 = vpack.c.bf16 %v8239_v30, %v8239_v30 }
 0x714   : > { %4164 = vst.msk [vmem:[#allocation5 + $0x28] sm:$0xf] %vm4153_vm3, %v4126_v17  ;;  %v3395_v1 = vpack.c.bf16 %v3362_v61, %v3361_v44  ;;  %5665 = vmatpush3.bf16.msra.mxu0 %v5972_v57  ;;  %5700 = vmatpush3.bf16.msra.mxu1 %v5972_v57 }
 0x715   : > { %v6238_v32 = vpop.eup %6237  ;;  %5666 = vmatprep.subr.bf16.mxu0 %v5973_v38  ;;  %5693 = vmatprep.subr.bf16.mxu1 %v5973_v38 }
 0x716   : > { %5652 = vmatprep.mubr.bf16.mxu1 %v3395_v1  ;;  %v3364_v46 = vmul.f32 %v6238_v32, %v8258_v0  ;;  %v8327_v0 = vpop.f32.mrf.mxu1  ;;  %v5164_v1 = vpack.c.bf16 %v8250_v43, %v8250_v43  ;;  %v5166_v43 = vpack.c.bf16 %v8245_v16, %v8245_v16 }
 0x717   : > { %v5171_v32 = vpack.c.bf16 %v8327_v0, %v8327_v0 }
 0x718   : > { %v3396_v42 = vpack.c.bf16 %v3364_v46, %v3363_v50  ;;  %v8331_v9 = vpop.f32.mrf.mxu1  ;;  %5667 = vmatpush3.bf16.msra.mxu0 %v5973_v38  ;;  %5701 = vmatpush3.bf16.msra.mxu1 %v5973_v38  ;;  %v5165_v50 = vpack.c.bf16 %v8232_v8, %v8232_v8 }
 0x719   : > { %5668 = vmatprep.subr.bf16.mxu0 %v5974_v53  ;;  %5694 = vmatprep.subr.bf16.mxu1 %v5974_v53  ;;  %v5174_v8 = vpack.c.bf16 %v8331_v9, %v8331_v9 }
 0x71a   : > { %5653 = vmatmul.mubr.bf16.gmra.mxu1 %v3396_v42  ;;  %v8333_v48 = vpop.f32.mrf.mxu1  ;;  %v5173_v42 = vpack.c.bf16 %v8323_v4, %v8323_v4 }
 0x71b   : > { %v5172_v30 = vpack.c.bf16 %v8333_v48, %v8333_v48 }
 0x71c   : > { %5669 = vmatpush3.bf16.msra.mxu0 %v5974_v53  ;;  %5702 = vmatpush3.bf16.msra.mxu1 %v5974_v53 }
 0x71d   : > { %5670 = vmatprep.subr.bf16.mxu0 %v5975_v20  ;;  %5695 = vmatprep.subr.bf16.mxu1 %v5975_v20 }
 0x720   : > { %5671 = vmatpush3.bf16.msra.mxu0 %v5975_v20  ;;  %5703 = vmatpush3.bf16.msra.mxu1 %v5975_v20 }
 0x756   : > { %v5610_v27 = vpop.f32.mrf.mxu0 }
 0x757   : > { %v5177_v59 = vpack.c.bf16 %v5610_v27, %v5610_v27 }
 0x758   : > { %v3769_v18 = vpop.f32.mrf.mxu0 }
 0x759   : > { %v5175_v49 = vpack.c.bf16 %v3769_v18, %v3769_v18 }
 0x75a   : > { %v5611_v5 = vpop.f32.mrf.mxu0 }
 0x75b   : > { %4218 = vrot.lane.b32.xlu0 %v5175_v49, %s6462_s14  ;;  %v5178_v40 = vpack.c.bf16 %v5611_v5, %v5611_v5 }
 0x75c   : > { %v3772_v21 = vpop.f32.mrf.mxu0 }
 0x75d   : > { %v5176_v51 = vpack.c.bf16 %v3772_v21, %v3772_v21 }
 0x75e   : > { %v8319_v33 = vpop.f32.mrf.mxu0 }
 0x75f   : > { %4220 = vrot.lane.b32.xlu1 %v5176_v51, %s6462_s14  ;;  %v5181_v51 = vpack.c.bf16 %v8319_v33, %v8319_v33 }
 0x760   : > { %v8321_v60 = vpop.f32.mrf.mxu0 }
 0x761   : > { %v5179_v18 = vpack.c.bf16 %v8321_v60, %v8321_v60 }
 0x762   : > { %v8325_v26 = vpop.f32.mrf.mxu0 }
 0x763   : > { %v5182_v60 = vpack.c.bf16 %v8325_v26, %v8325_v26 }
 0x764   : > { %v8329_v15 = vpop.f32.mrf.mxu0 }
 0x765   : > { %v5180_v16 = vpack.c.bf16 %v8329_v15, %v8329_v15 }
 0x78d   : > { %v5618_v45 = vpop.f32.mrf.mxu0 }
 0x78e   : > { %v5185_v23 = vpack.c.bf16 %v5618_v45, %v5618_v45 }
 0x78f   : > { %v3801_v13 = vpop.f32.mrf.mxu0 }
 0x790   : > { %v5183_v7 = vpack.c.bf16 %v3801_v13, %v3801_v13 }
 0x791   : > { %v5619_v37 = vpop.f32.mrf.mxu0 }
 0x792   : > { %4234 = vrot.lane.b32.xlu0 %v5183_v7, %s6462_s14  ;;  %v5186_v22 = vpack.c.bf16 %v5619_v37, %v5619_v37 }
 0x793   : > { %v3804_v55 = vpop.f32.mrf.mxu0  ;;  %v8336_v10 = vpop.f32.mrf.mxu1 }
 0x794   : > { %v5184_v35 = vpack.c.bf16 %v3804_v55, %v3804_v55  ;;  %v5193_v47 = vpack.c.bf16 %v8336_v10, %v8336_v10 }
 0x795   : > { %v3914_v54 = vpop.f32.mrf.mxu1 }
 0x796   : > { %4222 = vrot.lane.b32.xlu0 %v5177_v59, %s6462_s14  ;;  %4236 = vrot.lane.b32.xlu1 %v5184_v35, %s6462_s14  ;;  %v5191_v6 = vpack.c.bf16 %v3914_v54, %v3914_v54 }
 0x797   : > { %v8340_v58 = vpop.f32.mrf.mxu1 }
 0x798   : > { %v5194_v44 = vpack.c.bf16 %v8340_v58, %v8340_v58 }
 0x799   : > { %v3917_v24 = vpop.f32.mrf.mxu1 }
 0x79a   : > { %4238 = vrot.lane.b32.xlu0 %v5185_v23, %s6462_s14  ;;  %4224 = vrot.lane.b32.xlu1 %v5178_v40, %s6462_s14  ;;  %v5192_v34 = vpack.c.bf16 %v3917_v24, %v3917_v24 }
 0x79b   : > { %v8347_v19 = vpop.f32.mrf.mxu1 }
 0x79c   : > { %v5197_v48 = vpack.c.bf16 %v8347_v19, %v8347_v19 }
 0x79d   : > { %v8349_v28 = vpop.f32.mrf.mxu1 }
 0x79e   : > { %4240 = vrot.lane.b32.xlu1 %v5186_v22, %s6462_s14  ;;  %4331 = vrot.lane.b32.xlu0 %v5191_v6, %s6461_s13  ;;  %v5195_v9 = vpack.c.bf16 %v8349_v28, %v8349_v28 }
 0x79f   : > { %v8351_v63 = vpop.f32.mrf.mxu1 }
 0x7a0   : > { %v5198_v35 = vpack.c.bf16 %v8351_v63, %v8351_v63 }
 0x7a1   : > { %v8353_v3 = vpop.f32.mrf.mxu1 }
 0x7a2   : > { %4333 = vrot.lane.b32.xlu1 %v5192_v34, %s6461_s13  ;;  %v5196_v7 = vpack.c.bf16 %v8353_v3, %v8353_v3 }
 0x7ca   : > { %v5650_v2 = vpop.f32.mrf.mxu1 }
 0x7cb   : > { %v5201_v61 = vpack.c.bf16 %v5650_v2, %v5650_v2 }
 0x7cc   : > { %v3946_v52 = vpop.f32.mrf.mxu1 }
 0x7cd   : > { %v5199_v31 = vpack.c.bf16 %v3946_v52, %v3946_v52  ;;  %v4219_v62 = vpop.permute.xlu0 %4218 }
 0x7ce   : > { %v5651_v14 = vpop.f32.mrf.mxu1  ;;  %4267 = vst.msk [vmem:[#allocation5] sm:$0xf] %vm4266_vm4, %v4219_v62 }
 0x7cf   : > { %4347 = vrot.lane.b32.xlu0 %v5199_v31, %s6461_s13  ;;  %v5202_v17 = vpack.c.bf16 %v5651_v14, %v5651_v14 }
 0x7d0   : > { %v3949_v29 = vpop.f32.mrf.mxu1 }
 0x7d1   : > { %v5200_v12 = vpack.c.bf16 %v3949_v29, %v3949_v29  ;;  %v4221_v11 = vpop.permute.xlu1 %4220 }
 0x7d2   : > { %4268 = vst.msk [vmem:[#allocation5 + $0x4] sm:$0xf] %vm4266_vm4, %v4221_v11  ;;  %v5622_v46 = vpop.f32.mrf.mxu0 }
 0x7d3   : > { %4335 = vrot.lane.b32.xlu0 %v5193_v47, %s6461_s13  ;;  %4349 = vrot.lane.b32.xlu1 %v5200_v12, %s6461_s13  ;;  %v5189_v45 = vpack.c.bf16 %v5622_v46, %v5622_v46 }
 0x7d4   : > { %v3817_v27 = vpop.f32.mrf.mxu0 }
 0x7d5   : > { %v5187_v5 = vpack.c.bf16 %v3817_v27, %v3817_v27 }
 0x7d6   : > { %v5623_v49 = vpop.f32.mrf.mxu0 }
 0x7d7   : > { %4351 = vrot.lane.b32.xlu0 %v5201_v61, %s6461_s13  ;;  %4337 = vrot.lane.b32.xlu1 %v5194_v44, %s6461_s13  ;;  %v5190_v13 = vpack.c.bf16 %v5623_v49, %v5623_v49 }
 0x7d8   : > { %v3820_v21 = vpop.f32.mrf.mxu0 }
 0x7d9   : > { %v5188_v4 = vpack.c.bf16 %v3820_v21, %v3820_v21  ;;  %v8464_v21 = vld [vmem:[%s8579_s6] ss:$0 sm:$0xff] }
 0x7da   : > { %v5654_v0 = vpop.f32.mrf.mxu1 }
 0x7db   : > { %4113 = vrot.lane.b32.xlu0 %v5163_v41, %s6463_s30  ;;  %4353 = vrot.lane.b32.xlu1 %v5202_v17, %s6461_s13  ;;  %v5205_v10 = vpack.c.bf16 %v5654_v0, %v5654_v0 }
 0x7dc   : > { %v3962_v15 = vpop.f32.mrf.mxu1 }
 0x7dd   : > { %v5203_v37 = vpack.c.bf16 %v3962_v15, %v3962_v15 }
 0x7de   : > { %v5655_v33 = vpop.f32.mrf.mxu1 }
 0x7df   : > { %4129 = vrot.lane.b32.xlu0 %v5171_v32, %s6463_s30  ;;  %4115 = vrot.lane.b32.xlu1 %v5164_v1, %s6463_s30  ;;  %v5206_v23 = vpack.c.bf16 %v5655_v33, %v5655_v33  ;;  %v6241_v33 = vld [vmem:[%s6659_s18] sm:$0xff] }
 0x7e0   : > { %v3965_v26 = vpop.f32.mrf.mxu1 }
 0x7e1   : > { %v5204_v55 = vpack.c.bf16 %v3965_v26, %v3965_v26 }
 0x7e3   : > { %4117 = vrot.lane.b32.xlu0 %v5165_v50, %s6463_s30  ;;  %4131 = vrot.lane.b32.xlu1 %v5172_v30, %s6463_s30 }
 0x7e7   : > { %4133 = vrot.lane.b32.xlu0 %v5173_v42, %s6463_s30  ;;  %4119 = vrot.lane.b32.xlu1 %v5166_v43, %s6463_s30 }
 0x7eb   : > { %4226 = vrot.lane.b32.xlu0 %v5179_v18, %s6462_s14  ;;  %4135 = vrot.lane.b32.xlu1 %v5174_v8, %s6463_s30 }
 0x7ef   : > { %4228 = vrot.lane.b32.xlu1 %v5180_v16, %s6462_s14  ;;  %4242 = vrot.lane.b32.xlu0 %v5187_v5, %s6462_s14 }
 0x7f3   : > { %4230 = vrot.lane.b32.xlu0 %v5181_v51, %s6462_s14  ;;  %4244 = vrot.lane.b32.xlu1 %v5188_v4, %s6462_s14 }
 0x7f7   : > { %4246 = vrot.lane.b32.xlu0 %v5189_v45, %s6462_s14  ;;  %4232 = vrot.lane.b32.xlu1 %v5182_v60, %s6462_s14  ;;  %v6240_v60 = vld [vmem:[%s6659_s18 + $0x10] sm:$0xff] }
 0x7fb   : > { %4339 = vrot.lane.b32.xlu0 %v5195_v9, %s6461_s13  ;;  %4248 = vrot.lane.b32.xlu1 %v5190_v13, %s6462_s14 }
 0x7ff   : > { %4341 = vrot.lane.b32.xlu1 %v5196_v7, %s6461_s13  ;;  %4355 = vrot.lane.b32.xlu0 %v5203_v37, %s6461_s13 }
 0x803   : > { %4343 = vrot.lane.b32.xlu0 %v5197_v48, %s6461_s13  ;;  %4357 = vrot.lane.b32.xlu1 %v5204_v55, %s6461_s13 }
 0x804   : > { %v4235_v59 = vpop.permute.xlu0 %4234 }
 0x805   : > { %4275 = vst.msk [vmem:[#allocation5 + $0x20] sm:$0xf] %vm4266_vm4, %v4235_v59  ;;  %v6242_v59 = vld [vmem:[%s6659_s18 + $0x18] sm:$0xff] }
 0x807   : > { %4359 = vrot.lane.b32.xlu0 %v5205_v10, %s6461_s13  ;;  %4345 = vrot.lane.b32.xlu1 %v5198_v35, %s6461_s13  ;;  %v6243_v10 = vld [vmem:[%s6659_s18 + $0x50] sm:$0xff] }
 0x808   : > { %v4237_v54 = vpop.permute.xlu1 %4236  ;;  %v4223_v40 = vpop.permute.xlu0 %4222 }
 0x809   : > { %4276 = vst.msk [vmem:[#allocation5 + $0x24] sm:$0xf] %vm4266_vm4, %v4237_v54  ;;  %4269 = vst.msk [vmem:[#allocation5 + $0x8] sm:$0xf] %vm4266_vm4, %v4223_v40 }
 0x80b   : > { %4361 = vrot.lane.b32.xlu1 %v5206_v23, %s6461_s13 }
 0x80c   : > { %v4225_v58 = vpop.permute.xlu1 %4224  ;;  %v4239_v22 = vpop.permute.xlu0 %4238 }
 0x80d   : > { %4270 = vst.msk [vmem:[#allocation5 + $0xc] sm:$0xf] %vm4266_vm4, %v4225_v58  ;;  %4277 = vst.msk [vmem:[#allocation5 + $0x28] sm:$0xf] %vm4266_vm4, %v4239_v22  ;;  %v6244_v22 = vld [vmem:[%s6659_s18 + $0x8] sm:$0xff] }
 0x810   : > { %v4241_v6 = vpop.permute.xlu1 %4240  ;;  %v4332_v24 = vpop.permute.xlu0 %4331 }
 0x811   : > { %4278 = vst.msk [vmem:[#allocation5 + $0x2c] sm:$0xf] %vm4266_vm4, %v4241_v6 }
 0x812   : > { %4380 = vst.msk [vmem:[#allocation5] sm:$0xf] %vm4379_vm5, %v4332_v24  ;;  %v6245_v24 = vld [vmem:[%s6659_s18 + $0x40] sm:$0xff] }
 0x814   : > { %v4334_v39 = vpop.permute.xlu1 %4333 }
 0x815   : > { %4381 = vst.msk [vmem:[#allocation5 + $0x4] sm:$0xf] %vm4379_vm5, %v4334_v39 }
 0x81c   : > { %v5967_v25 = vld [vmem:[#allocation5] sm:$0xff]  }
 0x81d   : > { %5672 = vmatprep.mubr.bf16.mxu0 %v5967_v25 }
 0x841   : > { %v4348_v34 = vpop.permute.xlu0 %4347 }
 0x842   : > { %4388 = vst.msk [vmem:[#allocation5 + $0x20] sm:$0xf] %vm4379_vm5, %v4348_v34 }
 0x845   : > { %v4350_v36 = vpop.permute.xlu1 %4349  ;;  %v4336_v56 = vpop.permute.xlu0 %4335 }
 0x846   : > { %4389 = vst.msk [vmem:[#allocation5 + $0x24] sm:$0xf] %vm4379_vm5, %v4350_v36  ;;  %4382 = vst.msk [vmem:[#allocation5 + $0x8] sm:$0xf] %vm4379_vm5, %v4336_v56  ;;  %v6246_v36 = vld [vmem:[%s6659_s18 + $0x58] sm:$0xff] }
 0x849   : > { %v4338_v19 = vpop.permute.xlu1 %4337  ;;  %v4352_v28 = vpop.permute.xlu0 %4351 }
 0x84a   : > { %4383 = vst.msk [vmem:[#allocation5 + $0xc] sm:$0xf] %vm4379_vm5, %v4338_v19  ;;  %4390 = vst.msk [vmem:[#allocation5 + $0x28] sm:$0xf] %vm4379_vm5, %v4352_v28  ;;  %v6247_v28 = vld [vmem:[%s6659_s18 + $0x48] sm:$0xff] }
 0x84d   : > { %v4354_v57 = vpop.permute.xlu1 %4353  ;;  %v4114_v63 = vpop.permute.xlu0 %4113  ;;  %v5976_v38 = vld [vmem:[#allocation5 + $0x20] sm:$0xff]  }
 0x84e   : > { %4391 = vst.msk [vmem:[#allocation5 + $0x2c] sm:$0xf] %vm4379_vm5, %v4354_v57  ;;  %5680 = vmatprep.mubr.bf16.mxu1 %v5976_v38 }
 0x84f   : > { %4158 = vst.msk [vmem:[#allocation5 + $0x10] sm:$0xf] %vm4153_vm3, %v4114_v63 }
 0x851   : > { %v4116_v3 = vpop.permute.xlu1 %4115  ;;  %v4130_v2 = vpop.permute.xlu0 %4129  ;;  %v5977_v53 = vld [vmem:[#allocation5 + $0x8] sm:$0xff]  }
 0x852   : > { %4159 = vst.msk [vmem:[#allocation5 + $0x14] sm:$0xf] %vm4153_vm3, %v4116_v3  ;;  %4166 = vst.msk [vmem:[#allocation5 + $0x30] sm:$0xf] %vm4153_vm3, %v4130_v2  ;;  %5673 = vmatmul.mubr.bf16.vlgmr.msra.gmra.mxu0 %v5977_v53  ;;  %v6248_v2 = vld [vmem:[%s6659_s18 + $0x30] sm:$0xff] }
 0x855   : > { %v4132_v52 = vpop.permute.xlu1 %4131  ;;  %v4118_v31 = vpop.permute.xlu0 %4117  ;;  %v5978_v62 = vld [vmem:[#allocation5 + $0x28] sm:$0xff]  }
 0x856   : > { %4167 = vst.msk [vmem:[#allocation5 + $0x34] sm:$0xf] %vm4153_vm3, %v4132_v52  ;;  %4160 = vst.msk [vmem:[#allocation5 + $0x18] sm:$0xf] %vm4153_vm3, %v4118_v31  ;;  %5681 = vmatmul.mubr.bf16.vlgmr.msra.gmra.mxu1 %v5978_v62 }
 0x859   : > { %v4120_v14 = vpop.permute.xlu1 %4119  ;;  %v4134_v20 = vpop.permute.xlu0 %4133 }
 0x85a   : > { %4161 = vst.msk [vmem:[#allocation5 + $0x1c] sm:$0xf] %vm4153_vm3, %v4120_v14  ;;  %4168 = vst.msk [vmem:[#allocation5 + $0x38] sm:$0xf] %vm4153_vm3, %v4134_v20  ;;  %v6249_v14 = vld [vmem:[%s6659_s18 + $0x20] sm:$0xff] }
 0x85d   : > { %v4136_v29 = vpop.permute.xlu1 %4135  ;;  %v4227_v47 = vpop.permute.xlu0 %4226 }
 0x85e   : > { %4169 = vst.msk [vmem:[#allocation5 + $0x3c] sm:$0xf] %vm4153_vm3, %v4136_v29 }
 0x85f   : > { %4271 = vst.msk [vmem:[#allocation5 + $0x10] sm:$0xf] %vm4266_vm4, %v4227_v47 }
 0x861   : > { %v4229_v12 = vpop.permute.xlu1 %4228  ;;  %v4243_v11 = vpop.permute.xlu0 %4242 }
 0x862   : > { %4272 = vst.msk [vmem:[#allocation5 + $0x14] sm:$0xf] %vm4266_vm4, %v4229_v12  ;;  %4279 = vst.msk [vmem:[#allocation5 + $0x30] sm:$0xf] %vm4266_vm4, %v4243_v11 }
 0x865   : > { %v4245_v44 = vpop.permute.xlu1 %4244  ;;  %v4231_v61 = vpop.permute.xlu0 %4230 }
 0x866   : > { %4280 = vst.msk [vmem:[#allocation5 + $0x34] sm:$0xf] %vm4266_vm4, %v4245_v44  ;;  %4273 = vst.msk [vmem:[#allocation5 + $0x18] sm:$0xf] %vm4266_vm4, %v4231_v61  ;;  %v6250_v44 = vld [vmem:[%s6659_s18 + $0x38] sm:$0xff] }
 0x869   : > { %v4233_v41 = vpop.permute.xlu1 %4232  ;;  %v4247_v17 = vpop.permute.xlu0 %4246 }
 0x86a   : > { %4274 = vst.msk [vmem:[#allocation5 + $0x1c] sm:$0xf] %vm4266_vm4, %v4233_v41  ;;  %4281 = vst.msk [vmem:[#allocation5 + $0x38] sm:$0xf] %vm4266_vm4, %v4247_v17  ;;  %v6251_v41 = vld [vmem:[%s6659_s18 + $0x70] sm:$0xff] }
 0x86d   : > { %v4249_v1 = vpop.permute.xlu1 %4248  ;;  %v4340_v32 = vpop.permute.xlu0 %4339 }
 0x86e   : > { %4282 = vst.msk [vmem:[#allocation5 + $0x3c] sm:$0xf] %vm4266_vm4, %v4249_v1 }
 0x86f   : > { %4384 = vst.msk [vmem:[#allocation5 + $0x10] sm:$0xf] %vm4379_vm5, %v4340_v32 }
 0x871   : > { %v4342_v50 = vpop.permute.xlu1 %4341  ;;  %v4356_v30 = vpop.permute.xlu0 %4355 }
 0x872   : > { %4385 = vst.msk [vmem:[#allocation5 + $0x14] sm:$0xf] %vm4379_vm5, %v4342_v50  ;;  %4392 = vst.msk [vmem:[#allocation5 + $0x30] sm:$0xf] %vm4379_vm5, %v4356_v30  ;;  %v6252_v30 = vld [vmem:[%s6659_s18 + $0x28] sm:$0xff] }
 0x875   : > { %v4358_v46 = vpop.permute.xlu1 %4357  ;;  %v4344_v43 = vpop.permute.xlu0 %4343 }
 0x876   : > { %4393 = vst.msk [vmem:[#allocation5 + $0x34] sm:$0xf] %vm4379_vm5, %v4358_v46  ;;  %4386 = vst.msk [vmem:[#allocation5 + $0x18] sm:$0xf] %vm4379_vm5, %v4344_v43  ;;  %v6253_v43 = vld [vmem:[%s6659_s18 + $0x60] sm:$0xff] }
 0x879   : > { %v4346_v42 = vpop.permute.xlu1 %4345  ;;  %v4360_v27 = vpop.permute.xlu0 %4359  ;;  %v5979_v8 = vld [vmem:[#allocation5 + $0x10] sm:$0xff]  }
 0x87a   : > { %4387 = vst.msk [vmem:[#allocation5 + $0x1c] sm:$0xf] %vm4379_vm5, %v4346_v42  ;;  %4394 = vst.msk [vmem:[#allocation5 + $0x38] sm:$0xf] %vm4379_vm5, %v4360_v27  ;;  %5676 = vmatprep.mubr.bf16.mxu0 %v5979_v8 }
 0x87d   : > { %v4362_v18 = vpop.permute.xlu1 %4361  ;;  %v5980_v49 = vld [vmem:[#allocation5 + $0x30] sm:$0xff]  }
 0x87e   : > { %4395 = vst.msk [vmem:[#allocation5 + $0x3c] sm:$0xf] %vm4379_vm5, %v4362_v18  ;;  %5684 = vmatprep.mubr.bf16.mxu1 %v5980_v49  ;;  %v6254_v18 = vld [vmem:[%s6659_s18 + $0x78] sm:$0xff] }
 0x881   : > { %v5981_v16 = vld [vmem:[#allocation5 + $0x18] sm:$0xff]  }
 0x882   : > { %5677 = vmatmul.mubr.bf16.gmra.mxu0 %v5981_v16 }
 0x885   : > { %v5982_v5 = vld [vmem:[#allocation5 + $0x38] sm:$0xff]  }
 0x886   : > { %5685 = vmatmul.mubr.bf16.gmra.mxu1 %v5982_v5  ;;  %v6255_v5 = vld [vmem:[%s6659_s18 + $0x68] sm:$0xff] }
 0x912   : > { %v5674_v51 = vpop.f32.mrf.mxu0 }
 0x913   : > { %v4574_v4 = vadd.f32 %v5674_v51, %v8464_v21 }
 0x914   : > { %v4565_v0 = vpop.f32.mrf.mxu0 }
 0x915   : > { %v4630_v45 = vadd.f32 %v6240_v60, %v4574_v4  ;;  %v4566_v15 = vadd.f32 %v8464_v21, %v4565_v0 }
 0x916   : > { %v5675_v9 = vpop.f32.mrf.mxu0  ;;  %v5682_v13 = vpop.f32.mrf.mxu1 }
 0x917   : > { %4646 = vst [vmem:[%s8471_s16 + $0x10] sm:$0xff] %v4630_v45  ;;  %v4628_v7 = vadd.f32 %v6241_v33, %v4566_v15  ;;  %v4577_v37 = vadd.f32 %v5675_v9, %v8464_v21  ;;  %v4606_v26 = vadd.f32 %v5682_v13, %v8464_v21 }
 0x918   : > { %v4568_v48 = vpop.f32.mrf.mxu0  ;;  %v4597_v55 = vpop.f32.mrf.mxu1 }
 0x919   : > { %4644 = vst [vmem:[%s8471_s16] sm:$0xff] %v4628_v7  ;;  %v4631_v35 = vadd.f32 %v6242_v59, %v4577_v37  ;;  %v4638_v54 = vadd.f32 %v6243_v10, %v4606_v26  ;;  %v4569_v40 = vadd.f32 %v8464_v21, %v4568_v48  ;;  %v4598_v23 = vadd.f32 %v8464_v21, %v4597_v55 }
 0x91a   : > { %v5683_v58 = vpop.f32.mrf.mxu1 }
 0x91b   : > { %4647 = vst [vmem:[%s8471_s16 + $0x18] sm:$0xff] %v4631_v35  ;;  %4654 = vst [vmem:[%s8471_s16 + $0x50] sm:$0xff] %v4638_v54  ;;  %v4629_v6 = vadd.f32 %v6244_v22, %v4569_v40  ;;  %v4636_v39 = vadd.f32 %v6245_v24, %v4598_v23  ;;  %v4609_v25 = vadd.f32 %v5683_v58, %v8464_v21 }
 0x91c   : > { %v4600_v34 = vpop.f32.mrf.mxu1 }
 0x91d   : > { %4645 = vst [vmem:[%s8471_s16 + $0x8] sm:$0xff] %v4629_v6  ;;  %4652 = vst [vmem:[%s8471_s16 + $0x40] sm:$0xff] %v4636_v39  ;;  %v4639_v56 = vadd.f32 %v6246_v36, %v4609_v25  ;;  %v4601_v19 = vadd.f32 %v8464_v21, %v4600_v34 }
 0x91f   : > { %4655 = vst [vmem:[%s8471_s16 + $0x58] sm:$0xff] %v4639_v56  ;;  %v4637_v57 = vadd.f32 %v6247_v28, %v4601_v19 }
 0x921   : > { %4653 = vst [vmem:[%s8471_s16 + $0x48] sm:$0xff] %v4637_v57 }
 0x942   : > { %v5678_v63 = vpop.f32.mrf.mxu0 }
 0x943   : > { %v4590_v38 = vadd.f32 %v5678_v63, %v8464_v21 }
 0x944   : > { %v4581_v3 = vpop.f32.mrf.mxu0 }
 0x945   : > { %v4634_v53 = vadd.f32 %v6248_v2, %v4590_v38  ;;  %v4582_v52 = vadd.f32 %v8464_v21, %v4581_v3 }
 0x946   : > { %v5679_v31 = vpop.f32.mrf.mxu0  ;;  %v5686_v62 = vpop.f32.mrf.mxu1 }
 0x947   : > { %4650 = vst [vmem:[%s8471_s16 + $0x30] sm:$0xff] %v4634_v53  ;;  %v4632_v20 = vadd.f32 %v6249_v14, %v4582_v52  ;;  %v4593_v29 = vadd.f32 %v5679_v31, %v8464_v21  ;;  %v4622_v47 = vadd.f32 %v5686_v62, %v8464_v21 }
 0x948   : > { %v4584_v12 = vpop.f32.mrf.mxu0  ;;  %v4613_v11 = vpop.f32.mrf.mxu1 }
 0x949   : > { %4648 = vst [vmem:[%s8471_s16 + $0x20] sm:$0xff] %v4632_v20  ;;  %v4635_v61 = vadd.f32 %v6250_v44, %v4593_v29  ;;  %v4642_v17 = vadd.f32 %v6251_v41, %v4622_v47  ;;  %v4585_v1 = vadd.f32 %v8464_v21, %v4584_v12  ;;  %v4614_v32 = vadd.f32 %v8464_v21, %v4613_v11 }
 0x94a   : > { %v5687_v50 = vpop.f32.mrf.mxu1 }
 0x94b   : > { %4651 = vst [vmem:[%s8471_s16 + $0x38] sm:$0xff] %v4635_v61  ;;  %4658 = vst [vmem:[%s8471_s16 + $0x70] sm:$0xff] %v4642_v17  ;;  %v4633_v46 = vadd.f32 %v6252_v30, %v4585_v1  ;;  %v4640_v42 = vadd.f32 %v6253_v43, %v4614_v32  ;;  %v4625_v27 = vadd.f32 %v5687_v50, %v8464_v21 }
 0x94c   : > { %v4616_v8 = vpop.f32.mrf.mxu1 }
 0x94d   : > { %4649 = vst [vmem:[%s8471_s16 + $0x28] sm:$0xff] %v4633_v46  ;;  %4656 = vst [vmem:[%s8471_s16 + $0x60] sm:$0xff] %v4640_v42  ;;  %v4643_v49 = vadd.f32 %v6254_v18, %v4625_v27  ;;  %v4617_v16 = vadd.f32 %v8464_v21, %v4616_v8 }
 0x94f   : > { %4659 = vst [vmem:[%s8471_s16 + $0x78] sm:$0xff] %v4643_v49  ;;  %v4641_v51 = vadd.f32 %v6255_v5, %v4617_v16 }
 0x951   : > { %4657 = vst [vmem:[%s8471_s16 + $0x68] sm:$0xff] %v4641_v51 }
 0x952   : > { %6375 = shalt.err (!%p6372_p2)
}
 0x953   : > { %s6376_s18 = scalar_lea.hbm %s8520_s21, 2048  ;;  %s6380_s30 = scalar_lea.hbm %s8580_s7, 4096 }
 0x954   : > { %p6377_p7 = scmp.ne.s32.totalorder %s8520_s21, %s6376_s18  ;;  %p6381_p13 = scmp.lt.s32.totalorder %s8520_s21, %s8580_s7 }
 0x955   : > { %p6382_p0 = scmp.lt.s32.totalorder %s6380_s30, %s6376_s18 }
 0x956   : > { %p6378_p9 = pnand %p6377_p7, %p8734_p4 }
 0x957   : > { %p6383_p3 = por %p6382_p0, %p6381_p13 }
 0x958   : > { %p6379_p12 = pneg %p6378_p9 }
 0x95a   : > { %p6384_p1 = pnand %p6383_p3, %p6379_p12 }
 0x95c   : > { %6387 = shalt.err (!%p6384_p1)
}
 0x95d   : > { %s6465_s16 = smov 128   ;;  %s6466_s8 = smov 8  }
 0x95e   : > { %5750 = dma.vmem_to_hbm [thread:$0]  (%p8734_p4), %s8522_s1, 2048, %s8520_s21, %s4661_s27, %s6465_s16, %s6465_s16, %s6466_s8  }
 0x95f PF: > { %s4691_s17 = sand.u32 1, %s6430_s24   ;;  %p8735_p6 = scmp.ne.s32.totalorder %s8632_s12, 0 }
 0x960   : > { %p8736_p8 = scmp.ge.s32.totalorder %s6450_s29, 2  ;;  %s4692_s15 = scalar_lea.sflag [#allocation8], %s4691_s17 }
 0x962   : > { %p5767_p5 = pnand %p8736_p8, %p8735_p6 }
 0x964   : > { %p5768_p10 = pneg %p5767_p5 }
 0x966   : > { %6425 = dma.done.wait (%p5768_p10), %s4692_s15, 2048  }
 0x967   : > { %6427 = vsyncadd (%p5768_p10), %s4692_s15, 4294965248  ;;  %s25_s29 = sadd.s32 1, %s6450_s29   ;;  %s8737_s19 = sld [smem:[#allocation19_spill]] }
 0x968   : > { %p22_p11 = scmp.ge.s32.totalorder %s25_s29, 4   ;;  %s8738_s24 = smov %s6434_s25 }
 0x969   : > { %s8739_s25 = smov %s6438_s26  ;;  %s8740_s26 = smov %s6631_s22 }
 0x96a   : > { %s8741_s27 = smov %s6446_s28  ;;  %24 = sbr.rel (!%p22_p11) target bundleno = 12 (0xc), region = 119 }
 0x96d   : > { %s8742_s28 = smov %s8737_s19 }
 0x96f   :  { %4697 = vsyncpa [#allocation7], 1 }
 0x970   :  { %4699 = vsyncpa [#allocation7 + $0x1], 1 }
 0x971   :  { %4700 = vsyncpa [#allocation10], 1 }
 0x972   :  { %4701 = vsyncpa [#allocation13], 1 }
 0x973   :  { %4702 = vsyncpa [#allocation8], 1 }
 0x974   :  { %4704 = vsyncpa [#allocation8 + $0x1], 1 }

// kernel: tpu_custom_call.1
= control target key start
LH: loop header
LB: loop body
LE: loop exit
PB: predicated region body
PF: predicated region fallthrough
CT: control target
= control target key end

     0   :  { %s8573_s0 = inlined_call_operand.hbm [shape: f32[2,128,128], index: 0, kind: input, shape index: {}]   ;;  %s8574_s1 = inlined_call_operand.hbm [shape: bf16[128,128], index: 1, kind: input, shape index: {}]   ;;  %s8575_s2 = inlined_call_operand.vmem [shape: f32[1,128], index: 2, kind: input, shape index: {}]   ;;  %s8576_s3 = inlined_call_operand.hbm [shape: bf16[128,256], index: 3, kind: input, shape index: {}]   ;;  %s8577_s4 = inlined_call_operand.vmem [shape: f32[1,256], index: 4, kind: input, shape index: {}]   ;;  %s8578_s5 = inlined_call_operand.hbm [shape: bf16[128,128], index: 5, kind: input, shape index: {}]   ;;  %s8579_s6 = inlined_call_operand.vmem [shape: f32[1,128], index: 6, kind: input, shape index: {}]   ;;  %s8580_s7 = inlined_call_operand.hbm [shape: f32[2,128,128], index: 7, kind: output, shape index: {}]  }
   0x1   :  { %8626 = sst [smem:[#allocation65_spill]] %s8574_s1 }
   0x2   :  { %8627 = sst [smem:[#allocation66_spill]] %s8576_s3 }
   0x3   :  { %8628 = sst [smem:[#allocation67_spill]] %s8578_s5 }
   0x4   :  { %12 = vsyncpa [#allocation7], 0 }
   0x5   :  { %14 = vsyncpa [#allocation7 + $0x1], 0 }
   0x6   :  { %15 = vsyncpa [#allocation10], 0 }
   0x7   :  { %16 = vsyncpa [#allocation13], 0 }
   0x8   :  { %17 = vsyncpa [#allocation8], 0 }
   0x9   :  { %19 = vsyncpa [#allocation8 + $0x1], 0  ;;  %s6507_s24 = smov 0   ;;  %s6509_s25 = smov 0  }
   0xa   :  { %s6511_s26 = smov 0   ;;  %s6513_s27 = smov 0  }
   0xb   :  { %s6515_s28 = smov 0   ;;  %s6517_s29 = smov 0  }
   0xc LB: > { %s4791_s30 = sadd.s32 4294967295, %s6450_s29   ;;  %s4792_s8 = sadd.s32 4294967294, %s6450_s29   ;;  %s6450_s29 = sphi %s6517_s29, %s25_s29   ;;  %s6446_s28 = sphi %s6515_s28, %s8742_s28   ;;  %s6442_s27 = sphi %s6513_s27, %s8741_s27   ;;  %s6438_s26 = sphi %s6511_s26, %s8740_s26   ;;  %s6434_s25 = sphi %s6509_s25, %s8739_s25   ;;  %s6430_s24 = sphi %s6507_s24, %s8738_s24  }
   0xd   : > { %p57_p0 = scmp.ne.s32.totalorder %s6434_s25, %s6430_s24  ;;  %p6541_p1 = scmp.eq.s32.totalorder %s4791_s30, 0 }
   0xe   : > { %p6545_p2 = scmp.eq.s32.totalorder %s4791_s30, 1  ;;  %p215_p3 = scmp.eq.s32.totalorder %s4792_s8, 1 }
   0xf   : > { %p6551_p4 = por %p6541_p1, %p57_p0  ;;  %p4793_p5 = scmp.ge.s32.totalorder %s6450_s29, 1 }
  0x10   : > { %p6556_p6 = por %p215_p3, %p57_p0  ;;  %p222_p7 = scmp.lt.s32.totalorder %s6450_s29, 3 }
  0x11   : > { %s6452_s14 = smov [#allocation9]   ;;  %s6453_s17 = smov [#allocation11]  }
  0x12   : > { %s8632_s12 = scalar_select %p6556_p6, 1, 0 }
  0x13   : > { %p6561_p8 = pnand %p4793_p5, %p222_p7  ;;  %s234_s15 = sshll.u32 %s6452_s14, 4  ;;  %s235_s15 = int_to_ptr.vmem [resolvable:$true] %s234_s15 }
  0x14   : > { %s250_s18 = sshll.u32 %s6453_s17, 4  ;;  %s6267_s19 = scalar_lea.vmem %s235_s15, 1024  ;;  %s251_s18 = int_to_ptr.vmem [resolvable:$true] %s250_s18 }
  0x15   : > { %p5752_p9 = pneg %p6561_p8  ;;  %p6268_p13 = scmp.ne.s32.totalorder %s235_s15, %s6267_s19 }
  0x16   : > { %p6275_p5 = scmp.lt.s32.totalorder %s235_s15, %s235_s15  ;;  %p6276_p7 = scmp.lt.s32.totalorder %s6267_s19, %s6267_s19 }
  0x17   : > { %p6570_p11 = pnand %p5752_p9, %p6541_p1 }
  0x18   : > { %p6277_p10 = por %p6276_p7, %p6275_p5 }
  0x19   : > { %p6258_p12 = pneg %p6570_p11 }
  0x1b   : > { %p6270_p0 = pnand %p6268_p13, %p6258_p12 }
  0x1d   : > { %p6271_p3 = pneg %p6270_p0 }
  0x1f   : > { %p6278_p9 = pnand %p6277_p10, %p6271_p3 }
  0x21   : > { %6281 = shalt.err (!%p6278_p9)
}
  0x22   : > { %s6454_s20 = smov 64   ;;  %s6455_s21 = smov 4  }
  0x23   : > { %s8635_s1 = sld [smem:[#allocation65_spill]]  ;;  %s6293_s30 = scalar_lea.vmem %s251_s18, 2048 }
  0x24   : > { %p6294_p13 = scmp.ne.s32.totalorder %s251_s18, %s6293_s30  ;;  %p6301_p10 = scmp.lt.s32.totalorder %s251_s18, %s251_s18 }
  0x25   : > { %p6302_p3 = scmp.lt.s32.totalorder %s6293_s30, %s6293_s30 }
  0x26   : > { %p6296_p0 = pnand %p6294_p13, %p6258_p12 }
  0x27   : > { %p6303_p7 = por %p6302_p3, %p6301_p10 }
  0x28   : > { %p6297_p5 = pneg %p6296_p0 }
  0x29   : > { %5755 = dma.hbm_to_vmem [thread:$0]  (!%p6570_p11), %s8635_s1, 1024, %s235_s15, [#allocation10], %s6454_s20, %s6454_s20, %s6455_s21  }
  0x2a   : > { %p6304_p9 = pnand %p6303_p7, %p6297_p5 }
  0x2c   : > { %6307 = shalt.err (!%p6304_p9)
}
  0x2d   : > { %s8581_s8 = smov 128   ;;  %s8582_s14 = smov 8  }
  0x2e   : > { %s8636_s3 = sld [smem:[#allocation66_spill]]  ;;  %s6458_s19 = smov [#allocation12]  }
  0x2f   : > { %s266_s22 = sshll.u32 %s6458_s19, 4  ;;  %s267_s22 = int_to_ptr.vmem [resolvable:$true] %s266_s22 }
  0x30   : > { %s6319_s23 = scalar_lea.vmem %s267_s22, 1024  ;;  %p6327_p10 = scmp.lt.s32.totalorder %s267_s22, %s267_s22 }
  0x31   : > { %p6320_p13 = scmp.ne.s32.totalorder %s267_s22, %s6319_s23  ;;  %p6328_p3 = scmp.lt.s32.totalorder %s6319_s23, %s6319_s23 }
  0x33   : > { %p6322_p0 = pnand %p6320_p13, %p6258_p12  ;;  %p6329_p7 = por %p6328_p3, %p6327_p10 }
  0x34   : > { %5758 = dma.hbm_to_vmem [thread:$0]  (!%p6570_p11), %s8636_s3, 2048, %s251_s18, [#allocation10], %s8581_s8, %s8581_s8, %s8582_s14  }
  0x35   : > { %p6323_p5 = pneg %p6322_p0 }
  0x37   : > { %p6330_p9 = pnand %p6329_p7, %p6323_p5 }
  0x39   : > { %6333 = shalt.err (!%p6330_p9)
}
  0x3a   : > { %s8637_s5 = sld [smem:[#allocation67_spill]]  ;;  %s37_s15 = sadd.s32 1, %s6446_s28 }
  0x3b   : > { %p39_p12 = scmp.ge.s32.totalorder %s37_s15, 2  ;;  %s44_s16 = sadd.s32 1, %s6438_s26 }
  0x3c   : > { %p51_p13 = scmp.ne.s32.totalorder %s6438_s26, %s6434_s25  ;;  %p52_p0 = scmp.eq.s32.totalorder %s6450_s29, 0 }
  0x3d   : > { %s8744_s15 = smov (%p39_p12, %s37_s15), 0  ;;  %s5094_s18 = sshll.u32 %s6446_s28, 11 }
  0x3e   : > { %8638 = sst [smem:[#allocation19_spill]] %s8744_s15  ;;  %p6616_p5 = por %p52_p0, %p51_p13 }
  0x3f   : > { %p6622_p10 = por %p6545_p2, %p51_p13  ;;  %s41_s23 = ssub.s32 %s6446_s28, %s8744_s15 }
  0x40   : > { %5761 = dma.hbm_to_vmem [thread:$0]  (!%p6570_p11), %s8637_s5, 1024, %s267_s22, [#allocation13], %s6454_s20, %s6454_s20, %s6455_s21  }
  0x41   : > { %s8640_s19 = scalar_select %p6622_p10, 1, 0 }
  0x42   : > { %p5773_p11 = scmp.lt.s32.totalorder %s6450_s29, 2  ;;  %p42_p3 = scmp.eq.s32.totalorder %s41_s23, 0 }
  0x43   : > { %s283_s20 = sand.u32 1, %s6438_s26   ;;  %s293_s14 = scalar_lea.hbm %s8573_s0, %s5094_s18 }
  0x44   : > { %s4798_s21 = sshll.u32 %s283_s20, 7  ;;  %p6639_p2 = pnand %p5773_p11, %p6616_p5 }
  0x45   : > { %s6631_s22 = scalar_select %p42_p3, %s6438_s26, %s44_s16  }
  0x46   : > { %s287_s1 = scalar_lea.vmem [#allocation6], %s4798_s21  ;;  %s284_s5 = scalar_lea.sflag [#allocation7], %s283_s20 }
  0x47   : > { %s294_s3 = sshll.u32 %s287_s1, 4  ;;  %p6336_p7 = pneg %p6639_p2  ;;  %s295_s3 = int_to_ptr.vmem [resolvable:$true] %s294_s3 }
  0x48   : > { %s6347_s23 = scalar_lea.vmem %s295_s3, 2048  ;;  %s6459_s16 = smov [#allocation6]  }
  0x49   : > { %p6348_p9 = scmp.ne.s32.totalorder %s295_s3, %s6347_s23  ;;  %s6352_s15 = sshll.u32 %s6459_s16, 4  ;;  %s6353_s15 = int_to_ptr.vmem [resolvable:$false] %s6352_s15 }
  0x4a   : > { %s6354_s8 = scalar_lea.vmem %s6353_s15, 4096  ;;  %p6355_p0 = scmp.lt.s32.totalorder %s295_s3, %s6353_s15 }
  0x4b   : > { %p6350_p12 = pnand %p6348_p9, %p6336_p7  ;;  %p6356_p3 = scmp.lt.s32.totalorder %s6354_s8, %s6347_s23 }
  0x4d   : > { %p6351_p13 = pneg %p6350_p12  ;;  %p6357_p6 = por %p6356_p3, %p6355_p0 }
  0x4f   : > { %p6358_p10 = pnand %p6357_p6, %p6351_p13 }
  0x51   : > { %6361 = shalt.err (!%p6358_p10)
}
  0x52   : > { %s8642_s1 = smov 8   ;;  %s8643_s17 = smov 128  }
  0x53   : > { %5765 = dma.hbm_to_vmem [thread:$0]  (!%p6639_p2), %s293_s14, 2048, %s295_s3, %s284_s5, %s8643_s17, %s8643_s17, %s8642_s1  }
  0x54   : > { %306 = sbr.rel (%p6561_p8) target bundleno = 2399 (0x95f), region = 48 }
  0x59   : > { %s6653_s20 = sand.u32 1, %s6434_s25  }
  0x5a   : > { %s4802_s15 = sshll.u32 %s6653_s20, 7  ;;  %s309_s21 = scalar_lea.sflag [#allocation7], %s6653_s20 }
  0x5b   : > { %s6659_s18 = scalar_lea.vmem [#allocation6], %s4802_s15 }
  0x5c   : > { %6413 = dma.done.wait (%p6551_p4), %s309_s21, 2048  }
  0x5d   : > { %6415 = vsyncadd (%p6551_p4), %s309_s21, 4294965248 }
  0x5e   : > { %6417 = dma.done.wait (%p6541_p1), [#allocation10], 3072  }
  0x5f   : > { %6419 = vsyncadd (%p6541_p1), [#allocation10], 4294964224 }
  0x60   : > { %6421 = dma.done.wait (%p6541_p1), [#allocation13], 1024  }
  0x61   : > { %6423 = vsyncadd (%p6541_p1), [#allocation13], 4294966272  ;;  %v6460_v0 = vmov 0   ;;  %v5839_v1 = vld [vmem:[#allocation11 + $0x74] ss:$8 sps:$4 sm:$0xff]   ;;  %v5849_v8 = vld [vmem:[#allocation9 + $0x28] sm:$0xff]   ;;  %v403_v49 = vlaneseq }
  0x62   : > { %525 = vmatprep.mubr.bf16.mxu0 %v6460_v0  ;;  %v5841_v2 = vld [vmem:[#allocation9 + $0x38] sm:$0xff]   ;;  %493 = vmatprep.subr.bf16.mxu0 %v5839_v1  ;;  %v5843_v4 = vld [vmem:[#allocation11 + $0x64] ss:$8 sps:$4 sm:$0xff]   ;;  %v5845_v5 = vld [vmem:[#allocation9 + $0x30] sm:$0xff]   ;;  %vm678_vm0 = vcmask 257024   ;;  %s6461_s13 = smov 96  }
  0x63   : > { %v5842_v3 = vld [vmem:[#allocation11 + $0x70] ss:$8 sps:$4 sm:$0xff]   ;;  %5368 = vmatprep.subr.bf16.mxu1 %v5841_v2  ;;  %v5846_v6 = vld [vmem:[#allocation11 + $0x60] ss:$8 sps:$4 sm:$0xff]   ;;  %v5847_v7 = vld [vmem:[#allocation11 + $0x54] ss:$8 sps:$4 sm:$0xff]  }
  0x64   : > { %494 = vmatpush1.bf16.msra.mxu0 %v5842_v3  ;;  %5369 = vmatpush3.bf16.msra.mxu1 %v5841_v2  ;;  %v5850_v9 = vld [vmem:[#allocation11 + $0x50] ss:$8 sps:$4 sm:$0xff]   ;;  %v5851_v10 = vld [vmem:[#allocation11 + $0x44] ss:$8 sps:$4 sm:$0xff]   ;;  %v5854_v12 = vld [vmem:[#allocation11 + $0x40] ss:$8 sps:$4 sm:$0xff]  }
  0x65   : > { %495 = vmatprep.subr.bf16.mxu0 %v5843_v4  ;;  %5370 = vmatprep.subr.bf16.mxu1 %v5845_v5  ;;  %v5853_v11 = vld [vmem:[#allocation9 + $0x20] sm:$0xff]   ;;  %v5855_v13 = vld [vmem:[#allocation11 + $0x34] ss:$8 sps:$4 sm:$0xff]   ;;  %v5858_v15 = vld [vmem:[#allocation11 + $0x30] ss:$8 sps:$4 sm:$0xff]   ;;  %v404_v50 = vshrl.u32 %v403_v49, 7 }
  0x66   : > { %v5857_v14 = vld [vmem:[#allocation9 + $0x18] sm:$0xff]   ;;  %v5859_v16 = vld [vmem:[#allocation11 + $0x24] ss:$8 sps:$4 sm:$0xff]   ;;  %v5861_v17 = vld [vmem:[#allocation9 + $0x10] sm:$0xff]   ;;  %s6462_s14 = smov 64   ;;  %s6463_s30 = smov 32  }
  0x67   : > { %v1159_v18 = vld [vmem:[%s6659_s18] sm:$0xff]  ;;  %v1160_v19 = vld [vmem:[%s6659_s18 + $0x8] sm:$0xff]  ;;  %v5863_v22 = vld [vmem:[#allocation11 + $0x14] ss:$8 sps:$4 sm:$0xff]   ;;  %v405_v51 = vsub.s32 0, %v404_v50  ;;  %v409_v53 = vsub.s32 1, %v404_v50 }
  0x68   : > { %496 = vmatpush1.bf16.msra.mxu0 %v5846_v6  ;;  %5371 = vmatpush3.bf16.msra.mxu1 %v5845_v5  ;;  %v5862_v20 = vld [vmem:[#allocation11 + $0x20] ss:$8 sps:$4 sm:$0xff]   ;;  %v1175_v21 = vpack.c.bf16 %v1160_v19, %v1159_v18  ;;  %v5866_v24 = vld [vmem:[#allocation11 + $0x10] ss:$8 sps:$4 sm:$0xff]   ;;  %v5867_v25 = vld [vmem:[#allocation11 + $0x4] ss:$8 sps:$4 sm:$0xff]  }
  0x69   : > { %497 = vmatprep.subr.bf16.mxu0 %v5847_v7  ;;  %5372 = vmatprep.subr.bf16.mxu1 %v5849_v8  ;;  %v5865_v23 = vld [vmem:[#allocation9 + $0x8] sm:$0xff]   ;;  %v5869_v26 = vld [vmem:[#allocation9] sm:$0xff]   ;;  %v1161_v28 = vld [vmem:[%s6659_s18 + $0x10] sm:$0xff]  ;;  %vm1899_vm1 = vcmask 261120   ;;  %vm4153_vm3 = vcmask 519424   ;;  %vm4266_vm4 = vcmask 781824  }
  0x6a   : > { %5384 = vmatprep.mubr.bf16.mxu1 %v1175_v21  ;;  %v5870_v27 = vld [vmem:[#allocation11] ss:$8 sps:$4 sm:$0xff]   ;;  %v1162_v29 = vld [vmem:[%s6659_s18 + $0x18] sm:$0xff]  ;;  %v367_v34 = vld [vmem:[%s6659_s18 + $0x30] sm:$0xff]  ;;  %vm4379_vm5 = vcmask 1044224   ;;  %s8471_s16 = scalar_lea.vmem [#allocation14], %s4802_s15 }
  0x6b   : > { %v1176_v30 = vpack.c.bf16 %v1162_v29, %v1161_v28  ;;  %v365_v31 = vld [vmem:[%s6659_s18 + $0x20] sm:$0xff]  ;;  %v366_v32 = vld [vmem:[%s6659_s18 + $0x28] sm:$0xff]  ;;  %v368_v35 = vld [vmem:[%s6659_s18 + $0x38] sm:$0xff]  ;;  %s5207_s8 = sshll.u32 %s6442_s27, 11  ;;  %s4676_s1 = sshll.u32 %s8471_s16, 4  ;;  %s8522_s1 = int_to_ptr.vmem [resolvable:$true] %s4676_s1 }
  0x6c   : > { %498 = vmatpush1.bf16.msra.mxu0 %v5850_v9  ;;  %5373 = vmatpush3.bf16.msra.mxu1 %v5849_v8  ;;  %v379_v33 = vpack.c.bf16 %v366_v32, %v365_v31  ;;  %v369_v36 = vld [vmem:[%s6659_s18 + $0x40] sm:$0xff]  ;;  %v370_v37 = vld [vmem:[%s6659_s18 + $0x48] sm:$0xff]  ;;  %v380_v38 = vpack.c.bf16 %v368_v35, %v367_v34  ;;  %v371_v40 = vld [vmem:[%s6659_s18 + $0x50] sm:$0xff]  ;;  %s8520_s21 = scalar_lea.hbm %s8580_s7, %s5207_s8  ;;  %s4661_s27 = scalar_lea.sflag [#allocation8], %s6653_s20 }
  0x6d   : > { %499 = vmatprep.subr.bf16.mxu0 %v5851_v10  ;;  %5374 = vmatprep.subr.bf16.mxu1 %v5853_v11  ;;  %v381_v39 = vpack.c.bf16 %v370_v37, %v369_v36  ;;  %v372_v41 = vld [vmem:[%s6659_s18 + $0x58] sm:$0xff]  ;;  %v373_v42 = vld [vmem:[%s6659_s18 + $0x60] sm:$0xff]  ;;  %v374_v43 = vld [vmem:[%s6659_s18 + $0x68] sm:$0xff]  ;;  %s6362_s3 = scalar_lea.vmem %s8522_s1, 2048  ;;  %p8734_p4 = scmp.ne.s32.totalorder %s8640_s19, 0 }
  0x6e   : > { %v382_v44 = vpack.c.bf16 %v372_v41, %v371_v40  ;;  %v383_v45 = vpack.c.bf16 %v374_v43, %v373_v42  ;;  %v375_v46 = vld [vmem:[%s6659_s18 + $0x70] sm:$0xff]  ;;  %v376_v47 = vld [vmem:[%s6659_s18 + $0x78] sm:$0xff]  ;;  %v401_v52 = vld [vmem:[%s8577_s4] sm:$0x3]  ;;  %p6363_p1 = scmp.ne.s32.totalorder %s8522_s1, %s6362_s3  ;;  %s6464_s5 = smov [#allocation14]  }
  0x6f   : > { %v384_v48 = vpack.c.bf16 %v376_v47, %v375_v46  ;;  %v6701_v54 = vrot.slane %v401_v52, %v405_v51  ;;  %v6706_v55 = vld [vmem:[%s8575_s2] ss:$0 sm:$0xff]  ;;  %v6708_v56 = vrot.slane %v401_v52, %v409_v53  ;;  %s6366_s9 = sshll.u32 %s6464_s5, 4  ;;  %s6367_s9 = int_to_ptr.vmem [resolvable:$false] %s6366_s9 }
  0x70   : > { %500 = vmatpush1.bf16.msra.mxu0 %v5854_v12  ;;  %5375 = vmatpush3.bf16.msra.mxu1 %v5853_v11  ;;  %p6364_p6 = pnand %p6363_p1, %p8734_p4  ;;  %s6368_s11 = scalar_lea.vmem %s6367_s9, 4096 }
  0x71   : > { %501 = vmatprep.subr.bf16.mxu0 %v5855_v13  ;;  %5376 = vmatprep.subr.bf16.mxu1 %v5857_v14  ;;  %p6369_p5 = scmp.lt.s32.totalorder %s8522_s1, %s6367_s9  ;;  %p6370_p10 = scmp.lt.s32.totalorder %s6368_s11, %s6362_s3 }
  0x72   : > { %p6365_p8 = pneg %p6364_p6 }
  0x73   : > { %p6371_p11 = por %p6370_p10, %p6369_p5 }
  0x74   : > { %502 = vmatpush1.bf16.msra.mxu0 %v5858_v15  ;;  %5377 = vmatpush3.bf16.msra.mxu1 %v5857_v14 }
  0x75   : > { %503 = vmatprep.subr.bf16.mxu0 %v5859_v16  ;;  %5378 = vmatprep.subr.bf16.mxu1 %v5861_v17  ;;  %p6372_p2 = pnand %p6371_p11, %p6365_p8 }
  0x78   : > { %504 = vmatpush1.bf16.msra.mxu0 %v5862_v20  ;;  %5379 = vmatpush3.bf16.msra.mxu1 %v5861_v17 }
  0x79   : > { %505 = vmatprep.subr.bf16.mxu0 %v5863_v22  ;;  %5380 = vmatprep.subr.bf16.mxu1 %v5865_v23 }
  0x7c   : > { %506 = vmatpush1.bf16.msra.mxu0 %v5866_v24  ;;  %5381 = vmatpush3.bf16.msra.mxu1 %v5865_v23 }
  0x7d   : > { %507 = vmatprep.subr.bf16.mxu0 %v5867_v25  ;;  %5382 = vmatprep.subr.bf16.mxu1 %v5869_v26 }
  0x80   : > { %508 = vmatpush1.bf16.msra.mxu0 %v5870_v27  ;;  %5383 = vmatpush3.bf16.msra.mxu1 %v5869_v26 }
  0x83   : > { %526 = vmatmul.mubr.bf16.vlgmr.msra.gmra.mxu0 %v1175_v21  ;;  %5385 = vmatmul.mubr.bf16.vlgmr.msra.gmra.mxu1 %v1176_v30 }
  0x84   : > { %535 = vmatprep.mubr.bf16.mxu0 %v6460_v0  ;;  %5388 = vmatprep.mubr.bf16.mxu1 %v379_v33 }
  0x8b   : > { %536 = vmatmul.mubr.bf16.gmra.mxu0 %v1176_v30  ;;  %5389 = vmatmul.mubr.bf16.gmra.mxu1 %v380_v38 }
  0x8c   : > { %545 = vmatprep.mubr.bf16.mxu0 %v6460_v0  ;;  %5392 = vmatprep.mubr.bf16.mxu1 %v381_v39 }
  0x93   : > { %546 = vmatmul.mubr.bf16.gmra.mxu0 %v379_v33  ;;  %5393 = vmatmul.mubr.bf16.gmra.mxu1 %v382_v44 }
  0x94   : > { %555 = vmatprep.mubr.bf16.mxu0 %v6460_v0  ;;  %5396 = vmatprep.mubr.bf16.mxu1 %v383_v45 }
  0x9b   : > { %556 = vmatmul.mubr.bf16.gmra.mxu0 %v380_v38  ;;  %5397 = vmatmul.mubr.bf16.gmra.mxu1 %v384_v48 }
  0x9c   : > { %565 = vmatprep.mubr.bf16.mxu0 %v6460_v0 }
  0xa3   : > { %566 = vmatmul.mubr.bf16.gmra.mxu0 %v381_v39 }
  0xa4   : > { %575 = vmatprep.mubr.bf16.mxu0 %v6460_v0 }
  0xab   : > { %576 = vmatmul.mubr.bf16.gmra.mxu0 %v382_v44 }
  0xac   : > { %585 = vmatprep.mubr.bf16.mxu0 %v6460_v0 }
  0xb3   : > { %586 = vmatmul.mubr.bf16.gmra.mxu0 %v383_v45 }
  0xb4   : > { %595 = vmatprep.mubr.bf16.mxu0 %v6460_v0 }
  0xbb   : > { %596 = vmatmul.mubr.bf16.gmra.mxu0 %v384_v48 }
 0x143   : > { %v527_v57 = vpop.f32.mrf.mxu0  ;;  %v5386_v58 = vpop.f32.mrf.mxu1 }
 0x144   : > { %v528_v59 = vadd.f32 %v527_v57, %v6701_v54  ;;  %v1297_v60 = vadd.f32 %v5386_v58, %v6706_v55 }
 0x145   : > { %v529_v61 = vpop.f32.mrf.mxu0  ;;  %v1288_v62 = vpop.f32.mrf.mxu1 }
 0x146   : > { %v6712_v63 = vpack.c.bf16 %v528_v59, %v528_v59  ;;  %v6714_v0 = vpack.c.bf16 %v1297_v60, %v1297_v60  ;;  %v530_v1 = vadd.f32 %v529_v61, %v6708_v56  ;;  %v1289_v2 = vadd.f32 %v6706_v55, %v1288_v62 }
 0x147   : > { %v531_v3 = vpop.f32.mrf.mxu0  ;;  %v5387_v4 = vpop.f32.mrf.mxu1 }
 0x148   : > { %679 = vst.msk [vmem:[#allocation2] sm:$0xf] %vm678_vm0, %v6712_v63  ;;  %1418 = vst.msk [vmem:[#allocation4 + $0x8] sm:$0xf] %vm678_vm0, %v6714_v0  ;;  %v6722_v5 = vpack.c.bf16 %v530_v1, %v530_v1  ;;  %v6724_v6 = vpack.c.bf16 %v1289_v2, %v1289_v2  ;;  %v532_v7 = vadd.f32 %v531_v3, %v6701_v54  ;;  %767 = vrot.lane.b32.xlu0 %v6712_v63, %s6461_s13 }
 0x149   : > { %v1300_v8 = vadd.f32 %v5387_v4, %v6706_v55  ;;  %v533_v9 = vpop.f32.mrf.mxu0  ;;  %v1291_v10 = vpop.f32.mrf.mxu1 }
 0x14a   : > { %8644 = vst [vmem:[#allocation20_spill] sm:$0xff] %v6722_v5  ;;  %751 = vst.msk [vmem:[#allocation3] sm:$0xf] %vm678_vm0, %v6722_v5  ;;  %v6734_v11 = vpack.c.bf16 %v532_v7, %v532_v7  ;;  %v534_v13 = vadd.f32 %v533_v9, %v6708_v56  ;;  %v1292_v14 = vadd.f32 %v6706_v55, %v1291_v10 }
 0x14b   : > { %1416 = vst.msk [vmem:[#allocation4] sm:$0xf] %vm678_vm0, %v6724_v6  ;;  %v6736_v12 = vpack.c.bf16 %v1300_v8, %v1300_v8  ;;  %v537_v15 = vpop.f32.mrf.mxu0  ;;  %v5390_v16 = vpop.f32.mrf.mxu1 }
 0x14c   : > { %680 = vst.msk [vmem:[#allocation2 + $0x4] sm:$0xf] %vm678_vm0, %v6734_v11  ;;  %v6744_v17 = vpack.c.bf16 %v534_v13, %v534_v13  ;;  %v6746_v18 = vpack.c.bf16 %v1292_v14, %v1292_v14  ;;  %v538_v19 = vadd.f32 %v537_v15, %v6701_v54  ;;  %769 = vrot.lane.b32.xlu1 %v6734_v11, %s6461_s13 }
 0x14d   : > { %1419 = vst.msk [vmem:[#allocation4 + $0xc] sm:$0xf] %vm678_vm0, %v6736_v12  ;;  %1436 = vrot.lane.b32.xlu0 %v6714_v0, %s6461_s13  ;;  %v539_v20 = vpop.f32.mrf.mxu0  ;;  %v1313_v21 = vadd.f32 %v5390_v16, %v6706_v55  ;;  %v1304_v22 = vpop.f32.mrf.mxu1 }
 0x14e   : > { %8645 = vst [vmem:[#allocation21_spill] sm:$0xff] %v6744_v17  ;;  %752 = vst.msk [vmem:[#allocation3 + $0x4] sm:$0xf] %vm678_vm0, %v6744_v17  ;;  %v6758_v23 = vpack.c.bf16 %v538_v19, %v538_v19  ;;  %v540_v24 = vadd.f32 %v539_v20, %v6708_v56  ;;  %v1305_v25 = vadd.f32 %v6706_v55, %v1304_v22 }
 0x14f   : > { %1417 = vst.msk [vmem:[#allocation4 + $0x4] sm:$0xf] %vm678_vm0, %v6746_v18  ;;  %v541_v26 = vpop.f32.mrf.mxu0  ;;  %v6762_v27 = vpack.c.bf16 %v1313_v21, %v1313_v21  ;;  %v5391_v28 = vpop.f32.mrf.mxu1 }
 0x150   : > { %681 = vst.msk [vmem:[#allocation2 + $0x8] sm:$0xf] %vm678_vm0, %v6758_v23  ;;  %v6766_v29 = vpack.c.bf16 %v540_v24, %v540_v24  ;;  %v542_v30 = vadd.f32 %v541_v26, %v6701_v54  ;;  %1438 = vrot.lane.b32.xlu1 %v6736_v12, %s6461_s13  ;;  %v6773_v31 = vpack.c.bf16 %v1305_v25, %v1305_v25 }
 0x151   : > { %897 = vrot.lane.b32.xlu0 %v6712_v63, %s6462_s14  ;;  %v543_v32 = vpop.f32.mrf.mxu0  ;;  %1422 = vst.msk [vmem:[#allocation4 + $0x18] sm:$0xf] %vm678_vm0, %v6762_v27  ;;  %v1316_v33 = vadd.f32 %v5391_v28, %v6706_v55  ;;  %v1307_v34 = vpop.f32.mrf.mxu1 }
 0x152   : > { %8646 = vst [vmem:[#allocation22_spill] sm:$0xff] %v6766_v29  ;;  %753 = vst.msk [vmem:[#allocation3 + $0x8] sm:$0xf] %vm678_vm0, %v6766_v29  ;;  %v6780_v35 = vpack.c.bf16 %v542_v30, %v542_v30  ;;  %v544_v36 = vadd.f32 %v543_v32, %v6708_v56  ;;  %v1308_v37 = vadd.f32 %v6706_v55, %v1307_v34 }
 0x153   : > { %1420 = vst.msk [vmem:[#allocation4 + $0x10] sm:$0xf] %vm678_vm0, %v6773_v31  ;;  %v547_v38 = vpop.f32.mrf.mxu0  ;;  %v6786_v39 = vpack.c.bf16 %v1316_v33, %v1316_v33  ;;  %v5394_v40 = vpop.f32.mrf.mxu1 }
 0x154   : > { %682 = vst.msk [vmem:[#allocation2 + $0xc] sm:$0xf] %vm678_vm0, %v6780_v35  ;;  %v6790_v41 = vpack.c.bf16 %v544_v36, %v544_v36  ;;  %v548_v42 = vadd.f32 %v547_v38, %v6701_v54  ;;  %899 = vrot.lane.b32.xlu1 %v6734_v11, %s6462_s14  ;;  %v6797_v43 = vpack.c.bf16 %v1308_v37, %v1308_v37 }
 0x155   : > { %1027 = vrot.lane.b32.xlu0 %v6712_v63, %s6463_s30  ;;  %v549_v44 = vpop.f32.mrf.mxu0  ;;  %1423 = vst.msk [vmem:[#allocation4 + $0x1c] sm:$0xf] %vm678_vm0, %v6786_v39  ;;  %v1329_v46 = vadd.f32 %v5394_v40, %v6706_v55  ;;  %v1320_v47 = vpop.f32.mrf.mxu1 }
 0x156   : > { %8647 = vst [vmem:[#allocation23_spill] sm:$0xff] %v6790_v41  ;;  %v5871_v45 = vld [vmem:[#allocation4] sm:$0xff]   ;;  %754 = vst.msk [vmem:[#allocation3 + $0xc] sm:$0xf] %vm678_vm0, %v6790_v41  ;;  %v6804_v48 = vpack.c.bf16 %v548_v42, %v548_v42  ;;  %v550_v50 = vadd.f32 %v549_v44, %v6708_v56  ;;  %v1321_v51 = vadd.f32 %v6706_v55, %v1320_v47 }
 0x157   : > { %1421 = vst.msk [vmem:[#allocation4 + $0x14] sm:$0xf] %vm678_vm0, %v6797_v43  ;;  %v551_v52 = vpop.f32.mrf.mxu0  ;;  %5416 = vmatprep.mubr.msk.bf16.mxu0 %vm1899_vm1, %v5871_v45  ;;  %v6811_v53 = vpack.c.bf16 %v1329_v46, %v1329_v46  ;;  %v5395_v57 = vpop.f32.mrf.mxu1 }
 0x158   : > { %683 = vst.msk [vmem:[#allocation2 + $0x10] sm:$0xf] %vm678_vm0, %v6804_v48  ;;  %v6815_v58 = vpack.c.bf16 %v550_v50, %v550_v50  ;;  %v552_v59 = vadd.f32 %v551_v52, %v6701_v54  ;;  %1029 = vrot.lane.b32.xlu1 %v6734_v11, %s6463_s30  ;;  %v6822_v60 = vpack.c.bf16 %v1321_v51, %v1321_v51 }
 0x159   : > { %1501 = vrot.lane.b32.xlu0 %v6714_v0, %s6462_s14  ;;  %v553_v61 = vpop.f32.mrf.mxu0  ;;  %1426 = vst.msk [vmem:[#allocation4 + $0x28] sm:$0xf] %vm678_vm0, %v6811_v53  ;;  %v1332_v62 = vadd.f32 %v5395_v57, %v6706_v55  ;;  %v1323_v63 = vpop.f32.mrf.mxu1 }
 0x15a   : > { %8648 = vst [vmem:[#allocation24_spill] sm:$0xff] %v6815_v58  ;;  %755 = vst.msk [vmem:[#allocation3 + $0x10] sm:$0xf] %vm678_vm0, %v6815_v58  ;;  %v6829_v1 = vpack.c.bf16 %v552_v59, %v552_v59  ;;  %v554_v2 = vadd.f32 %v553_v61, %v6708_v56  ;;  %v1324_v3 = vadd.f32 %v6706_v55, %v1323_v63 }
 0x15b   : > { %1424 = vst.msk [vmem:[#allocation4 + $0x20] sm:$0xf] %vm678_vm0, %v6822_v60  ;;  %v557_v4 = vpop.f32.mrf.mxu0  ;;  %v6835_v7 = vpack.c.bf16 %v1332_v62, %v1332_v62  ;;  %v5398_v8 = vpop.f32.mrf.mxu1 }
 0x15c   : > { %684 = vst.msk [vmem:[#allocation2 + $0x14] sm:$0xf] %vm678_vm0, %v6829_v1  ;;  %v6839_v9 = vpack.c.bf16 %v554_v2, %v554_v2  ;;  %v558_v10 = vadd.f32 %v557_v4, %v6701_v54  ;;  %1503 = vrot.lane.b32.xlu1 %v6736_v12, %s6462_s14  ;;  %v6846_v11 = vpack.c.bf16 %v1324_v3, %v1324_v3 }
 0x15d   : > { %1566 = vrot.lane.b32.xlu0 %v6714_v0, %s6463_s30  ;;  %v559_v13 = vpop.f32.mrf.mxu0  ;;  %1427 = vst.msk [vmem:[#allocation4 + $0x2c] sm:$0xf] %vm678_vm0, %v6835_v7  ;;  %v1345_v14 = vadd.f32 %v5398_v8, %v6706_v55  ;;  %v1336_v15 = vpop.f32.mrf.mxu1 }
 0x15e   : > { %8649 = vst [vmem:[#allocation25_spill] sm:$0xff] %v6839_v9  ;;  %756 = vst.msk [vmem:[#allocation3 + $0x14] sm:$0xf] %vm678_vm0, %v6839_v9  ;;  %v6853_v16 = vpack.c.bf16 %v558_v10, %v558_v10  ;;  %v560_v19 = vadd.f32 %v559_v13, %v6708_v56  ;;  %v1337_v0 = vadd.f32 %v6706_v55, %v1336_v15 }
 0x15f   : > { %1425 = vst.msk [vmem:[#allocation4 + $0x24] sm:$0xf] %vm678_vm0, %v6846_v11  ;;  %v561_v20 = vpop.f32.mrf.mxu0  ;;  %v6859_v21 = vpack.c.bf16 %v1345_v14, %v1345_v14  ;;  %v5399_v22 = vpop.f32.mrf.mxu1 }
 0x160   : > { %685 = vst.msk [vmem:[#allocation2 + $0x18] sm:$0xf] %vm678_vm0, %v6853_v16  ;;  %v6863_v24 = vpack.c.bf16 %v560_v19, %v560_v19  ;;  %v562_v25 = vadd.f32 %v561_v20, %v6701_v54  ;;  %1568 = vrot.lane.b32.xlu1 %v6736_v12, %s6463_s30  ;;  %v6870_v26 = vpack.c.bf16 %v1337_v0, %v1337_v0 }
 0x161   : > { %1432 = vrot.lane.b32.xlu0 %v6724_v6, %s6461_s13  ;;  %v563_v28 = vpop.f32.mrf.mxu0  ;;  %1430 = vst.msk [vmem:[#allocation4 + $0x38] sm:$0xf] %vm678_vm0, %v6859_v21  ;;  %v1348_v30 = vadd.f32 %v5399_v22, %v6706_v55  ;;  %v1339_v32 = vpop.f32.mrf.mxu1 }
 0x162   : > { %8650 = vst [vmem:[#allocation26_spill] sm:$0xff] %v6863_v24  ;;  %757 = vst.msk [vmem:[#allocation3 + $0x18] sm:$0xf] %vm678_vm0, %v6863_v24  ;;  %v6877_v33 = vpack.c.bf16 %v562_v25, %v562_v25  ;;  %v564_v34 = vadd.f32 %v563_v28, %v6708_v56  ;;  %v1340_v12 = vadd.f32 %v6706_v55, %v1339_v32 }
 0x163   : > { %1428 = vst.msk [vmem:[#allocation4 + $0x30] sm:$0xf] %vm678_vm0, %v6870_v26  ;;  %v567_v36 = vpop.f32.mrf.mxu0  ;;  %v6883_v37 = vpack.c.bf16 %v1348_v30, %v1348_v30 }
 0x164   : > { %686 = vst.msk [vmem:[#allocation2 + $0x1c] sm:$0xf] %vm678_vm0, %v6877_v33  ;;  %v6887_v38 = vpack.c.bf16 %v564_v34, %v564_v34  ;;  %v568_v40 = vadd.f32 %v567_v36, %v6701_v54  ;;  %1434 = vrot.lane.b32.xlu1 %v6746_v18, %s6461_s13  ;;  %v6894_v42 = vpack.c.bf16 %v1340_v12, %v1340_v12 }
 0x165   : > { %1497 = vrot.lane.b32.xlu0 %v6724_v6, %s6462_s14  ;;  %v569_v44 = vpop.f32.mrf.mxu0  ;;  %1431 = vst.msk [vmem:[#allocation4 + $0x3c] sm:$0xf] %vm678_vm0, %v6883_v37 }
 0x166   : > { %8651 = vst [vmem:[#allocation27_spill] sm:$0xff] %v6887_v38  ;;  %758 = vst.msk [vmem:[#allocation3 + $0x1c] sm:$0xf] %vm678_vm0, %v6887_v38  ;;  %v6900_v55 = vpack.c.bf16 %v568_v40, %v568_v40  ;;  %v570_v45 = vadd.f32 %v569_v44, %v6708_v56 }
 0x167   : > { %1429 = vst.msk [vmem:[#allocation4 + $0x34] sm:$0xf] %vm678_vm0, %v6894_v42  ;;  %v571_v46 = vpop.f32.mrf.mxu0 }
 0x168   : > { %687 = vst.msk [vmem:[#allocation2 + $0x20] sm:$0xf] %vm678_vm0, %v6900_v55  ;;  %v6907_v47 = vpack.c.bf16 %v570_v45, %v570_v45  ;;  %v572_v50 = vadd.f32 %v571_v46, %v6701_v54  ;;  %1499 = vrot.lane.b32.xlu1 %v6746_v18, %s6462_s14 }
 0x169   : > { %1562 = vrot.lane.b32.xlu0 %v6724_v6, %s6463_s30  ;;  %v573_v51 = vpop.f32.mrf.mxu0 }
 0x16a   : > { %759 = vst.msk [vmem:[#allocation3 + $0x20] sm:$0xf] %vm678_vm0, %v6907_v47  ;;  %v6916_v52 = vpack.c.bf16 %v572_v50, %v572_v50  ;;  %v574_v57 = vadd.f32 %v573_v51, %v6708_v56 }
 0x16b   : > { %v577_v59 = vpop.f32.mrf.mxu0 }
 0x16c   : > { %688 = vst.msk [vmem:[#allocation2 + $0x24] sm:$0xf] %vm678_vm0, %v6916_v52  ;;  %v6921_v61 = vpack.c.bf16 %v574_v57, %v574_v57  ;;  %v578_v62 = vadd.f32 %v577_v59, %v6701_v54  ;;  %1564 = vrot.lane.b32.xlu1 %v6746_v18, %s6463_s30 }
 0x16d   : > { %771 = vrot.lane.b32.xlu0 %v6758_v23, %s6461_s13  ;;  %v579_v6 = vpop.f32.mrf.mxu0 }
 0x16e   : > { %760 = vst.msk [vmem:[#allocation3 + $0x24] sm:$0xf] %vm678_vm0, %v6921_v61  ;;  %v6930_v63 = vpack.c.bf16 %v578_v62, %v578_v62  ;;  %v580_v2 = vadd.f32 %v579_v6, %v6708_v56 }
 0x16f   : > { %v581_v3 = vpop.f32.mrf.mxu0 }
 0x170   : > { %689 = vst.msk [vmem:[#allocation2 + $0x28] sm:$0xf] %vm678_vm0, %v6930_v63  ;;  %v6935_v4 = vpack.c.bf16 %v580_v2, %v580_v2  ;;  %v582_v8 = vadd.f32 %v581_v3, %v6701_v54  ;;  %836 = vrot.lane.b32.xlu1 %v6766_v29, %s6461_s13 }
 0x171   : > { %1444 = vrot.lane.b32.xlu0 %v6762_v27, %s6461_s13  ;;  %v583_v18 = vpop.f32.mrf.mxu0 }
 0x172   : > { %761 = vst.msk [vmem:[#allocation3 + $0x28] sm:$0xf] %vm678_vm0, %v6935_v4  ;;  %v6944_v10 = vpack.c.bf16 %v582_v8, %v582_v8  ;;  %v584_v13 = vadd.f32 %v583_v18, %v6708_v56  ;;  %v5878_v18 = vld [vmem:[#allocation2 + $0x8] sm:$0xff]  }
 0x173   : > { %v587_v14 = vpop.f32.mrf.mxu0  ;;  %v5875_v3 = vld [vmem:[#allocation2 + $0x20] sm:$0xff]  }
 0x174   : > { %690 = vst.msk [vmem:[#allocation2 + $0x2c] sm:$0xf] %vm678_vm0, %v6944_v10  ;;  %v6949_v15 = vpack.c.bf16 %v584_v13, %v584_v13  ;;  %v588_v19 = vadd.f32 %v587_v14, %v6701_v54  ;;  %773 = vrot.lane.b32.xlu1 %v6780_v35, %s6461_s13  ;;  %v5879_v13 = vld [vmem:[#allocation2] sm:$0xff]  }
 0x175   : > { %901 = vrot.lane.b32.xlu0 %v6758_v23, %s6462_s14  ;;  %v589_v0 = vpop.f32.mrf.mxu0 }
 0x176   : > { %762 = vst.msk [vmem:[#allocation3 + $0x2c] sm:$0xf] %vm678_vm0, %v6949_v15  ;;  %v6958_v20 = vpack.c.bf16 %v588_v19, %v588_v19  ;;  %v590_v22 = vadd.f32 %v589_v0, %v6708_v56 }
 0x177   : > { %v591_v25 = vpop.f32.mrf.mxu0 }
 0x178   : > { %691 = vst.msk [vmem:[#allocation2 + $0x30] sm:$0xf] %vm678_vm0, %v6958_v20  ;;  %v6963_v28 = vpack.c.bf16 %v590_v22, %v590_v22  ;;  %v592_v30 = vadd.f32 %v591_v25, %v6701_v54  ;;  %1446 = vrot.lane.b32.xlu1 %v6786_v39, %s6461_s13  ;;  %v1925_v22 = vsel %vm1899_vm1, %v5879_v13, 0 }
 0x179   : > { %1031 = vrot.lane.b32.xlu0 %v6758_v23, %s6463_s30  ;;  %v593_v32 = vpop.f32.mrf.mxu0 }
 0x17a   : > { %763 = vst.msk [vmem:[#allocation3 + $0x30] sm:$0xf] %vm678_vm0, %v6963_v28  ;;  %v6972_v34 = vpack.c.bf16 %v592_v30, %v592_v30  ;;  %v594_v12 = vadd.f32 %v593_v32, %v6708_v56 }
 0x17b   : > { %v597_v36 = vpop.f32.mrf.mxu0  ;;  %v5874_v2 = vld [vmem:[#allocation2 + $0x28] sm:$0xff]  }
 0x17c   : > { %692 = vst.msk [vmem:[#allocation2 + $0x34] sm:$0xf] %vm678_vm0, %v6972_v34  ;;  %v6977_v40 = vpack.c.bf16 %v594_v12, %v594_v12  ;;  %v598_v44 = vadd.f32 %v597_v36, %v6701_v54  ;;  %903 = vrot.lane.b32.xlu1 %v6780_v35, %s6462_s14  ;;  %v5880_v12 = vld [vmem:[#allocation4 + $0x8] sm:$0xff]   ;;  %v5881_v36 = vld [vmem:[#allocation4 + $0x10] sm:$0xff]  }
 0x17d   : > { %1509 = vrot.lane.b32.xlu0 %v6762_v27, %s6462_s14  ;;  %v599_v23 = vpop.f32.mrf.mxu0 }
 0x17e   : > { %764 = vst.msk [vmem:[#allocation3 + $0x34] sm:$0xf] %vm678_vm0, %v6977_v40  ;;  %v6986_v45 = vpack.c.bf16 %v598_v44, %v598_v44  ;;  %v600_v46 = vadd.f32 %v599_v23, %v6708_v56 }
 0x17f   : > { %v601_v50 = vpop.f32.mrf.mxu0 }
 0x180   : > { %693 = vst.msk [vmem:[#allocation2 + $0x38] sm:$0xf] %vm678_vm0, %v6986_v45  ;;  %v6991_v51 = vpack.c.bf16 %v600_v46, %v600_v46  ;;  %v602_v57 = vadd.f32 %v601_v50, %v6701_v54  ;;  %1033 = vrot.lane.b32.xlu1 %v6780_v35, %s6463_s30  ;;  %v5883_v50 = vld [vmem:[#allocation4 + $0x20] sm:$0xff]  }
 0x181   : > { %1574 = vrot.lane.b32.xlu0 %v6762_v27, %s6463_s30  ;;  %v603_v62 = vpop.f32.mrf.mxu0 }
 0x182   : > { %765 = vst.msk [vmem:[#allocation3 + $0x38] sm:$0xf] %vm678_vm0, %v6991_v51  ;;  %v7000_v59 = vpack.c.bf16 %v602_v57, %v602_v57 }
 0x183   : > { %v5873_v27 = vld [vmem:[#allocation2 + $0x30] sm:$0xff]  }
 0x184   : > { %694 = vst.msk [vmem:[#allocation2 + $0x3c] sm:$0xf] %vm678_vm0, %v7000_v59  ;;  %1511 = vrot.lane.b32.xlu1 %v6786_v39, %s6462_s14 }
 0x185   : > { %1440 = vrot.lane.b32.xlu0 %v6773_v31, %s6461_s13 }
 0x188   : > { %1576 = vrot.lane.b32.xlu1 %v6786_v39, %s6463_s30  ;;  %v604_v39 = vadd.f32 %v603_v62, %v6708_v56  ;;  %v1940_v56 = vsel %vm1899_vm1, %v5874_v2, 0  ;;  %v5884_v62 = vld [vmem:[#allocation4 + $0x28] sm:$0xff]  }
 0x189   : > { %1505 = vrot.lane.b32.xlu0 %v6773_v31, %s6462_s14 }
 0x18a   : > { %v7024_v6 = vpack.c.bf16 %v604_v39, %v604_v39  ;;  %v5885_v39 = vld [vmem:[#allocation4 + $0x30] sm:$0xff]  }
 0x18b   : > { %v5872_v54 = vld [vmem:[#allocation2 + $0x38] sm:$0xff]  }
 0x18c   : > { %1442 = vrot.lane.b32.xlu1 %v6797_v43, %s6461_s13  ;;  %5704 = vmatprep.subr.msk.bf16.mxu0 %vm1899_vm1, %v5872_v54  ;;  %v1946_v35 = vsel %vm1899_vm1, %v5872_v54, 0  ;;  %766 = vst.msk [vmem:[#allocation3 + $0x3c] sm:$0xf] %vm678_vm0, %v7024_v6 }
 0x18d   : > { %1570 = vrot.lane.b32.xlu0 %v6773_v31, %s6463_s30  ;;  %5401 = vmatpush3.bf16.xpose.msra.mxu0 %v1946_v35  ;;  %v1943_v31 = vsel %vm1899_vm1, %v5873_v27, 0 }
 0x18e   : > { %5705 = vmatprep.subr.msk.bf16.mxu0 %vm1899_vm1, %v5873_v27 }
 0x190   : > { %1507 = vrot.lane.b32.xlu1 %v6797_v43, %s6462_s14 }
 0x191   : > { %775 = vrot.lane.b32.xlu0 %v6804_v48, %s6461_s13 }
 0x194   : > { %1572 = vrot.lane.b32.xlu1 %v6797_v43, %s6463_s30  ;;  %v1937_v43 = vsel %vm1899_vm1, %v5875_v3, 0 }
 0x195   : > { %905 = vrot.lane.b32.xlu0 %v6804_v48, %s6462_s14  ;;  %5403 = vmatpush3.bf16.xpose.msra.mxu0 %v1943_v31 }
 0x196   : > { %5706 = vmatprep.subr.msk.bf16.mxu0 %vm1899_vm1, %v5874_v2 }
 0x198   : > { %840 = vrot.lane.b32.xlu1 %v6815_v58, %s6461_s13 }
 0x199   : > { %1035 = vrot.lane.b32.xlu0 %v6804_v48, %s6463_s30  ;;  %v5876_v48 = vld [vmem:[#allocation2 + $0x18] sm:$0xff]  }
 0x19a   : > { %v1934_v8 = vsel %vm1899_vm1, %v5876_v48, 0 }
 0x19c   : > { %777 = vrot.lane.b32.xlu1 %v6829_v1, %s6461_s13 }
 0x19d   : > { %1452 = vrot.lane.b32.xlu0 %v6811_v53, %s6461_s13  ;;  %5405 = vmatpush3.bf16.xpose.msra.mxu0 %v1940_v56 }
 0x19e   : > { %5707 = vmatprep.subr.msk.bf16.mxu0 %vm1899_vm1, %v5875_v3  ;;  %v5887_v3 = vld [vmem:[#allocation4 + $0x38] sm:$0xff]  }
 0x1a0   : > { %907 = vrot.lane.b32.xlu1 %v6829_v1, %s6462_s14 }
 0x1a1   : > { %1517 = vrot.lane.b32.xlu0 %v6811_v53, %s6462_s14 }
 0x1a4   : > { %1037 = vrot.lane.b32.xlu1 %v6829_v1, %s6463_s30  ;;  %v5877_v1 = vld [vmem:[#allocation2 + $0x10] sm:$0xff]  }
 0x1a5   : > { %1582 = vrot.lane.b32.xlu0 %v6811_v53, %s6463_s30  ;;  %5407 = vmatpush3.bf16.xpose.msra.mxu0 %v1937_v43  ;;  %v1931_v53 = vsel %vm1899_vm1, %v5877_v1, 0 }
 0x1a6   : > { %5708 = vmatprep.subr.msk.bf16.mxu0 %vm1899_vm1, %v5876_v48 }
 0x1a8   : > { %1454 = vrot.lane.b32.xlu1 %v6835_v7, %s6461_s13 }
 0x1a9   : > { %1448 = vrot.lane.b32.xlu0 %v6822_v60, %s6461_s13 }
 0x1ac   : > { %1519 = vrot.lane.b32.xlu1 %v6835_v7, %s6462_s14 }
 0x1ad   : > { %1513 = vrot.lane.b32.xlu0 %v6822_v60, %s6462_s14  ;;  %5409 = vmatpush3.bf16.xpose.msra.mxu0 %v1934_v8 }
 0x1ae   : > { %5709 = vmatprep.subr.msk.bf16.mxu0 %vm1899_vm1, %v5877_v1 }
 0x1b0   : > { %1584 = vrot.lane.b32.xlu1 %v6835_v7, %s6463_s30 }
 0x1b1   : > { %1578 = vrot.lane.b32.xlu0 %v6822_v60, %s6463_s30  ;;  %v1928_v60 = vsel %vm1899_vm1, %v5878_v18, 0 }
 0x1b4   : > { %1450 = vrot.lane.b32.xlu1 %v6846_v11, %s6461_s13 }
 0x1b5   : > { %842 = vrot.lane.b32.xlu0 %v6839_v9, %s6461_s13  ;;  %5411 = vmatpush3.bf16.xpose.msra.mxu0 %v1931_v53 }
 0x1b6   : > { %5710 = vmatprep.subr.msk.bf16.mxu0 %vm1899_vm1, %v5878_v18 }
 0x1b8   : > { %1515 = vrot.lane.b32.xlu1 %v6846_v11, %s6462_s14 }
 0x1b9   : > { %779 = vrot.lane.b32.xlu0 %v6853_v16, %s6461_s13 }
 0x1ba   : > { %v768_v7 = vpop.permute.xlu0 %767 }
 0x1bb   : > { %816 = vst.msk [vmem:[#allocation2 + $0x40] sm:$0xf] %vm678_vm0, %v768_v7 }
 0x1bc   : > { %1580 = vrot.lane.b32.xlu1 %v6846_v11, %s6463_s30 }
 0x1bd   : > { %909 = vrot.lane.b32.xlu0 %v6853_v16, %s6462_s14  ;;  %5413 = vmatpush3.bf16.xpose.msra.mxu0 %v1928_v60 }
 0x1be   : > { %v770_v14 = vpop.permute.xlu1 %769  ;;  %5711 = vmatprep.subr.msk.bf16.mxu0 %vm1899_vm1, %v5879_v13 }
 0x1bf   : > { %v1437_v19 = vpop.permute.xlu0 %1436  ;;  %817 = vst.msk [vmem:[#allocation2 + $0x44] sm:$0xf] %vm678_vm0, %v770_v14 }
 0x1c0   : > { %1483 = vst.msk [vmem:[#allocation4 + $0x48] sm:$0xf] %vm678_vm0, %v1437_v19  ;;  %844 = vrot.lane.b32.xlu1 %v6863_v24, %s6461_s13 }
 0x1c1   : > { %1039 = vrot.lane.b32.xlu0 %v6853_v16, %s6463_s30 }
 0x1c2   : > { %v1439_v11 = vpop.permute.xlu1 %1438 }
 0x1c3   : > { %v898_v0 = vpop.permute.xlu0 %897  ;;  %1484 = vst.msk [vmem:[#allocation4 + $0x4c] sm:$0xf] %vm678_vm0, %v1439_v11 }
 0x1c4   : > { %946 = vst.msk [vmem:[#allocation2 + $0x80] sm:$0xf] %vm678_vm0, %v898_v0  ;;  %781 = vrot.lane.b32.xlu1 %v6877_v33, %s6461_s13 }
 0x1c5   : > { %1460 = vrot.lane.b32.xlu0 %v6859_v21, %s6461_s13  ;;  %5415 = vmatpush3.bf16.xpose.msra.mxu0 %v1925_v22 }
 0x1c6   : > { %v900_v25 = vpop.permute.xlu1 %899 }
 0x1c7   : > { %v1028_v30 = vpop.permute.xlu0 %1027  ;;  %947 = vst.msk [vmem:[#allocation2 + $0x84] sm:$0xf] %vm678_vm0, %v900_v25 }
 0x1c8   : > { %1076 = vst.msk [vmem:[#allocation2 + $0xc0] sm:$0xf] %vm678_vm0, %v1028_v30  ;;  %911 = vrot.lane.b32.xlu1 %v6877_v33, %s6462_s14 }
 0x1c9   : > { %1525 = vrot.lane.b32.xlu0 %v6859_v21, %s6462_s14 }
 0x1ca   : > { %v1030_v16 = vpop.permute.xlu1 %1029 }
 0x1cb   : > { %v1502_v32 = vpop.permute.xlu0 %1501  ;;  %1077 = vst.msk [vmem:[#allocation2 + $0xc4] sm:$0xf] %vm678_vm0, %v1030_v16 }
 0x1cc   : > { %1548 = vst.msk [vmem:[#allocation4 + $0x88] sm:$0xf] %vm678_vm0, %v1502_v32  ;;  %1041 = vrot.lane.b32.xlu1 %v6877_v33, %s6463_s30  ;;  %5417 = vmatmul.mubr.msk.bf16.vlgmr.msra.gmra.mxu0 %vm1899_vm1, %v5880_v12 }
 0x1cd   : > { %1590 = vrot.lane.b32.xlu0 %v6859_v21, %s6463_s30  ;;  %5420 = vmatprep.mubr.msk.bf16.mxu0 %vm1899_vm1, %v5881_v36  ;;  %v5882_v21 = vld [vmem:[#allocation4 + $0x18] sm:$0xff]  }
 0x1ce   : > { %v1504_v44 = vpop.permute.xlu1 %1503 }
 0x1cf   : > { %v1567_v23 = vpop.permute.xlu0 %1566  ;;  %1549 = vst.msk [vmem:[#allocation4 + $0x8c] sm:$0xf] %vm678_vm0, %v1504_v44 }
 0x1d0   : > { %1613 = vst.msk [vmem:[#allocation4 + $0xc8] sm:$0xf] %vm678_vm0, %v1567_v23  ;;  %1462 = vrot.lane.b32.xlu1 %v6883_v37, %s6461_s13 }
 0x1d1   : > { %1456 = vrot.lane.b32.xlu0 %v6870_v26, %s6461_s13 }
 0x1d2   : > { %v1569_v33 = vpop.permute.xlu1 %1568 }
 0x1d3   : > { %v1433_v46 = vpop.permute.xlu0 %1432  ;;  %1614 = vst.msk [vmem:[#allocation4 + $0xcc] sm:$0xf] %vm678_vm0, %v1569_v33 }
 0x1d4   : > { %1481 = vst.msk [vmem:[#allocation4 + $0x40] sm:$0xf] %vm678_vm0, %v1433_v46  ;;  %1527 = vrot.lane.b32.xlu1 %v6883_v37, %s6462_s14  ;;  %5421 = vmatmul.mubr.msk.bf16.gmra.mxu0 %vm1899_vm1, %v5882_v21 }
 0x1d5   : > { %1521 = vrot.lane.b32.xlu0 %v6870_v26, %s6462_s14  ;;  %5424 = vmatprep.mubr.msk.bf16.mxu0 %vm1899_vm1, %v5883_v50 }
 0x1d6   : > { %v1435_v57 = vpop.permute.xlu1 %1434 }
 0x1d7   : > { %v1498_v54 = vpop.permute.xlu0 %1497  ;;  %1482 = vst.msk [vmem:[#allocation4 + $0x44] sm:$0xf] %vm678_vm0, %v1435_v57 }
 0x1d8   : > { %1546 = vst.msk [vmem:[#allocation4 + $0x80] sm:$0xf] %vm678_vm0, %v1498_v54  ;;  %1592 = vrot.lane.b32.xlu1 %v6883_v37, %s6463_s30 }
 0x1d9   : > { %1586 = vrot.lane.b32.xlu0 %v6870_v26, %s6463_s30 }
 0x1da   : > { %v1500_v27 = vpop.permute.xlu1 %1499 }
 0x1db   : > { %v1563_v35 = vpop.permute.xlu0 %1562  ;;  %1547 = vst.msk [vmem:[#allocation4 + $0x84] sm:$0xf] %vm678_vm0, %v1500_v27 }
 0x1dc   : > { %1611 = vst.msk [vmem:[#allocation4 + $0xc0] sm:$0xf] %vm678_vm0, %v1563_v35  ;;  %1458 = vrot.lane.b32.xlu1 %v6894_v42, %s6461_s13  ;;  %5425 = vmatmul.mubr.msk.bf16.gmra.mxu0 %vm1899_vm1, %v5884_v62 }
 0x1dd   : > { %846 = vrot.lane.b32.xlu0 %v6887_v38, %s6461_s13  ;;  %5428 = vmatprep.mubr.msk.bf16.mxu0 %vm1899_vm1, %v5885_v39 }
 0x1de   : > { %v1565_v37 = vpop.permute.xlu1 %1564  ;;  %v5886_v26 = vld [vmem:[#allocation4 + $0x40] sm:$0xff]  }
 0x1df   : > { %v772_v31 = vpop.permute.xlu0 %771  ;;  %1612 = vst.msk [vmem:[#allocation4 + $0xc4] sm:$0xf] %vm678_vm0, %v1565_v37  ;;  %5448 = vmatprep.mubr.msk.bf16.mxu1 %vm1899_vm1, %v5886_v26 }
 0x1e0   : > { %818 = vst.msk [vmem:[#allocation2 + $0x48] sm:$0xf] %vm678_vm0, %v772_v31  ;;  %1523 = vrot.lane.b32.xlu1 %v6894_v42, %s6462_s14 }
 0x1e1   : > { %783 = vrot.lane.b32.xlu0 %v6900_v55, %s6461_s13 }
 0x1e2   : > { %v837_v2 = vpop.permute.xlu1 %836  ;;  %v5888_v43 = vld [vmem:[#allocation4 + $0x80] sm:$0xff]  }
 0x1e3   : > { %v1445_v56 = vpop.permute.xlu0 %1444  ;;  %883 = vst.msk [vmem:[#allocation3 + $0x48] sm:$0xf] %vm678_vm0, %v837_v2 }
 0x1e4   : > { %1487 = vst.msk [vmem:[#allocation4 + $0x58] sm:$0xf] %vm678_vm0, %v1445_v56  ;;  %1588 = vrot.lane.b32.xlu1 %v6894_v42, %s6463_s30  ;;  %5429 = vmatmul.mubr.msk.bf16.gmra.mxu0 %vm1899_vm1, %v5887_v3 }
 0x1e5   : > { %913 = vrot.lane.b32.xlu0 %v6900_v55, %s6462_s14  ;;  %5480 = vmatprep.mubr.msk.bf16.mxu0 %vm1899_vm1, %v5888_v43 }
 0x1e6   : > { %v774_v48 = vpop.permute.xlu1 %773 }
 0x1e7   : > { %v902_v8 = vpop.permute.xlu0 %901  ;;  %819 = vst.msk [vmem:[#allocation2 + $0x4c] sm:$0xf] %vm678_vm0, %v774_v48 }
 0x1e8   : > { %948 = vst.msk [vmem:[#allocation2 + $0x88] sm:$0xf] %vm678_vm0, %v902_v8  ;;  %848 = vrot.lane.b32.xlu1 %v6907_v47, %s6461_s13 }
 0x1e9   : > { %1043 = vrot.lane.b32.xlu0 %v6900_v55, %s6463_s30 }
 0x1ea   : > { %v1447_v42 = vpop.permute.xlu1 %1446 }
 0x1eb   : > { %v1032_v1 = vpop.permute.xlu0 %1031  ;;  %1488 = vst.msk [vmem:[#allocation4 + $0x5c] sm:$0xf] %vm678_vm0, %v1447_v42 }
 0x1ec   : > { %1078 = vst.msk [vmem:[#allocation2 + $0xc8] sm:$0xf] %vm678_vm0, %v1032_v1  ;;  %785 = vrot.lane.b32.xlu1 %v6916_v52, %s6461_s13 }
 0x1ed   : > { %850 = vrot.lane.b32.xlu0 %v6921_v61, %s6461_s13 }
 0x1ee   : > { %v904_v53 = vpop.permute.xlu1 %903 }
 0x1ef   : > { %v1510_v18 = vpop.permute.xlu0 %1509  ;;  %949 = vst.msk [vmem:[#allocation2 + $0x8c] sm:$0xf] %vm678_vm0, %v904_v53 }
 0x1f0   : > { %1552 = vst.msk [vmem:[#allocation4 + $0x98] sm:$0xf] %vm678_vm0, %v1510_v18  ;;  %915 = vrot.lane.b32.xlu1 %v6916_v52, %s6462_s14 }
 0x1f1   : > { %787 = vrot.lane.b32.xlu0 %v6930_v63, %s6461_s13 }
 0x1f2   : > { %v1034_v55 = vpop.permute.xlu1 %1033 }
 0x1f3   : > { %v1575_v7 = vpop.permute.xlu0 %1574  ;;  %1079 = vst.msk [vmem:[#allocation2 + $0xcc] sm:$0xf] %vm678_vm0, %v1034_v55 }
 0x1f4   : > { %1617 = vst.msk [vmem:[#allocation4 + $0xd8] sm:$0xf] %vm678_vm0, %v1575_v7  ;;  %1045 = vrot.lane.b32.xlu1 %v6916_v52, %s6463_s30 }
 0x1f5   : > { %917 = vrot.lane.b32.xlu0 %v6930_v63, %s6462_s14 }
 0x1f6   : > { %v1512_v60 = vpop.permute.xlu1 %1511 }
 0x1f7   : > { %v1441_v13 = vpop.permute.xlu0 %1440  ;;  %1553 = vst.msk [vmem:[#allocation4 + $0x9c] sm:$0xf] %vm678_vm0, %v1512_v60 }
 0x1f8   : > { %1485 = vst.msk [vmem:[#allocation4 + $0x50] sm:$0xf] %vm678_vm0, %v1441_v13  ;;  %789 = vrot.lane.b32.xlu1 %v6944_v10, %s6461_s13 }
 0x1f9   : > { %1047 = vrot.lane.b32.xlu0 %v6930_v63, %s6463_s30 }
 0x1fa   : > { %v1577_v14 = vpop.permute.xlu1 %1576 }
 0x1fb   : > { %v1506_v19 = vpop.permute.xlu0 %1505  ;;  %1618 = vst.msk [vmem:[#allocation4 + $0xdc] sm:$0xf] %vm678_vm0, %v1577_v14 }
 0x1fc   : > { %1550 = vst.msk [vmem:[#allocation4 + $0x90] sm:$0xf] %vm678_vm0, %v1506_v19  ;;  %919 = vrot.lane.b32.xlu1 %v6944_v10, %s6462_s14 }
 0x1fd   : > { %852 = vrot.lane.b32.xlu0 %v6935_v4, %s6461_s13 }
 0x1fe   : > { %v1443_v52 = vpop.permute.xlu1 %1442 }
 0x1ff   : > { %v1571_v11 = vpop.permute.xlu0 %1570  ;;  %1486 = vst.msk [vmem:[#allocation4 + $0x54] sm:$0xf] %vm678_vm0, %v1443_v52 }
 0x200   : > { %1615 = vst.msk [vmem:[#allocation4 + $0xd0] sm:$0xf] %vm678_vm0, %v1571_v11  ;;  %1049 = vrot.lane.b32.xlu1 %v6944_v10, %s6463_s30 }
 0x201   : > { %921 = vrot.lane.b32.xlu0 %v6958_v20, %s6462_s14 }
 0x202   : > { %v1508_v63 = vpop.permute.xlu1 %1507 }
 0x203   : > { %v776_v0 = vpop.permute.xlu0 %775  ;;  %1551 = vst.msk [vmem:[#allocation4 + $0x94] sm:$0xf] %vm678_vm0, %v1508_v63 }
 0x204   : > { %820 = vst.msk [vmem:[#allocation2 + $0x50] sm:$0xf] %vm678_vm0, %v776_v0  ;;  %854 = vrot.lane.b32.xlu1 %v6949_v15, %s6461_s13 }
 0x205   : > { %1051 = vrot.lane.b32.xlu0 %v6958_v20, %s6463_s30 }
 0x206   : > { %v1573_v22 = vpop.permute.xlu1 %1572 }
 0x207   : > { %v906_v25 = vpop.permute.xlu0 %905  ;;  %1616 = vst.msk [vmem:[#allocation4 + $0xd4] sm:$0xf] %vm678_vm0, %v1573_v22 }
 0x208   : > { %950 = vst.msk [vmem:[#allocation2 + $0x90] sm:$0xf] %vm678_vm0, %v906_v25  ;;  %791 = vrot.lane.b32.xlu1 %v6958_v20, %s6461_s13 }
 0x209   : > { %795 = vrot.lane.b32.xlu0 %v6986_v45, %s6461_s13 }
 0x20a   : > { %v841_v10 = vpop.permute.xlu1 %840 }
 0x20b   : > { %v1036_v30 = vpop.permute.xlu0 %1035  ;;  %885 = vst.msk [vmem:[#allocation3 + $0x50] sm:$0xf] %vm678_vm0, %v841_v10 }
 0x20c   : > { %1080 = vst.msk [vmem:[#allocation2 + $0xd0] sm:$0xf] %vm678_vm0, %v1036_v30  ;;  %856 = vrot.lane.b32.xlu1 %v6963_v28, %s6461_s13 }
 0x20d   : > { %925 = vrot.lane.b32.xlu0 %v6986_v45, %s6462_s14 }
 0x20e   : > { %v778_v16 = vpop.permute.xlu1 %777 }
 0x20f   : > { %v1453_v32 = vpop.permute.xlu0 %1452  ;;  %821 = vst.msk [vmem:[#allocation2 + $0x54] sm:$0xf] %vm678_vm0, %v778_v16 }
 0x210   : > { %1491 = vst.msk [vmem:[#allocation4 + $0x68] sm:$0xf] %vm678_vm0, %v1453_v32  ;;  %793 = vrot.lane.b32.xlu1 %v6972_v34, %s6461_s13 }
 0x211   : > { %1055 = vrot.lane.b32.xlu0 %v6986_v45, %s6463_s30 }
 0x212   : > { %v908_v20 = vpop.permute.xlu1 %907 }
 0x213   : > { %v1518_v12 = vpop.permute.xlu0 %1517  ;;  %951 = vst.msk [vmem:[#allocation2 + $0x94] sm:$0xf] %vm678_vm0, %v908_v20 }
 0x214   : > { %1556 = vst.msk [vmem:[#allocation4 + $0xa8] sm:$0xf] %vm678_vm0, %v1518_v12  ;;  %923 = vrot.lane.b32.xlu1 %v6972_v34, %s6462_s14 }
 0x215   : > { %797 = vrot.lane.b32.xlu0 %v7000_v59, %s6461_s13 }
 0x216   : > { %v1038_v36 = vpop.permute.xlu1 %1037 }
 0x217   : > { %v1583_v44 = vpop.permute.xlu0 %1582  ;;  %1081 = vst.msk [vmem:[#allocation2 + $0xd4] sm:$0xf] %vm678_vm0, %v1038_v36 }
 0x218   : > { %1621 = vst.msk [vmem:[#allocation4 + $0xe8] sm:$0xf] %vm678_vm0, %v1583_v44  ;;  %1053 = vrot.lane.b32.xlu1 %v6972_v34, %s6463_s30 }
 0x219   : > { %862 = vrot.lane.b32.xlu0 %v7024_v6, %s6461_s13 }
 0x21a   : > { %v1455_v45 = vpop.permute.xlu1 %1454 }
 0x21b   : > { %v1449_v23 = vpop.permute.xlu0 %1448  ;;  %1492 = vst.msk [vmem:[#allocation4 + $0x6c] sm:$0xf] %vm678_vm0, %v1455_v45 }
 0x21c   : > { %1489 = vst.msk [vmem:[#allocation4 + $0x60] sm:$0xf] %vm678_vm0, %v1449_v23  ;;  %858 = vrot.lane.b32.xlu1 %v6977_v40, %s6461_s13 }
 0x21d   : > { %838 = vrot.lane.b32.xlu0 %v6790_v41, %s6461_s13 }
 0x21e   : > { %v1520_v33 = vpop.permute.xlu1 %1519 }
 0x21f   : > { %v1514_v46 = vpop.permute.xlu0 %1513  ;;  %1557 = vst.msk [vmem:[#allocation4 + $0xac] sm:$0xf] %vm678_vm0, %v1520_v33 }
 0x220   : > { %1554 = vst.msk [vmem:[#allocation4 + $0xa0] sm:$0xf] %vm678_vm0, %v1514_v46  ;;  %860 = vrot.lane.b32.xlu1 %v6991_v51, %s6461_s13 }
 0x221   : > { %834 = vrot.lane.b32.xlu0 %v6744_v17, %s6461_s13 }
 0x222   : > { %v1585_v34 = vpop.permute.xlu1 %1584 }
 0x223   : > { %v1579_v21 = vpop.permute.xlu0 %1578  ;;  %1622 = vst.msk [vmem:[#allocation4 + $0xec] sm:$0xf] %vm678_vm0, %v1585_v34 }
 0x224   : > { %1619 = vst.msk [vmem:[#allocation4 + $0xe0] sm:$0xf] %vm678_vm0, %v1579_v21  ;;  %927 = vrot.lane.b32.xlu1 %v7000_v59, %s6462_s14  ;;  %v7318_v21 = vand.u32 127, %v403_v49 }
 0x225   : > { %992 = vrot.lane.b32.xlu0 %v7024_v6, %s6462_s14 }
 0x226   : > { %v1451_v50 = vpop.permute.xlu1 %1450  ;;  %vm2722_vm2 = vcmp.lt.s32.totalorder %v7318_v21, 30 }
 0x227   : > { %v843_v57 = vpop.permute.xlu0 %842  ;;  %1490 = vst.msk [vmem:[#allocation4 + $0x64] sm:$0xf] %vm678_vm0, %v1451_v50 }
 0x228   : > { %886 = vst.msk [vmem:[#allocation3 + $0x54] sm:$0xf] %vm678_vm0, %v843_v57  ;;  %1057 = vrot.lane.b32.xlu1 %v7000_v59, %s6463_s30 }
 0x229   : > { %986 = vrot.lane.b32.xlu0 %v6963_v28, %s6462_s14 }
 0x22a   : > { %v1516_v54 = vpop.permute.xlu1 %1515 }
 0x22b   : > { %v780_v27 = vpop.permute.xlu0 %779  ;;  %1555 = vst.msk [vmem:[#allocation4 + $0xa4] sm:$0xf] %vm678_vm0, %v1516_v54 }
 0x22c   : > { %822 = vst.msk [vmem:[#allocation2 + $0x58] sm:$0xf] %vm678_vm0, %v780_v27  ;;  %832 = vrot.lane.b32.xlu1 %v6722_v5, %s6461_s13 }
 0x22d   : > { %1118 = vrot.lane.b32.xlu0 %v6977_v40, %s6463_s30 }
 0x22e   : > { %v1581_v35 = vpop.permute.xlu1 %1580 }
 0x22f   : > { %v910_v62 = vpop.permute.xlu0 %909  ;;  %1620 = vst.msk [vmem:[#allocation4 + $0xe4] sm:$0xf] %vm678_vm0, %v1581_v35 }
 0x230   : > { %952 = vst.msk [vmem:[#allocation2 + $0x98] sm:$0xf] %vm678_vm0, %v910_v62  ;;  %990 = vrot.lane.b32.xlu1 %v6991_v51, %s6462_s14 }
 0x232   : > { %v845_v59 = vpop.permute.xlu1 %844 }
 0x233   : > { %v1040_v39 = vpop.permute.xlu0 %1039  ;;  %887 = vst.msk [vmem:[#allocation3 + $0x58] sm:$0xf] %vm678_vm0, %v845_v59 }
 0x234   : > { %1082 = vst.msk [vmem:[#allocation2 + $0xd8] sm:$0xf] %vm678_vm0, %v1040_v39  ;;  %1120 = vrot.lane.b32.xlu1 %v6991_v51, %s6463_s30 }
 0x236   : > { %v782_v37 = vpop.permute.xlu1 %781 }
 0x237   : > { %v1461_v31 = vpop.permute.xlu0 %1460  ;;  %823 = vst.msk [vmem:[#allocation2 + $0x5c] sm:$0xf] %vm678_vm0, %v782_v37 }
 0x238   : > { %1495 = vst.msk [vmem:[#allocation4 + $0x78] sm:$0xf] %vm678_vm0, %v1461_v31  ;;  %1122 = vrot.lane.b32.xlu1 %v7024_v6, %s6463_s30 }
 0x23a   : > { %v912_v26 = vpop.permute.xlu1 %911 }
 0x23b   : > { %v1526_v2 = vpop.permute.xlu0 %1525  ;;  %953 = vst.msk [vmem:[#allocation2 + $0x9c] sm:$0xf] %vm678_vm0, %v912_v26 }
 0x23c   : > { %1560 = vst.msk [vmem:[#allocation4 + $0xb8] sm:$0xf] %vm678_vm0, %v1526_v2  ;;  %988 = vrot.lane.b32.xlu1 %v6977_v40, %s6462_s14 }
 0x23e   : > { %v1042_v56 = vpop.permute.xlu1 %1041 }
 0x23f   : > { %v1591_v51 = vpop.permute.xlu0 %1590  ;;  %1083 = vst.msk [vmem:[#allocation2 + $0xdc] sm:$0xf] %vm678_vm0, %v1042_v56 }
 0x240   : > { %1625 = vst.msk [vmem:[#allocation4 + $0xf8] sm:$0xf] %vm678_vm0, %v1591_v51  ;;  %1116 = vrot.lane.b32.xlu1 %v6963_v28, %s6463_s30 }
 0x242   : > { %v1463_v3 = vpop.permute.xlu1 %1462 }
 0x243   : > { %v1457_v6 = vpop.permute.xlu0 %1456  ;;  %1496 = vst.msk [vmem:[#allocation4 + $0x7c] sm:$0xf] %vm678_vm0, %v1463_v3 }
 0x244   : > { %1493 = vst.msk [vmem:[#allocation4 + $0x70] sm:$0xf] %vm678_vm0, %v1457_v6 }
 0x246   : > { %v1528_v43 = vpop.permute.xlu1 %1527 }
 0x247   : > { %v1522_v48 = vpop.permute.xlu0 %1521  ;;  %1561 = vst.msk [vmem:[#allocation4 + $0xbc] sm:$0xf] %vm678_vm0, %v1528_v43 }
 0x248   : > { %1558 = vst.msk [vmem:[#allocation4 + $0xb0] sm:$0xf] %vm678_vm0, %v1522_v48 }
 0x24a   : > { %v1593_v40 = vpop.permute.xlu1 %1592 }
 0x24b   : > { %v1587_v8 = vpop.permute.xlu0 %1586  ;;  %1626 = vst.msk [vmem:[#allocation4 + $0xfc] sm:$0xf] %vm678_vm0, %v1593_v40 }
 0x24c   : > { %1623 = vst.msk [vmem:[#allocation4 + $0xf0] sm:$0xf] %vm678_vm0, %v1587_v8 }
 0x24e   : > { %v1459_v42 = vpop.permute.xlu1 %1458 }
 0x24f   : > { %v847_v28 = vpop.permute.xlu0 %846  ;;  %1494 = vst.msk [vmem:[#allocation4 + $0x74] sm:$0xf] %vm678_vm0, %v1459_v42 }
 0x250   : > { %888 = vst.msk [vmem:[#allocation3 + $0x5c] sm:$0xf] %vm678_vm0, %v847_v28 }
 0x252   : > { %v1524_v1 = vpop.permute.xlu1 %1523 }
 0x253   : > { %v784_v53 = vpop.permute.xlu0 %783  ;;  %1559 = vst.msk [vmem:[#allocation4 + $0xb4] sm:$0xf] %vm678_vm0, %v1524_v1 }
 0x254   : > { %824 = vst.msk [vmem:[#allocation2 + $0x60] sm:$0xf] %vm678_vm0, %v784_v53 }
 0x256   : > { %v1589_v18 = vpop.permute.xlu1 %1588 }
 0x257   : > { %v914_v55 = vpop.permute.xlu0 %913  ;;  %1624 = vst.msk [vmem:[#allocation4 + $0xf4] sm:$0xf] %vm678_vm0, %v1589_v18 }
 0x258   : > { %954 = vst.msk [vmem:[#allocation2 + $0xa0] sm:$0xf] %vm678_vm0, %v914_v55 }
 0x25a   : > { %v849_v7 = vpop.permute.xlu1 %848 }
 0x25b   : > { %v1044_v60 = vpop.permute.xlu0 %1043  ;;  %889 = vst.msk [vmem:[#allocation3 + $0x60] sm:$0xf] %vm678_vm0, %v849_v7 }
 0x25c   : > { %1084 = vst.msk [vmem:[#allocation2 + $0xe0] sm:$0xf] %vm678_vm0, %v1044_v60 }
 0x25e   : > { %v786_v13 = vpop.permute.xlu1 %785 }
 0x25f   : > { %v851_v14 = vpop.permute.xlu0 %850  ;;  %825 = vst.msk [vmem:[#allocation2 + $0x64] sm:$0xf] %vm678_vm0, %v786_v13 }
 0x260   : > { %890 = vst.msk [vmem:[#allocation3 + $0x64] sm:$0xf] %vm678_vm0, %v851_v14 }
 0x262   : > { %v916_v19 = vpop.permute.xlu1 %915 }
 0x263   : > { %v788_v52 = vpop.permute.xlu0 %787  ;;  %955 = vst.msk [vmem:[#allocation2 + $0xa4] sm:$0xf] %vm678_vm0, %v916_v19 }
 0x264   : > { %826 = vst.msk [vmem:[#allocation2 + $0x68] sm:$0xf] %vm678_vm0, %v788_v52 }
 0x266   : > { %v1046_v11 = vpop.permute.xlu1 %1045 }
 0x267   : > { %v918_v63 = vpop.permute.xlu0 %917  ;;  %1085 = vst.msk [vmem:[#allocation2 + $0xe4] sm:$0xf] %vm678_vm0, %v1046_v11 }
 0x268   : > { %956 = vst.msk [vmem:[#allocation2 + $0xa8] sm:$0xf] %vm678_vm0, %v918_v63 }
 0x26a   : > { %v790_v0 = vpop.permute.xlu1 %789 }
 0x26b   : > { %v1048_v22 = vpop.permute.xlu0 %1047  ;;  %827 = vst.msk [vmem:[#allocation2 + $0x6c] sm:$0xf] %vm678_vm0, %v790_v0 }
 0x26c   : > { %1086 = vst.msk [vmem:[#allocation2 + $0xe8] sm:$0xf] %vm678_vm0, %v1048_v22 }
 0x26e   : > { %v920_v25 = vpop.permute.xlu1 %919 }
 0x26f   : > { %v853_v10 = vpop.permute.xlu0 %852  ;;  %957 = vst.msk [vmem:[#allocation2 + $0xac] sm:$0xf] %vm678_vm0, %v920_v25 }
 0x270   : > { %891 = vst.msk [vmem:[#allocation3 + $0x68] sm:$0xf] %vm678_vm0, %v853_v10  ;;  %v5893_v10 = vld [vmem:[#allocation2 + $0x60] sm:$0xff]  }
 0x272   : > { %v1050_v30 = vpop.permute.xlu1 %1049  ;;  %v5891_v1 = vld [vmem:[#allocation2 + $0x68] sm:$0xff]  }
 0x273   : > { %v922_v16 = vpop.permute.xlu0 %921  ;;  %1087 = vst.msk [vmem:[#allocation2 + $0xec] sm:$0xf] %vm678_vm0, %v1050_v30  ;;  %v2165_v22 = vsel %vm1899_vm1, %v5891_v1, 0 }
 0x274   : > { %958 = vst.msk [vmem:[#allocation2 + $0xb0] sm:$0xf] %vm678_vm0, %v922_v16 }
 0x276   : > { %v855_v32 = vpop.permute.xlu1 %854 }
 0x277   : > { %v1052_v20 = vpop.permute.xlu0 %1051  ;;  %892 = vst.msk [vmem:[#allocation3 + $0x6c] sm:$0xf] %vm678_vm0, %v855_v32 }
 0x278   : > { %1088 = vst.msk [vmem:[#allocation2 + $0xf0] sm:$0xf] %vm678_vm0, %v1052_v20 }
 0x27a   : > { %v792_v12 = vpop.permute.xlu1 %791 }
 0x27b   : > { %v796_v36 = vpop.permute.xlu0 %795  ;;  %828 = vst.msk [vmem:[#allocation2 + $0x70] sm:$0xf] %vm678_vm0, %v792_v12 }
 0x27c   : > { %830 = vst.msk [vmem:[#allocation2 + $0x78] sm:$0xf] %vm678_vm0, %v796_v36 }
 0x27e   : > { %v857_v44 = vpop.permute.xlu1 %856 }
 0x27f   : > { %v926_v45 = vpop.permute.xlu0 %925  ;;  %893 = vst.msk [vmem:[#allocation3 + $0x70] sm:$0xf] %vm678_vm0, %v857_v44 }
 0x280   : > { %960 = vst.msk [vmem:[#allocation2 + $0xb8] sm:$0xf] %vm678_vm0, %v926_v45 }
 0x282   : > { %v794_v23 = vpop.permute.xlu1 %793 }
 0x283   : > { %v1056_v33 = vpop.permute.xlu0 %1055  ;;  %829 = vst.msk [vmem:[#allocation2 + $0x74] sm:$0xf] %vm678_vm0, %v794_v23 }
 0x284   : > { %1090 = vst.msk [vmem:[#allocation2 + $0xf8] sm:$0xf] %vm678_vm0, %v1056_v33 }
 0x286   : > { %v924_v46 = vpop.permute.xlu1 %923 }
 0x287   : > { %v798_v34 = vpop.permute.xlu0 %797  ;;  %959 = vst.msk [vmem:[#allocation2 + $0xb4] sm:$0xf] %vm678_vm0, %v924_v46 }
 0x288   : > { %831 = vst.msk [vmem:[#allocation2 + $0x7c] sm:$0xf] %vm678_vm0, %v798_v34  ;;  %v2162_v34 = vsel %vm1899_vm1, %v5893_v10, 0 }
 0x28a   : > { %v1054_v50 = vpop.permute.xlu1 %1053  ;;  %v5890_v37 = vld [vmem:[#allocation2 + $0x70] sm:$0xff]  }
 0x28b   : > { %v863_v57 = vpop.permute.xlu0 %862  ;;  %1089 = vst.msk [vmem:[#allocation2 + $0xf4] sm:$0xf] %vm678_vm0, %v1054_v50  ;;  %v2168_v28 = vsel %vm1899_vm1, %v5890_v37, 0 }
 0x28c   : > { %896 = vst.msk [vmem:[#allocation3 + $0x7c] sm:$0xf] %vm678_vm0, %v863_v57  ;;  %v5418_v54 = vpop.f32.mrf.mxu0  ;;  %v5895_v57 = vld [vmem:[#allocation2 + $0x58] sm:$0xff]  }
 0x28d   : > { %v7327_v62 = vsel %vm2722_vm2, %v5418_v54, -1e+30 }
 0x28e   : > { %v859_v27 = vpop.permute.xlu1 %858  ;;  %2793 = vmax.xlane.f32.xlu0 %v7327_v62  ;;  %v1982_v59 = vpop.f32.mrf.mxu0  ;;  %v5894_v32 = vld [vmem:[#allocation2 + $0xb0] sm:$0xff]  }
 0x28f   : > { %v839_v35 = vpop.permute.xlu0 %838  ;;  %v5889_v49 = vld [vmem:[#allocation2 + $0x78] sm:$0xff]   ;;  %894 = vst.msk [vmem:[#allocation3 + $0x74] sm:$0xf] %vm678_vm0, %v859_v27  ;;  %v7336_v26 = vsel %vm2722_vm2, %v1982_v59, -1e+30  ;;  %v2393_v50 = vsel %vm1899_vm1, %v5894_v32, 0 }
 0x290   : > { %884 = vst.msk [vmem:[#allocation3 + $0x4c] sm:$0xf] %vm678_vm0, %v839_v35  ;;  %5712 = vmatprep.subr.msk.bf16.mxu1 %vm1899_vm1, %v5889_v49  ;;  %v2171_v39 = vsel %vm1899_vm1, %v5889_v49, 0  ;;  %v5419_v31 = vpop.f32.mrf.mxu0  ;;  %v5896_v35 = vld [vmem:[#allocation2 + $0xa8] sm:$0xff]  }
 0x291   : > { %5433 = vmatpush3.bf16.xpose.msra.mxu1 %v2171_v39  ;;  %v7349_v43 = vsel %vm2722_vm2, %v5419_v31, -1e+30 }
 0x292   : > { %v861_v2 = vpop.permute.xlu1 %860  ;;  %5713 = vmatprep.subr.msk.bf16.mxu1 %vm1899_vm1, %v5890_v37  ;;  %2789 = vmax.xlane.f32.xlu0 %v7336_v26  ;;  %v1985_v51 = vpop.f32.mrf.mxu0 }
 0x293   : > { %v835_v56 = vpop.permute.xlu0 %834  ;;  %895 = vst.msk [vmem:[#allocation3 + $0x78] sm:$0xf] %vm678_vm0, %v861_v2  ;;  %v7344_v3 = vsel %vm2722_vm2, %v1985_v51, -1e+30  ;;  %v2390_v51 = vsel %vm1899_vm1, %v5896_v35, 0 }
 0x294   : > { %882 = vst.msk [vmem:[#allocation3 + $0x44] sm:$0xf] %vm678_vm0, %v835_v56  ;;  %2791 = vmax.xlane.f32.xlu1 %v7344_v3  ;;  %v5422_v6 = vpop.f32.mrf.mxu0  ;;  %v2159_v56 = vsel %vm1899_vm1, %v5895_v57, 0 }
 0x295   : > { %v7356_v42 = vsel %vm2722_vm2, %v5422_v6, -1e+30  ;;  %v5897_v6 = vld [vmem:[#allocation2 + $0x50] sm:$0xff]  }
 0x296   : > { %v928_v48 = vpop.permute.xlu1 %927  ;;  %2795 = vmax.xlane.f32.xlu0 %v7349_v43  ;;  %v1998_v8 = vpop.f32.mrf.mxu0 }
 0x297   : > { %v993_v40 = vpop.permute.xlu0 %992  ;;  %961 = vst.msk [vmem:[#allocation2 + $0xbc] sm:$0xf] %vm678_vm0, %v928_v48  ;;  %v7370_v13 = vsel %vm2722_vm2, %v1998_v8, -1e+30  ;;  %v5898_v48 = vld [vmem:[#allocation2 + $0xa0] sm:$0xff]   ;;  %v2156_v8 = vsel %vm1899_vm1, %v5897_v6, 0 }
 0x298   : > { %1026 = vst.msk [vmem:[#allocation3 + $0xbc] sm:$0xf] %vm678_vm0, %v993_v40  ;;  %2801 = vmax.xlane.f32.xlu1 %v7356_v42  ;;  %v5423_v53 = vpop.f32.mrf.mxu0 }
 0x299   : > { %5435 = vmatpush3.bf16.xpose.msra.mxu1 %v2168_v28  ;;  %v7362_v7 = vsel %vm2722_vm2, %v5423_v53, -1e+30  ;;  %v2387_v28 = vsel %vm1899_vm1, %v5898_v48, 0  ;;  %v5900_v53 = vld [vmem:[#allocation2 + $0x98] sm:$0xff]  }
 0x29a   : > { %v1058_v18 = vpop.permute.xlu1 %1057  ;;  %5714 = vmatprep.subr.msk.bf16.mxu1 %vm1899_vm1, %v5891_v1  ;;  %2803 = vmax.xlane.f32.xlu0 %v7362_v7  ;;  %v2001_v60 = vpop.f32.mrf.mxu0  ;;  %v5899_v1 = vld [vmem:[#allocation2 + $0x48] sm:$0xff]  }
 0x29b   : > { %v987_v55 = vpop.permute.xlu0 %986  ;;  %1091 = vst.msk [vmem:[#allocation2 + $0xfc] sm:$0xf] %vm678_vm0, %v1058_v18  ;;  %v7375_v19 = vsel %vm2722_vm2, %v2001_v60, -1e+30  ;;  %v2153_v18 = vsel %vm1899_vm1, %v5899_v1, 0  ;;  %v5901_v60 = vld [vmem:[#allocation2 + $0x40] sm:$0xff]  }
 0x29c   : > { %1023 = vst.msk [vmem:[#allocation3 + $0xb0] sm:$0xf] %vm678_vm0, %v987_v55  ;;  %2797 = vmax.xlane.f32.xlu1 %v7370_v13  ;;  %v5426_v14 = vpop.f32.mrf.mxu0  ;;  %v2384_v55 = vsel %vm1899_vm1, %v5900_v53, 0 }
 0x29d   : > { %v7385_v30 = vsel %vm2722_vm2, %v5426_v14, -1e+30  ;;  %v5902_v14 = vld [vmem:[#allocation2 + $0x90] sm:$0xff]  }
 0x29e   : > { %v833_v52 = vpop.permute.xlu1 %832  ;;  %v5892_v63 = vld [vmem:[#allocation2 + $0xb8] sm:$0xff]   ;;  %2799 = vmax.xlane.f32.xlu0 %v7375_v19  ;;  %v2014_v0 = vpop.f32.mrf.mxu0 }
 0x29f   : > { %v1119_v11 = vpop.permute.xlu0 %1118  ;;  %881 = vst.msk [vmem:[#allocation3 + $0x40] sm:$0xf] %vm678_vm0, %v833_v52  ;;  %5720 = vmatprep.subr.msk.bf16.mxu0 %vm1899_vm1, %v5892_v63  ;;  %v2396_v25 = vsel %vm1899_vm1, %v5892_v63, 0  ;;  %v7398_v44 = vsel %vm2722_vm2, %v2014_v0, -1e+30  ;;  %v2150_v52 = vsel %vm1899_vm1, %v5901_v60, 0 }
 0x2a0   : > { %1154 = vst.msk [vmem:[#allocation3 + $0xf4] sm:$0xf] %vm678_vm0, %v1119_v11  ;;  %5465 = vmatpush3.bf16.xpose.msra.mxu0 %v2396_v25  ;;  %v5427_v16 = vpop.f32.mrf.mxu0  ;;  %2809 = vmax.xlane.f32.xlu1 %v7385_v30  ;;  %v2381_v11 = vsel %vm1899_vm1, %v5902_v14, 0  ;;  %v5903_v63 = vld [vmem:[#allocation2 + $0x88] sm:$0xff]   ;;  %v5906_v25 = vld [vmem:[#allocation4 + $0x50] sm:$0xff]  }
 0x2a1   : > { %5437 = vmatpush3.bf16.xpose.msra.mxu1 %v2165_v22  ;;  %v7390_v12 = vsel %vm2722_vm2, %v5427_v16, -1e+30  ;;  %5721 = vmatprep.subr.msk.bf16.mxu0 %vm1899_vm1, %v5894_v32  ;;  %v5905_v22 = vld [vmem:[#allocation4 + $0x48] sm:$0xff]   ;;  %v5907_v16 = vld [vmem:[#allocation2 + $0x80] sm:$0xff]  }
 0x2a2   : > { %v991_v20 = vpop.permute.xlu1 %990  ;;  %5715 = vmatprep.subr.msk.bf16.mxu1 %vm1899_vm1, %v5893_v10  ;;  %2811 = vmax.xlane.f32.xlu0 %v7390_v12  ;;  %v2017_v36 = vpop.f32.mrf.mxu0  ;;  %v5904_v0 = vld [vmem:[#allocation2 + $0xf8] sm:$0xff]   ;;  %v2378_v10 = vsel %vm1899_vm1, %v5903_v63, 0 }
 0x2a3   : > { %1025 = vst.msk [vmem:[#allocation3 + $0xb8] sm:$0xf] %vm678_vm0, %v991_v20  ;;  %v7402_v23 = vsel %vm2722_vm2, %v2017_v36, -1e+30  ;;  %v2621_v32 = vsel %vm1899_vm1, %v5904_v0, 0  ;;  %v5908_v20 = vld [vmem:[#allocation2 + $0xf0] sm:$0xff]  }
 0x2a4   : > { %v5430_v45 = vpop.f32.mrf.mxu0  ;;  %2805 = vmax.xlane.f32.xlu1 %v7398_v44  ;;  %v5909_v36 = vld [vmem:[#allocation4 + $0x58] sm:$0xff]  }
 0x2a5   : > { %v7411_v54 = vsel %vm2722_vm2, %v5430_v45, -1e+30  ;;  %v5910_v45 = vld [vmem:[#allocation4 + $0x60] sm:$0xff]  }
 0x2a6   : > { %v1121_v33 = vpop.permute.xlu1 %1120  ;;  %2807 = vmax.xlane.f32.xlu0 %v7402_v23  ;;  %v2030_v46 = vpop.f32.mrf.mxu0 }
 0x2a7   : > { %1155 = vst.msk [vmem:[#allocation3 + $0xf8] sm:$0xf] %vm678_vm0, %v1121_v33  ;;  %v7424_v37 = vsel %vm2722_vm2, %v2030_v46, -1e+30  ;;  %v2375_v33 = vsel %vm1899_vm1, %v5907_v16, 0  ;;  %v5912_v46 = vld [vmem:[#allocation3 + $0x38] sm:$0xff]  }
 0x2a8   : > { %5467 = vmatpush3.bf16.xpose.msra.mxu0 %v2393_v50  ;;  %v5431_v27 = vpop.f32.mrf.mxu0  ;;  %2817 = vmax.xlane.f32.xlu1 %v7411_v54  ;;  %v5911_v50 = vld [vmem:[#allocation2 + $0xe8] sm:$0xff]  }
 0x2a9   : > { %5439 = vmatpush3.bf16.xpose.msra.mxu1 %v2162_v34  ;;  %v7416_v59 = vsel %vm2722_vm2, %v5431_v27, -1e+30  ;;  %5722 = vmatprep.subr.msk.bf16.mxu0 %vm1899_vm1, %v5896_v35  ;;  %v2618_v34 = vsel %vm1899_vm1, %v5908_v20, 0  ;;  %v5914_v27 = vld [vmem:[#allocation4 + $0x88] sm:$0xff]   ;;  %v5915_v35 = vld [vmem:[#allocation4 + $0x70] sm:$0xff]  }
 0x2aa   : > { %v1123_v49 = vpop.permute.xlu1 %1122  ;;  %5716 = vmatprep.subr.msk.bf16.mxu1 %vm1899_vm1, %v5895_v57  ;;  %2819 = vmax.xlane.f32.xlu0 %v7416_v59  ;;  %v2033_v39 = vpop.f32.mrf.mxu0  ;;  %v5913_v57 = vld [vmem:[#allocation4 + $0x68] sm:$0xff]  }
 0x2ab   : > { %1156 = vst.msk [vmem:[#allocation3 + $0xfc] sm:$0xf] %vm678_vm0, %v1123_v49  ;;  %v7428_v31 = vsel %vm2722_vm2, %v2033_v39, -1e+30  ;;  %v5916_v49 = vld [vmem:[#allocation4 + $0x90] sm:$0xff]   ;;  %v2615_v39 = vsel %vm1899_vm1, %v5911_v50, 0 }
 0x2ac   : > { %2813 = vmax.xlane.f32.xlu1 %v7424_v37 }
 0x2ae   : > { %v989_v2 = vpop.permute.xlu1 %988  ;;  %2815 = vmax.xlane.f32.xlu0 %v7428_v31 }
 0x2af   : > { %1024 = vst.msk [vmem:[#allocation3 + $0xb4] sm:$0xf] %vm678_vm0, %v989_v2  ;;  %v5917_v2 = vld [vmem:[#allocation2 + $0xe0] sm:$0xff]  }
 0x2b0   : > { %5469 = vmatpush3.bf16.xpose.msra.mxu0 %v2390_v51  ;;  %v5919_v51 = vld [vmem:[#allocation3 + $0x28] sm:$0xff]  }
 0x2b1   : > { %5441 = vmatpush3.bf16.xpose.msra.mxu1 %v2159_v56  ;;  %5723 = vmatprep.subr.msk.bf16.mxu0 %vm1899_vm1, %v5898_v48  ;;  %v5918_v56 = vld [vmem:[#allocation3 + $0x30] sm:$0xff]   ;;  %v5921_v48 = vld [vmem:[#allocation4 + $0x98] sm:$0xff]  }
 0x2b2   : > { %v1117_v40 = vpop.permute.xlu1 %1116  ;;  %5717 = vmatprep.subr.msk.bf16.mxu1 %vm1899_vm1, %v5897_v6  ;;  %v5920_v6 = vld [vmem:[#allocation4 + $0x78] sm:$0xff]  }
 0x2b3   : > { %1153 = vst.msk [vmem:[#allocation3 + $0xf0] sm:$0xf] %vm678_vm0, %v1117_v40  ;;  %v5922_v40 = vld [vmem:[#allocation4 + $0xa0] sm:$0xff]  }
 0x2b8   : > { %5471 = vmatpush3.bf16.xpose.msra.mxu0 %v2387_v28  ;;  %v2612_v28 = vsel %vm1899_vm1, %v5917_v2, 0 }
 0x2b9   : > { %5443 = vmatpush3.bf16.xpose.msra.mxu1 %v2156_v8  ;;  %5724 = vmatprep.subr.msk.bf16.mxu0 %vm1899_vm1, %v5900_v53  ;;  %v5923_v8 = vld [vmem:[#allocation4 + $0xc0] sm:$0xff]  }
 0x2ba   : > { %5718 = vmatprep.subr.msk.bf16.mxu1 %vm1899_vm1, %v5899_v1  ;;  %v5924_v1 = vld [vmem:[#allocation2 + $0xd8] sm:$0xff]   ;;  %v5925_v53 = vld [vmem:[#allocation3 + $0x20] sm:$0xff]  }
 0x2c0   : > { %5473 = vmatpush3.bf16.xpose.msra.mxu0 %v2384_v55  ;;  %v5927_v55 = vld [vmem:[#allocation4 + $0xa8] sm:$0xff]  }
 0x2c1   : > { %5445 = vmatpush3.bf16.xpose.msra.mxu1 %v2153_v18  ;;  %5725 = vmatprep.subr.msk.bf16.mxu0 %vm1899_vm1, %v5902_v14  ;;  %v5926_v18 = vld [vmem:[#allocation3 + $0x18] sm:$0xff]   ;;  %v2609_v14 = vsel %vm1899_vm1, %v5924_v1, 0 }
 0x2c2   : > { %5719 = vmatprep.subr.msk.bf16.mxu1 %vm1899_vm1, %v5901_v60  ;;  %v5928_v60 = vld [vmem:[#allocation4 + $0xb0] sm:$0xff]  }
 0x2c8   : > { %5475 = vmatpush3.bf16.xpose.msra.mxu0 %v2381_v11  ;;  %v5930_v11 = vld [vmem:[#allocation3 + $0x10] sm:$0xff]  }
 0x2c9   : > { %5447 = vmatpush3.bf16.xpose.msra.mxu1 %v2150_v52  ;;  %5726 = vmatprep.subr.msk.bf16.mxu0 %vm1899_vm1, %v5903_v63  ;;  %v5929_v52 = vld [vmem:[#allocation2 + $0xd0] sm:$0xff]   ;;  %v5931_v63 = vld [vmem:[#allocation3 + $0x8] sm:$0xff]  }
 0x2ca   : > { %5728 = vmatprep.subr.msk.bf16.mxu1 %vm1899_vm1, %v5904_v0  ;;  %v5932_v0 = vld [vmem:[#allocation4 + $0xb8] sm:$0xff]  }
 0x2d0   : > { %5449 = vmatmul.mubr.msk.bf16.vlgmr.msra.gmra.mxu1 %vm1899_vm1, %v5905_v22  ;;  %5477 = vmatpush3.bf16.xpose.msra.mxu0 %v2378_v10  ;;  %v2606_v22 = vsel %vm1899_vm1, %v5929_v52, 0  ;;  %v5934_v10 = vld [vmem:[#allocation3] sm:$0xff]  }
 0x2d1   : > { %5452 = vmatprep.mubr.msk.bf16.mxu1 %vm1899_vm1, %v5906_v25  ;;  %5497 = vmatpush3.bf16.xpose.msra.mxu1 %v2621_v32  ;;  %v5933_v25 = vld [vmem:[#allocation2 + $0xc8] sm:$0xff]  }
 0x2d2   : > { %5727 = vmatprep.subr.msk.bf16.mxu0 %vm1899_vm1, %v5907_v16  ;;  %5729 = vmatprep.subr.msk.bf16.mxu1 %vm1899_vm1, %v5908_v20  ;;  %v7480_v16 = vld [vmem:[#allocation3 + $0xb8] sm:$0xff]   ;;  %v2603_v32 = vsel %vm1899_vm1, %v5933_v25, 0  ;;  %v5936_v20 = vld [vmem:[#allocation2 + $0xc0] sm:$0xff]  }
 0x2d8   : > { %5453 = vmatmul.mubr.msk.bf16.gmra.mxu1 %vm1899_vm1, %v5909_v36  ;;  %5479 = vmatpush3.bf16.xpose.msra.mxu0 %v2375_v33  ;;  %v2600_v36 = vsel %vm1899_vm1, %v5936_v20, 0  ;;  %v5938_v33 = vld [vmem:[#allocation4 + $0xc8] sm:$0xff]  }
 0x2d9   : > { %5456 = vmatprep.mubr.msk.bf16.mxu1 %vm1899_vm1, %v5910_v45  ;;  %5499 = vmatpush3.bf16.xpose.msra.mxu1 %v2618_v34  ;;  %v5937_v45 = vld [vmem:[#allocation3 + $0x78] sm:$0xff]   ;;  %v5940_v34 = vld [vmem:[#allocation3 + $0x70] sm:$0xff]  }
 0x2da   : > { %5528 = vmatprep.subr.bf16.mxu0 %v5912_v46  ;;  %5730 = vmatprep.subr.msk.bf16.mxu1 %vm1899_vm1, %v5911_v50  ;;  %v5941_v50 = vld [vmem:[#allocation3 + $0x68] sm:$0xff]  }
 0x2df   : > { %5481 = vmatmul.mubr.msk.bf16.vlgmr.msra.gmra.mxu0 %vm1899_vm1, %v5914_v27  ;;  %v5943_v27 = vld [vmem:[#allocation4 + $0xe0] sm:$0xff]  }
 0x2e0   : > { %5457 = vmatmul.mubr.msk.bf16.gmra.mxu1 %vm1899_vm1, %v5913_v57  ;;  %5484 = vmatprep.mubr.msk.bf16.mxu0 %vm1899_vm1, %v5916_v49  ;;  %v5942_v57 = vld [vmem:[#allocation4 + $0xd8] sm:$0xff]  }
 0x2e1   : > { %5460 = vmatprep.mubr.msk.bf16.mxu1 %vm1899_vm1, %v5915_v35  ;;  %5501 = vmatpush3.bf16.xpose.msra.mxu1 %v2615_v39  ;;  %v5944_v35 = vld [vmem:[#allocation3 + $0x60] sm:$0xff]   ;;  %v5945_v49 = vld [vmem:[#allocation3 + $0x58] sm:$0xff]   ;;  %v5946_v39 = vld [vmem:[#allocation4 + $0xe8] sm:$0xff]  }
 0x2e2   : > { %5529 = vmatpush3.bf16.msra.mxu0 %v5912_v46  ;;  %5731 = vmatprep.subr.msk.bf16.mxu1 %vm1899_vm1, %v5917_v2  ;;  %v5939_v46 = vld [vmem:[#allocation4 + $0xd0] sm:$0xff]  }
 0x2e3   : > { %5530 = vmatprep.subr.bf16.mxu0 %v5918_v56  ;;  %v5947_v2 = vld [vmem:[#allocation4 + $0xf0] sm:$0xff]  }
 0x2e6   : > { %5531 = vmatpush3.bf16.msra.mxu0 %v5918_v56  ;;  %v5948_v56 = vld [vmem:[#allocation3 + $0x50] sm:$0xff]  }
 0x2e7   : > { %5532 = vmatprep.subr.bf16.mxu0 %v5919_v51  ;;  %5485 = vmatmul.mubr.msk.bf16.gmra.mxu0 %vm1899_vm1, %v5921_v48  ;;  %v5951_v48 = vld [vmem:[#allocation3 + $0x40] sm:$0xff]  }
 0x2e8   : > { %5461 = vmatmul.mubr.msk.bf16.gmra.mxu1 %vm1899_vm1, %v5920_v6  ;;  %5488 = vmatprep.mubr.msk.bf16.mxu0 %vm1899_vm1, %v5922_v40  ;;  %v5950_v6 = vld [vmem:[#allocation4 + $0xf8] sm:$0xff]  }
 0x2e9   : > { %5512 = vmatprep.mubr.msk.bf16.mxu1 %vm1899_vm1, %v5923_v8  ;;  %5503 = vmatpush3.bf16.xpose.msra.mxu1 %v2612_v28  ;;  %v5952_v40 = vld [vmem:[#allocation3 + $0xf8] sm:$0xff]  }
 0x2ea   : > { %5533 = vmatpush3.bf16.msra.mxu0 %v5919_v51  ;;  %5732 = vmatprep.subr.msk.bf16.mxu1 %vm1899_vm1, %v5924_v1  ;;  %v5949_v51 = vld [vmem:[#allocation3 + $0x48] sm:$0xff]  }
 0x2eb   : > { %5534 = vmatprep.subr.bf16.mxu0 %v5925_v53 }
 0x2ee   : > { %5535 = vmatpush3.bf16.msra.mxu0 %v5925_v53 }
 0x2ef   : > { %5536 = vmatprep.subr.bf16.mxu0 %v5926_v18  ;;  %5489 = vmatmul.mubr.msk.bf16.gmra.mxu0 %vm1899_vm1, %v5927_v55 }
 0x2f0   : > { %5492 = vmatprep.mubr.msk.bf16.mxu0 %vm1899_vm1, %v5928_v60 }
 0x2f1   : > { %5505 = vmatpush3.bf16.xpose.msra.mxu1 %v2609_v14 }
 0x2f2   : > { %5537 = vmatpush3.bf16.msra.mxu0 %v5926_v18  ;;  %5733 = vmatprep.subr.msk.bf16.mxu1 %vm1899_vm1, %v5929_v52 }
 0x2f3   : > { %5538 = vmatprep.subr.bf16.mxu0 %v5930_v11 }
 0x2f6   : > { %5539 = vmatpush3.bf16.msra.mxu0 %v5930_v11 }
 0x2f7   : > { %5540 = vmatprep.subr.bf16.mxu0 %v5931_v63  ;;  %5493 = vmatmul.mubr.msk.bf16.gmra.mxu0 %vm1899_vm1, %v5932_v0 }
 0x2f9   : > { %5507 = vmatpush3.bf16.xpose.msra.mxu1 %v2606_v22 }
 0x2fa   : > { %5541 = vmatpush3.bf16.msra.mxu0 %v5931_v63  ;;  %5734 = vmatprep.subr.msk.bf16.mxu1 %vm1899_vm1, %v5933_v25 }
 0x2fb   : > { %5542 = vmatprep.subr.bf16.mxu0 %v5934_v10 }
 0x2fe   : > { %5543 = vmatpush3.bf16.msra.mxu0 %v5934_v10 }
 0x2ff   : > { %5592 = vmatprep.subr.bf16.mxu0 %v7480_v16 }
 0x301   : > { %5509 = vmatpush3.bf16.xpose.msra.mxu1 %v2603_v32 }
 0x302   : > { %5735 = vmatprep.subr.msk.bf16.mxu1 %vm1899_vm1, %v5936_v20 }
 0x309   : > { %5511 = vmatpush3.bf16.xpose.msra.mxu1 %v2600_v36 }
 0x30a   : > { %5560 = vmatprep.subr.bf16.mxu1 %v5937_v45 }
 0x310   : > { %5513 = vmatmul.mubr.msk.bf16.vlgmr.msra.gmra.mxu1 %vm1899_vm1, %v5938_v33 }
 0x311   : > { %5516 = vmatprep.mubr.msk.bf16.mxu1 %vm1899_vm1, %v5939_v46  ;;  %5561 = vmatpush3.bf16.msra.mxu1 %v5937_v45 }
 0x312   : > { %5562 = vmatprep.subr.bf16.mxu1 %v5940_v34 }
 0x315   : > { %5563 = vmatpush3.bf16.msra.mxu1 %v5940_v34 }
 0x316   : > { %5564 = vmatprep.subr.bf16.mxu1 %v5941_v50 }
 0x318   : > { %5517 = vmatmul.mubr.msk.bf16.gmra.mxu1 %vm1899_vm1, %v5942_v57 }
 0x319   : > { %5520 = vmatprep.mubr.msk.bf16.mxu1 %vm1899_vm1, %v5943_v27  ;;  %5565 = vmatpush3.bf16.msra.mxu1 %v5941_v50 }
 0x31a   : > { %5566 = vmatprep.subr.bf16.mxu1 %v5944_v35 }
 0x31d   : > { %5567 = vmatpush3.bf16.msra.mxu1 %v5944_v35 }
 0x31e   : > { %5568 = vmatprep.subr.bf16.mxu1 %v5945_v49 }
 0x320   : > { %5521 = vmatmul.mubr.msk.bf16.gmra.mxu1 %vm1899_vm1, %v5946_v39 }
 0x321   : > { %5524 = vmatprep.mubr.msk.bf16.mxu1 %vm1899_vm1, %v5947_v2  ;;  %5569 = vmatpush3.bf16.msra.mxu1 %v5945_v49  ;;  %v2794_v49 = vpop.xlane.xlu0 %2793 }
 0x322   : > { %5570 = vmatprep.subr.bf16.mxu1 %v5948_v56 }
 0x325   : > { %5571 = vmatpush3.bf16.msra.mxu1 %v5948_v56 }
 0x326   : > { %5572 = vmatprep.subr.bf16.mxu1 %v5949_v51 }
 0x328   : > { %5525 = vmatmul.mubr.msk.bf16.gmra.mxu1 %vm1899_vm1, %v5950_v6 }
 0x329   : > { %5573 = vmatpush3.bf16.msra.mxu1 %v5949_v51 }
 0x32a   : > { %5574 = vmatprep.subr.bf16.mxu1 %v5951_v48 }
 0x32d   : > { %5575 = vmatpush3.bf16.msra.mxu1 %v5951_v48 }
 0x32e   : > { %5624 = vmatprep.subr.bf16.mxu1 %v5952_v40 }
 0x390   : > { %v5450_v8 = vpop.f32.mrf.mxu1 }
 0x391   : > { %v7495_v28 = vsel %vm2722_vm2, %v5450_v8, -1e+30 }
 0x392   : > { %v2207_v1 = vpop.f32.mrf.mxu1  ;;  %2825 = vmax.xlane.f32.xlu1 %v7495_v28 }
 0x393   : > { %v7510_v63 = vsel %vm2722_vm2, %v2207_v1, -1e+30  ;;  %v2790_v1 = vpop.xlane.xlu0 %2789 }
 0x394   : > { %v5451_v53 = vpop.f32.mrf.mxu1 }
 0x395   : > { %v7500_v18 = vsel %vm2722_vm2, %v5451_v53, -1e+30  ;;  %v2792_v53 = vpop.xlane.xlu1 %2791 }
 0x396   : > { %2827 = vmax.xlane.f32.xlu0 %v7500_v18  ;;  %v2210_v14 = vpop.f32.mrf.mxu1 }
 0x397   : > { %v7520_v10 = vsel %vm2722_vm2, %v2210_v14, -1e+30 }
 0x398   : > { %v5454_v22 = vpop.f32.mrf.mxu1 }
 0x399   : > { %v7530_v45 = vsel %vm2722_vm2, %v5454_v22, -1e+30  ;;  %v2796_v22 = vpop.xlane.xlu0 %2795 }
 0x39a   : > { %v2223_v20 = vpop.f32.mrf.mxu1 }
 0x39b   : > { %v7550_v39 = vsel %vm2722_vm2, %v2223_v20, -1e+30 }
 0x39c   : > { %v5455_v46 = vpop.f32.mrf.mxu1 }
 0x39d   : > { %v7540_v50 = vsel %vm2722_vm2, %v5455_v46, -1e+30 }
 0x39e   : > { %v2226_v27 = vpop.f32.mrf.mxu1 }
 0x39f   : > { %v5482_v55 = vpop.f32.mrf.mxu0  ;;  %v7560_v6 = vsel %vm2722_vm2, %v2226_v27, -1e+30 }
 0x3a0   : > { %v7505_v60 = vsel %vm2722_vm2, %v5482_v55, -1e+30  ;;  %v5458_v56 = vpop.f32.mrf.mxu1 }
 0x3a1   : > { %2857 = vmax.xlane.f32.xlu1 %v7505_v60  ;;  %v2432_v52 = vpop.f32.mrf.mxu0  ;;  %v7570_v55 = vsel %vm2722_vm2, %v5458_v56, -1e+30 }
 0x3a2   : > { %v7524_v32 = vsel %vm2722_vm2, %v2432_v52, -1e+30  ;;  %v2239_v40 = vpop.f32.mrf.mxu1 }
 0x3a3   : > { %v5483_v11 = vpop.f32.mrf.mxu0  ;;  %v7590_v27 = vsel %vm2722_vm2, %v2239_v40, -1e+30 }
 0x3a4   : > { %v7514_v0 = vsel %vm2722_vm2, %v5483_v11, -1e+30  ;;  %v5459_v52 = vpop.f32.mrf.mxu1 }
 0x3a5   : > { %2821 = vmax.xlane.f32.xlu1 %v7510_v63  ;;  %2859 = vmax.xlane.f32.xlu0 %v7514_v0  ;;  %v2435_v25 = vpop.f32.mrf.mxu0 }
 0x3a6   : > { %v7534_v33 = vsel %vm2722_vm2, %v2435_v25, -1e+30  ;;  %v7580_v25 = vsel %vm2722_vm2, %v5459_v52, -1e+30  ;;  %v2918_v52 = vsub.f32 %v7344_v3, %v2792_v53 }
 0x3a7   : > { %v5486_v36 = vpop.f32.mrf.mxu0 }
 0x3a8   : > { %v7544_v57 = vsel %vm2722_vm2, %v5486_v36, -1e+30  ;;  %v2242_v36 = vpop.f32.mrf.mxu1  ;;  %v2983_v41 = vmul.f32 1.442695, %v2918_v52 }
 0x3a9   : > { %2853 = vmax.xlane.f32.xlu1 %v7524_v32  ;;  %2823 = vmax.xlane.f32.xlu0 %v7520_v10  ;;  %v2448_v34 = vpop.f32.mrf.mxu0  ;;  %8652 = vst [vmem:[#allocation28_spill] sm:$0xff] %v7544_v57 }
 0x3aa   : > { %v7564_v48 = vsel %vm2722_vm2, %v2448_v34, -1e+30  ;;  %v2802_v34 = vpop.xlane.xlu1 %2801  ;;  %v5462_v56 = vpop.f32.mrf.mxu1  ;;  %5983 = vpow2.f32 %v2983_v41  ;;  %v2920_v41 = vsub.f32 %v7349_v43, %v2796_v22 }
 0x3ab   : > { %v5487_v35 = vpop.f32.mrf.mxu0  ;;  %8654 = vst [vmem:[#allocation30_spill] sm:$0xff] %v7564_v48  ;;  %v2923_v3 = vsub.f32 %v7356_v42, %v2802_v34 }
 0x3ac   : > { %v7554_v2 = vsel %vm2722_vm2, %v5487_v35, -1e+30  ;;  %v2987_v43 = vmul.f32 1.442695, %v2920_v41 }
 0x3ad   : > { %2833 = vmax.xlane.f32.xlu1 %v7530_v45  ;;  %2855 = vmax.xlane.f32.xlu0 %v7534_v33  ;;  %8653 = vst [vmem:[#allocation29_spill] sm:$0xff] %v7554_v2  ;;  %v2451_v51 = vpop.f32.mrf.mxu0  ;;  %v2993_v42 = vmul.f32 1.442695, %v2923_v3 }
 0x3ae   : > { %v7574_v14 = vsel %vm2722_vm2, %v2451_v51, -1e+30  ;;  %v2798_v5 = vpop.xlane.xlu1 %2797 }
 0x3af   : > { %v5490_v8 = vpop.f32.mrf.mxu0  ;;  %8655 = vst [vmem:[#allocation31_spill] sm:$0xff] %v7574_v14  ;;  %v2921_v34 = vsub.f32 %v7370_v13, %v2798_v5 }
 0x3b0   : > { %v7584_v20 = vsel %vm2722_vm2, %v5490_v8, -1e+30  ;;  %v2804_v8 = vpop.xlane.xlu0 %2803 }
 0x3b1   : > { %2835 = vmax.xlane.f32.xlu0 %v7540_v50  ;;  %2865 = vmax.xlane.f32.xlu1 %v7544_v57  ;;  %v2464_v11 = vpop.f32.mrf.mxu0  ;;  %8656 = vst [vmem:[#allocation32_spill] sm:$0xff] %v7584_v20  ;;  %v2989_v5 = vmul.f32 1.442695, %v2921_v34  ;;  %v2924_v22 = vsub.f32 %v7362_v7, %v2804_v8 }
 0x3b2   : > { %v7605_v40 = vsel %vm2722_vm2, %v2464_v11, -1e+30 }
 0x3b3   : > { %v5491_v46 = vpop.f32.mrf.mxu0  ;;  %8658 = vst [vmem:[#allocation34_spill] sm:$0xff] %v7605_v40  ;;  %v2995_v7 = vmul.f32 1.442695, %v2924_v22 }
 0x3b4   : > { %v7594_v35 = vsel %vm2722_vm2, %v5491_v46, -1e+30  ;;  %v2255_v46 = vpop.f32.mrf.mxu1  ;;  %v2800_v53 = vpop.xlane.xlu0 %2799 }
 0x3b5   : > { %2829 = vmax.xlane.f32.xlu1 %v7550_v39  ;;  %2867 = vmax.xlane.f32.xlu0 %v7554_v2  ;;  %8657 = vst [vmem:[#allocation33_spill] sm:$0xff] %v7594_v35  ;;  %v2467_v51 = vpop.f32.mrf.mxu0  ;;  %v2922_v8 = vsub.f32 %v7375_v19, %v2800_v53 }
 0x3b6   : > { %v7617_v11 = vsel %vm2722_vm2, %v2467_v51, -1e+30  ;;  %v5463_v29 = vpop.f32.mrf.mxu1 }
 0x3b7   : > { %v5494_v17 = vpop.f32.mrf.mxu0  ;;  %8659 = vst [vmem:[#allocation35_spill] sm:$0xff] %v7617_v11  ;;  %v7658_v34 = vpop.eup %5983 }
 0x3b8   : > { %v7629_v51 = vsel %vm2722_vm2, %v5494_v17, -1e+30  ;;  %v2258_v3 = vpop.f32.mrf.mxu1 }
 0x3b9   : > { %2861 = vmax.xlane.f32.xlu1 %v7564_v48  ;;  %2831 = vmax.xlane.f32.xlu0 %v7560_v6  ;;  %v2480_v57 = vpop.f32.mrf.mxu0  ;;  %8660 = vst [vmem:[#allocation36_spill] sm:$0xff] %v7629_v51 }
 0x3bb   : > { %v5495_v52 = vpop.f32.mrf.mxu0 }
 0x3bc   : > { %v7641_v17 = vsel %vm2722_vm2, %v5495_v52, -1e+30 }
 0x3bd   : > { %2841 = vmax.xlane.f32.xlu1 %v7570_v55  ;;  %2863 = vmax.xlane.f32.xlu0 %v7574_v14  ;;  %8661 = vst [vmem:[#allocation37_spill] sm:$0xff] %v7641_v17 }
 0x3c1   : > { %2843 = vmax.xlane.f32.xlu0 %v7580_v25  ;;  %2873 = vmax.xlane.f32.xlu1 %v7584_v20  ;;  %v7601_v20 = vsel %vm2722_vm2, %v2242_v36, -1e+30  ;;  %v7613_v36 = vsel %vm2722_vm2, %v5462_v56, -1e+30  ;;  %v7625_v56 = vsel %vm2722_vm2, %v5463_v29, -1e+30 }
 0x3c5   : > { %2837 = vmax.xlane.f32.xlu1 %v7590_v27  ;;  %2875 = vmax.xlane.f32.xlu0 %v7594_v35  ;;  %v2919_v35 = vsub.f32 %v7327_v62, %v2794_v49  ;;  %v2917_v62 = vsub.f32 %v7336_v26, %v2790_v1  ;;  %v2810_v49 = vpop.xlane.xlu1 %2809  ;;  %v2812_v1 = vpop.xlane.xlu0 %2811 }
 0x3c6   : > { %v2927_v13 = vsub.f32 %v7385_v30, %v2810_v49  ;;  %v7653_v49 = vsel %vm2722_vm2, %v2480_v57, -1e+30  ;;  %v2928_v19 = vsub.f32 %v7390_v12, %v2812_v1 }
 0x3c7   : > { %v2981_v26 = vmul.f32 1.442695, %v2917_v62  ;;  %8662 = vst [vmem:[#allocation38_spill] sm:$0xff] %v7653_v49 }
 0x3c8   : > { %v3001_v30 = vmul.f32 1.442695, %v2927_v13  ;;  %v3003_v22 = vmul.f32 1.442695, %v2928_v19 }
 0x3c9   : > { %2869 = vmax.xlane.f32.xlu1 %v7605_v40  ;;  %2839 = vmax.xlane.f32.xlu0 %v7601_v20  ;;  %v2985_v40 = vmul.f32 1.442695, %v2919_v35  ;;  %v2806_v29 = vpop.xlane.xlu1 %2805  ;;  %v7637_v35 = vsel %vm2722_vm2, %v2255_v46, -1e+30  ;;  %v2808_v62 = vpop.xlane.xlu0 %2807  ;;  %v7649_v46 = vsel %vm2722_vm2, %v2258_v3, -1e+30 }
 0x3cb   : > { %5985 = vpow2.f32 %v2985_v40  ;;  %v2925_v40 = vsub.f32 %v7398_v44, %v2806_v29  ;;  %v2926_v29 = vsub.f32 %v7402_v23, %v2808_v62 }
 0x3cc   : > { %5987 = vpow2.f32 %v2993_v42  ;;  %v2483_v42 = vpop.f32.mrf.mxu0 }
 0x3cd   : > { %2849 = vmax.xlane.f32.xlu1 %v7613_v36  ;;  %2871 = vmax.xlane.f32.xlu0 %v7617_v11  ;;  %5989 = vpow2.f32 %v2981_v26  ;;  %v2997_v44 = vmul.f32 1.442695, %v2925_v40  ;;  %v7662_v52 = vsel %vm2722_vm2, %v2483_v42, -1e+30  ;;  %v2820_v57 = vpop.xlane.xlu0 %2819  ;;  %v2818_v3 = vpop.xlane.xlu1 %2817  ;;  %v2999_v42 = vmul.f32 1.442695, %v2926_v29 }
 0x3ce   : > { %5991 = vpow2.f32 %v2989_v5  ;;  %8663 = vst [vmem:[#allocation39_spill] sm:$0xff] %v7662_v52  ;;  %v2991_v5 = vmul.f32 1.442695, %v2922_v8 }
 0x3cf   : > { %5993 = vpow2.f32 %v2987_v43 }
 0x3d0   : > { %5995 = vpow2.f32 %v3001_v30  ;;  %v5514_v26 = vpop.f32.mrf.mxu1  ;;  %v2932_v30 = vsub.f32 %v7416_v59, %v2820_v57 }
 0x3d1   : > { %2851 = vmax.xlane.f32.xlu0 %v7625_v56  ;;  %2881 = vmax.xlane.f32.xlu1 %v7629_v51  ;;  %5997 = vpow2.f32 %v2995_v7  ;;  %v2816_v12 = vpop.xlane.xlu0 %2815  ;;  %v2931_v7 = vsub.f32 %v7411_v54, %v2818_v3  ;;  %v2814_v59 = vpop.xlane.xlu1 %2813 }
 0x3d2   : > { %5999 = vpow2.f32 %v2997_v44  ;;  %v2657_v13 = vpop.f32.mrf.mxu1  ;;  %v3011_v23 = vmul.f32 1.442695, %v2932_v30  ;;  %v2930_v62 = vsub.f32 %v7428_v31, %v2816_v12  ;;  %v2929_v54 = vsub.f32 %v7424_v37, %v2814_v59 }
 0x3d3   : > { %6001 = vpow2.f32 %v2991_v5  ;;  %v3009_v5 = vmul.f32 1.442695, %v2931_v7  ;;  %v7700_v12 = vsel %vm2722_vm2, %v5514_v26, -1e+30  ;;  %v7708_v7 = vsel %vm2722_vm2, %v2657_v13, -1e+30 }
 0x3d4   : > { %v5515_v1 = vpop.f32.mrf.mxu1  ;;  %6003 = vpow2.f32 %v3003_v22  ;;  %v3007_v29 = vmul.f32 1.442695, %v2930_v62  ;;  %v3005_v31 = vmul.f32 1.442695, %v2929_v54 }
 0x3d5   : > { %2845 = vmax.xlane.f32.xlu1 %v7637_v35  ;;  %2883 = vmax.xlane.f32.xlu0 %v7641_v17  ;;  %6005 = vpow2.f32 %v2999_v42 }
 0x3d6   : > { %v2660_v57 = vpop.f32.mrf.mxu1  ;;  %6007 = vpow2.f32 %v3011_v23 }
 0x3d7   : > { %6009 = vpow2.f32 %v3009_v5 }
 0x3d8   : > { %v7666_v41 = vpop.eup %5985  ;;  %v5518_v22 = vpop.f32.mrf.mxu1  ;;  %6011 = vpow2.f32 %v3007_v29 }
 0x3d9   : > { %2877 = vmax.xlane.f32.xlu1 %v7653_v49  ;;  %2847 = vmax.xlane.f32.xlu0 %v7649_v46  ;;  %v7669_v53 = vpop.eup %5987  ;;  %6013 = vpow2.f32 %v3005_v31  ;;  %v7728_v31 = vsel %vm2722_vm2, %v5518_v22, -1e+30  ;;  %v7744_v22 = vsel %vm2722_vm2, %v2660_v57, -1e+30 }
 0x3da   : > { %v7674_v43 = vpop.eup %5989  ;;  %v2673_v42 = vpop.f32.mrf.mxu1  ;;  %8664 = vst [vmem:[#allocation40_spill] sm:$0xff] %v7728_v31 }
 0x3db   : > { %v7677_v40 = vpop.eup %5991  ;;  %v7738_v51 = vsel %vm2722_vm2, %v2673_v42, -1e+30 }
 0x3dc   : > { %v7682_v8 = vpop.eup %5993  ;;  %v5519_v23 = vpop.f32.mrf.mxu1  ;;  %8665 = vst [vmem:[#allocation41_spill] sm:$0xff] %v7738_v51 }
 0x3dd   : > { %3111 = vadd.xlane.f32.xlu1 %v7658_v34  ;;  %2879 = vmax.xlane.f32.xlu0 %v7662_v52  ;;  %v7685_v44 = vpop.eup %5995  ;;  %v7734_v52 = vsel %vm2722_vm2, %v5515_v1, -1e+30  ;;  %v7754_v1 = vsel %vm2722_vm2, %v5519_v23, -1e+30 }
 0x3de   : > { %v7689_v19 = vpop.eup %5997  ;;  %v2676_v59 = vpop.f32.mrf.mxu1  ;;  %8667 = vst [vmem:[#allocation43_spill] sm:$0xff] %v7754_v1 }
 0x3df   : > { %v7692_v3 = vpop.eup %5999  ;;  %v7764_v57 = vsel %vm2722_vm2, %v2676_v59, -1e+30 }
 0x3e0   : > { %v7696_v30 = vpop.eup %6001  ;;  %v5522_v13 = vpop.f32.mrf.mxu1  ;;  %8669 = vst [vmem:[#allocation45_spill] sm:$0xff] %v7764_v57 }
 0x3e1   : > { %3121 = vadd.xlane.f32.xlu1 %v7669_v53  ;;  %3113 = vadd.xlane.f32.xlu0 %v7666_v41  ;;  %v7704_v37 = vpop.eup %6003  ;;  %v7748_v11 = vsel %vm2722_vm2, %v5522_v13, -1e+30 }
 0x3e2   : > { %v7712_v62 = vpop.eup %6005  ;;  %v2689_v17 = vpop.f32.mrf.mxu1  ;;  %8666 = vst [vmem:[#allocation42_spill] sm:$0xff] %v7748_v11 }
 0x3e3   : > { %v7714_v26 = vpop.eup %6007  ;;  %v7758_v42 = vsel %vm2722_vm2, %v2689_v17, -1e+30 }
 0x3e4   : > { %v7718_v5 = vpop.eup %6009  ;;  %v5523_v49 = vpop.f32.mrf.mxu1  ;;  %8668 = vst [vmem:[#allocation44_spill] sm:$0xff] %v7758_v42 }
 0x3e5   : > { %3117 = vadd.xlane.f32.xlu1 %v7677_v40  ;;  %3109 = vadd.xlane.f32.xlu0 %v7674_v43  ;;  %v7720_v54 = vpop.eup %6011  ;;  %v7774_v17 = vsel %vm2722_vm2, %v5523_v49, -1e+30 }
 0x3e6   : > { %v7724_v29 = vpop.eup %6013  ;;  %8671 = vst [vmem:[#allocation47_spill] sm:$0xff] %v7774_v17 }
 0x3e9   : > { %3129 = vadd.xlane.f32.xlu1 %v7685_v44  ;;  %3115 = vadd.xlane.f32.xlu0 %v7682_v8 }
 0x3ed   : > { %3125 = vadd.xlane.f32.xlu1 %v7692_v3  ;;  %3123 = vadd.xlane.f32.xlu0 %v7689_v19 }
 0x3f1   : > { %2889 = vmax.xlane.f32.xlu1 %v7700_v12  ;;  %3119 = vadd.xlane.f32.xlu0 %v7696_v30 }
 0x3f5   : > { %2885 = vmax.xlane.f32.xlu1 %v7708_v7  ;;  %3131 = vadd.xlane.f32.xlu0 %v7704_v37 }
 0x3f9   : > { %3139 = vadd.xlane.f32.xlu1 %v7714_v26  ;;  %3127 = vadd.xlane.f32.xlu0 %v7712_v62 }
 0x3fd   : > { %3135 = vadd.xlane.f32.xlu1 %v7720_v54  ;;  %3137 = vadd.xlane.f32.xlu0 %v7718_v5 }
 0x401   : > { %2897 = vmax.xlane.f32.xlu1 %v7728_v31  ;;  %3133 = vadd.xlane.f32.xlu0 %v7724_v29  ;;  %v2692_v31 = vpop.f32.mrf.mxu1 }
 0x405   : > { %2893 = vmax.xlane.f32.xlu1 %v7738_v51  ;;  %2891 = vmax.xlane.f32.xlu0 %v7734_v52  ;;  %v5526_v51 = vpop.f32.mrf.mxu1 }
 0x406   : > { %v7768_v13 = vsel %vm2722_vm2, %v5526_v51, -1e+30  ;;  %v7784_v51 = vsel %vm2722_vm2, %v2692_v31, -1e+30 }
 0x407   : > { %8670 = vst [vmem:[#allocation46_spill] sm:$0xff] %v7768_v13  ;;  %8673 = vst [vmem:[#allocation49_spill] sm:$0xff] %v7784_v51 }
 0x409   : > { %2905 = vmax.xlane.f32.xlu1 %v7748_v11  ;;  %2887 = vmax.xlane.f32.xlu0 %v7744_v22  ;;  %v2705_v11 = vpop.f32.mrf.mxu1 }
 0x40a   : > { %v7778_v23 = vsel %vm2722_vm2, %v2705_v11, -1e+30 }
 0x40b   : > { %8672 = vst [vmem:[#allocation48_spill] sm:$0xff] %v7778_v23  ;;  %v5527_v59 = vpop.f32.mrf.mxu1 }
 0x40c   : > { %v7790_v49 = vsel %vm2722_vm2, %v5527_v59, -1e+30 }
 0x40d   : > { %2901 = vmax.xlane.f32.xlu1 %v7758_v42  ;;  %2899 = vmax.xlane.f32.xlu0 %v7754_v1  ;;  %8674 = vst [vmem:[#allocation50_spill] sm:$0xff] %v7790_v49  ;;  %v2708_v11 = vpop.f32.mrf.mxu1 }
 0x40e   : > { %v7796_v31 = vsel %vm2722_vm2, %v2708_v11, -1e+30 }
 0x40f   : > { %8675 = vst [vmem:[#allocation51_spill] sm:$0xff] %v7796_v31 }
 0x411   : > { %2913 = vmax.xlane.f32.xlu1 %v7768_v13  ;;  %2895 = vmax.xlane.f32.xlu0 %v7764_v57 }
 0x415   : > { %2909 = vmax.xlane.f32.xlu1 %v7778_v23  ;;  %2907 = vmax.xlane.f32.xlu0 %v7774_v17 }
 0x419   : > { %2903 = vmax.xlane.f32.xlu0 %v7784_v51 }
 0x41b   : > { %v2826_v13 = vpop.xlane.xlu1 %2825 }
 0x41c   : > { %v2935_v42 = vsub.f32 %v7495_v28, %v2826_v13 }
 0x41d   : > { %2915 = vmax.xlane.f32.xlu0 %v7790_v49 }
 0x41e   : > { %v3017_v1 = vmul.f32 1.442695, %v2935_v42 }
 0x41f   : > { %v2828_v23 = vpop.xlane.xlu0 %2827 }
 0x420   : > { %6015 = vpow2.f32 %v3017_v1  ;;  %v2936_v17 = vsub.f32 %v7500_v18, %v2828_v23 }
 0x421   : > { %2911 = vmax.xlane.f32.xlu0 %v7796_v31 }
 0x422   : > { %v3019_v51 = vmul.f32 1.442695, %v2936_v17 }
 0x424   : > { %6017 = vpow2.f32 %v3019_v51 }
 0x42a   : > { %v7799_v28 = vpop.xlane.xlu1 %2857 }
 0x42d   : > { %v7801_v13 = vpop.eup %6015 }
 0x42e   : > { %3145 = vadd.xlane.f32.xlu1 %v7801_v13  ;;  %v2822_v42 = vpop.xlane.xlu1 %2821  ;;  %v7804_v59 = vpop.xlane.xlu0 %2859 }
 0x42f   : > { %v2933_v1 = vsub.f32 %v7510_v63, %v2822_v42 }
 0x431   : > { %v7807_v18 = vpop.eup %6017  ;;  %v3013_v21 = vmul.f32 1.442695, %v2933_v1 }
 0x432   : > { %3147 = vadd.xlane.f32.xlu0 %v7807_v18  ;;  %v7810_v17 = vpop.xlane.xlu1 %2853  ;;  %v2824_v23 = vpop.xlane.xlu0 %2823 }
 0x433   : > { %6019 = vpow2.f32 %v3013_v21  ;;  %v2934_v51 = vsub.f32 %v7520_v10, %v2824_v23 }
 0x435   : > { %v3015_v11 = vmul.f32 1.442695, %v2934_v51 }
 0x436   : > { %v2834_v49 = vpop.xlane.xlu1 %2833  ;;  %v7813_v31 = vpop.xlane.xlu0 %2855 }
 0x437   : > { %v2939_v57 = vsub.f32 %v7530_v45, %v2834_v49  ;;  %6021 = vpow2.f32 %v3015_v11 }
 0x439   : > { %v3025_v2 = vmul.f32 1.442695, %v2939_v57 }
 0x43a   : > { %v2836_v63 = vpop.xlane.xlu0 %2835  ;;  %v7816_v42 = vpop.xlane.xlu1 %2865 }
 0x43b   : > { %8676 = vst [vmem:[#allocation52_spill] sm:$0xff] %v7816_v42  ;;  %6023 = vpow2.f32 %v3025_v2  ;;  %v2940_v1 = vsub.f32 %v7540_v50, %v2836_v63 }
 0x43d   : > { %v3027_v58 = vmul.f32 1.442695, %v2940_v1 }
 0x43e   : > { %v2830_v9 = vpop.xlane.xlu1 %2829  ;;  %v7819_v48 = vpop.xlane.xlu0 %2867 }
 0x43f   : > { %8677 = vst [vmem:[#allocation53_spill] sm:$0xff] %v7819_v48  ;;  %6025 = vpow2.f32 %v3027_v58  ;;  %v2937_v10 = vsub.f32 %v7550_v39, %v2830_v9 }
 0x440   : > { %v7822_v21 = vpop.eup %6019 }
 0x441   : > { %v3021_v23 = vmul.f32 1.442695, %v2937_v10  ;;  %3141 = vadd.xlane.f32.xlu1 %v7822_v21 }
 0x442   : > { %v7825_v45 = vpop.xlane.xlu1 %2861  ;;  %v2832_v57 = vpop.xlane.xlu0 %2831 }
 0x443   : > { %8678 = vst [vmem:[#allocation54_spill] sm:$0xff] %v7825_v45  ;;  %6027 = vpow2.f32 %v3021_v23  ;;  %v2938_v2 = vsub.f32 %v7560_v6, %v2832_v57 }
 0x444   : > { %v7828_v49 = vpop.eup %6021 }
 0x445   : > { %v3023_v50 = vmul.f32 1.442695, %v2938_v2  ;;  %3143 = vadd.xlane.f32.xlu0 %v7828_v49 }
 0x446   : > { %v2842_v51 = vpop.xlane.xlu1 %2841  ;;  %v7831_v58 = vpop.xlane.xlu0 %2863 }
 0x447   : > { %8679 = vst [vmem:[#allocation55_spill] sm:$0xff] %v7831_v58  ;;  %v2943_v9 = vsub.f32 %v7570_v55, %v2842_v51  ;;  %6029 = vpow2.f32 %v3023_v50 }
 0x448   : > { %v7834_v39 = vpop.eup %6023 }
 0x449   : > { %v3033_v11 = vmul.f32 1.442695, %v2943_v9  ;;  %3153 = vadd.xlane.f32.xlu1 %v7834_v39 }
 0x44a   : > { %v2844_v63 = vpop.xlane.xlu0 %2843  ;;  %v7837_v1 = vpop.xlane.xlu1 %2873 }
 0x44b   : > { %8680 = vst [vmem:[#allocation56_spill] sm:$0xff] %v7837_v1  ;;  %6031 = vpow2.f32 %v3033_v11  ;;  %v2944_v6 = vsub.f32 %v7580_v25, %v2844_v63 }
 0x44c   : > { %v7840_v10 = vpop.eup %6025 }
 0x44d   : > { %v3035_v23 = vmul.f32 1.442695, %v2944_v6  ;;  %3155 = vadd.xlane.f32.xlu0 %v7840_v10 }
 0x44e   : > { %v2838_v57 = vpop.xlane.xlu1 %2837  ;;  %v7843_v2 = vpop.xlane.xlu0 %2875 }
 0x44f   : > { %8681 = vst [vmem:[#allocation57_spill] sm:$0xff] %v7843_v2  ;;  %6033 = vpow2.f32 %v3035_v23  ;;  %v2941_v55 = vsub.f32 %v7590_v27, %v2838_v57 }
 0x450   : > { %v7846_v50 = vpop.eup %6027 }
 0x451   : > { %v3029_v51 = vmul.f32 1.442695, %v2941_v55  ;;  %3149 = vadd.xlane.f32.xlu1 %v7846_v50 }
 0x452   : > { %v7849_v9 = vpop.xlane.xlu1 %2869  ;;  %v2840_v11 = vpop.xlane.xlu0 %2839 }
 0x453   : > { %8682 = vst [vmem:[#allocation58_spill] sm:$0xff] %v7849_v9  ;;  %6035 = vpow2.f32 %v3029_v51  ;;  %v2942_v25 = vsub.f32 %v7601_v20, %v2840_v11 }
 0x454   : > { %v7852_v63 = vpop.eup %6029 }
 0x455   : > { %v3031_v6 = vmul.f32 1.442695, %v2942_v25  ;;  %3151 = vadd.xlane.f32.xlu0 %v7852_v63 }
 0x456   : > { %v2850_v1 = vpop.xlane.xlu1 %2849  ;;  %v7855_v23 = vpop.xlane.xlu0 %2871 }
 0x457   : > { %8683 = vst [vmem:[#allocation59_spill] sm:$0xff] %v7855_v23  ;;  %v2947_v27 = vsub.f32 %v7613_v36, %v2850_v1  ;;  %6037 = vpow2.f32 %v3031_v6 }
 0x458   : > { %v7858_v57 = vpop.eup %6031 }
 0x459   : > { %v3041_v55 = vmul.f32 1.442695, %v2947_v27  ;;  %3161 = vadd.xlane.f32.xlu1 %v7858_v57 }
 0x45a   : > { %v2852_v2 = vpop.xlane.xlu0 %2851  ;;  %v7861_v51 = vpop.xlane.xlu1 %2881 }
 0x45b   : > { %8684 = vst [vmem:[#allocation60_spill] sm:$0xff] %v7861_v51  ;;  %6039 = vpow2.f32 %v3041_v55  ;;  %v2948_v9 = vsub.f32 %v7625_v56, %v2852_v2 }
 0x45c   : > { %v7863_v20 = vpop.eup %6033 }
 0x45d   : > { %3163 = vadd.xlane.f32.xlu0 %v7863_v20  ;;  %v3043_v55 = vmul.f32 1.442695, %v2948_v9 }
 0x45e   : > { %v2846_v11 = vpop.xlane.xlu1 %2845  ;;  %v7866_v25 = vpop.xlane.xlu0 %2883 }
 0x45f   : > { %8685 = vst [vmem:[#allocation61_spill] sm:$0xff] %v7866_v25  ;;  %v2945_v36 = vsub.f32 %v7637_v35, %v2846_v11 }
 0x460   : > { %v7870_v1 = vpop.eup %6035 }
 0x461   : > { %v3037_v6 = vmul.f32 1.442695, %v2945_v36  ;;  %3157 = vadd.xlane.f32.xlu1 %v7870_v1 }
 0x462   : > { %v7873_v27 = vpop.xlane.xlu1 %2877  ;;  %v2848_v51 = vpop.xlane.xlu0 %2847 }
 0x463   : > { %8686 = vst [vmem:[#allocation62_spill] sm:$0xff] %v7873_v27  ;;  %6041 = vpow2.f32 %v3037_v6  ;;  %v2946_v23 = vsub.f32 %v7649_v46, %v2848_v51 }
 0x464   : > { %v7876_v42 = vpop.eup %6037  ;;  %6043 = vpow2.f32 %v3043_v55 }
 0x465   : > { %3159 = vadd.xlane.f32.xlu0 %v7876_v42  ;;  %v3039_v35 = vmul.f32 1.442695, %v2946_v23 }
 0x466   : > { %v3112_v25 = vpop.xlane.xlu1 %3111  ;;  %v7879_v56 = vpop.xlane.xlu0 %2879 }
 0x467   : > { %8687 = vst [vmem:[#allocation63_spill] sm:$0xff] %v7879_v56  ;;  %6045 = vpow2.f32 %v3039_v35 }
 0x468   : > { %v7881_v2 = vpop.eup %6039  ;;  %6047 = vrcp.f32 %v3112_v25 }
 0x469   : > { %8688 = vst [vmem:[#allocation64_spill] sm:$0xff] %v7881_v2  ;;  %3169 = vadd.xlane.f32.xlu1 %v7881_v2 }
 0x46a   : > { %v3122_v11 = vpop.xlane.xlu1 %3121  ;;  %v3114_v36 = vpop.xlane.xlu0 %3113 }
 0x46e   : > { %v3118_v9 = vpop.xlane.xlu1 %3117  ;;  %v3110_v6 = vpop.xlane.xlu0 %3109 }
 0x46f   : > { %6049 = vrcp.f32 %v3110_v6 }
 0x470   : > { %v7884_v46 = vpop.eup %6041  ;;  %6051 = vrcp.f32 %v3114_v36 }
 0x471   : > { %3165 = vadd.xlane.f32.xlu0 %v7884_v46  ;;  %v7887_v55 = vpop.eup %6043 }
 0x472   : > { %v3130_v51 = vpop.xlane.xlu1 %3129  ;;  %v3116_v56 = vpop.xlane.xlu0 %3115 }
 0x473   : > { %6053 = vrcp.f32 %v3116_v56 }
 0x474   : > { %v7890_v48 = vpop.eup %6045 }
 0x475   : > { %3171 = vadd.xlane.f32.xlu0 %v7887_v55  ;;  %v6048_v36 = vpop.eup %6047 }
 0x476   : > { %v3126_v23 = vpop.xlane.xlu1 %3125  ;;  %v3124_v27 = vpop.xlane.xlu0 %3123 }
 0x477   : > { %6055 = vrcp.f32 %v3124_v27 }
 0x478   : > { %6057 = vrcp.f32 %v3118_v9  ;;  %v3302_v9 = vmul.f32 %v6048_v36, %v7658_v34 }
 0x479   : > { %3167 = vadd.xlane.f32.xlu0 %v7890_v48  ;;  %6059 = vrcp.f32 %v3122_v11 }
 0x47a   : > { %982 = vrot.lane.b32.xlu1 %v6935_v4, %s6462_s14  ;;  %v7895_v25 = vpop.xlane.xlu1 %2889  ;;  %v3120_v35 = vpop.xlane.xlu0 %3119 }
 0x47b   : > { %6061 = vrcp.f32 %v3120_v35 }
 0x47c   : > { %v6050_v56 = vpop.eup %6049 }
 0x47d   : > { %v3301_v27 = vmul.f32 %v6050_v56, %v7674_v43  ;;  %v6052_v11 = vpop.eup %6051  ;;  %v5953_v56 = vld [vmem:[#allocation3 + $0xb0] sm:$0xff]  }
 0x47e   : > { %1112 = vrot.lane.b32.xlu1 %v6935_v4, %s6463_s30  ;;  %v7899_v6 = vpop.xlane.xlu1 %2885  ;;  %v3132_v45 = vpop.xlane.xlu0 %3131  ;;  %v3303_v24 = vmul.f32 %v6052_v11, %v7666_v41 }
 0x47f   : > { %v3365_v14 = vpack.c.bf16 %v3302_v9, %v3301_v27  ;;  %6063 = vrcp.f32 %v3132_v45 }
 0x480   : > { %v6054_v58 = vpop.eup %6053  ;;  %6065 = vrcp.f32 %v3126_v23 }
 0x481   : > { %5544 = vmatprep.mubr.bf16.mxu0 %v3365_v14  ;;  %v3304_v4 = vmul.f32 %v6054_v58, %v7682_v8  ;;  %6067 = vrcp.f32 %v3130_v51 }
 0x482   : > { %1114 = vrot.lane.b32.xlu1 %v6949_v15, %s6463_s30  ;;  %v3140_v35 = vpop.xlane.xlu1 %3139  ;;  %v3128_v38 = vpop.xlane.xlu0 %3127 }
 0x483   : > { %v3366_v2 = vpack.c.bf16 %v3304_v4, %v3303_v24  ;;  %6069 = vrcp.f32 %v3128_v38 }
 0x484   : > { %v6056_v43 = vpop.eup %6055 }
 0x485   : > { %v6058_v34 = vpop.eup %6057  ;;  %5545 = vmatmul.mubr.bf16.vlgmr.msra.gmra.mxu0 %v3366_v2  ;;  %v3308_v9 = vmul.f32 %v6056_v43, %v7689_v19 }
 0x486   : > { %v3136_v36 = vpop.xlane.xlu1 %3135  ;;  %v3138_v45 = vpop.xlane.xlu0 %3137  ;;  %5593 = vmatpush3.bf16.msra.mxu0 %v7480_v16  ;;  %v3305_v41 = vmul.f32 %v6058_v34, %v7677_v40  ;;  %v2950_v40 = vsub.f32 %v7534_v33, %v7813_v31  ;;  %v2949_v33 = vsub.f32 %v7524_v32, %v7810_v17 }
 0x487   : > { %v6060_v14 = vpop.eup %6059  ;;  %5594 = vmatprep.subr.bf16.mxu0 %v5953_v56  ;;  %6071 = vrcp.f32 %v3136_v36 }
 0x488   : > { %v6062_v27 = vpop.eup %6061  ;;  %6073 = vrcp.f32 %v3138_v45  ;;  %v3307_v38 = vmul.f32 %v6060_v14, %v7669_v53 }
 0x489   : > { %v3306_v8 = vmul.f32 %v6062_v27, %v7696_v30 }
 0x48a   : > { %v3134_v24 = vpop.xlane.xlu0 %3133  ;;  %5595 = vmatpush3.bf16.msra.mxu0 %v5953_v56  ;;  %v3368_v2 = vpack.c.bf16 %v3308_v9, %v3307_v38 }
 0x48b   : > { %6075 = vrcp.f32 %v3134_v24  ;;  %v3367_v58 = vpack.c.bf16 %v3306_v8, %v3305_v41  ;;  %v7930_v41 = vpop.xlane.xlu1 %2897 }
 0x48c   : > { %6077 = vrcp.f32 %v3140_v35  ;;  %v6064_v16 = vpop.eup %6063  ;;  %v3047_v35 = vmul.f32 1.442695, %v2950_v40  ;;  %v2952_v40 = vsub.f32 %v7514_v0, %v7804_v59  ;;  %v2965_v0 = vsub.f32 %v7708_v7, %v7899_v6 }
 0x48d   : > { %5548 = vmatprep.mubr.bf16.mxu0 %v3367_v58  ;;  %v6066_v19 = vpop.eup %6065  ;;  %v3312_v23 = vmul.f32 %v6064_v16, %v7704_v37 }
 0x48e   : > { %5549 = vmatmul.mubr.bf16.gmra.mxu0 %v3368_v2  ;;  %v6068_v30 = vpop.eup %6067  ;;  %v3309_v53 = vmul.f32 %v6066_v19, %v7692_v3  ;;  %6079 = vpow2.f32 %v3047_v35  ;;  %v7925_v14 = vpop.xlane.xlu0 %2891  ;;  %v2951_v35 = vsub.f32 %v7505_v60, %v7799_v28 }
 0x48f   : > { %984 = vrot.lane.b32.xlu0 %v6949_v15, %s6462_s14  ;;  %v3311_v4 = vmul.f32 %v6068_v30, %v7685_v44  ;;  %v3045_v44 = vmul.f32 1.442695, %v2949_v33 }
 0x490   : > { %v6070_v51 = vpop.eup %6069 }
 0x491   : > { %v3310_v11 = vmul.f32 %v6070_v51, %v7712_v62  ;;  %v3370_v36 = vpack.c.bf16 %v3312_v23, %v3311_v4  ;;  %6081 = vpow2.f32 %v3045_v44  ;;  %v3051_v23 = vmul.f32 1.442695, %v2952_v40 }
 0x492   : > { %v2888_v32 = vpop.xlane.xlu0 %2887 }
 0x493   : > { %v3369_v43 = vpack.c.bf16 %v3310_v11, %v3309_v53  ;;  %6083 = vpow2.f32 %v3051_v23  ;;  %v2966_v59 = vsub.f32 %v7744_v22, %v2888_v32  ;;  %v5954_v32 = vld [vmem:[#allocation3 + $0xf0] sm:$0xff]  }
 0x494   : > { %v6072_v34 = vpop.eup %6071 }
 0x495   : > { %v6074_v56 = vpop.eup %6073  ;;  %5552 = vmatprep.mubr.bf16.mxu0 %v3369_v43  ;;  %v3314_v3 = vmul.f32 %v6072_v34, %v7720_v54  ;;  %v3049_v43 = vmul.f32 1.442695, %v2951_v35  ;;  %v3077_v34 = vmul.f32 1.442695, %v2965_v0 }
 0x496   : > { %5553 = vmatmul.mubr.bf16.gmra.mxu0 %v3370_v36  ;;  %v3315_v62 = vmul.f32 %v6074_v56, %v7718_v5  ;;  %v7933_v54 = vpop.xlane.xlu0 %2899  ;;  %v7935_v5 = vpop.xlane.xlu1 %2893  ;;  %v3079_v56 = vmul.f32 1.442695, %v2966_v59 }
 0x498   : > { %v6076_v15 = vpop.eup %6075 }
 0x499   : > { %v6078_v31 = vpop.eup %6077  ;;  %v3313_v37 = vmul.f32 %v6076_v15, %v7724_v29 }
 0x49a   : > { %v3316_v27 = vmul.f32 %v6078_v31, %v7714_v26  ;;  %v7939_v8 = vpop.xlane.xlu0 %2895  ;;  %v7942_v26 = vpop.xlane.xlu1 %2905 }
 0x49b   : > { %v3371_v45 = vpack.c.bf16 %v3314_v3, %v3313_v37  ;;  %v7928_v17 = vpop.eup %6079 }
 0x49c   : > { %v3372_v9 = vpack.c.bf16 %v3316_v27, %v3315_v62 }
 0x49d   : > { %5556 = vmatprep.mubr.bf16.mxu0 %v3371_v45 }
 0x49e   : > { %5557 = vmatmul.mubr.bf16.gmra.mxu0 %v3372_v9  ;;  %v7937_v29 = vpop.eup %6081  ;;  %v7944_v24 = vpop.xlane.xlu0 %2907 }
 0x49f   : > { %v7946_v38 = vpop.xlane.xlu1 %2901 }
 0x4a0   : > { %v7969_v15 = vpop.eup %6083 }
 0x4a2   : > { %v7950_v58 = vpop.xlane.xlu0 %2903 }
 0x4a3   : > { %v7952_v2 = vpop.xlane.xlu1 %2913 }
 0x4a6   : > { %3175 = vadd.xlane.f32.xlu1 %v7928_v17  ;;  %v7954_v16 = vpop.xlane.xlu0 %2915 }
 0x4a7   : > { %v7956_v19 = vpop.xlane.xlu1 %2909 }
 0x4aa   : > { %v7962_v30 = vpop.xlane.xlu0 %2911 }
 0x4ae   : > { %3173 = vadd.xlane.f32.xlu0 %v7937_v29 }
 0x4b7   : > { %980 = vrot.lane.b32.xlu1 %v6921_v61, %s6462_s14  ;;  %v3146_v51 = vpop.xlane.xlu1 %3145 }
 0x4bb   : > { %v3148_v53 = vpop.xlane.xlu0 %3147 }
 0x4bc   : > { %6085 = vrcp.f32 %v3148_v53 }
 0x4c4   : > { %978 = vrot.lane.b32.xlu0 %v6907_v47, %s6462_s14 }
 0x4c9   : > { %v6086_v33 = vpop.eup %6085 }
 0x4ca   : > { %v3142_v11 = vpop.xlane.xlu1 %3141  ;;  %v3320_v7 = vmul.f32 %v6086_v33, %v7807_v18  ;;  %v6239_v18 = vld [vmem:[#allocation3 + $0xf8] sm:$0xff]  }
 0x4cb   : > { %6087 = vrcp.f32 %v3142_v11 }
 0x4cc   : > { %6089 = vrcp.f32 %v3146_v51 }
 0x4ce   : > { %v3144_v4 = vpop.xlane.xlu0 %3143 }
 0x4cf   : > { %6091 = vrcp.f32 %v3144_v4 }
 0x4d0   : > { %6093 = vpow2.f32 %v3049_v43 }
 0x4d1   : > { %6095 = vpow2.f32 %v3077_v34 }
 0x4d2   : > { %v3154_v36 = vpop.xlane.xlu1 %3153  ;;  %6097 = vpow2.f32 %v3079_v56 }
 0x4d6   : > { %v3156_v60 = vpop.xlane.xlu0 %3155 }
 0x4d7   : > { %6099 = vrcp.f32 %v3156_v60  ;;  %v2967_v60 = vsub.f32 %v7700_v12, %v7895_v25 }
 0x4d8   : > { %v6088_v28 = vpop.eup %6087 }
 0x4d9   : > { %v6090_v37 = vpop.eup %6089  ;;  %v3317_v22 = vmul.f32 %v6088_v28, %v7822_v21 }
 0x4da   : > { %v3150_v31 = vpop.xlane.xlu1 %3149  ;;  %v3319_v45 = vmul.f32 %v6090_v37, %v7801_v13 }
 0x4db   : > { %3179 = vadd.xlane.f32.xlu1 %v7969_v15  ;;  %6101 = vrcp.f32 %v3150_v31  ;;  %v3081_v31 = vmul.f32 1.442695, %v2967_v60  ;;  %v8695_v60 = vld [vmem:[#allocation30_spill] sm:$0xff] }
 0x4dc   : > { %v6092_v3 = vpop.eup %6091  ;;  %6103 = vrcp.f32 %v3154_v36  ;;  %v3374_v27 = vpack.c.bf16 %v3320_v7, %v3319_v45 }
 0x4dd   : > { %v3318_v6 = vmul.f32 %v6092_v3, %v7828_v49  ;;  %v7976_v9 = vpop.eup %6093 }
 0x4de   : > { %v3152_v62 = vpop.xlane.xlu0 %3151  ;;  %v7979_v21 = vpop.eup %6095 }
 0x4df   : > { %6105 = vrcp.f32 %v3152_v62  ;;  %v3373_v44 = vpack.c.bf16 %v3318_v6, %v3317_v22  ;;  %v7982_v13 = vpop.eup %6097 }
 0x4e1   : > { %5576 = vmatprep.mubr.bf16.mxu1 %v3373_v44 }
 0x4e2   : > { %5577 = vmatmul.mubr.bf16.vlgmr.msra.gmra.mxu1 %v3374_v27  ;;  %v3162_v49 = vpop.xlane.xlu1 %3161 }
 0x4e3   : > { %3177 = vadd.xlane.f32.xlu0 %v7976_v9  ;;  %5625 = vmatpush3.bf16.msra.mxu1 %v6239_v18 }
 0x4e4   : > { %5626 = vmatprep.subr.bf16.mxu1 %v5954_v32  ;;  %v6100_v40 = vpop.eup %6099 }
 0x4e5   : > { %v3324_v4 = vmul.f32 %v6100_v40, %v7840_v10 }
 0x4e6   : > { %v3164_v51 = vpop.xlane.xlu0 %3163 }
 0x4e7   : > { %3205 = vadd.xlane.f32.xlu0 %v7979_v21  ;;  %5627 = vmatpush3.bf16.msra.mxu1 %v5954_v32  ;;  %6107 = vrcp.f32 %v3164_v51 }
 0x4e8   : > { %v6102_v23 = vpop.eup %6101 }
 0x4e9   : > { %v6104_v11 = vpop.eup %6103  ;;  %v3321_v43 = vmul.f32 %v6102_v23, %v7846_v50 }
 0x4ea   : > { %v3158_v53 = vpop.xlane.xlu1 %3157  ;;  %v3323_v34 = vmul.f32 %v6104_v11, %v7834_v39 }
 0x4eb   : > { %3207 = vadd.xlane.f32.xlu0 %v7982_v13  ;;  %6109 = vrcp.f32 %v3158_v53 }
 0x4ec   : > { %1108 = vrot.lane.b32.xlu1 %v6907_v47, %s6463_s30  ;;  %v6106_v35 = vpop.eup %6105  ;;  %6111 = vrcp.f32 %v3162_v49  ;;  %v3376_v56 = vpack.c.bf16 %v3324_v4, %v3323_v34 }
 0x4ed   : > { %v3322_v0 = vmul.f32 %v6106_v35, %v7852_v63 }
 0x4ee   : > { %v3160_v59 = vpop.xlane.xlu0 %3159 }
 0x4ef   : > { %6113 = vrcp.f32 %v3160_v59  ;;  %v3375_v36 = vpack.c.bf16 %v3322_v0, %v3321_v43  ;;  %v8690_v43 = vld [vmem:[#allocation26_spill] sm:$0xff]  ;;  %v8692_v0 = vld [vmem:[#allocation55_spill] sm:$0xff] }
 0x4f0   : > { %6115 = vpow2.f32 %v3081_v31  ;;  %v8693_v59 = vld [vmem:[#allocation31_spill] sm:$0xff] }
 0x4f1   : > { %5580 = vmatprep.mubr.bf16.mxu1 %v3375_v36  ;;  %v2954_v34 = vsub.f32 %v8693_v59, %v8692_v0 }
 0x4f2   : > { %v3170_v33 = vpop.xlane.xlu1 %3169  ;;  %5581 = vmatmul.mubr.bf16.gmra.mxu1 %v3376_v56 }
 0x4f3   : > { %v3055_v56 = vmul.f32 1.442695, %v2954_v34 }
 0x4f4   : > { %v6108_v10 = vpop.eup %6107 }
 0x4f5   : > { %v3328_v3 = vmul.f32 %v6108_v10, %v7863_v20 }
 0x4f6   : > { %v983_v47 = vpop.permute.xlu1 %982 }
 0x4f7   : > { %1021 = vst.msk [vmem:[#allocation3 + $0xa8] sm:$0xf] %vm678_vm0, %v983_v47  ;;  %v8694_v47 = vld [vmem:[#allocation54_spill] sm:$0xff] }
 0x4f8   : > { %v6110_v63 = vpop.eup %6109  ;;  %v2953_v10 = vsub.f32 %v8695_v60, %v8694_v47  ;;  %v8697_v60 = vld [vmem:[#allocation24_spill] sm:$0xff] }
 0x4f9   : > { %v6112_v39 = vpop.eup %6111  ;;  %v3325_v6 = vmul.f32 %v6110_v63, %v7870_v1 }
 0x4fa   : > { %v1113_v50 = vpop.permute.xlu1 %1112  ;;  %v3166_v28 = vpop.xlane.xlu0 %3165  ;;  %v3327_v12 = vmul.f32 %v6112_v39, %v7858_v57 }
 0x4fb   : > { %1151 = vst.msk [vmem:[#allocation3 + $0xe8] sm:$0xf] %vm678_vm0, %v1113_v50 }
 0x4fc   : > { %v6114_v37 = vpop.eup %6113  ;;  %v3378_v45 = vpack.c.bf16 %v3328_v3, %v3327_v12 }
 0x4fd   : > { %v3326_v62 = vmul.f32 %v6114_v37, %v7876_v42  ;;  %v2968_v42 = vsub.f32 %v7734_v52, %v7925_v14  ;;  %v8005_v57 = vpop.eup %6115  ;;  %v8689_v52 = vld [vmem:[#allocation64_spill] sm:$0xff] }
 0x4fe   : > { %v1115_v7 = vpop.permute.xlu1 %1114  ;;  %v3172_v22 = vpop.xlane.xlu0 %3171 }
 0x4ff   : > { %1152 = vst.msk [vmem:[#allocation3 + $0xec] sm:$0xf] %vm678_vm0, %v1115_v7  ;;  %6117 = vrcp.f32 %v3172_v22  ;;  %v3377_v25 = vpack.c.bf16 %v3326_v62, %v3325_v6 }
 0x500   : > { %6119 = vrcp.f32 %v3166_v28  ;;  %v3053_v28 = vmul.f32 1.442695, %v2953_v10  ;;  %v8698_v10 = vld [vmem:[#allocation53_spill] sm:$0xff] }
 0x501   : > { %1110 = vrot.lane.b32.xlu0 %v6921_v61, %s6463_s30  ;;  %6121 = vrcp.f32 %v3170_v33  ;;  %5584 = vmatprep.mubr.bf16.mxu1 %v3377_v25  ;;  %v3083_v61 = vmul.f32 1.442695, %v2968_v42 }
 0x502   : > { %v3168_v20 = vpop.xlane.xlu0 %3167  ;;  %5585 = vmatmul.mubr.bf16.gmra.mxu1 %v3378_v45 }
 0x503   : > { %6123 = vrcp.f32 %v3168_v20 }
 0x504   : > { %6125 = vpow2.f32 %v3083_v61 }
 0x506   : > { %v985_v1 = vpop.permute.xlu0 %984  ;;  %v5955_v44 = vld [vmem:[#allocation3 + $0xe8] sm:$0xff]  }
 0x507   : > { %1022 = vst.msk [vmem:[#allocation3 + $0xac] sm:$0xf] %vm678_vm0, %v985_v1  ;;  %5628 = vmatprep.subr.bf16.mxu1 %v5955_v44 }
 0x508   : > { %5629 = vmatpush3.bf16.msra.mxu1 %v5955_v44 }
 0x50c   : > { %v6118_v27 = vpop.eup %6117 }
 0x50d   : > { %v6120_v32 = vpop.eup %6119  ;;  %v3332_v51 = vmul.f32 %v6118_v27, %v7887_v55 }
 0x50e   : > { %v5956_v18 = vld [vmem:[#allocation3 + $0xa8] sm:$0xff]   ;;  %v6122_v49 = vpop.eup %6121  ;;  %v3329_v23 = vmul.f32 %v6120_v32, %v7884_v46  ;;  %v8691_v46 = vld [vmem:[#allocation27_spill] sm:$0xff] }
 0x50f   : > { %5596 = vmatprep.subr.bf16.mxu0 %v5956_v18  ;;  %v3331_v14 = vmul.f32 %v6122_v49, %v8689_v52 }
 0x510   : > { %v6124_v40 = vpop.eup %6123  ;;  %3209 = vadd.xlane.f32.xlu1 %v8005_v57  ;;  %5597 = vmatpush3.bf16.msra.mxu0 %v5956_v18 }
 0x511   : > { %v3330_v53 = vmul.f32 %v6124_v40, %v7890_v48  ;;  %v3380_v35 = vpack.c.bf16 %v3332_v51, %v3331_v14  ;;  %v8012_v4 = vpop.eup %6125 }
 0x513   : > { %v3379_v11 = vpack.c.bf16 %v3330_v53, %v3329_v23 }
 0x515   : > { %5588 = vmatprep.mubr.bf16.mxu1 %v3379_v11 }
 0x516   : > { %5589 = vmatmul.mubr.bf16.gmra.mxu1 %v3380_v35  ;;  %v8696_v35 = vld [vmem:[#allocation25_spill] sm:$0xff] }
 0x520   : > { %3211 = vadd.xlane.f32.xlu0 %v8012_v4 }
 0x521   : > { %974 = vrot.lane.b32.xlu1 %v8690_v43, %s6462_s14 }
 0x525   : > { %1104 = vrot.lane.b32.xlu1 %v8690_v43, %s6463_s30 }
 0x529   : > { %1106 = vrot.lane.b32.xlu1 %v8691_v46, %s6463_s30 }
 0x52f   : > { %v3176_v48 = vpop.xlane.xlu1 %3175 }
 0x530   : > { %6127 = vrcp.f32 %v3176_v48 }
 0x533   : > { %v981_v55 = vpop.permute.xlu1 %980 }
 0x534   : > { %1020 = vst.msk [vmem:[#allocation3 + $0xa4] sm:$0xf] %vm678_vm0, %v981_v55 }
 0x536   : > { %976 = vrot.lane.b32.xlu0 %v8691_v46, %s6462_s14 }
 0x537   : > { %v3174_v36 = vpop.xlane.xlu0 %3173 }
 0x538   : > { %6129 = vrcp.f32 %v3174_v36 }
 0x539   : > { %6131 = vpow2.f32 %v3055_v56 }
 0x53a   : > { %6133 = vpow2.f32 %v3053_v28 }
 0x53b   : > { %v979_v33 = vpop.permute.xlu0 %978 }
 0x53c   : > { %1019 = vst.msk [vmem:[#allocation3 + $0xa0] sm:$0xf] %vm678_vm0, %v979_v33 }
 0x53d   : > { %v6128_v50 = vpop.eup %6127 }
 0x53e   : > { %v3334_v3 = vmul.f32 %v6128_v50, %v7928_v17  ;;  %v8699_v50 = vld [vmem:[#allocation29_spill] sm:$0xff] }
 0x53f   : > { %v2956_v28 = vsub.f32 %v8699_v50, %v8698_v10 }
 0x543   : > { %v5957_v63 = vld [vmem:[#allocation3 + $0xa0] sm:$0xff]  }
 0x544   : > { %5598 = vmatprep.subr.bf16.mxu0 %v5957_v63 }
 0x545   : > { %v6130_v31 = vpop.eup %6129  ;;  %v5546_v39 = vpop.f32.mrf.mxu0  ;;  %5599 = vmatpush3.bf16.msra.mxu0 %v5957_v63 }
 0x546   : > { %v3333_v37 = vmul.f32 %v6130_v31, %v7937_v29  ;;  %v5145_v7 = vpack.c.bf16 %v5546_v39, %v5546_v39  ;;  %v8033_v45 = vpop.eup %6131  ;;  %v3059_v31 = vmul.f32 1.442695, %v2956_v28  ;;  %v8706_v28 = vld [vmem:[#allocation22_spill] sm:$0xff] }
 0x547   : > { %v3479_v22 = vpop.f32.mrf.mxu0  ;;  %v8040_v61 = vpop.eup %6133 }
 0x548   : > { %v3381_v6 = vpack.c.bf16 %v3334_v3, %v3333_v37  ;;  %4043 = vst.msk [vmem:[#allocation5 + $0x8] sm:$0xf] %vm678_vm0, %v5145_v7  ;;  %v5143_v62 = vpack.c.bf16 %v3479_v22, %v3479_v22  ;;  %v8700_v37 = vld [vmem:[#allocation52_spill] sm:$0xff] }
 0x549   : > { %v5547_v12 = vpop.f32.mrf.mxu0  ;;  %v8701_v3 = vld [vmem:[#allocation28_spill] sm:$0xff] }
 0x54a   : > { %5608 = vmatprep.mubr.bf16.mxu0 %v3381_v6  ;;  %4041 = vst.msk [vmem:[#allocation5] sm:$0xf] %vm678_vm0, %v5143_v62  ;;  %v5146_v25 = vpack.c.bf16 %v5547_v12, %v5547_v12  ;;  %v2955_v7 = vsub.f32 %v8701_v3, %v8700_v37  ;;  %v8702_v12 = vld [vmem:[#allocation41_spill] sm:$0xff] }
 0x54b   : > { %v3482_v20 = vpop.f32.mrf.mxu0 }
 0x54c   : > { %4044 = vst.msk [vmem:[#allocation5 + $0xc] sm:$0xf] %vm678_vm0, %v5146_v25  ;;  %v5144_v29 = vpack.c.bf16 %v3482_v20, %v3482_v20  ;;  %v3057_v62 = vmul.f32 1.442695, %v2955_v7  ;;  %v2969_v25 = vsub.f32 %v8702_v12, %v7935_v5 }
 0x54d   : > { %3183 = vadd.xlane.f32.xlu1 %v8033_v45 }
 0x54e   : > { %v5550_v17 = vpop.f32.mrf.mxu0  ;;  %4042 = vst.msk [vmem:[#allocation5 + $0x4] sm:$0xf] %vm678_vm0, %v5144_v29 }
 0x54f   : > { %v5149_v1 = vpack.c.bf16 %v5550_v17, %v5550_v17 }
 0x550   : > { %v3495_v44 = vpop.f32.mrf.mxu0 }
 0x551   : > { %4047 = vst.msk [vmem:[#allocation5 + $0x18] sm:$0xf] %vm678_vm0, %v5149_v1  ;;  %v5147_v42 = vpack.c.bf16 %v3495_v44, %v3495_v44  ;;  %v3085_v44 = vmul.f32 1.442695, %v2969_v25 }
 0x552   : > { %v5551_v27 = vpop.f32.mrf.mxu0 }
 0x553   : > { %4045 = vst.msk [vmem:[#allocation5 + $0x10] sm:$0xf] %vm678_vm0, %v5147_v42  ;;  %v5150_v32 = vpack.c.bf16 %v5551_v27, %v5551_v27  ;;  %v8703_v42 = vld [vmem:[#allocation45_spill] sm:$0xff] }
 0x554   : > { %v3498_v18 = vpop.f32.mrf.mxu0  ;;  %v2970_v27 = vsub.f32 %v8703_v42, %v7939_v8 }
 0x555   : > { %4048 = vst.msk [vmem:[#allocation5 + $0x1c] sm:$0xf] %vm678_vm0, %v5150_v32  ;;  %v5148_v49 = vpack.c.bf16 %v3498_v18, %v3498_v18  ;;  %3181 = vadd.xlane.f32.xlu0 %v8040_v61 }
 0x556   : > { %v5554_v40 = vpop.f32.mrf.mxu0  ;;  %v3087_v5 = vmul.f32 1.442695, %v2970_v27 }
 0x557   : > { %4046 = vst.msk [vmem:[#allocation5 + $0x14] sm:$0xf] %vm678_vm0, %v5148_v49  ;;  %v5153_v51 = vpack.c.bf16 %v5554_v40, %v5554_v40 }
 0x558   : > { %v3511_v23 = vpop.f32.mrf.mxu0 }
 0x559   : > { %4051 = vst.msk [vmem:[#allocation5 + $0x28] sm:$0xf] %vm678_vm0, %v5153_v51  ;;  %v5151_v53 = vpack.c.bf16 %v3511_v23, %v3511_v23 }
 0x55a   : > { %v5555_v52 = vpop.f32.mrf.mxu0 }
 0x55b   : > { %4049 = vst.msk [vmem:[#allocation5 + $0x20] sm:$0xf] %vm678_vm0, %v5151_v53  ;;  %v5154_v14 = vpack.c.bf16 %v5555_v52, %v5555_v52 }
 0x55c   : > { %v3514_v11 = vpop.f32.mrf.mxu0 }
 0x55d   : > { %4052 = vst.msk [vmem:[#allocation5 + $0x2c] sm:$0xf] %vm678_vm0, %v5154_v14  ;;  %v5152_v43 = vpack.c.bf16 %v3514_v11, %v3514_v11  ;;  %v8704_v14 = vld [vmem:[#allocation40_spill] sm:$0xff] }
 0x55e   : > { %972 = vrot.lane.b32.xlu1 %v8696_v35, %s6462_s14  ;;  %v5558_v46 = vpop.f32.mrf.mxu0  ;;  %v2971_v11 = vsub.f32 %v8704_v14, %v7930_v41  ;;  %v8705_v41 = vld [vmem:[#allocation43_spill] sm:$0xff] }
 0x55f   : > { %4050 = vst.msk [vmem:[#allocation5 + $0x24] sm:$0xf] %vm678_vm0, %v5152_v43  ;;  %v5157_v48 = vpack.c.bf16 %v5558_v46, %v5558_v46 }
 0x560   : > { %v3527_v55 = vpop.f32.mrf.mxu0  ;;  %v3089_v46 = vmul.f32 1.442695, %v2971_v11 }
 0x561   : > { %4055 = vst.msk [vmem:[#allocation5 + $0x38] sm:$0xf] %vm678_vm0, %v5157_v48  ;;  %v5155_v0 = vpack.c.bf16 %v3527_v55, %v3527_v55 }
 0x562   : > { %v5559_v59 = vpop.f32.mrf.mxu0 }
 0x563   : > { %4053 = vst.msk [vmem:[#allocation5 + $0x30] sm:$0xf] %vm678_vm0, %v5155_v0  ;;  %v5158_v36 = vpack.c.bf16 %v5559_v59, %v5559_v59 }
 0x564   : > { %v3180_v34 = vpop.xlane.xlu1 %3179  ;;  %v3530_v56 = vpop.f32.mrf.mxu0 }
 0x565   : > { %4056 = vst.msk [vmem:[#allocation5 + $0x3c] sm:$0xf] %vm678_vm0, %v5158_v36  ;;  %v5156_v33 = vpack.c.bf16 %v3530_v56, %v3530_v56  ;;  %6135 = vrcp.f32 %v3180_v34  ;;  %v2972_v34 = vsub.f32 %v8705_v41, %v7933_v54  ;;  %v8718_v41 = vld [vmem:[#allocation44_spill] sm:$0xff] }
 0x567   : > { %4054 = vst.msk [vmem:[#allocation5 + $0x34] sm:$0xf] %vm678_vm0, %v5156_v33  ;;  %v3091_v56 = vmul.f32 1.442695, %v2972_v34  ;;  %v2973_v34 = vsub.f32 %v8718_v41, %v7946_v38 }
 0x568   : > { %v1109_v47 = vpop.permute.xlu1 %1108 }
 0x569   : > { %1149 = vst.msk [vmem:[#allocation3 + $0xe0] sm:$0xf] %vm678_vm0, %v1109_v47 }
 0x56b   : > { %970 = vrot.lane.b32.xlu0 %v8697_v60, %s6462_s14 }
 0x56c   : > { %v3178_v63 = vpop.xlane.xlu0 %3177 }
 0x56d   : > { %6137 = vrcp.f32 %v3178_v63 }
 0x570   : > { %v3206_v39 = vpop.xlane.xlu0 %3205 }
 0x571   : > { %6139 = vrcp.f32 %v3206_v39  ;;  %v8709_v39 = vld [vmem:[#allocation35_spill] sm:$0xff] }
 0x572   : > { %6141 = vpow2.f32 %v3059_v31  ;;  %v6136_v6 = vpop.eup %6135  ;;  %v8708_v31 = vld [vmem:[#allocation59_spill] sm:$0xff] }
 0x573   : > { %v8069_v1 = vmul.f32 %v6136_v6, %v7969_v15  ;;  %v2958_v37 = vsub.f32 %v8709_v39, %v8708_v31  ;;  %v8710_v6 = vld [vmem:[#allocation58_spill] sm:$0xff] }
 0x574   : > { %v3208_v22 = vpop.xlane.xlu0 %3207 }
 0x575   : > { %6143 = vrcp.f32 %v3208_v22  ;;  %v3063_v7 = vmul.f32 1.442695, %v2958_v37 }
 0x576   : > { %6145 = vpow2.f32 %v3057_v62  ;;  %v8711_v62 = vld [vmem:[#allocation34_spill] sm:$0xff] }
 0x577   : > { %6147 = vpow2.f32 %v3085_v44  ;;  %v2957_v12 = vsub.f32 %v8711_v62, %v8710_v6  ;;  %v8720_v62 = vld [vmem:[#allocation42_spill] sm:$0xff] }
 0x578   : > { %v1111_v20 = vpop.permute.xlu0 %1110  ;;  %6149 = vpow2.f32 %v3087_v5 }
 0x579   : > { %1150 = vst.msk [vmem:[#allocation3 + $0xe4] sm:$0xf] %vm678_vm0, %v1111_v20  ;;  %v3061_v20 = vmul.f32 1.442695, %v2957_v12  ;;  %v2975_v12 = vsub.f32 %v8720_v62, %v7942_v26 }
 0x57a   : > { %v6138_v29 = vpop.eup %6137 }
 0x57b   : > { %v8066_v17 = vmul.f32 %v6138_v29, %v7976_v9 }
 0x57d   : > { %v3382_v32 = vpack.c.bf16 %v8069_v1, %v8066_v17 }
 0x57e   : > { %v6140_v18 = vpop.eup %6139 }
 0x57f   : > { %v8075_v40 = vpop.eup %6141  ;;  %v3349_v15 = vmul.f32 %v6140_v18, %v7979_v21 }
 0x580   : > { %v5958_v49 = vld [vmem:[#allocation3 + $0xe0] sm:$0xff]  }
 0x581   : > { %5630 = vmatprep.subr.bf16.mxu1 %v5958_v49 }
 0x582   : > { %v6144_v51 = vpop.eup %6143  ;;  %3187 = vadd.xlane.f32.xlu1 %v8075_v40  ;;  %5631 = vmatpush3.bf16.msra.mxu1 %v5958_v49 }
 0x583   : > { %v3350_v9 = vmul.f32 %v6144_v51, %v7982_v13  ;;  %v8080_v23 = vpop.eup %6145  ;;  %v8712_v51 = vld [vmem:[#allocation21_spill] sm:$0xff] }
 0x584   : > { %v8083_v53 = vpop.eup %6147 }
 0x585   : > { %v3389_v8 = vpack.c.bf16 %v3350_v9, %v3349_v15  ;;  %v8086_v52 = vpop.eup %6149  ;;  %v8714_v9 = vld [vmem:[#allocation57_spill] sm:$0xff] }
 0x587   : > { %5640 = vmatprep.mubr.bf16.mxu1 %v3389_v8  ;;  %v8715_v8 = vld [vmem:[#allocation33_spill] sm:$0xff] }
 0x58a   : > { %3185 = vadd.xlane.f32.xlu0 %v8080_v23 }
 0x58e   : > { %3213 = vadd.xlane.f32.xlu0 %v8083_v53 }
 0x592   : > { %3215 = vadd.xlane.f32.xlu0 %v8086_v52 }
 0x593   : > { %1100 = vrot.lane.b32.xlu1 %v8697_v60, %s6463_s30 }
 0x599   : > { %v3210_v21 = vpop.xlane.xlu1 %3209 }
 0x59a   : > { %6151 = vrcp.f32 %v3210_v21  ;;  %v2960_v21 = vsub.f32 %v8715_v8, %v8714_v9  ;;  %v8724_v9 = vld [vmem:[#allocation36_spill] sm:$0xff] }
 0x59b   : > { %6153 = vpow2.f32 %v3089_v46  ;;  %v8717_v46 = vld [vmem:[#allocation32_spill] sm:$0xff] }
 0x59c   : > { %v3067_v14 = vmul.f32 1.442695, %v2960_v21 }
 0x59d   : > { %v975_v13 = vpop.permute.xlu1 %974 }
 0x59e   : > { %1017 = vst.msk [vmem:[#allocation3 + $0x98] sm:$0xf] %vm678_vm0, %v975_v13 }
 0x5a1   : > { %v1105_v43 = vpop.permute.xlu1 %1104 }
 0x5a2   : > { %1147 = vst.msk [vmem:[#allocation3 + $0xd8] sm:$0xf] %vm678_vm0, %v1105_v43  ;;  %v8716_v43 = vld [vmem:[#allocation56_spill] sm:$0xff]  ;;  %v8205_v41 = vpop.f32.mrf.mxu1 }
 0x5a5   : > { %v1107_v48 = vpop.permute.xlu1 %1106 }
 0x5a6   : > { %1148 = vst.msk [vmem:[#allocation3 + $0xdc] sm:$0xf] %vm678_vm0, %v1107_v48  ;;  %v2959_v48 = vsub.f32 %v8717_v46, %v8716_v43 }
 0x5a7   : > { %v6152_v36 = vpop.eup %6151 }
 0x5a8   : > { %1102 = vrot.lane.b32.xlu0 %v8696_v35, %s6463_s30  ;;  %v8101_v47 = vpop.eup %6153  ;;  %v8105_v35 = vmul.f32 %v6152_v36, %v8005_v57  ;;  %v8707_v57 = vld [vmem:[#allocation23_spill] sm:$0xff] }
 0x5a9   : > { %v3212_v55 = vpop.xlane.xlu0 %3211 }
 0x5aa   : > { %6155 = vrcp.f32 %v3212_v55 }
 0x5ab   : > { %6157 = vpow2.f32 %v3091_v56 }
 0x5ad   : > { %v977_v0 = vpop.permute.xlu0 %976  ;;  %v5959_v59 = vld [vmem:[#allocation3 + $0xd8] sm:$0xff]  }
 0x5ae   : > { %1018 = vst.msk [vmem:[#allocation3 + $0x9c] sm:$0xf] %vm678_vm0, %v977_v0  ;;  %5632 = vmatprep.subr.bf16.mxu1 %v5959_v59 }
 0x5af   : > { %5633 = vmatpush3.bf16.msra.mxu1 %v5959_v59  ;;  %v3065_v59 = vmul.f32 1.442695, %v2959_v48  ;;  %v8726_v48 = vld [vmem:[#allocation46_spill] sm:$0xff] }
 0x5b5   : > { %v5960_v33 = vld [vmem:[#allocation3 + $0x98] sm:$0xff]  }
 0x5b6   : > { %5600 = vmatprep.subr.bf16.mxu0 %v5960_v33 }
 0x5b7   : > { %v6156_v60 = vpop.eup %6155  ;;  %3217 = vadd.xlane.f32.xlu1 %v8101_v47  ;;  %5601 = vmatpush3.bf16.msra.mxu0 %v5960_v33 }
 0x5b8   : > { %v8108_v10 = vmul.f32 %v6156_v60, %v8012_v4  ;;  %v8112_v50 = vpop.eup %6157 }
 0x5ba   : > { %v3390_v54 = vpack.c.bf16 %v8108_v10, %v8105_v35 }
 0x5c7   : > { %3219 = vadd.xlane.f32.xlu0 %v8112_v50 }
 0x5c8   : > { %966 = vrot.lane.b32.xlu1 %v8706_v28, %s6462_s14 }
 0x5cc   : > { %1096 = vrot.lane.b32.xlu1 %v8706_v28, %s6463_s30  ;;  %v3093_v28 = vmul.f32 1.442695, %v2973_v34 }
 0x5d0   : > { %1098 = vrot.lane.b32.xlu1 %v8707_v57, %s6463_s30 }
 0x5d6   : > { %v3184_v63 = vpop.xlane.xlu1 %3183 }
 0x5d7   : > { %6159 = vrcp.f32 %v3184_v63 }
 0x5da   : > { %v973_v4 = vpop.permute.xlu1 %972 }
 0x5db   : > { %1016 = vst.msk [vmem:[#allocation3 + $0x94] sm:$0xf] %vm678_vm0, %v973_v4 }
 0x5dd   : > { %968 = vrot.lane.b32.xlu0 %v8707_v57, %s6462_s14  ;;  %v8719_v57 = vld [vmem:[#allocation49_spill] sm:$0xff] }
 0x5de   : > { %v3182_v3 = vpop.xlane.xlu0 %3181  ;;  %v2974_v63 = vsub.f32 %v8719_v57, %v7950_v58 }
 0x5df   : > { %6161 = vrcp.f32 %v3182_v3 }
 0x5e0   : > { %6163 = vpow2.f32 %v3063_v7  ;;  %v3095_v38 = vmul.f32 1.442695, %v2974_v63 }
 0x5e1   : > { %6165 = vpow2.f32 %v3061_v20  ;;  %v8721_v20 = vld [vmem:[#allocation62_spill] sm:$0xff] }
 0x5e2   : > { %v971_v22 = vpop.permute.xlu0 %970 }
 0x5e3   : > { %1015 = vst.msk [vmem:[#allocation3 + $0x90] sm:$0xf] %vm678_vm0, %v971_v22 }
 0x5e4   : > { %v6160_v25 = vpop.eup %6159 }
 0x5e5   : > { %v8133_v27 = vmul.f32 %v6160_v25, %v8033_v45  ;;  %v8713_v45 = vld [vmem:[#allocation20_spill] sm:$0xff] }
 0x5ea   : > { %v5961_v29 = vld [vmem:[#allocation3 + $0x90] sm:$0xff]  }
 0x5eb   : > { %5602 = vmatprep.subr.bf16.mxu0 %v5961_v29 }
 0x5ec   : > { %v6162_v44 = vpop.eup %6161  ;;  %5603 = vmatpush3.bf16.msra.mxu0 %v5961_v29  ;;  %v8722_v29 = vld [vmem:[#allocation38_spill] sm:$0xff] }
 0x5ed   : > { %v8130_v42 = vmul.f32 %v6162_v44, %v8040_v61  ;;  %v8137_v5 = vpop.eup %6163  ;;  %v2961_v44 = vsub.f32 %v8722_v29, %v8721_v20 }
 0x5ee   : > { %v8140_v49 = vpop.eup %6165 }
 0x5ef   : > { %v3383_v18 = vpack.c.bf16 %v8133_v27, %v8130_v42  ;;  %v3069_v21 = vmul.f32 1.442695, %v2961_v44 }
 0x5f4   : > { %3191 = vadd.xlane.f32.xlu1 %v8137_v5 }
 0x5fc   : > { %3189 = vadd.xlane.f32.xlu0 %v8140_v49 }
 0x605   : > { %964 = vrot.lane.b32.xlu1 %v8712_v51, %s6462_s14 }
 0x60b   : > { %v3188_v61 = vpop.xlane.xlu1 %3187 }
 0x60c   : > { %6167 = vrcp.f32 %v3188_v61  ;;  %v3097_v61 = vmul.f32 1.442695, %v2975_v12 }
 0x60f   : > { %v1101_v15 = vpop.permute.xlu1 %1100 }
 0x610   : > { %1145 = vst.msk [vmem:[#allocation3 + $0xd0] sm:$0xf] %vm678_vm0, %v1101_v15 }
 0x612   : > { %962 = vrot.lane.b32.xlu0 %v8713_v45, %s6462_s14 }
 0x613   : > { %v3186_v13 = vpop.xlane.xlu0 %3185 }
 0x614   : > { %6169 = vrcp.f32 %v3186_v13 }
 0x617   : > { %v3214_v11 = vpop.xlane.xlu0 %3213 }
 0x618   : > { %6171 = vrcp.f32 %v3214_v11 }
 0x619   : > { %6173 = vpow2.f32 %v3067_v14  ;;  %v6168_v0 = vpop.eup %6167  ;;  %v8725_v14 = vld [vmem:[#allocation48_spill] sm:$0xff] }
 0x61a   : > { %v8159_v60 = vmul.f32 %v6168_v0, %v8075_v40  ;;  %v2977_v11 = vsub.f32 %v8725_v14, %v7956_v19  ;;  %v8727_v0 = vld [vmem:[#allocation47_spill] sm:$0xff] }
 0x61b   : > { %v3216_v55 = vpop.xlane.xlu0 %3215  ;;  %v8729_v19 = vld [vmem:[#allocation39_spill] sm:$0xff] }
 0x61c   : > { %6175 = vrcp.f32 %v3216_v55  ;;  %v3101_v55 = vmul.f32 1.442695, %v2977_v11 }
 0x61d   : > { %6177 = vpow2.f32 %v3065_v59  ;;  %v2976_v59 = vsub.f32 %v8727_v0, %v7944_v24 }
 0x61e   : > { %6179 = vpow2.f32 %v3093_v28 }
 0x61f   : > { %v1103_v36 = vpop.permute.xlu0 %1102  ;;  %6181 = vpow2.f32 %v3095_v38  ;;  %v3099_v57 = vmul.f32 1.442695, %v2976_v59 }
 0x620   : > { %1146 = vst.msk [vmem:[#allocation3 + $0xd4] sm:$0xf] %vm678_vm0, %v1103_v36 }
 0x621   : > { %v6170_v56 = vpop.eup %6169 }
 0x622   : > { %v8156_v33 = vmul.f32 %v6170_v56, %v8080_v23  ;;  %v8728_v56 = vld [vmem:[#allocation63_spill] sm:$0xff] }
 0x623   : > { %v2962_v28 = vsub.f32 %v8729_v19, %v8728_v56 }
 0x624   : > { %v3384_v4 = vpack.c.bf16 %v8159_v60, %v8156_v33 }
 0x625   : > { %v6172_v31 = vpop.eup %6171  ;;  %v3071_v62 = vmul.f32 1.442695, %v2962_v28 }
 0x626   : > { %v8165_v37 = vpop.eup %6173  ;;  %v8169_v40 = vmul.f32 %v6172_v31, %v8083_v53 }
 0x627   : > { %v5962_v39 = vld [vmem:[#allocation3 + $0xd0] sm:$0xff]  }
 0x628   : > { %5634 = vmatprep.subr.bf16.mxu1 %v5962_v39 }
 0x629   : > { %v6176_v3 = vpop.eup %6175  ;;  %3195 = vadd.xlane.f32.xlu1 %v8165_v37  ;;  %5635 = vmatpush3.bf16.msra.mxu1 %v5962_v39 }
 0x62a   : > { %v8172_v23 = vmul.f32 %v6176_v3, %v8086_v52  ;;  %v8176_v7 = vpop.eup %6177  ;;  %v8730_v3 = vld [vmem:[#allocation61_spill] sm:$0xff] }
 0x62b   : > { %v8179_v22 = vpop.eup %6179 }
 0x62c   : > { %v3391_v58 = vpack.c.bf16 %v8172_v23, %v8169_v40  ;;  %v8182_v6 = vpop.eup %6181 }
 0x631   : > { %3193 = vadd.xlane.f32.xlu0 %v8176_v7 }
 0x635   : > { %3221 = vadd.xlane.f32.xlu0 %v8179_v22 }
 0x639   : > { %3223 = vadd.xlane.f32.xlu0 %v8182_v6 }
 0x63a   : > { %1092 = vrot.lane.b32.xlu1 %v8713_v45, %s6463_s30  ;;  %v8723_v45 = vld [vmem:[#allocation60_spill] sm:$0xff] }
 0x63b   : > { %v2963_v8 = vsub.f32 %v8724_v9, %v8723_v45 }
 0x63d   : > { %v3073_v13 = vmul.f32 1.442695, %v2963_v8 }
 0x640   : > { %v3218_v53 = vpop.xlane.xlu1 %3217 }
 0x641   : > { %6183 = vrcp.f32 %v3218_v53  ;;  %v8731_v53 = vld [vmem:[#allocation37_spill] sm:$0xff] }
 0x642   : > { %6185 = vpow2.f32 %v3097_v61 }
 0x644   : > { %v967_v52 = vpop.permute.xlu1 %966 }
 0x645   : > { %1013 = vst.msk [vmem:[#allocation3 + $0x88] sm:$0xf] %vm678_vm0, %v967_v52  ;;  %v2964_v52 = vsub.f32 %v8731_v53, %v8730_v3 }
 0x647   : > { %v3075_v29 = vmul.f32 1.442695, %v2964_v52 }
 0x648   : > { %v1097_v25 = vpop.permute.xlu1 %1096 }
 0x649   : > { %1143 = vst.msk [vmem:[#allocation3 + $0xc8] sm:$0xf] %vm678_vm0, %v1097_v25 }
 0x64c   : > { %v1099_v15 = vpop.permute.xlu1 %1098 }
 0x64d   : > { %1144 = vst.msk [vmem:[#allocation3 + $0xcc] sm:$0xf] %vm678_vm0, %v1099_v15  ;;  %v8733_v15 = vld [vmem:[#allocation50_spill] sm:$0xff] }
 0x64e   : > { %v6184_v36 = vpop.eup %6183  ;;  %v2980_v45 = vsub.f32 %v8733_v15, %v7954_v16 }
 0x64f   : > { %1094 = vrot.lane.b32.xlu0 %v8712_v51, %s6463_s30  ;;  %v2979_v51 = vsub.f32 %v8726_v48, %v7952_v2  ;;  %v8209_v31 = vpop.eup %6185  ;;  %v3624_v2 = vpop.f32.mrf.mxu1  ;;  %v8213_v24 = vmul.f32 %v6184_v36, %v8101_v47  ;;  %v8732_v47 = vld [vmem:[#allocation51_spill] sm:$0xff] }
 0x650   : > { %v3220_v26 = vpop.xlane.xlu0 %3219  ;;  %v2978_v44 = vsub.f32 %v8732_v47, %v7962_v30  ;;  %v5159_v59 = vpack.c.bf16 %v3624_v2, %v3624_v2 }
 0x651   : > { %6187 = vrcp.f32 %v3220_v26  ;;  %v3105_v34 = vmul.f32 1.442695, %v2979_v51  ;;  %v5579_v20 = vpop.f32.mrf.mxu1 }
 0x652   : > { %6189 = vpow2.f32 %v3069_v21  ;;  %v3103_v9 = vmul.f32 1.442695, %v2978_v44 }
 0x653   : > { %6191 = vpow2.f32 %v3073_v13  ;;  %v3627_v61 = vpop.f32.mrf.mxu1  ;;  %v3107_v13 = vmul.f32 1.442695, %v2980_v45 }
 0x654   : > { %v969_v43 = vpop.permute.xlu0 %968  ;;  %v5963_v46 = vld [vmem:[#allocation3 + $0xc8] sm:$0xff]   ;;  %6193 = vpow2.f32 %v3101_v55  ;;  %v5160_v52 = vpack.c.bf16 %v3627_v61, %v3627_v61 }
 0x655   : > { %1014 = vst.msk [vmem:[#allocation3 + $0x8c] sm:$0xf] %vm678_vm0, %v969_v43  ;;  %5636 = vmatprep.subr.bf16.mxu1 %v5963_v46  ;;  %6195 = vpow2.f32 %v3105_v34  ;;  %v8232_v8 = vpop.f32.mrf.mxu1 }
 0x656   : > { %5637 = vmatpush3.bf16.msra.mxu1 %v5963_v46  ;;  %6197 = vpow2.f32 %v3099_v57 }
 0x657   : > { %6199 = vpow2.f32 %v3071_v62  ;;  %v8239_v30 = vpop.f32.mrf.mxu1  ;;  %v5161_v62 = vpack.c.bf16 %v8205_v41, %v8205_v41 }
 0x658   : > { %6201 = vpow2.f32 %v3075_v29 }
 0x659   : > { %6203 = vpow2.f32 %v3103_v9  ;;  %v8245_v16 = vpop.f32.mrf.mxu1 }
 0x65a   : > { %6205 = vpow2.f32 %v3107_v13 }
 0x65b   : > { %v8250_v43 = vpop.f32.mrf.mxu1 }
 0x65c   : > { %v5964_v63 = vld [vmem:[#allocation3 + $0x88] sm:$0xff]  }
 0x65d   : > { %5604 = vmatprep.subr.bf16.mxu0 %v5964_v63  ;;  %v5586_v48 = vpop.f32.mrf.mxu1 }
 0x65e   : > { %v6188_v38 = vpop.eup %6187  ;;  %3225 = vadd.xlane.f32.xlu1 %v8209_v31  ;;  %5605 = vmatpush3.bf16.msra.mxu0 %v5964_v63  ;;  %v5169_v47 = vpack.c.bf16 %v5586_v48, %v5586_v48 }
 0x65f   : > { %v8216_v39 = vmul.f32 %v6188_v38, %v8112_v50  ;;  %v8220_v12 = vpop.eup %6189  ;;  %v3656_v55 = vpop.f32.mrf.mxu1  ;;  %v5162_v38 = vpack.c.bf16 %v5579_v20, %v5579_v20 }
 0x660   : > { %v8227_v50 = vpop.eup %6191  ;;  %v5167_v56 = vpack.c.bf16 %v3656_v55, %v3656_v55 }
 0x661   : > { %v3392_v25 = vpack.c.bf16 %v8216_v39, %v8213_v24  ;;  %v8234_v21 = vpop.eup %6193  ;;  %v5587_v36 = vpop.f32.mrf.mxu1 }
 0x662   : > { %3197 = vadd.xlane.f32.xlu1 %v8220_v12  ;;  %v8237_v26 = vpop.eup %6195  ;;  %v5170_v2 = vpack.c.bf16 %v5587_v36, %v5587_v36 }
 0x663   : > { %v8241_v14 = vpop.eup %6197  ;;  %v3659_v28 = vpop.f32.mrf.mxu1 }
 0x664   : > { %v8247_v11 = vpop.eup %6199  ;;  %v5168_v57 = vpack.c.bf16 %v3659_v28, %v3659_v28 }
 0x665   : > { %v8252_v46 = vpop.eup %6201 }
 0x666   : > { %3201 = vadd.xlane.f32.xlu1 %v8227_v50  ;;  %v8255_v51 = vpop.eup %6203 }
 0x667   : > { %v8258_v0 = vpop.eup %6205 }
 0x66a   : > { %3229 = vadd.xlane.f32.xlu1 %v8234_v21 }
 0x66e   : > { %3233 = vadd.xlane.f32.xlu1 %v8237_v26  ;;  %3227 = vadd.xlane.f32.xlu0 %v8241_v14 }
 0x672   : > { %3199 = vadd.xlane.f32.xlu0 %v8247_v11 }
 0x676   : > { %3203 = vadd.xlane.f32.xlu0 %v8252_v46 }
 0x67a   : > { %3231 = vadd.xlane.f32.xlu0 %v8255_v51 }
 0x67d   : > { %v3192_v34 = vpop.xlane.xlu1 %3191 }
 0x67e   : > { %3235 = vadd.xlane.f32.xlu0 %v8258_v0 }
 0x67f   : > { %4105 = vrot.lane.b32.xlu1 %v5159_v59, %s6463_s30 }
 0x681   : > { %v965_v19 = vpop.permute.xlu1 %964 }
 0x682   : > { %1012 = vst.msk [vmem:[#allocation3 + $0x84] sm:$0xf] %vm678_vm0, %v965_v19 }
 0x683   : > { %4121 = vrot.lane.b32.xlu1 %v5167_v56, %s6463_s30 }
 0x685   : > { %v3190_v63 = vpop.xlane.xlu0 %3189 }
 0x686   : > { %6207 = vrcp.f32 %v3190_v63 }
 0x687   : > { %4123 = vrot.lane.b32.xlu1 %v5168_v57, %s6463_s30  ;;  %6209 = vrcp.f32 %v3192_v34 }
 0x689   : > { %v963_v3 = vpop.permute.xlu0 %962 }
 0x68a   : > { %1011 = vst.msk [vmem:[#allocation3 + $0x80] sm:$0xf] %vm678_vm0, %v963_v3 }
 0x68b   : > { %4111 = vrot.lane.b32.xlu1 %v5162_v38, %s6463_s30 }
 0x68f   : > { %4127 = vrot.lane.b32.xlu1 %v5170_v2, %s6463_s30 }
 0x691   : > { %v5965_v53 = vld [vmem:[#allocation3 + $0x80] sm:$0xff]  }
 0x692   : > { %5606 = vmatprep.subr.bf16.mxu0 %v5965_v53 }
 0x693   : > { %5607 = vmatpush3.bf16.msra.mxu0 %v5965_v53  ;;  %v6208_v20 = vpop.eup %6207 }
 0x694   : > { %4107 = vrot.lane.b32.xlu0 %v5160_v52, %s6463_s30  ;;  %v6210_v29 = vpop.eup %6209  ;;  %v3341_v44 = vmul.f32 %v6208_v20, %v8140_v49 }
 0x695   : > { %v3342_v61 = vmul.f32 %v6210_v29, %v8137_v5 }
 0x696   : > { %5609 = vmatmul.mubr.bf16.vlgmr.msra.gmra.mxu0 %v3382_v32 }
 0x697   : > { %5612 = vmatprep.mubr.bf16.mxu0 %v3383_v18  ;;  %v3385_v41 = vpack.c.bf16 %v3342_v61, %v3341_v44 }
 0x698   : > { %4109 = vrot.lane.b32.xlu0 %v5161_v62, %s6463_s30 }
 0x69c   : > { %4125 = vrot.lane.b32.xlu0 %v5169_v47, %s6463_s30 }
 0x69e   : > { %5613 = vmatmul.mubr.bf16.gmra.mxu0 %v3384_v4 }
 0x69f   : > { %5616 = vmatprep.mubr.bf16.mxu0 %v3385_v41 }
 0x6b2   : > { %v3196_v17 = vpop.xlane.xlu1 %3195 }
 0x6b3   : > { %6211 = vrcp.f32 %v3196_v17 }
 0x6b6   : > { %v1093_v1 = vpop.permute.xlu1 %1092 }
 0x6b7   : > { %1141 = vst.msk [vmem:[#allocation3 + $0xc0] sm:$0xf] %vm678_vm0, %v1093_v1 }
 0x6ba   : > { %v3194_v32 = vpop.xlane.xlu0 %3193 }
 0x6bb   : > { %6213 = vrcp.f32 %v3194_v32 }
 0x6be   : > { %v3222_v42 = vpop.xlane.xlu0 %3221 }
 0x6c0   : > { %v6212_v18 = vpop.eup %6211 }
 0x6c1   : > { %v3344_v60 = vmul.f32 %v6212_v18, %v8165_v37 }
 0x6c2   : > { %v3224_v27 = vpop.xlane.xlu0 %3223 }
 0x6c3   : > { %6215 = vrcp.f32 %v3224_v27 }
 0x6c4   : > { %6217 = vrcp.f32 %v3222_v42 }
 0x6c6   : > { %v1095_v49 = vpop.permute.xlu0 %1094 }
 0x6c7   : > { %1142 = vst.msk [vmem:[#allocation3 + $0xc4] sm:$0xf] %vm678_vm0, %v1095_v49 }
 0x6c8   : > { %v6214_v5 = vpop.eup %6213 }
 0x6c9   : > { %v3343_v33 = vmul.f32 %v6214_v5, %v8176_v7 }
 0x6cb   : > { %v3386_v4 = vpack.c.bf16 %v3344_v60, %v3343_v33 }
 0x6cd   : > { %5617 = vmatmul.mubr.bf16.gmra.mxu0 %v3386_v4  ;;  %v8323_v4 = vpop.f32.mrf.mxu1 }
 0x6ce   : > { %v5966_v15 = vld [vmem:[#allocation3 + $0xc0] sm:$0xff]  }
 0x6cf   : > { %5638 = vmatprep.subr.bf16.mxu1 %v5966_v15 }
 0x6d0   : > { %5639 = vmatpush3.bf16.msra.mxu1 %v5966_v15  ;;  %v6216_v45 = vpop.eup %6215 }
 0x6d1   : > { %v6218_v9 = vpop.eup %6217  ;;  %v3358_v13 = vmul.f32 %v6216_v45, %v8182_v6 }
 0x6d2   : > { %v3357_v7 = vmul.f32 %v6218_v9, %v8179_v22 }
 0x6d3   : > { %5641 = vmatmul.mubr.bf16.vlgmr.msra.gmra.mxu1 %v3390_v54 }
 0x6d4   : > { %5644 = vmatprep.mubr.bf16.mxu1 %v3391_v58  ;;  %v3393_v37 = vpack.c.bf16 %v3358_v13, %v3357_v7 }
 0x6db   : > { %5645 = vmatmul.mubr.bf16.gmra.mxu1 %v3392_v25 }
 0x6dc   : > { %5648 = vmatprep.mubr.bf16.mxu1 %v3393_v37 }
 0x6e7   : > { %v3226_v48 = vpop.xlane.xlu1 %3225 }
 0x6e8   : > { %6219 = vrcp.f32 %v3226_v48 }
 0x6eb   : > { %v3198_v55 = vpop.xlane.xlu1 %3197 }
 0x6ef   : > { %v3202_v59 = vpop.xlane.xlu1 %3201 }
 0x6f3   : > { %v3230_v35 = vpop.xlane.xlu1 %3229 }
 0x6f5   : > { %v6220_v39 = vpop.eup %6219 }
 0x6f6   : > { %v3359_v19 = vmul.f32 %v6220_v39, %v8209_v31  ;;  %v5968_v39 = vld [vmem:[#allocation12 + $0x38] sm:$0xff]  }
 0x6f7   : > { %v3234_v10 = vpop.xlane.xlu1 %3233  ;;  %v3228_v54 = vpop.xlane.xlu0 %3227  ;;  %5656 = vmatprep.subr.bf16.mxu0 %v5968_v39  ;;  %5688 = vmatprep.subr.bf16.mxu1 %v5968_v39 }
 0x6f8   : > { %6221 = vrcp.f32 %v3228_v54  ;;  %5657 = vmatpush3.bf16.msra.mxu0 %v5968_v39  ;;  %5696 = vmatpush3.bf16.msra.mxu1 %v5968_v39 }
 0x6f9   : > { %6223 = vrcp.f32 %v3198_v55 }
 0x6fb   : > { %v4106_v40 = vpop.permute.xlu1 %4105  ;;  %v3200_v23 = vpop.xlane.xlu0 %3199 }
 0x6fc   : > { %4154 = vst.msk [vmem:[#allocation5] sm:$0xf] %vm4153_vm3, %v4106_v40  ;;  %6225 = vrcp.f32 %v3200_v23 }
 0x6fd   : > { %6227 = vrcp.f32 %v3202_v59 }
 0x6ff   : > { %v4122_v58 = vpop.permute.xlu1 %4121  ;;  %v3204_v22 = vpop.xlane.xlu0 %3203 }
 0x700   : > { %4162 = vst.msk [vmem:[#allocation5 + $0x20] sm:$0xf] %vm4153_vm3, %v4122_v58  ;;  %6229 = vrcp.f32 %v3204_v22 }
 0x701   : > { %6231 = vrcp.f32 %v3230_v35 }
 0x703   : > { %v4124_v6 = vpop.permute.xlu1 %4123  ;;  %v3232_v24 = vpop.xlane.xlu0 %3231 }
 0x704   : > { %4163 = vst.msk [vmem:[#allocation5 + $0x24] sm:$0xf] %vm4153_vm3, %v4124_v6  ;;  %6233 = vrcp.f32 %v3232_v24 }
 0x705   : > { %v6222_v25 = vpop.eup %6221  ;;  %6235 = vrcp.f32 %v3234_v10 }
 0x706   : > { %v6224_v34 = vpop.eup %6223  ;;  %v3360_v28 = vmul.f32 %v6222_v25, %v8241_v14  ;;  %v5969_v25 = vld [vmem:[#allocation12 + $0x30] sm:$0xff]  }
 0x707   : > { %v4112_v36 = vpop.permute.xlu1 %4111  ;;  %v3236_v56 = vpop.xlane.xlu0 %3235  ;;  %v3345_v38 = vmul.f32 %v6224_v34, %v8220_v12  ;;  %5658 = vmatprep.subr.bf16.mxu0 %v5969_v25  ;;  %5689 = vmatprep.subr.bf16.mxu1 %v5969_v25 }
 0x708   : > { %4157 = vst.msk [vmem:[#allocation5 + $0xc] sm:$0xf] %vm4153_vm3, %v4112_v36  ;;  %6237 = vrcp.f32 %v3236_v56  ;;  %v3394_v63 = vpack.c.bf16 %v3360_v28, %v3359_v19  ;;  %v5970_v36 = vld [vmem:[#allocation12 + $0x28] sm:$0xff]   ;;  %5659 = vmatpush3.bf16.msra.mxu0 %v5969_v25  ;;  %5697 = vmatpush3.bf16.msra.mxu1 %v5969_v25  ;;  %v5971_v56 = vld [vmem:[#allocation12 + $0x20] sm:$0xff]  }
 0x709   : > { %v6226_v57 = vpop.eup %6225  ;;  %5660 = vmatprep.subr.bf16.mxu0 %v5970_v36  ;;  %5690 = vmatprep.subr.bf16.mxu1 %v5970_v36 }
 0x70a   : > { %v3346_v3 = vmul.f32 %v6226_v57, %v8247_v11  ;;  %v6228_v2 = vpop.eup %6227  ;;  %5649 = vmatmul.mubr.bf16.gmra.mxu1 %v3394_v63  ;;  %v5972_v57 = vld [vmem:[#allocation12 + $0x18] sm:$0xff]  }
 0x70b   : > { %v4128_v53 = vpop.permute.xlu1 %4127  ;;  %v4108_v52 = vpop.permute.xlu0 %4107  ;;  %v3347_v14 = vmul.f32 %v6228_v2, %v8227_v50 }
 0x70c   : > { %4165 = vst.msk [vmem:[#allocation5 + $0x2c] sm:$0xf] %vm4153_vm3, %v4128_v53  ;;  %4155 = vst.msk [vmem:[#allocation5 + $0x4] sm:$0xf] %vm4153_vm3, %v4108_v52  ;;  %v3387_v31 = vpack.c.bf16 %v3346_v3, %v3345_v38  ;;  %5661 = vmatpush3.bf16.msra.mxu0 %v5970_v36  ;;  %5698 = vmatpush3.bf16.msra.mxu1 %v5970_v36  ;;  %v5973_v38 = vld [vmem:[#allocation12 + $0x10] sm:$0xff]   ;;  %v5974_v53 = vld [vmem:[#allocation12 + $0x8] sm:$0xff]  }
 0x70d   : > { %v6230_v62 = vpop.eup %6229  ;;  %5662 = vmatprep.subr.bf16.mxu0 %v5971_v56  ;;  %5691 = vmatprep.subr.bf16.mxu1 %v5971_v56 }
 0x70e   : > { %5620 = vmatprep.mubr.bf16.mxu0 %v3387_v31  ;;  %v3348_v20 = vmul.f32 %v6230_v62, %v8252_v46  ;;  %v6232_v29 = vpop.eup %6231 }
 0x70f   : > { %v4110_v47 = vpop.permute.xlu0 %4109  ;;  %v3361_v44 = vmul.f32 %v6232_v29, %v8234_v21 }
 0x710   : > { %4156 = vst.msk [vmem:[#allocation5 + $0x8] sm:$0xf] %vm4153_vm3, %v4110_v47  ;;  %v3388_v12 = vpack.c.bf16 %v3348_v20, %v3347_v14  ;;  %5663 = vmatpush3.bf16.msra.mxu0 %v5971_v56  ;;  %5699 = vmatpush3.bf16.msra.mxu1 %v5971_v56  ;;  %v5975_v20 = vld [vmem:[#allocation12] sm:$0xff]  }
 0x711   : > { %v6234_v11 = vpop.eup %6233  ;;  %5664 = vmatprep.subr.bf16.mxu0 %v5972_v57  ;;  %5692 = vmatprep.subr.bf16.mxu1 %v5972_v57 }
 0x712   : > { %5621 = vmatmul.mubr.bf16.gmra.mxu0 %v3388_v12  ;;  %v3362_v61 = vmul.f32 %v6234_v11, %v8255_v51  ;;  %v6236_v41 = vpop.eup %6235 }
 0x713   : > { %v4126_v17 = vpop.permute.xlu0 %4125  ;;  %v3363_v50 = vmul.f32 %v6236_v41, %v8237_v26  ;;  %v5163_v41 = vpack.c.bf16 %v8239_v30, %v8239_v30 }
 0x714   : > { %4164 = vst.msk [vmem:[#allocation5 + $0x28] sm:$0xf] %vm4153_vm3, %v4126_v17  ;;  %v3395_v1 = vpack.c.bf16 %v3362_v61, %v3361_v44  ;;  %5665 = vmatpush3.bf16.msra.mxu0 %v5972_v57  ;;  %5700 = vmatpush3.bf16.msra.mxu1 %v5972_v57 }
 0x715   : > { %v6238_v32 = vpop.eup %6237  ;;  %5666 = vmatprep.subr.bf16.mxu0 %v5973_v38  ;;  %5693 = vmatprep.subr.bf16.mxu1 %v5973_v38 }
 0x716   : > { %5652 = vmatprep.mubr.bf16.mxu1 %v3395_v1  ;;  %v3364_v46 = vmul.f32 %v6238_v32, %v8258_v0  ;;  %v8327_v0 = vpop.f32.mrf.mxu1  ;;  %v5164_v1 = vpack.c.bf16 %v8250_v43, %v8250_v43  ;;  %v5166_v43 = vpack.c.bf16 %v8245_v16, %v8245_v16 }
 0x717   : > { %v5171_v32 = vpack.c.bf16 %v8327_v0, %v8327_v0 }
 0x718   : > { %v3396_v42 = vpack.c.bf16 %v3364_v46, %v3363_v50  ;;  %v8331_v9 = vpop.f32.mrf.mxu1  ;;  %5667 = vmatpush3.bf16.msra.mxu0 %v5973_v38  ;;  %5701 = vmatpush3.bf16.msra.mxu1 %v5973_v38  ;;  %v5165_v50 = vpack.c.bf16 %v8232_v8, %v8232_v8 }
 0x719   : > { %5668 = vmatprep.subr.bf16.mxu0 %v5974_v53  ;;  %5694 = vmatprep.subr.bf16.mxu1 %v5974_v53  ;;  %v5174_v8 = vpack.c.bf16 %v8331_v9, %v8331_v9 }
 0x71a   : > { %5653 = vmatmul.mubr.bf16.gmra.mxu1 %v3396_v42  ;;  %v8333_v48 = vpop.f32.mrf.mxu1  ;;  %v5173_v42 = vpack.c.bf16 %v8323_v4, %v8323_v4 }
 0x71b   : > { %v5172_v30 = vpack.c.bf16 %v8333_v48, %v8333_v48 }
 0x71c   : > { %5669 = vmatpush3.bf16.msra.mxu0 %v5974_v53  ;;  %5702 = vmatpush3.bf16.msra.mxu1 %v5974_v53 }
 0x71d   : > { %5670 = vmatprep.subr.bf16.mxu0 %v5975_v20  ;;  %5695 = vmatprep.subr.bf16.mxu1 %v5975_v20 }
 0x720   : > { %5671 = vmatpush3.bf16.msra.mxu0 %v5975_v20  ;;  %5703 = vmatpush3.bf16.msra.mxu1 %v5975_v20 }
 0x756   : > { %v5610_v27 = vpop.f32.mrf.mxu0 }
 0x757   : > { %v5177_v59 = vpack.c.bf16 %v5610_v27, %v5610_v27 }
 0x758   : > { %v3769_v18 = vpop.f32.mrf.mxu0 }
 0x759   : > { %v5175_v49 = vpack.c.bf16 %v3769_v18, %v3769_v18 }
 0x75a   : > { %v5611_v5 = vpop.f32.mrf.mxu0 }
 0x75b   : > { %4218 = vrot.lane.b32.xlu0 %v5175_v49, %s6462_s14  ;;  %v5178_v40 = vpack.c.bf16 %v5611_v5, %v5611_v5 }
 0x75c   : > { %v3772_v21 = vpop.f32.mrf.mxu0 }
 0x75d   : > { %v5176_v51 = vpack.c.bf16 %v3772_v21, %v3772_v21 }
 0x75e   : > { %v8319_v33 = vpop.f32.mrf.mxu0 }
 0x75f   : > { %4220 = vrot.lane.b32.xlu1 %v5176_v51, %s6462_s14  ;;  %v5181_v51 = vpack.c.bf16 %v8319_v33, %v8319_v33 }
 0x760   : > { %v8321_v60 = vpop.f32.mrf.mxu0 }
 0x761   : > { %v5179_v18 = vpack.c.bf16 %v8321_v60, %v8321_v60 }
 0x762   : > { %v8325_v26 = vpop.f32.mrf.mxu0 }
 0x763   : > { %v5182_v60 = vpack.c.bf16 %v8325_v26, %v8325_v26 }
 0x764   : > { %v8329_v15 = vpop.f32.mrf.mxu0 }
 0x765   : > { %v5180_v16 = vpack.c.bf16 %v8329_v15, %v8329_v15 }
 0x78d   : > { %v5618_v45 = vpop.f32.mrf.mxu0 }
 0x78e   : > { %v5185_v23 = vpack.c.bf16 %v5618_v45, %v5618_v45 }
 0x78f   : > { %v3801_v13 = vpop.f32.mrf.mxu0 }
 0x790   : > { %v5183_v7 = vpack.c.bf16 %v3801_v13, %v3801_v13 }
 0x791   : > { %v5619_v37 = vpop.f32.mrf.mxu0 }
 0x792   : > { %4234 = vrot.lane.b32.xlu0 %v5183_v7, %s6462_s14  ;;  %v5186_v22 = vpack.c.bf16 %v5619_v37, %v5619_v37 }
 0x793   : > { %v3804_v55 = vpop.f32.mrf.mxu0  ;;  %v8336_v10 = vpop.f32.mrf.mxu1 }
 0x794   : > { %v5184_v35 = vpack.c.bf16 %v3804_v55, %v3804_v55  ;;  %v5193_v47 = vpack.c.bf16 %v8336_v10, %v8336_v10 }
 0x795   : > { %v3914_v54 = vpop.f32.mrf.mxu1 }
 0x796   : > { %4222 = vrot.lane.b32.xlu0 %v5177_v59, %s6462_s14  ;;  %4236 = vrot.lane.b32.xlu1 %v5184_v35, %s6462_s14  ;;  %v5191_v6 = vpack.c.bf16 %v3914_v54, %v3914_v54 }
 0x797   : > { %v8340_v58 = vpop.f32.mrf.mxu1 }
 0x798   : > { %v5194_v44 = vpack.c.bf16 %v8340_v58, %v8340_v58 }
 0x799   : > { %v3917_v24 = vpop.f32.mrf.mxu1 }
 0x79a   : > { %4238 = vrot.lane.b32.xlu0 %v5185_v23, %s6462_s14  ;;  %4224 = vrot.lane.b32.xlu1 %v5178_v40, %s6462_s14  ;;  %v5192_v34 = vpack.c.bf16 %v3917_v24, %v3917_v24 }
 0x79b   : > { %v8347_v19 = vpop.f32.mrf.mxu1 }
 0x79c   : > { %v5197_v48 = vpack.c.bf16 %v8347_v19, %v8347_v19 }
 0x79d   : > { %v8349_v28 = vpop.f32.mrf.mxu1 }
 0x79e   : > { %4240 = vrot.lane.b32.xlu1 %v5186_v22, %s6462_s14  ;;  %4331 = vrot.lane.b32.xlu0 %v5191_v6, %s6461_s13  ;;  %v5195_v9 = vpack.c.bf16 %v8349_v28, %v8349_v28 }
 0x79f   : > { %v8351_v63 = vpop.f32.mrf.mxu1 }
 0x7a0   : > { %v5198_v35 = vpack.c.bf16 %v8351_v63, %v8351_v63 }
 0x7a1   : > { %v8353_v3 = vpop.f32.mrf.mxu1 }
 0x7a2   : > { %4333 = vrot.lane.b32.xlu1 %v5192_v34, %s6461_s13  ;;  %v5196_v7 = vpack.c.bf16 %v8353_v3, %v8353_v3 }
 0x7ca   : > { %v5650_v2 = vpop.f32.mrf.mxu1 }
 0x7cb   : > { %v5201_v61 = vpack.c.bf16 %v5650_v2, %v5650_v2 }
 0x7cc   : > { %v3946_v52 = vpop.f32.mrf.mxu1 }
 0x7cd   : > { %v5199_v31 = vpack.c.bf16 %v3946_v52, %v3946_v52  ;;  %v4219_v62 = vpop.permute.xlu0 %4218 }
 0x7ce   : > { %v5651_v14 = vpop.f32.mrf.mxu1  ;;  %4267 = vst.msk [vmem:[#allocation5] sm:$0xf] %vm4266_vm4, %v4219_v62 }
 0x7cf   : > { %4347 = vrot.lane.b32.xlu0 %v5199_v31, %s6461_s13  ;;  %v5202_v17 = vpack.c.bf16 %v5651_v14, %v5651_v14 }
 0x7d0   : > { %v3949_v29 = vpop.f32.mrf.mxu1 }
 0x7d1   : > { %v5200_v12 = vpack.c.bf16 %v3949_v29, %v3949_v29  ;;  %v4221_v11 = vpop.permute.xlu1 %4220 }
 0x7d2   : > { %4268 = vst.msk [vmem:[#allocation5 + $0x4] sm:$0xf] %vm4266_vm4, %v4221_v11  ;;  %v5622_v46 = vpop.f32.mrf.mxu0 }
 0x7d3   : > { %4335 = vrot.lane.b32.xlu0 %v5193_v47, %s6461_s13  ;;  %4349 = vrot.lane.b32.xlu1 %v5200_v12, %s6461_s13  ;;  %v5189_v45 = vpack.c.bf16 %v5622_v46, %v5622_v46 }
 0x7d4   : > { %v3817_v27 = vpop.f32.mrf.mxu0 }
 0x7d5   : > { %v5187_v5 = vpack.c.bf16 %v3817_v27, %v3817_v27 }
 0x7d6   : > { %v5623_v49 = vpop.f32.mrf.mxu0 }
 0x7d7   : > { %4351 = vrot.lane.b32.xlu0 %v5201_v61, %s6461_s13  ;;  %4337 = vrot.lane.b32.xlu1 %v5194_v44, %s6461_s13  ;;  %v5190_v13 = vpack.c.bf16 %v5623_v49, %v5623_v49 }
 0x7d8   : > { %v3820_v21 = vpop.f32.mrf.mxu0 }
 0x7d9   : > { %v5188_v4 = vpack.c.bf16 %v3820_v21, %v3820_v21  ;;  %v8464_v21 = vld [vmem:[%s8579_s6] ss:$0 sm:$0xff] }
 0x7da   : > { %v5654_v0 = vpop.f32.mrf.mxu1 }
 0x7db   : > { %4113 = vrot.lane.b32.xlu0 %v5163_v41, %s6463_s30  ;;  %4353 = vrot.lane.b32.xlu1 %v5202_v17, %s6461_s13  ;;  %v5205_v10 = vpack.c.bf16 %v5654_v0, %v5654_v0 }
 0x7dc   : > { %v3962_v15 = vpop.f32.mrf.mxu1 }
 0x7dd   : > { %v5203_v37 = vpack.c.bf16 %v3962_v15, %v3962_v15 }
 0x7de   : > { %v5655_v33 = vpop.f32.mrf.mxu1 }
 0x7df   : > { %4129 = vrot.lane.b32.xlu0 %v5171_v32, %s6463_s30  ;;  %4115 = vrot.lane.b32.xlu1 %v5164_v1, %s6463_s30  ;;  %v5206_v23 = vpack.c.bf16 %v5655_v33, %v5655_v33  ;;  %v6241_v33 = vld [vmem:[%s6659_s18] sm:$0xff] }
 0x7e0   : > { %v3965_v26 = vpop.f32.mrf.mxu1 }
 0x7e1   : > { %v5204_v55 = vpack.c.bf16 %v3965_v26, %v3965_v26 }
 0x7e3   : > { %4117 = vrot.lane.b32.xlu0 %v5165_v50, %s6463_s30  ;;  %4131 = vrot.lane.b32.xlu1 %v5172_v30, %s6463_s30 }
 0x7e7   : > { %4133 = vrot.lane.b32.xlu0 %v5173_v42, %s6463_s30  ;;  %4119 = vrot.lane.b32.xlu1 %v5166_v43, %s6463_s30 }
 0x7eb   : > { %4226 = vrot.lane.b32.xlu0 %v5179_v18, %s6462_s14  ;;  %4135 = vrot.lane.b32.xlu1 %v5174_v8, %s6463_s30 }
 0x7ef   : > { %4228 = vrot.lane.b32.xlu1 %v5180_v16, %s6462_s14  ;;  %4242 = vrot.lane.b32.xlu0 %v5187_v5, %s6462_s14 }
 0x7f3   : > { %4230 = vrot.lane.b32.xlu0 %v5181_v51, %s6462_s14  ;;  %4244 = vrot.lane.b32.xlu1 %v5188_v4, %s6462_s14 }
 0x7f7   : > { %4246 = vrot.lane.b32.xlu0 %v5189_v45, %s6462_s14  ;;  %4232 = vrot.lane.b32.xlu1 %v5182_v60, %s6462_s14  ;;  %v6240_v60 = vld [vmem:[%s6659_s18 + $0x10] sm:$0xff] }
 0x7fb   : > { %4339 = vrot.lane.b32.xlu0 %v5195_v9, %s6461_s13  ;;  %4248 = vrot.lane.b32.xlu1 %v5190_v13, %s6462_s14 }
 0x7ff   : > { %4341 = vrot.lane.b32.xlu1 %v5196_v7, %s6461_s13  ;;  %4355 = vrot.lane.b32.xlu0 %v5203_v37, %s6461_s13 }
 0x803   : > { %4343 = vrot.lane.b32.xlu0 %v5197_v48, %s6461_s13  ;;  %4357 = vrot.lane.b32.xlu1 %v5204_v55, %s6461_s13 }
 0x804   : > { %v4235_v59 = vpop.permute.xlu0 %4234 }
 0x805   : > { %4275 = vst.msk [vmem:[#allocation5 + $0x20] sm:$0xf] %vm4266_vm4, %v4235_v59  ;;  %v6242_v59 = vld [vmem:[%s6659_s18 + $0x18] sm:$0xff] }
 0x807   : > { %4359 = vrot.lane.b32.xlu0 %v5205_v10, %s6461_s13  ;;  %4345 = vrot.lane.b32.xlu1 %v5198_v35, %s6461_s13  ;;  %v6243_v10 = vld [vmem:[%s6659_s18 + $0x50] sm:$0xff] }
 0x808   : > { %v4237_v54 = vpop.permute.xlu1 %4236  ;;  %v4223_v40 = vpop.permute.xlu0 %4222 }
 0x809   : > { %4276 = vst.msk [vmem:[#allocation5 + $0x24] sm:$0xf] %vm4266_vm4, %v4237_v54  ;;  %4269 = vst.msk [vmem:[#allocation5 + $0x8] sm:$0xf] %vm4266_vm4, %v4223_v40 }
 0x80b   : > { %4361 = vrot.lane.b32.xlu1 %v5206_v23, %s6461_s13 }
 0x80c   : > { %v4225_v58 = vpop.permute.xlu1 %4224  ;;  %v4239_v22 = vpop.permute.xlu0 %4238 }
 0x80d   : > { %4270 = vst.msk [vmem:[#allocation5 + $0xc] sm:$0xf] %vm4266_vm4, %v4225_v58  ;;  %4277 = vst.msk [vmem:[#allocation5 + $0x28] sm:$0xf] %vm4266_vm4, %v4239_v22  ;;  %v6244_v22 = vld [vmem:[%s6659_s18 + $0x8] sm:$0xff] }
 0x810   : > { %v4241_v6 = vpop.permute.xlu1 %4240  ;;  %v4332_v24 = vpop.permute.xlu0 %4331 }
 0x811   : > { %4278 = vst.msk [vmem:[#allocation5 + $0x2c] sm:$0xf] %vm4266_vm4, %v4241_v6 }
 0x812   : > { %4380 = vst.msk [vmem:[#allocation5] sm:$0xf] %vm4379_vm5, %v4332_v24  ;;  %v6245_v24 = vld [vmem:[%s6659_s18 + $0x40] sm:$0xff] }
 0x814   : > { %v4334_v39 = vpop.permute.xlu1 %4333 }
 0x815   : > { %4381 = vst.msk [vmem:[#allocation5 + $0x4] sm:$0xf] %vm4379_vm5, %v4334_v39 }
 0x81c   : > { %v5967_v25 = vld [vmem:[#allocation5] sm:$0xff]  }
 0x81d   : > { %5672 = vmatprep.mubr.bf16.mxu0 %v5967_v25 }
 0x841   : > { %v4348_v34 = vpop.permute.xlu0 %4347 }
 0x842   : > { %4388 = vst.msk [vmem:[#allocation5 + $0x20] sm:$0xf] %vm4379_vm5, %v4348_v34 }
 0x845   : > { %v4350_v36 = vpop.permute.xlu1 %4349  ;;  %v4336_v56 = vpop.permute.xlu0 %4335 }
 0x846   : > { %4389 = vst.msk [vmem:[#allocation5 + $0x24] sm:$0xf] %vm4379_vm5, %v4350_v36  ;;  %4382 = vst.msk [vmem:[#allocation5 + $0x8] sm:$0xf] %vm4379_vm5, %v4336_v56  ;;  %v6246_v36 = vld [vmem:[%s6659_s18 + $0x58] sm:$0xff] }
 0x849   : > { %v4338_v19 = vpop.permute.xlu1 %4337  ;;  %v4352_v28 = vpop.permute.xlu0 %4351 }
 0x84a   : > { %4383 = vst.msk [vmem:[#allocation5 + $0xc] sm:$0xf] %vm4379_vm5, %v4338_v19  ;;  %4390 = vst.msk [vmem:[#allocation5 + $0x28] sm:$0xf] %vm4379_vm5, %v4352_v28  ;;  %v6247_v28 = vld [vmem:[%s6659_s18 + $0x48] sm:$0xff] }
 0x84d   : > { %v4354_v57 = vpop.permute.xlu1 %4353  ;;  %v4114_v63 = vpop.permute.xlu0 %4113  ;;  %v5976_v38 = vld [vmem:[#allocation5 + $0x20] sm:$0xff]  }
 0x84e   : > { %4391 = vst.msk [vmem:[#allocation5 + $0x2c] sm:$0xf] %vm4379_vm5, %v4354_v57  ;;  %5680 = vmatprep.mubr.bf16.mxu1 %v5976_v38 }
 0x84f   : > { %4158 = vst.msk [vmem:[#allocation5 + $0x10] sm:$0xf] %vm4153_vm3, %v4114_v63 }
 0x851   : > { %v4116_v3 = vpop.permute.xlu1 %4115  ;;  %v4130_v2 = vpop.permute.xlu0 %4129  ;;  %v5977_v53 = vld [vmem:[#allocation5 + $0x8] sm:$0xff]  }
 0x852   : > { %4159 = vst.msk [vmem:[#allocation5 + $0x14] sm:$0xf] %vm4153_vm3, %v4116_v3  ;;  %4166 = vst.msk [vmem:[#allocation5 + $0x30] sm:$0xf] %vm4153_vm3, %v4130_v2  ;;  %5673 = vmatmul.mubr.bf16.vlgmr.msra.gmra.mxu0 %v5977_v53  ;;  %v6248_v2 = vld [vmem:[%s6659_s18 + $0x30] sm:$0xff] }
 0x855   : > { %v4132_v52 = vpop.permute.xlu1 %4131  ;;  %v4118_v31 = vpop.permute.xlu0 %4117  ;;  %v5978_v62 = vld [vmem:[#allocation5 + $0x28] sm:$0xff]  }
 0x856   : > { %4167 = vst.msk [vmem:[#allocation5 + $0x34] sm:$0xf] %vm4153_vm3, %v4132_v52  ;;  %4160 = vst.msk [vmem:[#allocation5 + $0x18] sm:$0xf] %vm4153_vm3, %v4118_v31  ;;  %5681 = vmatmul.mubr.bf16.vlgmr.msra.gmra.mxu1 %v5978_v62 }
 0x859   : > { %v4120_v14 = vpop.permute.xlu1 %4119  ;;  %v4134_v20 = vpop.permute.xlu0 %4133 }
 0x85a   : > { %4161 = vst.msk [vmem:[#allocation5 + $0x1c] sm:$0xf] %vm4153_vm3, %v4120_v14  ;;  %4168 = vst.msk [vmem:[#allocation5 + $0x38] sm:$0xf] %vm4153_vm3, %v4134_v20  ;;  %v6249_v14 = vld [vmem:[%s6659_s18 + $0x20] sm:$0xff] }
 0x85d   : > { %v4136_v29 = vpop.permute.xlu1 %4135  ;;  %v4227_v47 = vpop.permute.xlu0 %4226 }
 0x85e   : > { %4169 = vst.msk [vmem:[#allocation5 + $0x3c] sm:$0xf] %vm4153_vm3, %v4136_v29 }
 0x85f   : > { %4271 = vst.msk [vmem:[#allocation5 + $0x10] sm:$0xf] %vm4266_vm4, %v4227_v47 }
 0x861   : > { %v4229_v12 = vpop.permute.xlu1 %4228  ;;  %v4243_v11 = vpop.permute.xlu0 %4242 }
 0x862   : > { %4272 = vst.msk [vmem:[#allocation5 + $0x14] sm:$0xf] %vm4266_vm4, %v4229_v12  ;;  %4279 = vst.msk [vmem:[#allocation5 + $0x30] sm:$0xf] %vm4266_vm4, %v4243_v11 }
 0x865   : > { %v4245_v44 = vpop.permute.xlu1 %4244  ;;  %v4231_v61 = vpop.permute.xlu0 %4230 }
 0x866   : > { %4280 = vst.msk [vmem:[#allocation5 + $0x34] sm:$0xf] %vm4266_vm4, %v4245_v44  ;;  %4273 = vst.msk [vmem:[#allocation5 + $0x18] sm:$0xf] %vm4266_vm4, %v4231_v61  ;;  %v6250_v44 = vld [vmem:[%s6659_s18 + $0x38] sm:$0xff] }
 0x869   : > { %v4233_v41 = vpop.permute.xlu1 %4232  ;;  %v4247_v17 = vpop.permute.xlu0 %4246 }
 0x86a   : > { %4274 = vst.msk [vmem:[#allocation5 + $0x1c] sm:$0xf] %vm4266_vm4, %v4233_v41  ;;  %4281 = vst.msk [vmem:[#allocation5 + $0x38] sm:$0xf] %vm4266_vm4, %v4247_v17  ;;  %v6251_v41 = vld [vmem:[%s6659_s18 + $0x70] sm:$0xff] }
 0x86d   : > { %v4249_v1 = vpop.permute.xlu1 %4248  ;;  %v4340_v32 = vpop.permute.xlu0 %4339 }
 0x86e   : > { %4282 = vst.msk [vmem:[#allocation5 + $0x3c] sm:$0xf] %vm4266_vm4, %v4249_v1 }
 0x86f   : > { %4384 = vst.msk [vmem:[#allocation5 + $0x10] sm:$0xf] %vm4379_vm5, %v4340_v32 }
 0x871   : > { %v4342_v50 = vpop.permute.xlu1 %4341  ;;  %v4356_v30 = vpop.permute.xlu0 %4355 }
 0x872   : > { %4385 = vst.msk [vmem:[#allocation5 + $0x14] sm:$0xf] %vm4379_vm5, %v4342_v50  ;;  %4392 = vst.msk [vmem:[#allocation5 + $0x30] sm:$0xf] %vm4379_vm5, %v4356_v30  ;;  %v6252_v30 = vld [vmem:[%s6659_s18 + $0x28] sm:$0xff] }
 0x875   : > { %v4358_v46 = vpop.permute.xlu1 %4357  ;;  %v4344_v43 = vpop.permute.xlu0 %4343 }
 0x876   : > { %4393 = vst.msk [vmem:[#allocation5 + $0x34] sm:$0xf] %vm4379_vm5, %v4358_v46  ;;  %4386 = vst.msk [vmem:[#allocation5 + $0x18] sm:$0xf] %vm4379_vm5, %v4344_v43  ;;  %v6253_v43 = vld [vmem:[%s6659_s18 + $0x60] sm:$0xff] }
 0x879   : > { %v4346_v42 = vpop.permute.xlu1 %4345  ;;  %v4360_v27 = vpop.permute.xlu0 %4359  ;;  %v5979_v8 = vld [vmem:[#allocation5 + $0x10] sm:$0xff]  }
 0x87a   : > { %4387 = vst.msk [vmem:[#allocation5 + $0x1c] sm:$0xf] %vm4379_vm5, %v4346_v42  ;;  %4394 = vst.msk [vmem:[#allocation5 + $0x38] sm:$0xf] %vm4379_vm5, %v4360_v27  ;;  %5676 = vmatprep.mubr.bf16.mxu0 %v5979_v8 }
 0x87d   : > { %v4362_v18 = vpop.permute.xlu1 %4361  ;;  %v5980_v49 = vld [vmem:[#allocation5 + $0x30] sm:$0xff]  }
 0x87e   : > { %4395 = vst.msk [vmem:[#allocation5 + $0x3c] sm:$0xf] %vm4379_vm5, %v4362_v18  ;;  %5684 = vmatprep.mubr.bf16.mxu1 %v5980_v49  ;;  %v6254_v18 = vld [vmem:[%s6659_s18 + $0x78] sm:$0xff] }
 0x881   : > { %v5981_v16 = vld [vmem:[#allocation5 + $0x18] sm:$0xff]  }
 0x882   : > { %5677 = vmatmul.mubr.bf16.gmra.mxu0 %v5981_v16 }
 0x885   : > { %v5982_v5 = vld [vmem:[#allocation5 + $0x38] sm:$0xff]  }
 0x886   : > { %5685 = vmatmul.mubr.bf16.gmra.mxu1 %v5982_v5  ;;  %v6255_v5 = vld [vmem:[%s6659_s18 + $0x68] sm:$0xff] }
 0x912   : > { %v5674_v51 = vpop.f32.mrf.mxu0 }
 0x913   : > { %v4574_v4 = vadd.f32 %v5674_v51, %v8464_v21 }
 0x914   : > { %v4565_v0 = vpop.f32.mrf.mxu0 }
 0x915   : > { %v4630_v45 = vadd.f32 %v6240_v60, %v4574_v4  ;;  %v4566_v15 = vadd.f32 %v8464_v21, %v4565_v0 }
 0x916   : > { %v5675_v9 = vpop.f32.mrf.mxu0  ;;  %v5682_v13 = vpop.f32.mrf.mxu1 }
 0x917   : > { %4646 = vst [vmem:[%s8471_s16 + $0x10] sm:$0xff] %v4630_v45  ;;  %v4628_v7 = vadd.f32 %v6241_v33, %v4566_v15  ;;  %v4577_v37 = vadd.f32 %v5675_v9, %v8464_v21  ;;  %v4606_v26 = vadd.f32 %v5682_v13, %v8464_v21 }
 0x918   : > { %v4568_v48 = vpop.f32.mrf.mxu0  ;;  %v4597_v55 = vpop.f32.mrf.mxu1 }
 0x919   : > { %4644 = vst [vmem:[%s8471_s16] sm:$0xff] %v4628_v7  ;;  %v4631_v35 = vadd.f32 %v6242_v59, %v4577_v37  ;;  %v4638_v54 = vadd.f32 %v6243_v10, %v4606_v26  ;;  %v4569_v40 = vadd.f32 %v8464_v21, %v4568_v48  ;;  %v4598_v23 = vadd.f32 %v8464_v21, %v4597_v55 }
 0x91a   : > { %v5683_v58 = vpop.f32.mrf.mxu1 }
 0x91b   : > { %4647 = vst [vmem:[%s8471_s16 + $0x18] sm:$0xff] %v4631_v35  ;;  %4654 = vst [vmem:[%s8471_s16 + $0x50] sm:$0xff] %v4638_v54  ;;  %v4629_v6 = vadd.f32 %v6244_v22, %v4569_v40  ;;  %v4636_v39 = vadd.f32 %v6245_v24, %v4598_v23  ;;  %v4609_v25 = vadd.f32 %v5683_v58, %v8464_v21 }
 0x91c   : > { %v4600_v34 = vpop.f32.mrf.mxu1 }
 0x91d   : > { %4645 = vst [vmem:[%s8471_s16 + $0x8] sm:$0xff] %v4629_v6  ;;  %4652 = vst [vmem:[%s8471_s16 + $0x40] sm:$0xff] %v4636_v39  ;;  %v4639_v56 = vadd.f32 %v6246_v36, %v4609_v25  ;;  %v4601_v19 = vadd.f32 %v8464_v21, %v4600_v34 }
 0x91f   : > { %4655 = vst [vmem:[%s8471_s16 + $0x58] sm:$0xff] %v4639_v56  ;;  %v4637_v57 = vadd.f32 %v6247_v28, %v4601_v19 }
 0x921   : > { %4653 = vst [vmem:[%s8471_s16 + $0x48] sm:$0xff] %v4637_v57 }
 0x942   : > { %v5678_v63 = vpop.f32.mrf.mxu0 }
 0x943   : > { %v4590_v38 = vadd.f32 %v5678_v63, %v8464_v21 }
 0x944   : > { %v4581_v3 = vpop.f32.mrf.mxu0 }
 0x945   : > { %v4634_v53 = vadd.f32 %v6248_v2, %v4590_v38  ;;  %v4582_v52 = vadd.f32 %v8464_v21, %v4581_v3 }
 0x946   : > { %v5679_v31 = vpop.f32.mrf.mxu0  ;;  %v5686_v62 = vpop.f32.mrf.mxu1 }
 0x947   : > { %4650 = vst [vmem:[%s8471_s16 + $0x30] sm:$0xff] %v4634_v53  ;;  %v4632_v20 = vadd.f32 %v6249_v14, %v4582_v52  ;;  %v4593_v29 = vadd.f32 %v5679_v31, %v8464_v21  ;;  %v4622_v47 = vadd.f32 %v5686_v62, %v8464_v21 }
 0x948   : > { %v4584_v12 = vpop.f32.mrf.mxu0  ;;  %v4613_v11 = vpop.f32.mrf.mxu1 }
 0x949   : > { %4648 = vst [vmem:[%s8471_s16 + $0x20] sm:$0xff] %v4632_v20  ;;  %v4635_v61 = vadd.f32 %v6250_v44, %v4593_v29  ;;  %v4642_v17 = vadd.f32 %v6251_v41, %v4622_v47  ;;  %v4585_v1 = vadd.f32 %v8464_v21, %v4584_v12  ;;  %v4614_v32 = vadd.f32 %v8464_v21, %v4613_v11 }
 0x94a   : > { %v5687_v50 = vpop.f32.mrf.mxu1 }
 0x94b   : > { %4651 = vst [vmem:[%s8471_s16 + $0x38] sm:$0xff] %v4635_v61  ;;  %4658 = vst [vmem:[%s8471_s16 + $0x70] sm:$0xff] %v4642_v17  ;;  %v4633_v46 = vadd.f32 %v6252_v30, %v4585_v1  ;;  %v4640_v42 = vadd.f32 %v6253_v43, %v4614_v32  ;;  %v4625_v27 = vadd.f32 %v5687_v50, %v8464_v21 }
 0x94c   : > { %v4616_v8 = vpop.f32.mrf.mxu1 }
 0x94d   : > { %4649 = vst [vmem:[%s8471_s16 + $0x28] sm:$0xff] %v4633_v46  ;;  %4656 = vst [vmem:[%s8471_s16 + $0x60] sm:$0xff] %v4640_v42  ;;  %v4643_v49 = vadd.f32 %v6254_v18, %v4625_v27  ;;  %v4617_v16 = vadd.f32 %v8464_v21, %v4616_v8 }
 0x94f   : > { %4659 = vst [vmem:[%s8471_s16 + $0x78] sm:$0xff] %v4643_v49  ;;  %v4641_v51 = vadd.f32 %v6255_v5, %v4617_v16 }
 0x951   : > { %4657 = vst [vmem:[%s8471_s16 + $0x68] sm:$0xff] %v4641_v51 }
 0x952   : > { %6375 = shalt.err (!%p6372_p2)
}
 0x953   : > { %s6376_s18 = scalar_lea.hbm %s8520_s21, 2048  ;;  %s6380_s30 = scalar_lea.hbm %s8580_s7, 4096 }
 0x954   : > { %p6377_p7 = scmp.ne.s32.totalorder %s8520_s21, %s6376_s18  ;;  %p6381_p13 = scmp.lt.s32.totalorder %s8520_s21, %s8580_s7 }
 0x955   : > { %p6382_p0 = scmp.lt.s32.totalorder %s6380_s30, %s6376_s18 }
 0x956   : > { %p6378_p9 = pnand %p6377_p7, %p8734_p4 }
 0x957   : > { %p6383_p3 = por %p6382_p0, %p6381_p13 }
 0x958   : > { %p6379_p12 = pneg %p6378_p9 }
 0x95a   : > { %p6384_p1 = pnand %p6383_p3, %p6379_p12 }
 0x95c   : > { %6387 = shalt.err (!%p6384_p1)
}
 0x95d   : > { %s6465_s16 = smov 128   ;;  %s6466_s8 = smov 8  }
 0x95e   : > { %5750 = dma.vmem_to_hbm [thread:$0]  (%p8734_p4), %s8522_s1, 2048, %s8520_s21, %s4661_s27, %s6465_s16, %s6465_s16, %s6466_s8  }
 0x95f PF: > { %s4691_s17 = sand.u32 1, %s6430_s24   ;;  %p8735_p6 = scmp.ne.s32.totalorder %s8632_s12, 0 }
 0x960   : > { %p8736_p8 = scmp.ge.s32.totalorder %s6450_s29, 2  ;;  %s4692_s15 = scalar_lea.sflag [#allocation8], %s4691_s17 }
 0x962   : > { %p5767_p5 = pnand %p8736_p8, %p8735_p6 }
 0x964   : > { %p5768_p10 = pneg %p5767_p5 }
 0x966   : > { %6425 = dma.done.wait (%p5768_p10), %s4692_s15, 2048  }
 0x967   : > { %6427 = vsyncadd (%p5768_p10), %s4692_s15, 4294965248  ;;  %s25_s29 = sadd.s32 1, %s6450_s29   ;;  %s8737_s19 = sld [smem:[#allocation19_spill]] }
 0x968   : > { %p22_p11 = scmp.ge.s32.totalorder %s25_s29, 4   ;;  %s8738_s24 = smov %s6434_s25 }
 0x969   : > { %s8739_s25 = smov %s6438_s26  ;;  %s8740_s26 = smov %s6631_s22 }
 0x96a   : > { %s8741_s27 = smov %s6446_s28  ;;  %24 = sbr.rel (!%p22_p11) target bundleno = 12 (0xc), region = 119 }
 0x96d   : > { %s8742_s28 = smov %s8737_s19 }
 0x96f   :  { %4697 = vsyncpa [#allocation7], 1 }
 0x970   :  { %4699 = vsyncpa [#allocation7 + $0x1], 1 }
 0x971   :  { %4700 = vsyncpa [#allocation10], 1 }
 0x972   :  { %4701 = vsyncpa [#allocation13], 1 }
 0x973   :  { %4702 = vsyncpa [#allocation8], 1 }
 0x974   :  { %4704 = vsyncpa [#allocation8 + $0x1], 1 }

</bundles_post_ra>
